<compile_context>
chip_gen: v7x
topology: tpu7x:2x2x1
jax: 0.10.0
libtpu: 0.0.40
codegen_flags: <defaults>
</compile_context>

<pallas_src>
import functools

import numpy as np
import jax
import jax.numpy as jnp
from jax.experimental import pallas as pl
from jax.experimental.pallas import tpu as pltpu

CP = 128  # lane-padded channel width used for every internal activation


def _choose_cpack(max_cin):
    """Smallest divisor of 128 that holds the widest real channel count."""
    for c in (8, 16, 32, 64, 128):
        if c >= max_cin:
            return c
    raise ValueError("channel widths > 128 are not supported by this kernel")


# --------------------------------------------------------------------------
# The fused kernel
# --------------------------------------------------------------------------

def _transition_kernel(x_ref, mask_ref, conv_w_ref, conv_b_ref, bn_g_ref,
                       bn_b_ref, rp_cw_ref, rp_cb_ref, rp_bg_ref, rp_bb_ref,
                       fc1_w_ref, fc1_b_ref, fc2_w_ref, fc2_b_ref,
                       ns_ref, rew_ref,
                       act_ref, tmp_ref,
                       *, B, H, W, C, blocks, cpack, residual, renormalize,
                       eps):
    rows = B * H * W
    tpg = CP // cpack               # taps packed per 128-lane K group
    n_groups = -(-9 // tpg)         # ceil(9 / tpg)
    inv_rows = 1.0 / float(rows)

    def conv_out(src_ref, layer):
        """Conv2dSame(3x3) as ONE fused MXU matmul.

        9 shifted taps are built with pltpu.roll along rows (+ lane roll to
        pack `tpg` taps of `cpack` channels per 128-lane K group), border
        cells zeroed via a precomputed mask, then a single
        (rows, n_groups*128) @ (n_groups*128, 128) dot in bf16 / f32-acc.
        """
        src = src_ref[...]                                   # (rows, CP) f32
        parts = []
        for g in range(n_groups):
            acc = None
            for tl in range(tpg):
                t = g * tpg + tl
                if t >= 9:
                    continue
                di, dj = t // 3 - 1, t % 3 - 1
                off = di * W + dj
                v = src if off == 0 else pltpu.roll(src, (-off) % rows, axis=0)
                if tl:                                        # move real lanes
                    v = pltpu.roll(v, tl * cpack, axis=1)     # to this tap band
                acc = v if acc is None else acc + v
            acc = acc * mask_ref[:, g * CP:(g + 1) * CP]      # zero border taps
            parts.append(acc.astype(jnp.bfloat16))            # 1 cast per group
        slab = parts[0] if len(parts) == 1 else jnp.concatenate(parts, axis=1)
        out = jnp.dot(slab, conv_w_ref[layer],
                      preferred_element_type=jnp.float32)
        return out + conv_b_ref[layer]                        # (rows, CP) f32

    def batchnorm(x2d, idx):
        # BatchNorm2d training mode, single-pass stats (biased variance).
        s1 = jnp.sum(x2d, axis=0, keepdims=True)
        s2 = jnp.sum(x2d * x2d, axis=0, keepdims=True)
        mean = s1 * inv_rows
        var = s2 * inv_rows - mean * mean
        return ((x2d - mean) * jax.lax.rsqrt(var + eps) * bn_g_ref[idx]
                + bn_b_ref[idx])

    # --- conv0 -> ReLU -> BN ---
    act_ref[...] = batchnorm(jnp.maximum(conv_out(x_ref, 0), 0.0), 0)

    # --- residual blocks: (conv, ReLU, BN, conv, BN) + skip, ReLU ---
    for i in range(blocks):
        tmp_ref[...] = batchnorm(
            jnp.maximum(conv_out(act_ref, 1 + 2 * i), 0.0), 1 + 2 * i)
        o = batchnorm(conv_out(tmp_ref, 2 + 2 * i), 2 + 2 * i)
        # re-read the skip from VMEM instead of carrying it live across convs
        act_ref[...] = jnp.maximum(o + act_ref[...], 0.0)

    # --- final conv (hidden -> C), optional residual, ReLU, renormalize ---
    y = conv_out(act_ref, 2 * blocks + 1)
    if residual:
        lane2 = jax.lax.broadcasted_iota(jnp.int32, (rows, CP), 1)
        # only the true image lanes (< C) participate in the skip add — the
        # one-hot action planes stored in lanes C..C+A-1 are masked out.
        y = y + jnp.where(lane2 < C, x_ref[...], 0.0)
    y = jnp.maximum(y, 0.0)

    y3 = y.reshape(B, H * W, CP)
    lane3 = jax.lax.broadcasted_iota(jnp.int32, (1, 1, CP), 2)
    valid = lane3 < C                                          # true channels
    if renormalize:
        mx = jnp.max(jnp.where(valid, y3, -jnp.inf), axis=2, keepdims=True)
        mx = jnp.max(mx, axis=1, keepdims=True)                # (B,1,1)
        mn = jnp.min(jnp.where(valid, y3, jnp.inf), axis=2, keepdims=True)
        mn = jnp.min(mn, axis=1, keepdims=True)                # (B,1,1)
        # NOTE: matches the PyTorch reference — no epsilon guard on (mx - mn).
        ns3 = (y3 - mn) / (mx - mn)
    else:
        ns3 = y3
    ns3 = jnp.where(valid, ns3, 0.0)                           # padded lanes -> 0

    # lane-dense (rows, 128) store; the [:, :C] slice + NCHW transpose happen
    # in the JAX wrapper.
    ns_ref[...] = ns3.reshape(rows, CP)

    # --- RewardPredictor ---
    # 1x1 conv (C -> 1) as a weighted channel reduction + bias, ReLU.
    r = jnp.sum(ns3 * rp_cw_ref[...].reshape(1, 1, CP), axis=2) + rp_cb_ref[...]
    r = jnp.maximum(r, 0.0)                                    # (B, H*W)
    # BatchNorm2d(1), training mode, single-pass stats over all B*H*W values.
    s1 = jnp.sum(jnp.sum(r, axis=1, keepdims=True), axis=0, keepdims=True)
    s2 = jnp.sum(jnp.sum(r * r, axis=1, keepdims=True), axis=0, keepdims=True)
    rmean = s1 * inv_rows
    rvar = s2 * inv_rows - rmean * rmean
    r = (r - rmean) * jax.lax.rsqrt(rvar + eps) * rp_bg_ref[...] + rp_bb_ref[...]
    # Flatten -> Linear(pixels, 256) -> ReLU -> Linear(256, 2*limit+1)
    r1 = jnp.dot(r.astype(jnp.bfloat16), fc1_w_ref[...],
                 preferred_element_type=jnp.float32) + fc1_b_ref[...]
    r1 = jnp.maximum(r1, 0.0)
    rew_ref[...] = jnp.dot(r1.astype(jnp.bfloat16), fc2_w_ref[...],
                           preferred_element_type=jnp.float32) + fc2_b_ref[...]


# --------------------------------------------------------------------------
# Parameter initialization (PyTorch-shaped) and one-time packing
# --------------------------------------------------------------------------

def _conv_init(key, cout, cin, k):
    k1, k2 = jax.random.split(key)
    fan_in = cin * k * k
    w = jax.random.normal(k1, (cout, cin, k, k), jnp.float32) / jnp.sqrt(fan_in)
    b = 0.01 * jax.random.normal(k2, (cout,), jnp.float32)
    return w, b


def _linear_init(key, cout, cin):
    k1, k2 = jax.random.split(key)
    w = jax.random.normal(k1, (cout, cin), jnp.float32) / jnp.sqrt(cin)
    b = 0.01 * jax.random.normal(k2, (cout,), jnp.float32)
    return w, b


def init_params(key, *, channels, num_actions, hidden, blocks, pixels, limit):
    keys = jax.random.split(key, 4 + 2 * blocks)
    p = {}
    p["conv0_w"], p["conv0_b"] = _conv_init(keys[0], hidden,
                                            channels + num_actions, 3)
    p["bn0_g"] = jnp.ones((hidden,), jnp.float32)
    p["bn0_b"] = jnp.zeros((hidden,), jnp.float32)
    p["blocks"] = []
    for i in range(blocks):
        k1, k2 = keys[1 + 2 * i], keys[2 + 2 * i]
        blk = {}
        blk["c1_w"], blk["c1_b"] = _conv_init(k1, hidden, hidden, 3)
        blk["n1_g"] = jnp.ones((hidden,), jnp.float32)
        blk["n1_b"] = jnp.zeros((hidden,), jnp.float32)
        blk["c2_w"], blk["c2_b"] = _conv_init(k2, hidden, hidden, 3)
        blk["n2_g"] = jnp.ones((hidden,), jnp.float32)
        blk["n2_b"] = jnp.zeros((hidden,), jnp.float32)
        p["blocks"].append(blk)
    p["convf_w"], p["convf_b"] = _conv_init(keys[1 + 2 * blocks], channels,
                                            hidden, 3)
    p["rp_conv_w"], p["rp_conv_b"] = _conv_init(keys[2 + 2 * blocks], 1,
                                                channels, 1)
    p["rp_bn_g"] = jnp.ones((1,), jnp.float32)
    p["rp_bn_b"] = jnp.zeros((1,), jnp.float32)
    kf1, kf2 = jax.random.split(keys[3 + 2 * blocks])
    p["rp_fc1_w"], p["rp_fc1_b"] = _linear_init(kf1, 256, pixels * 1)
    p["rp_fc2_w"], p["rp_fc2_b"] = _linear_init(kf2, 2 * limit + 1, 256)
    return p
    # NOTE: self.action_embedding exists in the PyTorch __init__ but is unused
    # in forward, so it is intentionally not represented here.


def pack_params(params, *, channels, num_actions):
    """One-time packing: tap-fused / lane-packed K layout, bf16 MXU weights."""
    hidden = params["conv0_w"].shape[0]
    blocks = len(params["blocks"])
    cpack = _choose_cpack(max(channels + num_actions, hidden))
    tpg = CP // cpack
    n_groups = -(-9 // tpg)
    K = n_groups * CP
    Lc = 2 * blocks + 2
    Lbn = 2 * blocks + 1

    conv_w = jnp.zeros((Lc, K, CP), jnp.float32)
    conv_b = jnp.zeros((Lc, 1, CP), jnp.float32)
    bn_g = jnp.zeros((Lbn, 1, CP), jnp.float32)
    bn_b = jnp.zeros((Lbn, 1, CP), jnp.float32)

    def put_conv(cw, cb, layer, w_torch, b):
        cout, cin = w_torch.shape[0], w_torch.shape[1]
        for t in range(9):
            kh, kw = t // 3, t % 3
            g, tl = t // tpg, t % tpg
            k0 = g * CP + tl * cpack
            cw = cw.at[layer, k0:k0 + cin, :cout].set(w_torch[:, :, kh, kw].T)
        cb = cb.at[layer, 0, :cout].set(b)
        return cw, cb

    def put_bn(g_arr, b_arr, idx, gamma, beta):
        g_arr = g_arr.at[idx, 0, :gamma.shape[0]].set(gamma)
        b_arr = b_arr.at[idx, 0, :beta.shape[0]].set(beta)
        return g_arr, b_arr

    conv_w, conv_b = put_conv(conv_w, conv_b, 0,
                              params["conv0_w"], params["conv0_b"])
    bn_g, bn_b = put_bn(bn_g, bn_b, 0, params["bn0_g"], params["bn0_b"])
    for i, blk in enumerate(params["blocks"]):
        conv_w, conv_b = put_conv(conv_w, conv_b, 1 + 2 * i,
                                  blk["c1_w"], blk["c1_b"])
        bn_g, bn_b = put_bn(bn_g, bn_b, 1 + 2 * i, blk["n1_g"], blk["n1_b"])
        conv_w, conv_b = put_conv(conv_w, conv_b, 2 + 2 * i,
                                  blk["c2_w"], blk["c2_b"])
        bn_g, bn_b = put_bn(bn_g, bn_b, 2 + 2 * i, blk["n2_g"], blk["n2_b"])
    conv_w, conv_b = put_conv(conv_w, conv_b, Lc - 1,
                              params["convf_w"], params["convf_b"])

    rp_cw = jnp.zeros((1, CP), jnp.float32).at[0, :channels].set(
        params["rp_conv_w"].reshape(channels))

    return dict(
        conv_w=conv_w.astype(jnp.bfloat16),                 # (Lc, K, 128)
        conv_b=conv_b,
        bn_g=bn_g,
        bn_b=bn_b,
        rp_conv_w=rp_cw,
        rp_conv_b=params["rp_conv_b"].reshape(1, 1),
        rp_bn_g=params["rp_bn_g"].reshape(1, 1),
        rp_bn_b=params["rp_bn_b"].reshape(1, 1),
        fc1_w=params["rp_fc1_w"].T.astype(jnp.bfloat16),    # (pixels, 256)
        fc1_b=params["rp_fc1_b"].reshape(1, -1),
        fc2_w=params["rp_fc2_w"].T.astype(jnp.bfloat16),    # (256, 2*limit+1)
        fc2_b=params["rp_fc2_b"].reshape(1, -1),
    )


def _build_tap_mask(B, H, W, cpack):
    """(rows, K) f32 constant: 1 where a tap's source pixel is in-bounds."""
    rows = B * H * W
    tpg = CP // cpack
    n_groups = -(-9 // tpg)
    K = n_groups * CP
    i_idx = (np.arange(rows) // W) % H
    j_idx = np.arange(rows) % W
    mask = np.zeros((rows, K), np.float32)
    for t in range(9):
        di, dj = t // 3 - 1, t % 3 - 1
        valid = ((i_idx + di >= 0) & (i_idx + di < H) &
                 (j_idx + dj >= 0) & (j_idx + dj < W)).astype(np.float32)
        g, tl = t // tpg, t % tpg
        k0 = g * CP + tl * cpack
        mask[:, k0:k0 + cpack] = valid[:, None]
    return jnp.asarray(mask)


# --------------------------------------------------------------------------
# TransitionModel.forward
# --------------------------------------------------------------------------

def transition_forward(packed, x_nchw, action, *, num_actions, channels,
                       hidden, blocks, residual=False, renormalize=True):
    B, C, H, W = x_nchw.shape
    rows = B * H * W
    assert C + num_actions <= CP and hidden <= CP
    assert packed["fc1_w"].shape[0] == H * W, "pixels must equal H*W"

    cpack = _choose_cpack(max(channels + num_actions, hidden))
    tpg = CP // cpack
    n_groups = -(-9 // tpg)
    K = n_groups * CP

    # Stacked input: image channels in lanes [0,C), one-hot action planes in
    # lanes [C, C+A), rest zero.  Lane-dense (rows, 128) layout.
    onehot = jax.nn.one_hot(action, num_actions, dtype=x_nchw.dtype)       # (B,A)
    x_nhwc = jnp.transpose(x_nchw, (0, 2, 3, 1))                           # (B,H,W,C)
    planes = jnp.broadcast_to(onehot[:, None, None, :], (B, H, W, num_actions))
    stacked = jnp.concatenate([x_nhwc, planes], axis=-1)
    x_in = jnp.pad(stacked,
                   ((0, 0), (0, 0), (0, 0), (0, CP - (C + num_actions)))
                   ).reshape(rows, CP)

    mask = _build_tap_mask(B, H, W, cpack)                                 # const

    nout = packed["fc2_b"].shape[-1]
    nout_pad = -(-nout // CP) * CP
    fc2_w_pad = jnp.pad(packed["fc2_w"], ((0, 0), (0, nout_pad - nout)))
    fc2_b_pad = jnp.pad(packed["fc2_b"], ((0, 0), (0, nout_pad - nout)))

    operands = (x_in, mask, packed["conv_w"], packed["conv_b"],
                packed["bn_g"], packed["bn_b"], packed["rp_conv_w"],
                packed["rp_conv_b"], packed["rp_bn_g"], packed["rp_bn_b"],
                packed["fc1_w"], packed["fc1_b"], fc2_w_pad, fc2_b_pad)

    in_bytes = sum(int(a.size) * a.dtype.itemsize for a in operands)
    out_bytes = rows * CP * 4 + B * nout_pad * 4
    scratch_bytes = 2 * rows * CP * 4
    vmem_limit = int(max((in_bytes + out_bytes + scratch_bytes) * 3,
                         16 * 1024 * 1024))
    flops = ((2 * blocks + 2) * 2 * rows * K * CP
             + 2 * B * H * W * 256 + 2 * B * 256 * nout_pad)
    cost = pl.CostEstimate(flops=flops,
                           transcendentals=(2 * blocks + 2) * CP,
                           bytes_accessed=in_bytes + out_bytes)

    kernel = functools.partial(_transition_kernel, B=B, H=H, W=W, C=C,
                               blocks=blocks, cpack=cpack, residual=residual,
                               renormalize=renormalize, eps=1e-5)
    vmem_spec = pl.BlockSpec(memory_space=pltpu.MemorySpace.VMEM)

    ns_flat, rew_pad = pl.pallas_call(
        kernel,
        out_shape=(jax.ShapeDtypeStruct((rows, CP), jnp.float32),
                   jax.ShapeDtypeStruct((B, nout_pad), jnp.float32)),
        in_specs=[vmem_spec] * len(operands),
        out_specs=(vmem_spec, vmem_spec),
        scratch_shapes=[
            pltpu.VMEM((rows, CP), jnp.float32),   # current activation / skip
            pltpu.VMEM((rows, CP), jnp.float32),   # intra-block temp
        ],
        compiler_params=pltpu.CompilerParams(vmem_limit_bytes=vmem_limit),
        cost_estimate=cost,
    )(*operands)

    # Cheap layout plumbing in XLA: slice true channels + NCHW transpose.
    next_state = jnp.transpose(ns_flat.reshape(B, H, W, CP)[..., :C],
                               (0, 3, 1, 2))
    next_reward = rew_pad[:, :nout]
    return next_state, next_reward


# --------------------------------------------------------------------------
# Demo
# --------------------------------------------------------------------------

if __name__ == "__main__":
    B, C, H, W = 2, 4, 8, 8
    NUM_ACTIONS = 6
    HIDDEN = 32
    BLOCKS = 2
    PIXELS = H * W          # module requires pixels == H*W
    LIMIT = 10              # reward head -> 2*limit+1 = 21 bins

    key = jax.random.PRNGKey(0)
    kp, kx, ka = jax.random.split(key, 3)

    params = init_params(kp, channels=C, num_actions=NUM_ACTIONS,
                         hidden=HIDDEN, blocks=BLOCKS, pixels=PIXELS,
                         limit=LIMIT)
    packed = pack_params(params, channels=C, num_actions=NUM_ACTIONS)

    x = jax.random.normal(kx, (B, C, H, W), jnp.float32)
    action = jax.random.randint(ka, (B,), 0, NUM_ACTIONS, jnp.int32)

    fwd = jax.jit(functools.partial(transition_forward,
                                    num_actions=NUM_ACTIONS, channels=C,
                                    hidden=HIDDEN, blocks=BLOCKS))
    next_state, next_reward = fwd(packed, x, action)
    jax.block_until_ready((next_state, next_reward))

    assert next_state.shape == (B, C, H, W)
    assert next_reward.shape == (B, 2 * LIMIT + 1)
    assert bool(jnp.all(jnp.isfinite(next_state)))
    assert bool(jnp.all(jnp.isfinite(next_reward)))
    print("KERNEL_OK")
</pallas_src>

<mosaic_0001>
module attributes {stable_mosaic.version = 11 : i64} {
  func.func @_transition_kernel(%arg0: memref<128x128xf32, #tpu.memory_space<vmem>>, %arg1: memref<128x384xf32, #tpu.memory_space<vmem>>, %arg2: memref<6x384x128xbf16, #tpu.memory_space<vmem>>, %arg3: memref<6x1x128xf32, #tpu.memory_space<vmem>>, %arg4: memref<5x1x128xf32, #tpu.memory_space<vmem>>, %arg5: memref<5x1x128xf32, #tpu.memory_space<vmem>>, %arg6: memref<1x128xf32, #tpu.memory_space<vmem>>, %arg7: memref<1x1xf32, #tpu.memory_space<vmem>>, %arg8: memref<1x1xf32, #tpu.memory_space<vmem>>, %arg9: memref<1x1xf32, #tpu.memory_space<vmem>>, %arg10: memref<64x256xbf16, #tpu.memory_space<vmem>>, %arg11: memref<1x256xf32, #tpu.memory_space<vmem>>, %arg12: memref<256x128xbf16, #tpu.memory_space<vmem>>, %arg13: memref<1x128xf32, #tpu.memory_space<vmem>>, %arg14: memref<128x128xf32, #tpu.memory_space<vmem>>, %arg15: memref<2x128xf32, #tpu.memory_space<vmem>>, %arg16: memref<128x128xf32, #tpu.memory_space<vmem>>, %arg17: memref<128x128xf32, #tpu.memory_space<vmem>>) attributes {dimension_semantics = [], scalar_prefetch = 0 : i64, scratch_operands = 2 : i64, tpu.core_type = #tpu.core_type<tc>} {
    %c0 = arith.constant 0 : index
    %c0_0 = arith.constant 0 : index
    %0 = vector.load %arg0[%c0, %c0_0] : memref<128x128xf32, #tpu.memory_space<vmem>>, vector<128x128xf32>
    %c9_i32 = arith.constant 9 : i32
    %1 = tpu.dynamic_rotate %0 by %c9_i32 dim 0 : vector<128x128xf32>, i32 -> vector<128x128xf32>
    %c8_i32 = arith.constant 8 : i32
    %2 = tpu.dynamic_rotate %0 by %c8_i32 dim 0 : vector<128x128xf32>, i32 -> vector<128x128xf32>
    %c32_i32 = arith.constant 32 : i32
    %3 = tpu.dynamic_rotate %2 by %c32_i32 dim 1 : vector<128x128xf32>, i32 -> vector<128x128xf32>
    %4 = arith.addf %1, %3 : vector<128x128xf32>
    %c7_i32 = arith.constant 7 : i32
    %5 = tpu.dynamic_rotate %0 by %c7_i32 dim 0 : vector<128x128xf32>, i32 -> vector<128x128xf32>
    %c64_i32 = arith.constant 64 : i32
    %6 = tpu.dynamic_rotate %5 by %c64_i32 dim 1 : vector<128x128xf32>, i32 -> vector<128x128xf32>
    %7 = arith.addf %4, %6 : vector<128x128xf32>
    %c1_i32 = arith.constant 1 : i32
    %8 = tpu.dynamic_rotate %0 by %c1_i32 dim 0 : vector<128x128xf32>, i32 -> vector<128x128xf32>
    %c96_i32 = arith.constant 96 : i32
    %9 = tpu.dynamic_rotate %8 by %c96_i32 dim 1 : vector<128x128xf32>, i32 -> vector<128x128xf32>
    %10 = arith.addf %7, %9 : vector<128x128xf32>
    %c0_1 = arith.constant 0 : index
    %c0_2 = arith.constant 0 : index
    %11 = vector.load %arg1[%c0_1, %c0_2] : memref<128x384xf32, #tpu.memory_space<vmem>>, vector<128x128xf32>
    %12 = arith.mulf %10, %11 : vector<128x128xf32>
    %13 = arith.truncf %12 : vector<128x128xf32> to vector<128x128xbf16>
    %c127_i32 = arith.constant 127 : i32
    %14 = tpu.dynamic_rotate %0 by %c127_i32 dim 0 : vector<128x128xf32>, i32 -> vector<128x128xf32>
    %c32_i32_3 = arith.constant 32 : i32
    %15 = tpu.dynamic_rotate %14 by %c32_i32_3 dim 1 : vector<128x128xf32>, i32 -> vector<128x128xf32>
    %16 = arith.addf %0, %15 : vector<128x128xf32>
    %c121_i32 = arith.constant 121 : i32
    %17 = tpu.dynamic_rotate %0 by %c121_i32 dim 0 : vector<128x128xf32>, i32 -> vector<128x128xf32>
    %c64_i32_4 = arith.constant 64 : i32
    %18 = tpu.dynamic_rotate %17 by %c64_i32_4 dim 1 : vector<128x128xf32>, i32 -> vector<128x128xf32>
    %19 = arith.addf %16, %18 : vector<128x128xf32>
    %c120_i32 = arith.constant 120 : i32
    %20 = tpu.dynamic_rotate %0 by %c120_i32 dim 0 : vector<128x128xf32>, i32 -> vector<128x128xf32>
    %c96_i32_5 = arith.constant 96 : i32
    %21 = tpu.dynamic_rotate %20 by %c96_i32_5 dim 1 : vector<128x128xf32>, i32 -> vector<128x128xf32>
    %22 = arith.addf %19, %21 : vector<128x128xf32>
    %c0_6 = arith.constant 0 : index
    %c128 = arith.constant 128 : index
    %23 = vector.load %arg1[%c0_6, %c128] : memref<128x384xf32, #tpu.memory_space<vmem>>, vector<128x128xf32>
    %24 = arith.mulf %22, %23 : vector<128x128xf32>
    %25 = arith.truncf %24 : vector<128x128xf32> to vector<128x128xbf16>
    %c119_i32 = arith.constant 119 : i32
    %26 = tpu.dynamic_rotate %0 by %c119_i32 dim 0 : vector<128x128xf32>, i32 -> vector<128x128xf32>
    %c0_7 = arith.constant 0 : index
    %c256 = arith.constant 256 : index
    %27 = vector.load %arg1[%c0_7, %c256] : memref<128x384xf32, #tpu.memory_space<vmem>>, vector<128x128xf32>
    %28 = arith.mulf %26, %27 : vector<128x128xf32>
    %29 = arith.truncf %28 : vector<128x128xf32> to vector<128x128xbf16>
    %30 = tpu.concatenate %13, %25, %29 in 1 : vector<128x128xbf16>, vector<128x128xbf16>, vector<128x128xbf16> -> vector<128x384xbf16>
    %c0_8 = arith.constant 0 : index
    %c0_9 = arith.constant 0 : index
    %c0_10 = arith.constant 0 : index
    %31 = vector.load %arg2[%c0_8, %c0_9, %c0_10] : memref<6x384x128xbf16, #tpu.memory_space<vmem>>, vector<1x384x128xbf16>
    %32 = vector.shape_cast %31 : vector<1x384x128xbf16> to vector<384x128xbf16>
    %cst = arith.constant dense<0.000000e+00> : vector<128x128xf32>
    %33 = tpu.matmul %30, %32, %cst {dimension_numbers = #tpu.dot_dimension_numbers<[1], [0], [0], [1], [0, 0, 1, 1], [], []>} : vector<128x384xbf16>, vector<384x128xbf16>, vector<128x128xf32> -> vector<128x128xf32>
    %c0_11 = arith.constant 0 : index
    %c0_12 = arith.constant 0 : index
    %c0_13 = arith.constant 0 : index
    %34 = vector.load %arg3[%c0_11, %c0_12, %c0_13] : memref<6x1x128xf32, #tpu.memory_space<vmem>>, vector<1x1x128xf32>
    %35 = vector.shape_cast %34 : vector<1x1x128xf32> to vector<1x128xf32>
    %36 = vector.broadcast %35 : vector<1x128xf32> to vector<128x128xf32>
    %37 = arith.addf %33, %36 : vector<128x128xf32>
    %cst_14 = arith.constant 0.000000e+00 : f32
    %38 = vector.broadcast %cst_14 : f32 to vector<128x128xf32>
    %39 = arith.maximumf %37, %38 : vector<128x128xf32>
    %cst_15 = arith.constant dense<0.000000e+00> : vector<128xf32>
    %40 = vector.multi_reduction <add>, %39, %cst_15 [0] : vector<128x128xf32> to vector<128xf32>
    %41 = vector.shape_cast %40 : vector<128xf32> to vector<1x128xf32>
    %42 = arith.mulf %39, %39 : vector<128x128xf32>
    %cst_16 = arith.constant dense<0.000000e+00> : vector<128xf32>
    %43 = vector.multi_reduction <add>, %42, %cst_16 [0] : vector<128x128xf32> to vector<128xf32>
    %44 = vector.shape_cast %43 : vector<128xf32> to vector<1x128xf32>
    %cst_17 = arith.constant 7.812500e-03 : f32
    %45 = vector.broadcast %cst_17 : f32 to vector<1x128xf32>
    %46 = arith.mulf %41, %45 : vector<1x128xf32>
    %cst_18 = arith.constant 7.812500e-03 : f32
    %47 = vector.broadcast %cst_18 : f32 to vector<1x128xf32>
    %48 = arith.mulf %44, %47 : vector<1x128xf32>
    %49 = arith.mulf %46, %46 : vector<1x128xf32>
    %50 = arith.subf %48, %49 : vector<1x128xf32>
    %51 = vector.broadcast %46 : vector<1x128xf32> to vector<128x128xf32>
    %52 = arith.subf %39, %51 : vector<128x128xf32>
    %cst_19 = arith.constant 9.99999974E-6 : f32
    %53 = vector.broadcast %cst_19 : f32 to vector<1x128xf32>
    %54 = arith.addf %50, %53 : vector<1x128xf32>
    %55 = math.rsqrt %54 : vector<1x128xf32>
    %56 = vector.broadcast %55 : vector<1x128xf32> to vector<128x128xf32>
    %57 = arith.mulf %52, %56 : vector<128x128xf32>
    %c0_20 = arith.constant 0 : index
    %c0_21 = arith.constant 0 : index
    %c0_22 = arith.constant 0 : index
    %58 = vector.load %arg4[%c0_20, %c0_21, %c0_22] : memref<5x1x128xf32, #tpu.memory_space<vmem>>, vector<1x1x128xf32>
    %59 = vector.shape_cast %58 : vector<1x1x128xf32> to vector<1x128xf32>
    %60 = vector.broadcast %59 : vector<1x128xf32> to vector<128x128xf32>
    %61 = arith.mulf %57, %60 : vector<128x128xf32>
    %c0_23 = arith.constant 0 : index
    %c0_24 = arith.constant 0 : index
    %c0_25 = arith.constant 0 : index
    %62 = vector.load %arg5[%c0_23, %c0_24, %c0_25] : memref<5x1x128xf32, #tpu.memory_space<vmem>>, vector<1x1x128xf32>
    %63 = vector.shape_cast %62 : vector<1x1x128xf32> to vector<1x128xf32>
    %64 = vector.broadcast %63 : vector<1x128xf32> to vector<128x128xf32>
    %65 = arith.addf %61, %64 : vector<128x128xf32>
    %c0_26 = arith.constant 0 : index
    %c0_27 = arith.constant 0 : index
    %66 = vector.load %arg16[%c0_26, %c0_27] : memref<128x128xf32, #tpu.memory_space<vmem>>, vector<128x128xf32>
    tpu.vector_store %arg16[%c0_26, %c0_27], %65 {strides = array<i32>} : memref<128x128xf32, #tpu.memory_space<vmem>>, vector<128x128xf32>,
    %c0_28 = arith.constant 0 : index
    %c0_29 = arith.constant 0 : index
    %67 = vector.load %arg16[%c0_28, %c0_29] : memref<128x128xf32, #tpu.memory_space<vmem>>, vector<128x128xf32>
    %c9_i32_30 = arith.constant 9 : i32
    %68 = tpu.dynamic_rotate %67 by %c9_i32_30 dim 0 : vector<128x128xf32>, i32 -> vector<128x128xf32>
    %c8_i32_31 = arith.constant 8 : i32
    %69 = tpu.dynamic_rotate %67 by %c8_i32_31 dim 0 : vector<128x128xf32>, i32 -> vector<128x128xf32>
    %c32_i32_32 = arith.constant 32 : i32
    %70 = tpu.dynamic_rotate %69 by %c32_i32_32 dim 1 : vector<128x128xf32>, i32 -> vector<128x128xf32>
    %71 = arith.addf %68, %70 : vector<128x128xf32>
    %c7_i32_33 = arith.constant 7 : i32
    %72 = tpu.dynamic_rotate %67 by %c7_i32_33 dim 0 : vector<128x128xf32>, i32 -> vector<128x128xf32>
    %c64_i32_34 = arith.constant 64 : i32
    %73 = tpu.dynamic_rotate %72 by %c64_i32_34 dim 1 : vector<128x128xf32>, i32 -> vector<128x128xf32>
    %74 = arith.addf %71, %73 : vector<128x128xf32>
    %c1_i32_35 = arith.constant 1 : i32
    %75 = tpu.dynamic_rotate %67 by %c1_i32_35 dim 0 : vector<128x128xf32>, i32 -> vector<128x128xf32>
    %c96_i32_36 = arith.constant 96 : i32
    %76 = tpu.dynamic_rotate %75 by %c96_i32_36 dim 1 : vector<128x128xf32>, i32 -> vector<128x128xf32>
    %77 = arith.addf %74, %76 : vector<128x128xf32>
    %c0_37 = arith.constant 0 : index
    %c0_38 = arith.constant 0 : index
    %78 = vector.load %arg1[%c0_37, %c0_38] : memref<128x384xf32, #tpu.memory_space<vmem>>, vector<128x128xf32>
    %79 = arith.mulf %77, %78 : vector<128x128xf32>
    %80 = arith.truncf %79 : vector<128x128xf32> to vector<128x128xbf16>
    %c127_i32_39 = arith.constant 127 : i32
    %81 = tpu.dynamic_rotate %67 by %c127_i32_39 dim 0 : vector<128x128xf32>, i32 -> vector<128x128xf32>
    %c32_i32_40 = arith.constant 32 : i32
    %82 = tpu.dynamic_rotate %81 by %c32_i32_40 dim 1 : vector<128x128xf32>, i32 -> vector<128x128xf32>
    %83 = arith.addf %67, %82 : vector<128x128xf32>
    %c121_i32_41 = arith.constant 121 : i32
    %84 = tpu.dynamic_rotate %67 by %c121_i32_41 dim 0 : vector<128x128xf32>, i32 -> vector<128x128xf32>
    %c64_i32_42 = arith.constant 64 : i32
    %85 = tpu.dynamic_rotate %84 by %c64_i32_42 dim 1 : vector<128x128xf32>, i32 -> vector<128x128xf32>
    %86 = arith.addf %83, %85 : vector<128x128xf32>
    %c120_i32_43 = arith.constant 120 : i32
    %87 = tpu.dynamic_rotate %67 by %c120_i32_43 dim 0 : vector<128x128xf32>, i32 -> vector<128x128xf32>
    %c96_i32_44 = arith.constant 96 : i32
    %88 = tpu.dynamic_rotate %87 by %c96_i32_44 dim 1 : vector<128x128xf32>, i32 -> vector<128x128xf32>
    %89 = arith.addf %86, %88 : vector<128x128xf32>
    %c0_45 = arith.constant 0 : index
    %c128_46 = arith.constant 128 : index
    %90 = vector.load %arg1[%c0_45, %c128_46] : memref<128x384xf32, #tpu.memory_space<vmem>>, vector<128x128xf32>
    %91 = arith.mulf %89, %90 : vector<128x128xf32>
    %92 = arith.truncf %91 : vector<128x128xf32> to vector<128x128xbf16>
    %c119_i32_47 = arith.constant 119 : i32
    %93 = tpu.dynamic_rotate %67 by %c119_i32_47 dim 0 : vector<128x128xf32>, i32 -> vector<128x128xf32>
    %c0_48 = arith.constant 0 : index
    %c256_49 = arith.constant 256 : index
    %94 = vector.load %arg1[%c0_48, %c256_49] : memref<128x384xf32, #tpu.memory_space<vmem>>, vector<128x128xf32>
    %95 = arith.mulf %93, %94 : vector<128x128xf32>
    %96 = arith.truncf %95 : vector<128x128xf32> to vector<128x128xbf16>
    %97 = tpu.concatenate %80, %92, %96 in 1 : vector<128x128xbf16>, vector<128x128xbf16>, vector<128x128xbf16> -> vector<128x384xbf16>
    %c1 = arith.constant 1 : index
    %c0_50 = arith.constant 0 : index
    %c0_51 = arith.constant 0 : index
    %98 = vector.load %arg2[%c1, %c0_50, %c0_51] : memref<6x384x128xbf16, #tpu.memory_space<vmem>>, vector<1x384x128xbf16>
    %99 = vector.shape_cast %98 : vector<1x384x128xbf16> to vector<384x128xbf16>
    %cst_52 = arith.constant dense<0.000000e+00> : vector<128x128xf32>
    %100 = tpu.matmul %97, %99, %cst_52 {dimension_numbers = #tpu.dot_dimension_numbers<[1], [0], [0], [1], [0, 0, 1, 1], [], []>} : vector<128x384xbf16>, vector<384x128xbf16>, vector<128x128xf32> -> vector<128x128xf32>
    %c1_53 = arith.constant 1 : index
    %c0_54 = arith.constant 0 : index
    %c0_55 = arith.constant 0 : index
    %101 = vector.load %arg3[%c1_53, %c0_54, %c0_55] : memref<6x1x128xf32, #tpu.memory_space<vmem>>, vector<1x1x128xf32>
    %102 = vector.shape_cast %101 : vector<1x1x128xf32> to vector<1x128xf32>
    %103 = vector.broadcast %102 : vector<1x128xf32> to vector<128x128xf32>
    %104 = arith.addf %100, %103 : vector<128x128xf32>
    %cst_56 = arith.constant 0.000000e+00 : f32
    %105 = vector.broadcast %cst_56 : f32 to vector<128x128xf32>
    %106 = arith.maximumf %104, %105 : vector<128x128xf32>
    %cst_57 = arith.constant dense<0.000000e+00> : vector<128xf32>
    %107 = vector.multi_reduction <add>, %106, %cst_57 [0] : vector<128x128xf32> to vector<128xf32>
    %108 = vector.shape_cast %107 : vector<128xf32> to vector<1x128xf32>
    %109 = arith.mulf %106, %106 : vector<128x128xf32>
    %cst_58 = arith.constant dense<0.000000e+00> : vector<128xf32>
    %110 = vector.multi_reduction <add>, %109, %cst_58 [0] : vector<128x128xf32> to vector<128xf32>
    %111 = vector.shape_cast %110 : vector<128xf32> to vector<1x128xf32>
    %cst_59 = arith.constant 7.812500e-03 : f32
    %112 = vector.broadcast %cst_59 : f32 to vector<1x128xf32>
    %113 = arith.mulf %108, %112 : vector<1x128xf32>
    %cst_60 = arith.constant 7.812500e-03 : f32
    %114 = vector.broadcast %cst_60 : f32 to vector<1x128xf32>
    %115 = arith.mulf %111, %114 : vector<1x128xf32>
    %116 = arith.mulf %113, %113 : vector<1x128xf32>
    %117 = arith.subf %115, %116 : vector<1x128xf32>
    %118 = vector.broadcast %113 : vector<1x128xf32> to vector<128x128xf32>
    %119 = arith.subf %106, %118 : vector<128x128xf32>
    %cst_61 = arith.constant 9.99999974E-6 : f32
    %120 = vector.broadcast %cst_61 : f32 to vector<1x128xf32>
    %121 = arith.addf %117, %120 : vector<1x128xf32>
    %122 = math.rsqrt %121 : vector<1x128xf32>
    %123 = vector.broadcast %122 : vector<1x128xf32> to vector<128x128xf32>
    %124 = arith.mulf %119, %123 : vector<128x128xf32>
    %c1_62 = arith.constant 1 : index
    %c0_63 = arith.constant 0 : index
    %c0_64 = arith.constant 0 : index
    %125 = vector.load %arg4[%c1_62, %c0_63, %c0_64] : memref<5x1x128xf32, #tpu.memory_space<vmem>>, vector<1x1x128xf32>
    %126 = vector.shape_cast %125 : vector<1x1x128xf32> to vector<1x128xf32>
    %127 = vector.broadcast %126 : vector<1x128xf32> to vector<128x128xf32>
    %128 = arith.mulf %124, %127 : vector<128x128xf32>
    %c1_65 = arith.constant 1 : index
    %c0_66 = arith.constant 0 : index
    %c0_67 = arith.constant 0 : index
    %129 = vector.load %arg5[%c1_65, %c0_66, %c0_67] : memref<5x1x128xf32, #tpu.memory_space<vmem>>, vector<1x1x128xf32>
    %130 = vector.shape_cast %129 : vector<1x1x128xf32> to vector<1x128xf32>
    %131 = vector.broadcast %130 : vector<1x128xf32> to vector<128x128xf32>
    %132 = arith.addf %128, %131 : vector<128x128xf32>
    %c0_68 = arith.constant 0 : index
    %c0_69 = arith.constant 0 : index
    %133 = vector.load %arg17[%c0_68, %c0_69] : memref<128x128xf32, #tpu.memory_space<vmem>>, vector<128x128xf32>
    tpu.vector_store %arg17[%c0_68, %c0_69], %132 {strides = array<i32>} : memref<128x128xf32, #tpu.memory_space<vmem>>, vector<128x128xf32>,
    %c0_70 = arith.constant 0 : index
    %c0_71 = arith.constant 0 : index
    %134 = vector.load %arg17[%c0_70, %c0_71] : memref<128x128xf32, #tpu.memory_space<vmem>>, vector<128x128xf32>
    %c9_i32_72 = arith.constant 9 : i32
    %135 = tpu.dynamic_rotate %134 by %c9_i32_72 dim 0 : vector<128x128xf32>, i32 -> vector<128x128xf32>
    %c8_i32_73 = arith.constant 8 : i32
    %136 = tpu.dynamic_rotate %134 by %c8_i32_73 dim 0 : vector<128x128xf32>, i32 -> vector<128x128xf32>
    %c32_i32_74 = arith.constant 32 : i32
    %137 = tpu.dynamic_rotate %136 by %c32_i32_74 dim 1 : vector<128x128xf32>, i32 -> vector<128x128xf32>
    %138 = arith.addf %135, %137 : vector<128x128xf32>
    %c7_i32_75 = arith.constant 7 : i32
    %139 = tpu.dynamic_rotate %134 by %c7_i32_75 dim 0 : vector<128x128xf32>, i32 -> vector<128x128xf32>
    %c64_i32_76 = arith.constant 64 : i32
    %140 = tpu.dynamic_rotate %139 by %c64_i32_76 dim 1 : vector<128x128xf32>, i32 -> vector<128x128xf32>
    %141 = arith.addf %138, %140 : vector<128x128xf32>
    %c1_i32_77 = arith.constant 1 : i32
    %142 = tpu.dynamic_rotate %134 by %c1_i32_77 dim 0 : vector<128x128xf32>, i32 -> vector<128x128xf32>
    %c96_i32_78 = arith.constant 96 : i32
    %143 = tpu.dynamic_rotate %142 by %c96_i32_78 dim 1 : vector<128x128xf32>, i32 -> vector<128x128xf32>
    %144 = arith.addf %141, %143 : vector<128x128xf32>
    %c0_79 = arith.constant 0 : index
    %c0_80 = arith.constant 0 : index
    %145 = vector.load %arg1[%c0_79, %c0_80] : memref<128x384xf32, #tpu.memory_space<vmem>>, vector<128x128xf32>
    %146 = arith.mulf %144, %145 : vector<128x128xf32>
    %147 = arith.truncf %146 : vector<128x128xf32> to vector<128x128xbf16>
    %c127_i32_81 = arith.constant 127 : i32
    %148 = tpu.dynamic_rotate %134 by %c127_i32_81 dim 0 : vector<128x128xf32>, i32 -> vector<128x128xf32>
    %c32_i32_82 = arith.constant 32 : i32
    %149 = tpu.dynamic_rotate %148 by %c32_i32_82 dim 1 : vector<128x128xf32>, i32 -> vector<128x128xf32>
    %150 = arith.addf %134, %149 : vector<128x128xf32>
    %c121_i32_83 = arith.constant 121 : i32
    %151 = tpu.dynamic_rotate %134 by %c121_i32_83 dim 0 : vector<128x128xf32>, i32 -> vector<128x128xf32>
    %c64_i32_84 = arith.constant 64 : i32
    %152 = tpu.dynamic_rotate %151 by %c64_i32_84 dim 1 : vector<128x128xf32>, i32 -> vector<128x128xf32>
    %153 = arith.addf %150, %152 : vector<128x128xf32>
    %c120_i32_85 = arith.constant 120 : i32
    %154 = tpu.dynamic_rotate %134 by %c120_i32_85 dim 0 : vector<128x128xf32>, i32 -> vector<128x128xf32>
    %c96_i32_86 = arith.constant 96 : i32
    %155 = tpu.dynamic_rotate %154 by %c96_i32_86 dim 1 : vector<128x128xf32>, i32 -> vector<128x128xf32>
    %156 = arith.addf %153, %155 : vector<128x128xf32>
    %c0_87 = arith.constant 0 : index
    %c128_88 = arith.constant 128 : index
    %157 = vector.load %arg1[%c0_87, %c128_88] : memref<128x384xf32, #tpu.memory_space<vmem>>, vector<128x128xf32>
    %158 = arith.mulf %156, %157 : vector<128x128xf32>
    %159 = arith.truncf %158 : vector<128x128xf32> to vector<128x128xbf16>
    %c119_i32_89 = arith.constant 119 : i32
    %160 = tpu.dynamic_rotate %134 by %c119_i32_89 dim 0 : vector<128x128xf32>, i32 -> vector<128x128xf32>
    %c0_90 = arith.constant 0 : index
    %c256_91 = arith.constant 256 : index
    %161 = vector.load %arg1[%c0_90, %c256_91] : memref<128x384xf32, #tpu.memory_space<vmem>>, vector<128x128xf32>
    %162 = arith.mulf %160, %161 : vector<128x128xf32>
    %163 = arith.truncf %162 : vector<128x128xf32> to vector<128x128xbf16>
    %164 = tpu.concatenate %147, %159, %163 in 1 : vector<128x128xbf16>, vector<128x128xbf16>, vector<128x128xbf16> -> vector<128x384xbf16>
    %c2 = arith.constant 2 : index
    %c0_92 = arith.constant 0 : index
    %c0_93 = arith.constant 0 : index
    %165 = vector.load %arg2[%c2, %c0_92, %c0_93] : memref<6x384x128xbf16, #tpu.memory_space<vmem>>, vector<1x384x128xbf16>
    %166 = vector.shape_cast %165 : vector<1x384x128xbf16> to vector<384x128xbf16>
    %cst_94 = arith.constant dense<0.000000e+00> : vector<128x128xf32>
    %167 = tpu.matmul %164, %166, %cst_94 {dimension_numbers = #tpu.dot_dimension_numbers<[1], [0], [0], [1], [0, 0, 1, 1], [], []>} : vector<128x384xbf16>, vector<384x128xbf16>, vector<128x128xf32> -> vector<128x128xf32>
    %c2_95 = arith.constant 2 : index
    %c0_96 = arith.constant 0 : index
    %c0_97 = arith.constant 0 : index
    %168 = vector.load %arg3[%c2_95, %c0_96, %c0_97] : memref<6x1x128xf32, #tpu.memory_space<vmem>>, vector<1x1x128xf32>
    %169 = vector.shape_cast %168 : vector<1x1x128xf32> to vector<1x128xf32>
    %170 = vector.broadcast %169 : vector<1x128xf32> to vector<128x128xf32>
    %171 = arith.addf %167, %170 : vector<128x128xf32>
    %cst_98 = arith.constant dense<0.000000e+00> : vector<128xf32>
    %172 = vector.multi_reduction <add>, %171, %cst_98 [0] : vector<128x128xf32> to vector<128xf32>
    %173 = vector.shape_cast %172 : vector<128xf32> to vector<1x128xf32>
    %174 = arith.mulf %171, %171 : vector<128x128xf32>
    %cst_99 = arith.constant dense<0.000000e+00> : vector<128xf32>
    %175 = vector.multi_reduction <add>, %174, %cst_99 [0] : vector<128x128xf32> to vector<128xf32>
    %176 = vector.shape_cast %175 : vector<128xf32> to vector<1x128xf32>
    %cst_100 = arith.constant 7.812500e-03 : f32
    %177 = vector.broadcast %cst_100 : f32 to vector<1x128xf32>
    %178 = arith.mulf %173, %177 : vector<1x128xf32>
    %cst_101 = arith.constant 7.812500e-03 : f32
    %179 = vector.broadcast %cst_101 : f32 to vector<1x128xf32>
    %180 = arith.mulf %176, %179 : vector<1x128xf32>
    %181 = arith.mulf %178, %178 : vector<1x128xf32>
    %182 = arith.subf %180, %181 : vector<1x128xf32>
    %183 = vector.broadcast %178 : vector<1x128xf32> to vector<128x128xf32>
    %184 = arith.subf %171, %183 : vector<128x128xf32>
    %cst_102 = arith.constant 9.99999974E-6 : f32
    %185 = vector.broadcast %cst_102 : f32 to vector<1x128xf32>
    %186 = arith.addf %182, %185 : vector<1x128xf32>
    %187 = math.rsqrt %186 : vector<1x128xf32>
    %188 = vector.broadcast %187 : vector<1x128xf32> to vector<128x128xf32>
    %189 = arith.mulf %184, %188 : vector<128x128xf32>
    %c2_103 = arith.constant 2 : index
    %c0_104 = arith.constant 0 : index
    %c0_105 = arith.constant 0 : index
    %190 = vector.load %arg4[%c2_103, %c0_104, %c0_105] : memref<5x1x128xf32, #tpu.memory_space<vmem>>, vector<1x1x128xf32>
    %191 = vector.shape_cast %190 : vector<1x1x128xf32> to vector<1x128xf32>
    %192 = vector.broadcast %191 : vector<1x128xf32> to vector<128x128xf32>
    %193 = arith.mulf %189, %192 : vector<128x128xf32>
    %c2_106 = arith.constant 2 : index
    %c0_107 = arith.constant 0 : index
    %c0_108 = arith.constant 0 : index
    %194 = vector.load %arg5[%c2_106, %c0_107, %c0_108] : memref<5x1x128xf32, #tpu.memory_space<vmem>>, vector<1x1x128xf32>
    %195 = vector.shape_cast %194 : vector<1x1x128xf32> to vector<1x128xf32>
    %196 = vector.broadcast %195 : vector<1x128xf32> to vector<128x128xf32>
    %197 = arith.addf %193, %196 : vector<128x128xf32>
    %c0_109 = arith.constant 0 : index
    %c0_110 = arith.constant 0 : index
    %198 = vector.load %arg16[%c0_109, %c0_110] : memref<128x128xf32, #tpu.memory_space<vmem>>, vector<128x128xf32>
    %199 = arith.addf %197, %198 : vector<128x128xf32>
    %cst_111 = arith.constant 0.000000e+00 : f32
    %200 = vector.broadcast %cst_111 : f32 to vector<128x128xf32>
    %201 = arith.maximumf %199, %200 : vector<128x128xf32>
    %c0_112 = arith.constant 0 : index
    %c0_113 = arith.constant 0 : index
    %202 = vector.load %arg16[%c0_112, %c0_113] : memref<128x128xf32, #tpu.memory_space<vmem>>, vector<128x128xf32>
    tpu.vector_store %arg16[%c0_112, %c0_113], %201 {strides = array<i32>} : memref<128x128xf32, #tpu.memory_space<vmem>>, vector<128x128xf32>,
    %c0_114 = arith.constant 0 : index
    %c0_115 = arith.constant 0 : index
    %203 = vector.load %arg16[%c0_114, %c0_115] : memref<128x128xf32, #tpu.memory_space<vmem>>, vector<128x128xf32>
    %c9_i32_116 = arith.constant 9 : i32
    %204 = tpu.dynamic_rotate %203 by %c9_i32_116 dim 0 : vector<128x128xf32>, i32 -> vector<128x128xf32>
    %c8_i32_117 = arith.constant 8 : i32
    %205 = tpu.dynamic_rotate %203 by %c8_i32_117 dim 0 : vector<128x128xf32>, i32 -> vector<128x128xf32>
    %c32_i32_118 = arith.constant 32 : i32
    %206 = tpu.dynamic_rotate %205 by %c32_i32_118 dim 1 : vector<128x128xf32>, i32 -> vector<128x128xf32>
    %207 = arith.addf %204, %206 : vector<128x128xf32>
    %c7_i32_119 = arith.constant 7 : i32
    %208 = tpu.dynamic_rotate %203 by %c7_i32_119 dim 0 : vector<128x128xf32>, i32 -> vector<128x128xf32>
    %c64_i32_120 = arith.constant 64 : i32
    %209 = tpu.dynamic_rotate %208 by %c64_i32_120 dim 1 : vector<128x128xf32>, i32 -> vector<128x128xf32>
    %210 = arith.addf %207, %209 : vector<128x128xf32>
    %c1_i32_121 = arith.constant 1 : i32
    %211 = tpu.dynamic_rotate %203 by %c1_i32_121 dim 0 : vector<128x128xf32>, i32 -> vector<128x128xf32>
    %c96_i32_122 = arith.constant 96 : i32
    %212 = tpu.dynamic_rotate %211 by %c96_i32_122 dim 1 : vector<128x128xf32>, i32 -> vector<128x128xf32>
    %213 = arith.addf %210, %212 : vector<128x128xf32>
    %c0_123 = arith.constant 0 : index
    %c0_124 = arith.constant 0 : index
    %214 = vector.load %arg1[%c0_123, %c0_124] : memref<128x384xf32, #tpu.memory_space<vmem>>, vector<128x128xf32>
    %215 = arith.mulf %213, %214 : vector<128x128xf32>
    %216 = arith.truncf %215 : vector<128x128xf32> to vector<128x128xbf16>
    %c127_i32_125 = arith.constant 127 : i32
    %217 = tpu.dynamic_rotate %203 by %c127_i32_125 dim 0 : vector<128x128xf32>, i32 -> vector<128x128xf32>
    %c32_i32_126 = arith.constant 32 : i32
    %218 = tpu.dynamic_rotate %217 by %c32_i32_126 dim 1 : vector<128x128xf32>, i32 -> vector<128x128xf32>
    %219 = arith.addf %203, %218 : vector<128x128xf32>
    %c121_i32_127 = arith.constant 121 : i32
    %220 = tpu.dynamic_rotate %203 by %c121_i32_127 dim 0 : vector<128x128xf32>, i32 -> vector<128x128xf32>
    %c64_i32_128 = arith.constant 64 : i32
    %221 = tpu.dynamic_rotate %220 by %c64_i32_128 dim 1 : vector<128x128xf32>, i32 -> vector<128x128xf32>
    %222 = arith.addf %219, %221 : vector<128x128xf32>
    %c120_i32_129 = arith.constant 120 : i32
    %223 = tpu.dynamic_rotate %203 by %c120_i32_129 dim 0 : vector<128x128xf32>, i32 -> vector<128x128xf32>
    %c96_i32_130 = arith.constant 96 : i32
    %224 = tpu.dynamic_rotate %223 by %c96_i32_130 dim 1 : vector<128x128xf32>, i32 -> vector<128x128xf32>
    %225 = arith.addf %222, %224 : vector<128x128xf32>
    %c0_131 = arith.constant 0 : index
    %c128_132 = arith.constant 128 : index
    %226 = vector.load %arg1[%c0_131, %c128_132] : memref<128x384xf32, #tpu.memory_space<vmem>>, vector<128x128xf32>
    %227 = arith.mulf %225, %226 : vector<128x128xf32>
    %228 = arith.truncf %227 : vector<128x128xf32> to vector<128x128xbf16>
    %c119_i32_133 = arith.constant 119 : i32
    %229 = tpu.dynamic_rotate %203 by %c119_i32_133 dim 0 : vector<128x128xf32>, i32 -> vector<128x128xf32>
    %c0_134 = arith.constant 0 : index
    %c256_135 = arith.constant 256 : index
    %230 = vector.load %arg1[%c0_134, %c256_135] : memref<128x384xf32, #tpu.memory_space<vmem>>, vector<128x128xf32>
    %231 = arith.mulf %229, %230 : vector<128x128xf32>
    %232 = arith.truncf %231 : vector<128x128xf32> to vector<128x128xbf16>
    %233 = tpu.concatenate %216, %228, %232 in 1 : vector<128x128xbf16>, vector<128x128xbf16>, vector<128x128xbf16> -> vector<128x384xbf16>
    %c3 = arith.constant 3 : index
    %c0_136 = arith.constant 0 : index
    %c0_137 = arith.constant 0 : index
    %234 = vector.load %arg2[%c3, %c0_136, %c0_137] : memref<6x384x128xbf16, #tpu.memory_space<vmem>>, vector<1x384x128xbf16>
    %235 = vector.shape_cast %234 : vector<1x384x128xbf16> to vector<384x128xbf16>
    %cst_138 = arith.constant dense<0.000000e+00> : vector<128x128xf32>
    %236 = tpu.matmul %233, %235, %cst_138 {dimension_numbers = #tpu.dot_dimension_numbers<[1], [0], [0], [1], [0, 0, 1, 1], [], []>} : vector<128x384xbf16>, vector<384x128xbf16>, vector<128x128xf32> -> vector<128x128xf32>
    %c3_139 = arith.constant 3 : index
    %c0_140 = arith.constant 0 : index
    %c0_141 = arith.constant 0 : index
    %237 = vector.load %arg3[%c3_139, %c0_140, %c0_141] : memref<6x1x128xf32, #tpu.memory_space<vmem>>, vector<1x1x128xf32>
    %238 = vector.shape_cast %237 : vector<1x1x128xf32> to vector<1x128xf32>
    %239 = vector.broadcast %238 : vector<1x128xf32> to vector<128x128xf32>
    %240 = arith.addf %236, %239 : vector<128x128xf32>
    %cst_142 = arith.constant 0.000000e+00 : f32
    %241 = vector.broadcast %cst_142 : f32 to vector<128x128xf32>
    %242 = arith.maximumf %240, %241 : vector<128x128xf32>
    %cst_143 = arith.constant dense<0.000000e+00> : vector<128xf32>
    %243 = vector.multi_reduction <add>, %242, %cst_143 [0] : vector<128x128xf32> to vector<128xf32>
    %244 = vector.shape_cast %243 : vector<128xf32> to vector<1x128xf32>
    %245 = arith.mulf %242, %242 : vector<128x128xf32>
    %cst_144 = arith.constant dense<0.000000e+00> : vector<128xf32>
    %246 = vector.multi_reduction <add>, %245, %cst_144 [0] : vector<128x128xf32> to vector<128xf32>
    %247 = vector.shape_cast %246 : vector<128xf32> to vector<1x128xf32>
    %cst_145 = arith.constant 7.812500e-03 : f32
    %248 = vector.broadcast %cst_145 : f32 to vector<1x128xf32>
    %249 = arith.mulf %244, %248 : vector<1x128xf32>
    %cst_146 = arith.constant 7.812500e-03 : f32
    %250 = vector.broadcast %cst_146 : f32 to vector<1x128xf32>
    %251 = arith.mulf %247, %250 : vector<1x128xf32>
    %252 = arith.mulf %249, %249 : vector<1x128xf32>
    %253 = arith.subf %251, %252 : vector<1x128xf32>
    %254 = vector.broadcast %249 : vector<1x128xf32> to vector<128x128xf32>
    %255 = arith.subf %242, %254 : vector<128x128xf32>
    %cst_147 = arith.constant 9.99999974E-6 : f32
    %256 = vector.broadcast %cst_147 : f32 to vector<1x128xf32>
    %257 = arith.addf %253, %256 : vector<1x128xf32>
    %258 = math.rsqrt %257 : vector<1x128xf32>
    %259 = vector.broadcast %258 : vector<1x128xf32> to vector<128x128xf32>
    %260 = arith.mulf %255, %259 : vector<128x128xf32>
    %c3_148 = arith.constant 3 : index
    %c0_149 = arith.constant 0 : index
    %c0_150 = arith.constant 0 : index
    %261 = vector.load %arg4[%c3_148, %c0_149, %c0_150] : memref<5x1x128xf32, #tpu.memory_space<vmem>>, vector<1x1x128xf32>
    %262 = vector.shape_cast %261 : vector<1x1x128xf32> to vector<1x128xf32>
    %263 = vector.broadcast %262 : vector<1x128xf32> to vector<128x128xf32>
    %264 = arith.mulf %260, %263 : vector<128x128xf32>
    %c3_151 = arith.constant 3 : index
    %c0_152 = arith.constant 0 : index
    %c0_153 = arith.constant 0 : index
    %265 = vector.load %arg5[%c3_151, %c0_152, %c0_153] : memref<5x1x128xf32, #tpu.memory_space<vmem>>, vector<1x1x128xf32>
    %266 = vector.shape_cast %265 : vector<1x1x128xf32> to vector<1x128xf32>
    %267 = vector.broadcast %266 : vector<1x128xf32> to vector<128x128xf32>
    %268 = arith.addf %264, %267 : vector<128x128xf32>
    %c0_154 = arith.constant 0 : index
    %c0_155 = arith.constant 0 : index
    %269 = vector.load %arg17[%c0_154, %c0_155] : memref<128x128xf32, #tpu.memory_space<vmem>>, vector<128x128xf32>
    tpu.vector_store %arg17[%c0_154, %c0_155], %268 {strides = array<i32>} : memref<128x128xf32, #tpu.memory_space<vmem>>, vector<128x128xf32>,
    %c0_156 = arith.constant 0 : index
    %c0_157 = arith.constant 0 : index
    %270 = vector.load %arg17[%c0_156, %c0_157] : memref<128x128xf32, #tpu.memory_space<vmem>>, vector<128x128xf32>
    %c9_i32_158 = arith.constant 9 : i32
    %271 = tpu.dynamic_rotate %270 by %c9_i32_158 dim 0 : vector<128x128xf32>, i32 -> vector<128x128xf32>
    %c8_i32_159 = arith.constant 8 : i32
    %272 = tpu.dynamic_rotate %270 by %c8_i32_159 dim 0 : vector<128x128xf32>, i32 -> vector<128x128xf32>
    %c32_i32_160 = arith.constant 32 : i32
    %273 = tpu.dynamic_rotate %272 by %c32_i32_160 dim 1 : vector<128x128xf32>, i32 -> vector<128x128xf32>
    %274 = arith.addf %271, %273 : vector<128x128xf32>
    %c7_i32_161 = arith.constant 7 : i32
    %275 = tpu.dynamic_rotate %270 by %c7_i32_161 dim 0 : vector<128x128xf32>, i32 -> vector<128x128xf32>
    %c64_i32_162 = arith.constant 64 : i32
    %276 = tpu.dynamic_rotate %275 by %c64_i32_162 dim 1 : vector<128x128xf32>, i32 -> vector<128x128xf32>
    %277 = arith.addf %274, %276 : vector<128x128xf32>
    %c1_i32_163 = arith.constant 1 : i32
    %278 = tpu.dynamic_rotate %270 by %c1_i32_163 dim 0 : vector<128x128xf32>, i32 -> vector<128x128xf32>
    %c96_i32_164 = arith.constant 96 : i32
    %279 = tpu.dynamic_rotate %278 by %c96_i32_164 dim 1 : vector<128x128xf32>, i32 -> vector<128x128xf32>
    %280 = arith.addf %277, %279 : vector<128x128xf32>
    %c0_165 = arith.constant 0 : index
    %c0_166 = arith.constant 0 : index
    %281 = vector.load %arg1[%c0_165, %c0_166] : memref<128x384xf32, #tpu.memory_space<vmem>>, vector<128x128xf32>
    %282 = arith.mulf %280, %281 : vector<128x128xf32>
    %283 = arith.truncf %282 : vector<128x128xf32> to vector<128x128xbf16>
    %c127_i32_167 = arith.constant 127 : i32
    %284 = tpu.dynamic_rotate %270 by %c127_i32_167 dim 0 : vector<128x128xf32>, i32 -> vector<128x128xf32>
    %c32_i32_168 = arith.constant 32 : i32
    %285 = tpu.dynamic_rotate %284 by %c32_i32_168 dim 1 : vector<128x128xf32>, i32 -> vector<128x128xf32>
    %286 = arith.addf %270, %285 : vector<128x128xf32>
    %c121_i32_169 = arith.constant 121 : i32
    %287 = tpu.dynamic_rotate %270 by %c121_i32_169 dim 0 : vector<128x128xf32>, i32 -> vector<128x128xf32>
    %c64_i32_170 = arith.constant 64 : i32
    %288 = tpu.dynamic_rotate %287 by %c64_i32_170 dim 1 : vector<128x128xf32>, i32 -> vector<128x128xf32>
    %289 = arith.addf %286, %288 : vector<128x128xf32>
    %c120_i32_171 = arith.constant 120 : i32
    %290 = tpu.dynamic_rotate %270 by %c120_i32_171 dim 0 : vector<128x128xf32>, i32 -> vector<128x128xf32>
    %c96_i32_172 = arith.constant 96 : i32
    %291 = tpu.dynamic_rotate %290 by %c96_i32_172 dim 1 : vector<128x128xf32>, i32 -> vector<128x128xf32>
    %292 = arith.addf %289, %291 : vector<128x128xf32>
    %c0_173 = arith.constant 0 : index
    %c128_174 = arith.constant 128 : index
    %293 = vector.load %arg1[%c0_173, %c128_174] : memref<128x384xf32, #tpu.memory_space<vmem>>, vector<128x128xf32>
    %294 = arith.mulf %292, %293 : vector<128x128xf32>
    %295 = arith.truncf %294 : vector<128x128xf32> to vector<128x128xbf16>
    %c119_i32_175 = arith.constant 119 : i32
    %296 = tpu.dynamic_rotate %270 by %c119_i32_175 dim 0 : vector<128x128xf32>, i32 -> vector<128x128xf32>
    %c0_176 = arith.constant 0 : index
    %c256_177 = arith.constant 256 : index
    %297 = vector.load %arg1[%c0_176, %c256_177] : memref<128x384xf32, #tpu.memory_space<vmem>>, vector<128x128xf32>
    %298 = arith.mulf %296, %297 : vector<128x128xf32>
    %299 = arith.truncf %298 : vector<128x128xf32> to vector<128x128xbf16>
    %300 = tpu.concatenate %283, %295, %299 in 1 : vector<128x128xbf16>, vector<128x128xbf16>, vector<128x128xbf16> -> vector<128x384xbf16>
    %c4 = arith.constant 4 : index
    %c0_178 = arith.constant 0 : index
    %c0_179 = arith.constant 0 : index
    %301 = vector.load %arg2[%c4, %c0_178, %c0_179] : memref<6x384x128xbf16, #tpu.memory_space<vmem>>, vector<1x384x128xbf16>
    %302 = vector.shape_cast %301 : vector<1x384x128xbf16> to vector<384x128xbf16>
    %cst_180 = arith.constant dense<0.000000e+00> : vector<128x128xf32>
    %303 = tpu.matmul %300, %302, %cst_180 {dimension_numbers = #tpu.dot_dimension_numbers<[1], [0], [0], [1], [0, 0, 1, 1], [], []>} : vector<128x384xbf16>, vector<384x128xbf16>, vector<128x128xf32> -> vector<128x128xf32>
    %c4_181 = arith.constant 4 : index
    %c0_182 = arith.constant 0 : index
    %c0_183 = arith.constant 0 : index
    %304 = vector.load %arg3[%c4_181, %c0_182, %c0_183] : memref<6x1x128xf32, #tpu.memory_space<vmem>>, vector<1x1x128xf32>
    %305 = vector.shape_cast %304 : vector<1x1x128xf32> to vector<1x128xf32>
    %306 = vector.broadcast %305 : vector<1x128xf32> to vector<128x128xf32>
    %307 = arith.addf %303, %306 : vector<128x128xf32>
    %cst_184 = arith.constant dense<0.000000e+00> : vector<128xf32>
    %308 = vector.multi_reduction <add>, %307, %cst_184 [0] : vector<128x128xf32> to vector<128xf32>
    %309 = vector.shape_cast %308 : vector<128xf32> to vector<1x128xf32>
    %310 = arith.mulf %307, %307 : vector<128x128xf32>
    %cst_185 = arith.constant dense<0.000000e+00> : vector<128xf32>
    %311 = vector.multi_reduction <add>, %310, %cst_185 [0] : vector<128x128xf32> to vector<128xf32>
    %312 = vector.shape_cast %311 : vector<128xf32> to vector<1x128xf32>
    %cst_186 = arith.constant 7.812500e-03 : f32
    %313 = vector.broadcast %cst_186 : f32 to vector<1x128xf32>
    %314 = arith.mulf %309, %313 : vector<1x128xf32>
    %cst_187 = arith.constant 7.812500e-03 : f32
    %315 = vector.broadcast %cst_187 : f32 to vector<1x128xf32>
    %316 = arith.mulf %312, %315 : vector<1x128xf32>
    %317 = arith.mulf %314, %314 : vector<1x128xf32>
    %318 = arith.subf %316, %317 : vector<1x128xf32>
    %319 = vector.broadcast %314 : vector<1x128xf32> to vector<128x128xf32>
    %320 = arith.subf %307, %319 : vector<128x128xf32>
    %cst_188 = arith.constant 9.99999974E-6 : f32
    %321 = vector.broadcast %cst_188 : f32 to vector<1x128xf32>
    %322 = arith.addf %318, %321 : vector<1x128xf32>
    %323 = math.rsqrt %322 : vector<1x128xf32>
    %324 = vector.broadcast %323 : vector<1x128xf32> to vector<128x128xf32>
    %325 = arith.mulf %320, %324 : vector<128x128xf32>
    %c4_189 = arith.constant 4 : index
    %c0_190 = arith.constant 0 : index
    %c0_191 = arith.constant 0 : index
    %326 = vector.load %arg4[%c4_189, %c0_190, %c0_191] : memref<5x1x128xf32, #tpu.memory_space<vmem>>, vector<1x1x128xf32>
    %327 = vector.shape_cast %326 : vector<1x1x128xf32> to vector<1x128xf32>
    %328 = vector.broadcast %327 : vector<1x128xf32> to vector<128x128xf32>
    %329 = arith.mulf %325, %328 : vector<128x128xf32>
    %c4_192 = arith.constant 4 : index
    %c0_193 = arith.constant 0 : index
    %c0_194 = arith.constant 0 : index
    %330 = vector.load %arg5[%c4_192, %c0_193, %c0_194] : memref<5x1x128xf32, #tpu.memory_space<vmem>>, vector<1x1x128xf32>
    %331 = vector.shape_cast %330 : vector<1x1x128xf32> to vector<1x128xf32>
    %332 = vector.broadcast %331 : vector<1x128xf32> to vector<128x128xf32>
    %333 = arith.addf %329, %332 : vector<128x128xf32>
    %c0_195 = arith.constant 0 : index
    %c0_196 = arith.constant 0 : index
    %334 = vector.load %arg16[%c0_195, %c0_196] : memref<128x128xf32, #tpu.memory_space<vmem>>, vector<128x128xf32>
    %335 = arith.addf %333, %334 : vector<128x128xf32>
    %cst_197 = arith.constant 0.000000e+00 : f32
    %336 = vector.broadcast %cst_197 : f32 to vector<128x128xf32>
    %337 = arith.maximumf %335, %336 : vector<128x128xf32>
    %c0_198 = arith.constant 0 : index
    %c0_199 = arith.constant 0 : index
    %338 = vector.load %arg16[%c0_198, %c0_199] : memref<128x128xf32, #tpu.memory_space<vmem>>, vector<128x128xf32>
    tpu.vector_store %arg16[%c0_198, %c0_199], %337 {strides = array<i32>} : memref<128x128xf32, #tpu.memory_space<vmem>>, vector<128x128xf32>,
    %c0_200 = arith.constant 0 : index
    %c0_201 = arith.constant 0 : index
    %339 = vector.load %arg16[%c0_200, %c0_201] : memref<128x128xf32, #tpu.memory_space<vmem>>, vector<128x128xf32>
    %c9_i32_202 = arith.constant 9 : i32
    %340 = tpu.dynamic_rotate %339 by %c9_i32_202 dim 0 : vector<128x128xf32>, i32 -> vector<128x128xf32>
    %c8_i32_203 = arith.constant 8 : i32
    %341 = tpu.dynamic_rotate %339 by %c8_i32_203 dim 0 : vector<128x128xf32>, i32 -> vector<128x128xf32>
    %c32_i32_204 = arith.constant 32 : i32
    %342 = tpu.dynamic_rotate %341 by %c32_i32_204 dim 1 : vector<128x128xf32>, i32 -> vector<128x128xf32>
    %343 = arith.addf %340, %342 : vector<128x128xf32>
    %c7_i32_205 = arith.constant 7 : i32
    %344 = tpu.dynamic_rotate %339 by %c7_i32_205 dim 0 : vector<128x128xf32>, i32 -> vector<128x128xf32>
    %c64_i32_206 = arith.constant 64 : i32
    %345 = tpu.dynamic_rotate %344 by %c64_i32_206 dim 1 : vector<128x128xf32>, i32 -> vector<128x128xf32>
    %346 = arith.addf %343, %345 : vector<128x128xf32>
    %c1_i32_207 = arith.constant 1 : i32
    %347 = tpu.dynamic_rotate %339 by %c1_i32_207 dim 0 : vector<128x128xf32>, i32 -> vector<128x128xf32>
    %c96_i32_208 = arith.constant 96 : i32
    %348 = tpu.dynamic_rotate %347 by %c96_i32_208 dim 1 : vector<128x128xf32>, i32 -> vector<128x128xf32>
    %349 = arith.addf %346, %348 : vector<128x128xf32>
    %c0_209 = arith.constant 0 : index
    %c0_210 = arith.constant 0 : index
    %350 = vector.load %arg1[%c0_209, %c0_210] : memref<128x384xf32, #tpu.memory_space<vmem>>, vector<128x128xf32>
    %351 = arith.mulf %349, %350 : vector<128x128xf32>
    %352 = arith.truncf %351 : vector<128x128xf32> to vector<128x128xbf16>
    %c127_i32_211 = arith.constant 127 : i32
    %353 = tpu.dynamic_rotate %339 by %c127_i32_211 dim 0 : vector<128x128xf32>, i32 -> vector<128x128xf32>
    %c32_i32_212 = arith.constant 32 : i32
    %354 = tpu.dynamic_rotate %353 by %c32_i32_212 dim 1 : vector<128x128xf32>, i32 -> vector<128x128xf32>
    %355 = arith.addf %339, %354 : vector<128x128xf32>
    %c121_i32_213 = arith.constant 121 : i32
    %356 = tpu.dynamic_rotate %339 by %c121_i32_213 dim 0 : vector<128x128xf32>, i32 -> vector<128x128xf32>
    %c64_i32_214 = arith.constant 64 : i32
    %357 = tpu.dynamic_rotate %356 by %c64_i32_214 dim 1 : vector<128x128xf32>, i32 -> vector<128x128xf32>
    %358 = arith.addf %355, %357 : vector<128x128xf32>
    %c120_i32_215 = arith.constant 120 : i32
    %359 = tpu.dynamic_rotate %339 by %c120_i32_215 dim 0 : vector<128x128xf32>, i32 -> vector<128x128xf32>
    %c96_i32_216 = arith.constant 96 : i32
    %360 = tpu.dynamic_rotate %359 by %c96_i32_216 dim 1 : vector<128x128xf32>, i32 -> vector<128x128xf32>
    %361 = arith.addf %358, %360 : vector<128x128xf32>
    %c0_217 = arith.constant 0 : index
    %c128_218 = arith.constant 128 : index
    %362 = vector.load %arg1[%c0_217, %c128_218] : memref<128x384xf32, #tpu.memory_space<vmem>>, vector<128x128xf32>
    %363 = arith.mulf %361, %362 : vector<128x128xf32>
    %364 = arith.truncf %363 : vector<128x128xf32> to vector<128x128xbf16>
    %c119_i32_219 = arith.constant 119 : i32
    %365 = tpu.dynamic_rotate %339 by %c119_i32_219 dim 0 : vector<128x128xf32>, i32 -> vector<128x128xf32>
    %c0_220 = arith.constant 0 : index
    %c256_221 = arith.constant 256 : index
    %366 = vector.load %arg1[%c0_220, %c256_221] : memref<128x384xf32, #tpu.memory_space<vmem>>, vector<128x128xf32>
    %367 = arith.mulf %365, %366 : vector<128x128xf32>
    %368 = arith.truncf %367 : vector<128x128xf32> to vector<128x128xbf16>
    %369 = tpu.concatenate %352, %364, %368 in 1 : vector<128x128xbf16>, vector<128x128xbf16>, vector<128x128xbf16> -> vector<128x384xbf16>
    %c5 = arith.constant 5 : index
    %c0_222 = arith.constant 0 : index
    %c0_223 = arith.constant 0 : index
    %370 = vector.load %arg2[%c5, %c0_222, %c0_223] : memref<6x384x128xbf16, #tpu.memory_space<vmem>>, vector<1x384x128xbf16>
    %371 = vector.shape_cast %370 : vector<1x384x128xbf16> to vector<384x128xbf16>
    %cst_224 = arith.constant dense<0.000000e+00> : vector<128x128xf32>
    %372 = tpu.matmul %369, %371, %cst_224 {dimension_numbers = #tpu.dot_dimension_numbers<[1], [0], [0], [1], [0, 0, 1, 1], [], []>} : vector<128x384xbf16>, vector<384x128xbf16>, vector<128x128xf32> -> vector<128x128xf32>
    %c5_225 = arith.constant 5 : index
    %c0_226 = arith.constant 0 : index
    %c0_227 = arith.constant 0 : index
    %373 = vector.load %arg3[%c5_225, %c0_226, %c0_227] : memref<6x1x128xf32, #tpu.memory_space<vmem>>, vector<1x1x128xf32>
    %374 = vector.shape_cast %373 : vector<1x1x128xf32> to vector<1x128xf32>
    %375 = vector.broadcast %374 : vector<1x128xf32> to vector<128x128xf32>
    %376 = arith.addf %372, %375 : vector<128x128xf32>
    %cst_228 = arith.constant 0.000000e+00 : f32
    %377 = vector.broadcast %cst_228 : f32 to vector<128x128xf32>
    %378 = arith.maximumf %376, %377 : vector<128x128xf32>
    %379 = vector.shape_cast %378 : vector<128x128xf32> to vector<2x64x128xf32>
    %380 = tpu.iota {dimensions = array<i32: 2>} : vector<1x1x128xi32>
    %c4_i32 = arith.constant 4 : i32
    %381 = vector.broadcast %c4_i32 : i32 to vector<1x1x128xi32>
    %382 = arith.cmpi slt, %380, %381 : vector<1x1x128xi32>
    %cst_229 = arith.constant 0xFF800000 : f32
    %383 = vector.shape_cast %382 : vector<1x1x128xi1> to vector<1x1x128xi1>
    %384 = vector.broadcast %383 : vector<1x1x128xi1> to vector<2x64x128xi1>
    %385 = vector.broadcast %cst_229 : f32 to vector<2x64x128xf32>
    %386 = arith.select %384, %379, %385 : vector<2x64x128xi1>, vector<2x64x128xf32>
    %cst_230 = arith.constant dense<0xFF800000> : vector<2x64xf32>
    %387 = vector.multi_reduction <maximumf>, %386, %cst_230 [2] : vector<2x64x128xf32> to vector<2x64xf32>
    %388 = vector.shape_cast %387 : vector<2x64xf32> to vector<2x64x1xf32>
    %cst_231 = arith.constant dense<0xFF800000> : vector<2x1xf32>
    %389 = vector.multi_reduction <maximumf>, %388, %cst_231 [1] : vector<2x64x1xf32> to vector<2x1xf32>
    %390 = vector.shape_cast %389 : vector<2x1xf32> to vector<2x1x1xf32>
    %cst_232 = arith.constant 0x7F800000 : f32
    %391 = vector.shape_cast %382 : vector<1x1x128xi1> to vector<1x1x128xi1>
    %392 = vector.broadcast %391 : vector<1x1x128xi1> to vector<2x64x128xi1>
    %393 = vector.broadcast %cst_232 : f32 to vector<2x64x128xf32>
    %394 = arith.select %392, %379, %393 : vector<2x64x128xi1>, vector<2x64x128xf32>
    %cst_233 = arith.constant dense<0x7F800000> : vector<2x64xf32>
    %395 = vector.multi_reduction <minimumf>, %394, %cst_233 [2] : vector<2x64x128xf32> to vector<2x64xf32>
    %396 = vector.shape_cast %395 : vector<2x64xf32> to vector<2x64x1xf32>
    %cst_234 = arith.constant dense<0x7F800000> : vector<2x1xf32>
    %397 = vector.multi_reduction <minimumf>, %396, %cst_234 [1] : vector<2x64x1xf32> to vector<2x1xf32>
    %398 = vector.shape_cast %397 : vector<2x1xf32> to vector<2x1x1xf32>
    %399 = vector.broadcast %398 : vector<2x1x1xf32> to vector<2x64x128xf32>
    %400 = arith.subf %379, %399 : vector<2x64x128xf32>
    %401 = arith.subf %390, %398 : vector<2x1x1xf32>
    %402 = vector.broadcast %401 : vector<2x1x1xf32> to vector<2x64x128xf32>
    %403 = arith.divf %400, %402 : vector<2x64x128xf32>
    %cst_235 = arith.constant 0.000000e+00 : f32
    %404 = vector.shape_cast %382 : vector<1x1x128xi1> to vector<1x1x128xi1>
    %405 = vector.broadcast %404 : vector<1x1x128xi1> to vector<2x64x128xi1>
    %406 = vector.broadcast %cst_235 : f32 to vector<2x64x128xf32>
    %407 = arith.select %405, %403, %406 : vector<2x64x128xi1>, vector<2x64x128xf32>
    %408 = vector.shape_cast %407 : vector<2x64x128xf32> to vector<128x128xf32>
    %c0_236 = arith.constant 0 : index
    %c0_237 = arith.constant 0 : index
    %409 = vector.load %arg14[%c0_236, %c0_237] : memref<128x128xf32, #tpu.memory_space<vmem>>, vector<128x128xf32>
    tpu.vector_store %arg14[%c0_236, %c0_237], %408 {strides = array<i32>} : memref<128x128xf32, #tpu.memory_space<vmem>>, vector<128x128xf32>,
    %c0_238 = arith.constant 0 : index
    %c0_239 = arith.constant 0 : index
    %410 = vector.load %arg6[%c0_238, %c0_239] : memref<1x128xf32, #tpu.memory_space<vmem>>, vector<1x128xf32>
    %411 = vector.shape_cast %410 : vector<1x128xf32> to vector<1x1x128xf32>
    %412 = vector.broadcast %411 : vector<1x1x128xf32> to vector<2x64x128xf32>
    %413 = arith.mulf %407, %412 : vector<2x64x128xf32>
    %cst_240 = arith.constant dense<0.000000e+00> : vector<2x64xf32>
    %414 = vector.multi_reduction <add>, %413, %cst_240 [2] : vector<2x64x128xf32> to vector<2x64xf32>
    %c0_241 = arith.constant 0 : index
    %c0_242 = arith.constant 0 : index
    %415 = vector.load %arg7[%c0_241, %c0_242] : memref<1x1xf32, #tpu.memory_space<vmem>>, vector<1x1xf32>
    %416 = vector.broadcast %415 : vector<1x1xf32> to vector<2x64xf32>
    %417 = arith.addf %414, %416 : vector<2x64xf32>
    %cst_243 = arith.constant 0.000000e+00 : f32
    %418 = vector.broadcast %cst_243 : f32 to vector<2x64xf32>
    %419 = arith.maximumf %417, %418 : vector<2x64xf32>
    %cst_244 = arith.constant dense<0.000000e+00> : vector<2xf32>
    %420 = vector.multi_reduction <add>, %419, %cst_244 [1] : vector<2x64xf32> to vector<2xf32>
    %421 = vector.shape_cast %420 : vector<2xf32> to vector<2x1xf32>
    %cst_245 = arith.constant dense<0.000000e+00> : vector<1xf32>
    %422 = vector.multi_reduction <add>, %421, %cst_245 [0] : vector<2x1xf32> to vector<1xf32>
    %423 = vector.shape_cast %422 : vector<1xf32> to vector<1x1xf32>
    %424 = arith.mulf %419, %419 : vector<2x64xf32>
    %cst_246 = arith.constant dense<0.000000e+00> : vector<2xf32>
    %425 = vector.multi_reduction <add>, %424, %cst_246 [1] : vector<2x64xf32> to vector<2xf32>
    %426 = vector.shape_cast %425 : vector<2xf32> to vector<2x1xf32>
    %cst_247 = arith.constant dense<0.000000e+00> : vector<1xf32>
    %427 = vector.multi_reduction <add>, %426, %cst_247 [0] : vector<2x1xf32> to vector<1xf32>
    %428 = vector.shape_cast %427 : vector<1xf32> to vector<1x1xf32>
    %cst_248 = arith.constant 7.812500e-03 : f32
    %429 = vector.broadcast %cst_248 : f32 to vector<1x1xf32>
    %430 = arith.mulf %423, %429 : vector<1x1xf32>
    %cst_249 = arith.constant 7.812500e-03 : f32
    %431 = vector.broadcast %cst_249 : f32 to vector<1x1xf32>
    %432 = arith.mulf %428, %431 : vector<1x1xf32>
    %433 = arith.mulf %430, %430 : vector<1x1xf32>
    %434 = arith.subf %432, %433 : vector<1x1xf32>
    %435 = vector.broadcast %430 : vector<1x1xf32> to vector<2x64xf32>
    %436 = arith.subf %419, %435 : vector<2x64xf32>
    %cst_250 = arith.constant 9.99999974E-6 : f32
    %437 = vector.broadcast %cst_250 : f32 to vector<1x1xf32>
    %438 = arith.addf %434, %437 : vector<1x1xf32>
    %439 = math.rsqrt %438 : vector<1x1xf32>
    %440 = vector.broadcast %439 : vector<1x1xf32> to vector<2x64xf32>
    %441 = arith.mulf %436, %440 : vector<2x64xf32>
    %c0_251 = arith.constant 0 : index
    %c0_252 = arith.constant 0 : index
    %442 = vector.load %arg8[%c0_251, %c0_252] : memref<1x1xf32, #tpu.memory_space<vmem>>, vector<1x1xf32>
    %443 = vector.broadcast %442 : vector<1x1xf32> to vector<2x64xf32>
    %444 = arith.mulf %441, %443 : vector<2x64xf32>
    %c0_253 = arith.constant 0 : index
    %c0_254 = arith.constant 0 : index
    %445 = vector.load %arg9[%c0_253, %c0_254] : memref<1x1xf32, #tpu.memory_space<vmem>>, vector<1x1xf32>
    %446 = vector.broadcast %445 : vector<1x1xf32> to vector<2x64xf32>
    %447 = arith.addf %444, %446 : vector<2x64xf32>
    %448 = arith.truncf %447 : vector<2x64xf32> to vector<2x64xbf16>
    %c0_255 = arith.constant 0 : index
    %c0_256 = arith.constant 0 : index
    %449 = vector.load %arg10[%c0_255, %c0_256] : memref<64x256xbf16, #tpu.memory_space<vmem>>, vector<64x256xbf16>
    %cst_257 = arith.constant dense<0.000000e+00> : vector<2x256xf32>
    %450 = tpu.matmul %448, %449, %cst_257 {dimension_numbers = #tpu.dot_dimension_numbers<[1], [0], [0], [1], [0, 0, 1, 1], [], []>} : vector<2x64xbf16>, vector<64x256xbf16>, vector<2x256xf32> -> vector<2x256xf32>
    %c0_258 = arith.constant 0 : index
    %c0_259 = arith.constant 0 : index
    %451 = vector.load %arg11[%c0_258, %c0_259] : memref<1x256xf32, #tpu.memory_space<vmem>>, vector<1x256xf32>
    %452 = vector.broadcast %451 : vector<1x256xf32> to vector<2x256xf32>
    %453 = arith.addf %450, %452 : vector<2x256xf32>
    %cst_260 = arith.constant 0.000000e+00 : f32
    %454 = vector.broadcast %cst_260 : f32 to vector<2x256xf32>
    %455 = arith.maximumf %453, %454 : vector<2x256xf32>
    %456 = arith.truncf %455 : vector<2x256xf32> to vector<2x256xbf16>
    %c0_261 = arith.constant 0 : index
    %c0_262 = arith.constant 0 : index
    %457 = vector.load %arg12[%c0_261, %c0_262] : memref<256x128xbf16, #tpu.memory_space<vmem>>, vector<256x128xbf16>
    %cst_263 = arith.constant dense<0.000000e+00> : vector<2x128xf32>
    %458 = tpu.matmul %456, %457, %cst_263 {dimension_numbers = #tpu.dot_dimension_numbers<[1], [0], [0], [1], [0, 0, 1, 1], [], []>} : vector<2x256xbf16>, vector<256x128xbf16>, vector<2x128xf32> -> vector<2x128xf32>
    %c0_264 = arith.constant 0 : index
    %c0_265 = arith.constant 0 : index
    %459 = vector.load %arg13[%c0_264, %c0_265] : memref<1x128xf32, #tpu.memory_space<vmem>>, vector<1x128xf32>
    %460 = vector.broadcast %459 : vector<1x128xf32> to vector<2x128xf32>
    %461 = arith.addf %458, %460 : vector<2x128xf32>
    %c0_266 = arith.constant 0 : index
    %c0_267 = arith.constant 0 : index
    %462 = vector.load %arg15[%c0_266, %c0_267] : memref<2x128xf32, #tpu.memory_space<vmem>>, vector<2x128xf32>
    tpu.vector_store %arg15[%c0_266, %c0_267], %461 {strides = array<i32>} : memref<2x128xf32, #tpu.memory_space<vmem>>, vector<2x128xf32>,
    return
  }
}

</mosaic_0001>

<bundles_post_ra>
// kernel: transition_forward.1
= control target key start
LH: loop header
LB: loop body
LE: loop exit
PB: predicated region body
PF: predicated region fallthrough
CT: control target
= control target key end

     0   :  { %s14675_s0 = inlined_call_operand.vmem [shape: f32[128,128], index: 0, kind: input, shape index: {}]   ;;  %s14676_s1 = inlined_call_operand.hbm [shape: f32[128,384], index: 1, kind: input, shape index: {}]   ;;  %s14677_s2 = inlined_call_operand.vmem [shape: bf16[6,384,128], index: 2, kind: input, shape index: {}]   ;;  %s14678_s3 = inlined_call_operand.hbm [shape: f32[6,1,128], index: 3, kind: input, shape index: {}]   ;;  %s14679_s4 = inlined_call_operand.hbm [shape: f32[5,1,128], index: 4, kind: input, shape index: {}]   ;;  %s14680_s5 = inlined_call_operand.hbm [shape: f32[5,1,128], index: 5, kind: input, shape index: {}]   ;;  %s14681_s6 = inlined_call_operand.hbm [shape: f32[1,128], index: 6, kind: input, shape index: {}]   ;;  %s14682_s7 = inlined_call_operand.<no memory space> [shape: f32[1,1], index: 7, kind: input, shape index: {}]   ;;  %s14683_s10 = inlined_call_operand.hbm [shape: bf16[64,256], index: 10, kind: input, shape index: {}]   ;;  %s14684_s11 = inlined_call_operand.hbm [shape: f32[1,256], index: 11, kind: input, shape index: {}]   ;;  %s14685_s12 = inlined_call_operand.vmem [shape: bf16[256,128], index: 12, kind: input, shape index: {}]   ;;  %s14686_s13 = inlined_call_operand.vmem [shape: f32[1,128], index: 13, kind: input, shape index: {}]   ;;  %s14687_s14 = inlined_call_operand.vmem [shape: f32[128,128], index: 14, kind: output, shape index: {0}]   ;;  %s14688_s15 = inlined_call_operand.hbm [shape: f32[2,128], index: 15, kind: output, shape index: {1}]   ;;  %s14689_s8 = inlined_call_operand.<no memory space> [shape: f32[1,1], index: 8, kind: input, shape index: {}]   ;;  %s14690_s9 = inlined_call_operand.<no memory space> [shape: f32[1,1], index: 9, kind: input, shape index: {}]  }
   0x1   :  { %v21_v0 = vstv %s14682_s7  ;;  %v23_v1 = vstv %s14689_s8  ;;  %v25_v2 = vstv %s14690_s9 }
   0x2   :  { %22 = vst [vmem:[#allocation4] sm:$0x1] %v21_v0  ;;  %24 = vst [vmem:[#allocation5] sm:$0x1] %v23_v1 }
   0x3   :  { %26 = vst [vmem:[#allocation6] sm:$0x1] %v25_v2 }
   0x4   :  { %27 = vsyncpa [#allocation8], 0 }
   0x5   :  { %28 = vsyncpa [#allocation11], 0 }
   0x6   :  { %29 = vsyncpa [#allocation14], 0 }
   0x7   :  { %30 = vsyncpa [#allocation17], 0 }
   0x8   :  { %31 = vsyncpa [#allocation9], 0  ;;  %s9006_s24 = smov [#allocation10]   ;;  %s8820_s27 = scalar_lea.hbm %s14678_s3, 96 }
   0x9   :  { %s53_s25 = sshll.u32 %s9006_s24, 4  ;;  %p8821_p0 = scmp.ne.s32.totalorder %s14678_s3, %s8820_s27  ;;  %s54_s25 = int_to_ptr.vmem [resolvable:$true] %s53_s25 }
   0xa   :  { %p8824_p1 = scmp.lt.u32.totalorder %s8820_s27, %s14678_s3 }
   0xc   :  { %p8826_p2 = pnand %p8824_p1, %p8821_p0 }
   0xe   :  { %8829 = shalt.err (!%p8826_p2)
}
   0xf   :  { %s8830_s30 = scalar_lea.vmem %s54_s25, 96  ;;  %p8835_p4 = scmp.lt.s32.totalorder %s54_s25, %s54_s25 }
  0x10   :  { %p8831_p3 = scmp.ne.s32.totalorder %s54_s25, %s8830_s30  ;;  %p8836_p5 = scmp.lt.s32.totalorder %s8830_s30, %s8830_s30 }
  0x12   :  { %p8837_p6 = por %p8836_p5, %p8835_p4 }
  0x14   :  { %p8838_p7 = pnand %p8837_p6, %p8831_p3 }
  0x16   :  { %8841 = shalt.err (!%p8838_p7)
}
  0x17   :  { %s9007_s16 = smov 16   ;;  %s9008_s17 = smov 1  }
  0x18   :  { %59 = dma.hbm_to_vmem [thread:$0]  %s14678_s3, 96, %s54_s25, [#allocation11], %s9007_s16, %s9007_s16, %s9008_s17  }
  0x19   :  { %s9009_s20 = smov [#allocation13]   ;;  %s9010_s22 = smov [#allocation16]  }
  0x1a   :  { %s77_s21 = sshll.u32 %s9009_s20, 4  ;;  %s105_s23 = sshll.u32 %s9010_s22, 4  ;;  %s78_s21 = int_to_ptr.vmem [resolvable:$true] %s77_s21  ;;  %s106_s23 = int_to_ptr.vmem [resolvable:$true] %s105_s23 }
  0x1b   :  { %s8842_s26 = scalar_lea.hbm %s14680_s5, 80 }
  0x1c   :  { %p8843_p8 = scmp.ne.s32.totalorder %s14680_s5, %s8842_s26  ;;  %p8846_p9 = scmp.lt.u32.totalorder %s8842_s26, %s14680_s5 }
  0x1e   :  { %p8848_p10 = pnand %p8846_p9, %p8843_p8 }
  0x20   :  { %8851 = shalt.err (!%p8848_p10)
}
  0x21   :  { %s8852_s3 = scalar_lea.vmem %s78_s21, 80  ;;  %s8856_s25 = scalar_lea.vmem %s78_s21, 96 }
  0x22   :  { %p8853_p11 = scmp.ne.s32.totalorder %s78_s21, %s8852_s3  ;;  %p8857_p12 = scmp.lt.s32.totalorder %s78_s21, %s78_s21 }
  0x23   :  { %p8858_p13 = scmp.lt.s32.totalorder %s8856_s25, %s8852_s3 }
  0x25   :  { %p8859_p0 = por %p8858_p13, %p8857_p12 }
  0x27   :  { %p8860_p1 = pnand %p8859_p0, %p8853_p11 }
  0x29   :  { %8863 = shalt.err (!%p8860_p1)
}
  0x2a   :  { %83 = dma.hbm_to_vmem [thread:$0]  %s14680_s5, 80, %s78_s21, [#allocation14], %s9007_s16, %s9007_s16, %s9008_s17  }
  0x2b   :  { %s8864_s20 = scalar_lea.hbm %s14683_s10, 1024 }
  0x2c   :  { %p8865_p2 = scmp.ne.s32.totalorder %s14683_s10, %s8864_s20  ;;  %p8868_p3 = scmp.lt.u32.totalorder %s8864_s20, %s14683_s10 }
  0x2e   :  { %p8870_p4 = pnand %p8868_p3, %p8865_p2 }
  0x30   :  { %8873 = shalt.err (!%p8870_p4)
}
  0x31   :  { %s8874_s27 = scalar_lea.vmem %s106_s23, 1024  ;;  %p8879_p6 = scmp.lt.s32.totalorder %s106_s23, %s106_s23 }
  0x32   :  { %p8875_p5 = scmp.ne.s32.totalorder %s106_s23, %s8874_s27  ;;  %p8880_p7 = scmp.lt.s32.totalorder %s8874_s27, %s8874_s27 }
  0x34   :  { %p8881_p8 = por %p8880_p7, %p8879_p6 }
  0x36   :  { %p8882_p9 = pnand %p8881_p8, %p8875_p5 }
  0x38   :  { %8885 = shalt.err (!%p8882_p9)
}
  0x39   :  { %s9011_s5 = smov 128   ;;  %s9012_s21 = smov 8  }
  0x3a   :  { %111 = dma.hbm_to_vmem [thread:$0]  %s14683_s10, 1024, %s106_s23, [#allocation17], %s9011_s5, %s9011_s5, %s9012_s21  }
  0x3b   :  { %s9013_s9 = smov [#allocation7]   ;;  %s8886_s30 = scalar_lea.hbm %s14676_s1, 6144 }
  0x3c   :  { %s39_s3 = sshll.u32 %s9013_s9, 4  ;;  %p8887_p10 = scmp.ne.s32.totalorder %s14676_s1, %s8886_s30  ;;  %s40_s3 = int_to_ptr.vmem [resolvable:$true] %s39_s3 }
  0x3d   :  { %p8890_p11 = scmp.lt.u32.totalorder %s8886_s30, %s14676_s1 }
  0x3f   :  { %p8892_p12 = pnand %p8890_p11, %p8887_p10 }
  0x41   :  { %8895 = shalt.err (!%p8892_p12)
}
  0x42   :  { %s8896_s24 = scalar_lea.vmem %s40_s3, 6144  ;;  %p8901_p0 = scmp.lt.s32.totalorder %s40_s3, %s40_s3 }
  0x43   :  { %p8897_p13 = scmp.ne.s32.totalorder %s40_s3, %s8896_s24  ;;  %p8902_p1 = scmp.lt.s32.totalorder %s8896_s24, %s8896_s24 }
  0x45   :  { %p8903_p2 = por %p8902_p1, %p8901_p0 }
  0x47   :  { %p8904_p3 = pnand %p8903_p2, %p8897_p13 }
  0x49   :  { %8907 = shalt.err (!%p8904_p3)
}
  0x4a   :  { %s9014_s10 = smov 384   ;;  %s9015_s23 = smov 24  }
  0x4b   :  { %45 = dma.hbm_to_vmem [thread:$0]  %s14676_s1, 6144, %s40_s3, [#allocation8], %s9014_s10, %s9014_s10, %s9015_s23  }
  0x4c   :  { %s9016_s27 = smov [#allocation12]   ;;  %s9017_s21 = smov [#allocation15]  }
  0x4d   :  { %s65_s5 = sshll.u32 %s9016_s27, 4  ;;  %s90_s8 = sshll.u32 %s9017_s21, 4  ;;  %s66_s5 = int_to_ptr.vmem [resolvable:$true] %s65_s5  ;;  %s91_s8 = int_to_ptr.vmem [resolvable:$true] %s90_s8 }
  0x4e   :  { %s8908_s25 = scalar_lea.hbm %s14679_s4, 80 }
  0x4f   :  { %p8909_p4 = scmp.ne.s32.totalorder %s14679_s4, %s8908_s25  ;;  %p8912_p5 = scmp.lt.u32.totalorder %s8908_s25, %s14679_s4 }
  0x51   :  { %p8914_p6 = pnand %p8912_p5, %p8909_p4 }
  0x53   :  { %8917 = shalt.err (!%p8914_p6)
}
  0x54   :  { %s8918_s1 = scalar_lea.vmem %s66_s5, 80  ;;  %s8922_s3 = scalar_lea.vmem %s66_s5, 96 }
  0x55   :  { %p8919_p7 = scmp.ne.s32.totalorder %s66_s5, %s8918_s1  ;;  %p8923_p8 = scmp.lt.s32.totalorder %s66_s5, %s66_s5 }
  0x56   :  { %p8924_p9 = scmp.lt.s32.totalorder %s8922_s3, %s8918_s1 }
  0x58   :  { %p8925_p10 = por %p8924_p9, %p8923_p8 }
  0x5a   :  { %p8926_p11 = pnand %p8925_p10, %p8919_p7 }
  0x5c   :  { %8929 = shalt.err (!%p8926_p11)
}
  0x5d   :  { %71 = dma.hbm_to_vmem [thread:$0]  %s14679_s4, 80, %s66_s5, [#allocation11], %s9007_s16, %s9007_s16, %s9008_s17  }
  0x5e   :  { %s8930_s23 = scalar_lea.hbm %s14681_s6, 16 }
  0x5f   :  { %p8931_p12 = scmp.ne.s32.totalorder %s14681_s6, %s8930_s23  ;;  %p8934_p13 = scmp.lt.u32.totalorder %s8930_s23, %s14681_s6 }
  0x61   :  { %p8936_p0 = pnand %p8934_p13, %p8931_p12 }
  0x63   :  { %8939 = shalt.err (!%p8936_p0)
}
  0x64   :  { %s8940_s28 = scalar_lea.vmem %s91_s8, 16  ;;  %s8944_s9 = scalar_lea.vmem %s91_s8, 32 }
  0x65   :  { %p8941_p1 = scmp.ne.s32.totalorder %s91_s8, %s8940_s28  ;;  %p8945_p2 = scmp.lt.s32.totalorder %s91_s8, %s91_s8 }
  0x66   :  { %p8946_p3 = scmp.lt.s32.totalorder %s8944_s9, %s8940_s28 }
  0x68   :  { %p8947_p4 = por %p8946_p3, %p8945_p2 }
  0x6a   :  { %p8948_p5 = pnand %p8947_p4, %p8941_p1 }
  0x6c   :  { %8951 = shalt.err (!%p8948_p5)
}
  0x6d   :  { %93 = dma.hbm_to_vmem [thread:$0]  %s14681_s6, 16, %s91_s8, [#allocation14]  }
  0x6e   :  { %s9018_s17 = smov [#allocation18]   ;;  %s8952_s30 = scalar_lea.hbm %s14684_s11, 32 }
  0x6f   :  { %s118_s5 = sshll.u32 %s9018_s17, 4  ;;  %p8953_p6 = scmp.ne.s32.totalorder %s14684_s11, %s8952_s30  ;;  %s119_s5 = int_to_ptr.vmem [resolvable:$true] %s118_s5 }
  0x70   :  { %p8956_p7 = scmp.lt.u32.totalorder %s8952_s30, %s14684_s11 }
  0x72   :  { %p8958_p8 = pnand %p8956_p7, %p8953_p6 }
  0x74   :  { %8961 = shalt.err (!%p8958_p8)
}
  0x75   :  { %s8962_s20 = scalar_lea.vmem %s119_s5, 32  ;;  %p8967_p10 = scmp.lt.s32.totalorder %s119_s5, %s119_s5 }
  0x76   :  { %p8963_p9 = scmp.ne.s32.totalorder %s119_s5, %s8962_s20  ;;  %p8968_p11 = scmp.lt.s32.totalorder %s8962_s20, %s8962_s20 }
  0x78   :  { %p8969_p12 = por %p8968_p11, %p8967_p10 }
  0x7a   :  { %p8970_p13 = pnand %p8969_p12, %p8963_p9 }
  0x7c   :  { %8973 = shalt.err (!%p8970_p13)
}
  0x7d   :  { %121 = dma.hbm_to_vmem [thread:$0]  %s14684_s11, 32, %s119_s5, [#allocation17]  }
  0x7e   :  { %8996 = dma.done.wait [#allocation8], 6144  }
  0x7f   :  { %8997 = vsyncadd [#allocation8], 4294961152 }
  0x80   :  { %8998 = dma.done.wait [#allocation11], 176  }
  0x81   :  { %8999 = vsyncadd [#allocation11], 4294967120 }
  0x82   :  { %9000 = dma.done.wait [#allocation14], 96  }
  0x83   :  { %9001 = vsyncadd [#allocation14], 4294967200 }
  0x84   :  { %9002 = dma.done.wait [#allocation17], 1056  }
  0x85   :  { %9003 = vsyncadd [#allocation17], 4294966240  ;;  %v14691_v3 = vlaneseq  ;;  %v9212_v5 = vld [vmem:[%s14675_s0 + $0x78] sm:$0xff]  ;;  %v148_v6 = vld [vmem:[%s14675_s0] sm:$0xff]  ;;  %s9019_s26 = smov 32   ;;  %s9020_s4 = smov 64  }
  0x86   :  { %v9220_v7 = vld [vmem:[%s14675_s0 + $0x8] sm:$0xff]  ;;  %199 = vrot.lane.b32.xlu1 %v9212_v5, %s9019_s26  ;;  %v247_v8 = vrot.slane %v148_v6, 1  ;;  %v9229_v10 = vld [vmem:[%s14675_s0 + $0x10] sm:$0xff]  ;;  %v164_v16 = vrot.slane %v148_v6, 7  ;;  %v8622_v18 = vld [vmem:[%s14677_s2 + $0x40] sm:$0xff]   ;;  %v262_v20 = vrot.slane %v9212_v5, 1 }
  0x87   :  { %v9207_v4 = vshrl.u32 %v14691_v3, 7  ;;  %v248_v9 = vrot.slane %v9220_v7, 1  ;;  %v249_v11 = vrot.slane %v9229_v10, 1  ;;  %v165_v12 = vrot.slane %v9220_v7, 7  ;;  %v8623_v21 = vld [vmem:[%s14677_s2] sm:$0xff]   ;;  %7908 = vmatprep.subr.bf16.mxu0 %v8622_v18  ;;  %v8624_v22 = vld [vmem:[%s14677_s2 + $0x48] sm:$0xff]  }
  0x88   :  { %v166_v13 = vrot.slane %v9229_v10, 7  ;;  %7909 = vmatpush3.bf16.msra.mxu0 %v8623_v21  ;;  %v8625_v23 = vld [vmem:[%s14677_s2 + $0x80] sm:$0xff]   ;;  %v9280_v24 = vld [vmem:[%s14675_s0 + $0x18] sm:$0xff]  ;;  %v8626_v25 = vld [vmem:[%s14677_s2 + $0x8] sm:$0xff]   ;;  %s9021_s23 = smov 96   ;;  %v179_v30 = vrot.slane %v9212_v5, 7 }
  0x89   :  { %14770 = vst [vmem:[#allocation25_spill] sm:$0xff] %v9207_v4  ;;  %vm263_vm0 = vcmp.lt.s32.totalorder %v9207_v4, 7  ;;  %vm182_vm1 = vcmp.lt.s32.totalorder %v9207_v4, 1  ;;  %7910 = vmatprep.subr.bf16.mxu0 %v8624_v22  ;;  %8410 = vmatprep.subr.bf16.mxu1 %v8625_v23  ;;  %v8627_v27 = vld [vmem:[%s14677_s2 + $0x50] sm:$0xff]   ;;  %v9299_v28 = vld [vmem:[%s14675_s0 + $0x20] sm:$0xff]  ;;  %v8628_v29 = vld [vmem:[%s14677_s2 + $0x88] sm:$0xff]  }
  0x8a   :  { %v9236_v14 = vsel %vm263_vm0, %v247_v8, %v248_v9  ;;  %201 = vrot.lane.b32.xlu1 %v148_v6, %s9019_s26  ;;  %v9246_v15 = vsel %vm263_vm0, %v248_v9, %v249_v11  ;;  %v9252_v17 = vsel %vm182_vm1, %v165_v12, %v166_v13  ;;  %v9263_v19 = vsel %vm182_vm1, %v164_v16, %v165_v12  ;;  %v8629_v32 = vld [vmem:[%s14677_s2 + $0x10] sm:$0xff]   ;;  %v8630_v34 = vld [vmem:[%s14677_s2 + $0x58] sm:$0xff]   ;;  %v8633_v38 = vld [vmem:[%s14677_s2 + $0x60] sm:$0xff]   ;;  %s9023_s11 = smov [#allocation19]  }
  0x8b   :  { %416 = vrot.lane.b32.xlu0 %v9236_v14, %s9019_s26  ;;  %v9291_v26 = vsel %vm263_vm0, %v262_v20, %v247_v8  ;;  %8411 = vmatpush3.bf16.msra.mxu1 %v8625_v23  ;;  %v250_v31 = vrot.slane %v9280_v24, 1  ;;  %v251_v33 = vrot.slane %v9299_v28, 1  ;;  %v8631_v35 = vld [vmem:[%s14677_s2 + $0x90] sm:$0xff]   ;;  %v8632_v36 = vld [vmem:[%s14677_s2 + $0x18] sm:$0xff]   ;;  %v9331_v37 = vsel %vm182_vm1, %v179_v30, %v164_v16  ;;  %v8635_v41 = vld [vmem:[%s14677_s2 + $0x20] sm:$0xff]   ;;  %s7464_s7 = sshll.u32 %s9023_s11, 4  ;;  %s7465_s7 = int_to_ptr.vmem [resolvable:$true] %s7464_s7 }
  0x8c   :  { %7911 = vmatpush3.bf16.msra.mxu0 %v8626_v25  ;;  %8412 = vmatprep.subr.bf16.mxu1 %v8628_v29  ;;  %v8634_v40 = vld [vmem:[%s14677_s2 + $0x98] sm:$0xff]   ;;  %v8636_v42 = vld [vmem:[%s14677_s2 + $0x68] sm:$0xff]   ;;  %v8637_v44 = vld [vmem:[%s14677_s2 + $0xa0] sm:$0xff]   ;;  %v167_v45 = vrot.slane %v9280_v24, 7  ;;  %v168_v46 = vrot.slane %v9299_v28, 7  ;;  %vm6749_vm3 = vcmask 130112   ;;  %p8979_p1 = scmp.lt.s32.totalorder %s7465_s7, %s7465_s7 }
  0x8d   :  { %7912 = vmatprep.subr.bf16.mxu0 %v8627_v27  ;;  %v9338_v39 = vsel %vm263_vm0, %v250_v31, %v251_v33  ;;  %v276_v43 = vsel %vm263_vm0, %v249_v11, %v250_v31  ;;  %v8638_v47 = vld [vmem:[%s14677_s2 + $0x28] sm:$0xff]   ;;  %v8639_v48 = vld [vmem:[%s14677_s2 + $0x70] sm:$0xff]   ;;  %v8642_v53 = vld [vmem:[%s14677_s2 + $0x78] sm:$0xff]   ;;  %vm6756_vm4 = vcmask 195712   ;;  %vm6763_vm5 = vcmask 261312   ;;  %s8974_s27 = scalar_lea.vmem %s7465_s7, 32 }
  0x8e   :  { %466 = vrot.lane.b32.xlu1 %v9252_v17, %s9020_s4  ;;  %v8640_v49 = vld [vmem:[%s14677_s2 + $0xa8] sm:$0xff]   ;;  %v9378_v50 = vsel %vm182_vm1, %v167_v45, %v168_v46  ;;  %v8641_v51 = vld [vmem:[%s14677_s2 + $0x30] sm:$0xff]   ;;  %v9399_v54 = vsel %vm182_vm1, %v166_v13, %v167_v45  ;;  %v603_v59 = vld [vmem:[#allocation7 + $0x58] sm:$0xff]  ;;  %vm6770_vm6 = vcmask 326912   ;;  %vm6777_vm7 = vcmask 392512   ;;  %p8975_p0 = scmp.ne.s32.totalorder %s7465_s7, %s8974_s27  ;;  %p8980_p2 = scmp.lt.s32.totalorder %s8974_s27, %s8974_s27 }
  0x8f   :  { %418 = vrot.lane.b32.xlu0 %v9246_v15, %s9019_s26  ;;  %8413 = vmatpush3.bf16.msra.mxu1 %v8628_v29  ;;  %v9388_v52 = vld [vmem:[%s14675_s0 + $0x28] sm:$0xff]  ;;  %v8643_v55 = vld [vmem:[%s14677_s2 + $0xb0] sm:$0xff]   ;;  %v8644_v60 = vld [vmem:[%s14677_s2 + $0x38] sm:$0xff]   ;;  %vm6784_vm8 = vcmask 458112   ;;  %vm6791_vm9 = vcmask 523712   ;;  %vm6832_vm10 = vcmask 1041409  }
  0x90   :  { %7913 = vmatpush3.bf16.msra.mxu0 %v8629_v32  ;;  %8414 = vmatprep.subr.bf16.mxu1 %v8631_v35  ;;  %v602_v56 = vld [vmem:[#allocation7 + $0x40] sm:$0xff]  ;;  %v9407_v57 = vld [vmem:[%s14675_s0 + $0x30] sm:$0xff]  ;;  %v252_v58 = vrot.slane %v9388_v52, 1  ;;  %v8645_v61 = vld [vmem:[%s14677_s2 + $0xb8] sm:$0xff]   ;;  %v169_v11 = vrot.slane %v9388_v52, 7  ;;  %vm6835_vm11 = vcmask 517120   ;;  %p8981_p3 = por %p8980_p2, %p8979_p1 }
  0x91   :  { %7914 = vmatprep.subr.bf16.mxu0 %v8630_v34  ;;  %v600_v62 = vld [vmem:[#allocation7 + $0x10] sm:$0xff]  ;;  %v601_v63 = vld [vmem:[#allocation7 + $0x28] sm:$0xff]  ;;  %v618_v6 = vmul.f32 %v602_v56, %v9338_v39  ;;  %v170_v12 = vrot.slane %v9407_v57, 7  ;;  %v9448_v16 = vld [vmem:[%s14675_s0 + $0x40] sm:$0xff]  ;;  %vm6839_vm12 = vcmask 1041408   ;;  %vm7231_vm13 = vcmask 523264  }
  0x92   :  { %282 = vrot.lane.b32.xlu1 %v9236_v14, %s9020_s4  ;;  %v274_v0 = vsel %vm263_vm0, %v251_v33, %v252_v58  ;;  %v616_v1 = vmul.f32 %v600_v62, %v9246_v15  ;;  %v617_v2 = vmul.f32 %v601_v63, %v276_v43  ;;  %v9460_v22 = vld [vmem:[%s14675_s0 + $0x48] sm:$0xff]  ;;  %v604_v23 = vld [vmem:[#allocation7 + $0x70] sm:$0xff]  ;;  %v9470_v25 = vsel %vm182_vm1, %v168_v46, %v169_v11  ;;  %v607_v34 = vld [vmem:[#allocation7 + $0xb8] sm:$0xff]  ;;  %p8982_p4 = pnand %p8981_p3, %p8975_p0 }
  0x93   :  { %464 = vrot.lane.b32.xlu0 %v9263_v19, %s9020_s4  ;;  %8415 = vmatpush3.bf16.msra.mxu1 %v8631_v35  ;;  %v619_v8 = vmul.f32 %v603_v59, %v274_v0  ;;  %v9454_v18 = vsel %vm182_vm1, %v169_v11, %v170_v12  ;;  %v255_v27 = vrot.slane %v9448_v16, 1  ;;  %v605_v29 = vld [vmem:[#allocation7 + $0x88] sm:$0xff]  ;;  %v606_v32 = vld [vmem:[#allocation7 + $0xa0] sm:$0xff]  ;;  %v172_v33 = vrot.slane %v9448_v16, 7  ;;  %v608_v59 = vld [vmem:[#allocation7 + $0xd0] sm:$0xff] }
  0x94   :  { %7915 = vmatpush3.bf16.msra.mxu0 %v8632_v36  ;;  %8416 = vmatprep.subr.bf16.mxu1 %v8634_v40  ;;  %v632_v9 = vpack.c.bf16 %v617_v2, %v616_v1  ;;  %v9506_v45 = vld [vmem:[%s14675_s0 + $0x50] sm:$0xff]  ;;  %v610_v63 = vld [vmem:[#allocation7 + $0x100] sm:$0xff]  ;;  %v611_v1 = vld [vmem:[#allocation7 + $0x118] sm:$0xff] }
  0x95   :  { %7916 = vmatprep.subr.bf16.mxu0 %v8633_v38  ;;  %v609_v62 = vld [vmem:[#allocation7 + $0xe8] sm:$0xff]  ;;  %v1616_v4 = vld [vmem:[#allocation7 + $0x20] sm:$0xff] }
  0x96   :  { %514 = vrot.lane.b32.xlu1 %v9229_v10, %s9021_s23  ;;  %8426 = vmatprep.mubr.bf16.mxu1 %v632_v9 }
  0x97   :  { %280 = vrot.lane.b32.xlu0 %v9291_v26, %s9020_s4  ;;  %8417 = vmatpush3.bf16.msra.mxu1 %v8634_v40 }
  0x98   :  { %7917 = vmatpush3.bf16.msra.mxu0 %v8635_v41  ;;  %8418 = vmatprep.subr.bf16.mxu1 %v8637_v44 }
  0x99   :  { %7918 = vmatprep.subr.bf16.mxu0 %v8636_v42 }
  0x9a   :  { %330 = vrot.lane.b32.xlu1 %v9263_v19, %s9021_s23 }
  0x9b   :  { %512 = vrot.lane.b32.xlu0 %v9220_v7, %s9021_s23  ;;  %8419 = vmatpush3.bf16.msra.mxu1 %v8637_v44 }
  0x9c   :  { %7919 = vmatpush3.bf16.msra.mxu0 %v8638_v47  ;;  %8420 = vmatprep.subr.bf16.mxu1 %v8640_v49  ;;  %v257_v47 = vrot.slane %v9506_v45, 1 }
  0x9d   :  { %7920 = vmatprep.subr.bf16.mxu0 %v8639_v48  ;;  %v173_v48 = vrot.slane %v9460_v22, 7 }
  0x9e   :  { %422 = vrot.lane.b32.xlu1 %v9338_v39, %s9019_s26 }
  0x9f   :  { %328 = vrot.lane.b32.xlu0 %v9331_v37, %s9021_s23  ;;  %8421 = vmatpush3.bf16.msra.mxu1 %v8640_v49  ;;  %v174_v49 = vrot.slane %v9506_v45, 7 }
  0xa0   :  { %7921 = vmatpush3.bf16.msra.mxu0 %v8641_v51  ;;  %8422 = vmatprep.subr.bf16.mxu1 %v8643_v55 }
  0xa1   :  { %7922 = vmatprep.subr.bf16.mxu0 %v8642_v53  ;;  %v9555_v56 = vsel %vm182_vm1, %v173_v48, %v174_v49 }
  0xa2   :  { %205 = vrot.lane.b32.xlu1 %v9229_v10, %s9019_s26  ;;  %v633_v10 = vpack.c.bf16 %v619_v8, %v618_v6 }
  0xa3   :  { %420 = vrot.lane.b32.xlu0 %v276_v43, %s9019_s26  ;;  %8423 = vmatpush3.bf16.msra.mxu1 %v8643_v55  ;;  %v9547_v55 = vld [vmem:[%s14675_s0 + $0x60] sm:$0xff] }
  0xa4   :  { %7923 = vmatpush3.bf16.msra.mxu0 %v8644_v60  ;;  %8424 = vmatprep.subr.bf16.mxu1 %v8645_v61  ;;  %v9569_v60 = vsel %vm182_vm1, %v172_v33, %v173_v48  ;;  %v561_v48 = vld [vmem:[#allocation7 + $0x20] sm:$0xff] }
  0xa6   :  { %470 = vrot.lane.b32.xlu1 %v9378_v50, %s9020_s4 }
  0xa7   :  { %203 = vrot.lane.b32.xlu0 %v9220_v7, %s9019_s26  ;;  %v253_v7 = vrot.slane %v9407_v57, 1  ;;  %8425 = vmatpush3.bf16.msra.mxu1 %v8645_v61  ;;  %v259_v61 = vrot.slane %v9547_v55, 1 }
  0xa9   :  { %v273_v13 = vsel %vm263_vm0, %v252_v58, %v253_v7  ;;  %v9561_v58 = vld [vmem:[%s14675_s0 + $0x68] sm:$0xff] }
  0xaa   :  { %286 = vrot.lane.b32.xlu1 %v276_v43, %s9020_s4  ;;  %8427 = vmatmul.mubr.bf16.vlgmr.msra.gmra.mrb[0].mxu1 %v633_v10  ;;  %v620_v35 = vmul.f32 %v604_v23, %v273_v13 }
  0xab   :  { %468 = vrot.lane.b32.xlu0 %v9399_v54, %s9020_s4 }
  0xae   :  { %518 = vrot.lane.b32.xlu1 %v9299_v28, %s9021_s23 }
  0xaf   :  { %284 = vrot.lane.b32.xlu0 %v9246_v15, %s9020_s4  ;;  %v9442_v15 = vld [vmem:[%s14675_s0 + $0x38] sm:$0xff] }
  0xb0   :  { %v254_v21 = vrot.slane %v9442_v15, 1  ;;  %v171_v31 = vrot.slane %v9442_v15, 7 }
  0xb2   :  { %334 = vrot.lane.b32.xlu1 %v9399_v54, %s9021_s23  ;;  %v271_v36 = vsel %vm263_vm0, %v254_v21, %v255_v27  ;;  %v9514_v46 = vsel %vm182_vm1, %v170_v12, %v171_v31 }
  0xb3   :  { %516 = vrot.lane.b32.xlu0 %v9280_v24, %s9021_s23  ;;  %v622_v41 = vmul.f32 %v606_v32, %v271_v36 }
  0xb6   :  { %426 = vrot.lane.b32.xlu1 %v273_v13, %s9019_s26 }
  0xb7   :  { %332 = vrot.lane.b32.xlu0 %v9252_v17, %s9021_s23 }
  0xba   :  { %209 = vrot.lane.b32.xlu1 %v9299_v28, %s9019_s26  ;;  %v272_v28 = vsel %vm263_vm0, %v253_v7, %v254_v21 }
  0xbb   :  { %424 = vrot.lane.b32.xlu0 %v274_v0, %s9019_s26  ;;  %v621_v38 = vmul.f32 %v605_v29, %v272_v28  ;;  %v176_v29 = vrot.slane %v9547_v55, 7 }
  0xbd   :  { %v634_v43 = vpack.c.bf16 %v621_v38, %v620_v35 }
  0xbe   :  { %474 = vrot.lane.b32.xlu1 %v9454_v18, %s9020_s4 }
  0xbf   :  { %207 = vrot.lane.b32.xlu0 %v9280_v24, %s9019_s26  ;;  %v256_v24 = vrot.slane %v9460_v22, 1  ;;  %8430 = vmatprep.mubr.bf16.mxu1 %v634_v43 }
  0xc1   :  { %v270_v40 = vsel %vm263_vm0, %v255_v27, %v256_v24  ;;  %v9531_v51 = vsel %vm263_vm0, %v256_v24, %v257_v47 }
  0xc2   :  { %290 = vrot.lane.b32.xlu1 %v274_v0, %s9020_s4  ;;  %v623_v42 = vmul.f32 %v607_v34, %v270_v40  ;;  %v260_v0 = vrot.slane %v9561_v58, 1  ;;  %v624_v6 = vmul.f32 %v608_v59, %v9531_v51 }
  0xc3   :  { %472 = vrot.lane.b32.xlu0 %v9470_v25, %s9020_s4 }
  0xc4   :  { %v635_v44 = vpack.c.bf16 %v623_v42, %v622_v41  ;;  %v9587_v9 = vsel %vm263_vm0, %v259_v61, %v260_v0  ;;  %v9634_v41 = vld [vmem:[%s14675_s0] sm:$0xff] }
  0xc5   :  { %v627_v11 = vmul.f32 %v611_v1, %v9587_v9 }
  0xc6   :  { %522 = vrot.lane.b32.xlu1 %v9407_v57, %s9021_s23  ;;  %8431 = vmatmul.mubr.bf16.gmra.mrb[4].mxu1 %v635_v44 }
  0xc7   :  { %288 = vrot.lane.b32.xlu0 %v9338_v39, %s9020_s4  ;;  %v9501_v39 = vsel %vm182_vm1, %v171_v31, %v172_v33  ;;  %v9606_v31 = vld [vmem:[%s14675_s0 + $0x70] sm:$0xff] }
  0xc8   :  { %v178_v33 = vrot.slane %v9606_v31, 7 }
  0xca   :  { %338 = vrot.lane.b32.xlu1 %v9470_v25, %s9021_s23 }
  0xcb   :  { %520 = vrot.lane.b32.xlu0 %v9388_v52, %s9021_s23 }
  0xce   :  { %430 = vrot.lane.b32.xlu1 %v271_v36, %s9019_s26 }
  0xcf   :  { %336 = vrot.lane.b32.xlu0 %v9378_v50, %s9021_s23 }
  0xd2   :  { %213 = vrot.lane.b32.xlu1 %v9407_v57, %s9019_s26 }
  0xd3   :  { %428 = vrot.lane.b32.xlu0 %v272_v28, %s9019_s26 }
  0xd6   :  { %478 = vrot.lane.b32.xlu1 %v9501_v39, %s9020_s4 }
  0xd7   :  { %211 = vrot.lane.b32.xlu0 %v9388_v52, %s9019_s26  ;;  %v9536_v52 = vld [vmem:[%s14675_s0 + $0x58] sm:$0xff] }
  0xd8   :  { %v258_v53 = vrot.slane %v9536_v52, 1  ;;  %v175_v57 = vrot.slane %v9536_v52, 7 }
  0xda   :  { %294 = vrot.lane.b32.xlu1 %v272_v28, %s9020_s4  ;;  %v268_v2 = vsel %vm263_vm0, %v257_v47, %v258_v53  ;;  %v9581_v7 = vsel %vm263_vm0, %v258_v53, %v259_v61  ;;  %v9616_v34 = vsel %vm182_vm1, %v175_v57, %v176_v29  ;;  %v8810_v28 = vld [vmem:[%s14675_s0 + $0x8] sm:$0xff]  ;;  %v9629_v38 = vsel %vm182_vm1, %v174_v49, %v175_v57 }
  0xdb   :  { %476 = vrot.lane.b32.xlu0 %v9514_v46, %s9020_s4  ;;  %v625_v8 = vmul.f32 %v609_v62, %v268_v2  ;;  %v626_v10 = vmul.f32 %v610_v63, %v9581_v7  ;;  %v560_v47 = vld [vmem:[#allocation7 + $0x8] sm:$0xff] }
  0xdd   :  { %v636_v12 = vpack.c.bf16 %v625_v8, %v624_v6 }
  0xde   :  { %526 = vrot.lane.b32.xlu1 %v9448_v16, %s9021_s23 }
  0xdf   :  { %292 = vrot.lane.b32.xlu0 %v273_v13, %s9020_s4  ;;  %8434 = vmatprep.mubr.bf16.mxu1 %v636_v12  ;;  %v376_v12 = vld [vmem:[#allocation7] sm:$0xff] }
  0xe2   :  { %342 = vrot.lane.b32.xlu1 %v9514_v46, %s9021_s23 }
  0xe3   :  { %524 = vrot.lane.b32.xlu0 %v9442_v15, %s9021_s23 }
  0xe6   :  { %434 = vrot.lane.b32.xlu1 %v9531_v51, %s9019_s26 }
  0xe7   :  { %340 = vrot.lane.b32.xlu0 %v9454_v18, %s9021_s23 }
  0xea   :  { %217 = vrot.lane.b32.xlu1 %v9448_v16, %s9019_s26  ;;  %v637_v16 = vpack.c.bf16 %v627_v11, %v626_v10  ;;  %v377_v11 = vld [vmem:[#allocation7 + $0x18] sm:$0xff] }
  0xeb   :  { %432 = vrot.lane.b32.xlu0 %v270_v40, %s9019_s26 }
  0xec   :  { %8435 = vmatmul.mubr.bf16.gmra.mrb[8].mxu1 %v637_v16 }
  0xee   :  { %482 = vrot.lane.b32.xlu1 %v9555_v56, %s9020_s4 }
  0xef   :  { %215 = vrot.lane.b32.xlu0 %v9442_v15, %s9019_s26 }
  0xf2   :  { %298 = vrot.lane.b32.xlu1 %v270_v40, %s9020_s4 }
  0xf3   :  { %480 = vrot.lane.b32.xlu0 %v9569_v60, %s9020_s4 }
  0xf6   :  { %530 = vrot.lane.b32.xlu1 %v9506_v45, %s9021_s23 }
  0xf7   :  { %296 = vrot.lane.b32.xlu0 %v271_v36, %s9020_s4 }
  0xf8   :  { %v200_v13 = vpop.permute.xlu1 %199 }
  0xfa   :  { %346 = vrot.lane.b32.xlu1 %v9569_v60, %s9021_s23 }
  0xfb   :  { %528 = vrot.lane.b32.xlu0 %v9460_v22, %s9021_s23 }
  0xfc   :  { %v202_v23 = vpop.permute.xlu1 %201 }
  0xfd   :  { %v417_v21 = vpop.permute.xlu0 %416  ;;  %v232_v49 = vadd.f32 %v202_v23, %v9331_v37 }
  0xfe   :  { %438 = vrot.lane.b32.xlu1 %v9581_v7, %s9019_s26  ;;  %v448_v42 = vadd.f32 %v9634_v41, %v417_v21 }
  0xff   :  { %344 = vrot.lane.b32.xlu0 %v9501_v39, %s9021_s23 }
 0x100   :  { %v467_v32 = vpop.permute.xlu1 %466 }
 0x101   :  { %v419_v27 = vpop.permute.xlu0 %418 }
 0x102   :  { %221 = vrot.lane.b32.xlu1 %v9506_v45, %s9019_s26  ;;  %v449_v35 = vadd.f32 %v8810_v28, %v419_v27 }
 0x103   :  { %436 = vrot.lane.b32.xlu0 %v268_v2, %s9019_s26 }
 0x104   :  { %v283_v36 = vpop.permute.xlu1 %282  ;;  %v497_v43 = vadd.f32 %v467_v32, %v449_v35 }
 0x105   :  { %v465_v24 = vpop.permute.xlu0 %464  ;;  %v313_v62 = vadd.f32 %v283_v36, %v232_v49 }
 0x106   :  { %486 = vrot.lane.b32.xlu1 %v9616_v34, %s9020_s4  ;;  %v496_v53 = vadd.f32 %v465_v24, %v448_v42 }
 0x107   :  { %219 = vrot.lane.b32.xlu0 %v9460_v22, %s9019_s26  ;;  %v9641_v22 = vsel %vm182_vm1, %v178_v33, %v179_v30 }
 0x108   :  { %v515_v44 = vpop.permute.xlu1 %514  ;;  %v231_v61 = vadd.f32 %v200_v13, %v9641_v22 }
 0x109   :  { %v281_v40 = vpop.permute.xlu0 %280  ;;  %v545_v57 = vadd.f32 %v515_v44, %v497_v43 }
 0x10a   :  { %302 = vrot.lane.b32.xlu1 %v268_v2, %s9020_s4  ;;  %v312_v30 = vadd.f32 %v281_v40, %v231_v61  ;;  %v261_v2 = vrot.slane %v9606_v31, 1  ;;  %v177_v40 = vrot.slane %v9561_v58, 7  ;;  %v612_v61 = vld [vmem:[#allocation7 + $0x130] sm:$0xff] }
 0x10b   :  { %484 = vrot.lane.b32.xlu0 %v9629_v38, %s9020_s4  ;;  %v577_v10 = vmul.f32 %v561_v48, %v545_v57  ;;  %v8813_v57 = vld [vmem:[%s14675_s0 + $0x10] sm:$0xff] }
 0x10c   :  { %v331_v1 = vpop.permute.xlu1 %330  ;;  %v9661_v24 = vsel %vm263_vm0, %v260_v0, %v261_v2  ;;  %v9674_v43 = vsel %vm182_vm1, %v177_v40, %v178_v33  ;;  %v9687_v49 = vsel %vm182_vm1, %v176_v29, %v177_v40 }
 0x10d   :  { %v513_v59 = vpop.permute.xlu0 %512  ;;  %v361_v6 = vadd.f32 %v331_v1, %v313_v62  ;;  %v613_v1 = vld [vmem:[#allocation7 + $0x148] sm:$0xff] }
 0x10e   :  { %v544_v63 = vadd.f32 %v513_v59, %v496_v53  ;;  %534 = vrot.lane.b32.xlu1 %v9547_v55, %s9021_s23  ;;  %v615_v53 = vld [vmem:[#allocation7 + $0x178] sm:$0xff] }
 0x10f   :  { %300 = vrot.lane.b32.xlu0 %v9531_v51, %s9020_s4  ;;  %v393_v27 = vmul.f32 %v377_v11, %v361_v6  ;;  %v631_v11 = vmul.f32 %v615_v53, %v9236_v14 }
 0x110   :  { %v576_v8 = vmul.f32 %v560_v47, %v544_v63  ;;  %v423_v13 = vpop.permute.xlu1 %422  ;;  %v8812_v47 = vld [vmem:[%s14675_s0 + $0x18] sm:$0xff] }
 0x111   :  { %v329_v16 = vpop.permute.xlu0 %328  ;;  %v451_v48 = vadd.f32 %v8812_v47, %v423_v13 }
 0x112   :  { %v360_v21 = vadd.f32 %v329_v16, %v312_v30  ;;  %v592_v23 = vpack.c.bf16 %v577_v10, %v576_v8  ;;  %350 = vrot.lane.b32.xlu1 %v9629_v38, %s9021_s23  ;;  %v614_v30 = vld [vmem:[#allocation7 + $0x160] sm:$0xff]  ;;  %v264_v10 = vsel %vm263_vm0, %v261_v2, %v262_v20  ;;  %v563_v16 = vld [vmem:[#allocation7 + $0x50] sm:$0xff] }
 0x113   :  { %532 = vrot.lane.b32.xlu0 %v9536_v52, %s9021_s23 }
 0x114   :  { %v392_v51 = vmul.f32 %v376_v12, %v360_v21  ;;  %871 = vmatprep.mubr.bf16.mxu0 %v592_v23  ;;  %v206_v28 = vpop.permute.xlu1 %205  ;;  %v628_v12 = vmul.f32 %v612_v61, %v9661_v24  ;;  %v562_v21 = vld [vmem:[#allocation7 + $0x38] sm:$0xff]  ;;  %v629_v23 = vmul.f32 %v613_v1, %v264_v10 }
 0x115   :  { %v421_v32 = vpop.permute.xlu0 %420  ;;  %v234_v6 = vadd.f32 %v206_v28, %v9252_v17  ;;  %v630_v17 = vmul.f32 %v614_v30, %v9291_v26  ;;  %v379_v28 = vld [vmem:[#allocation7 + $0x48] sm:$0xff]  ;;  %v8815_v30 = vld [vmem:[%s14675_s0 + $0x20] sm:$0xff] }
 0x116   :  { %v408_v35 = vpack.c.bf16 %v393_v27, %v392_v51  ;;  %442 = vrot.lane.b32.xlu1 %v9661_v24, %s9019_s26  ;;  %v450_v59 = vadd.f32 %v8813_v57, %v421_v32 }
 0x117   :  { %348 = vrot.lane.b32.xlu0 %v9555_v56, %s9021_s23 }
 0x118   :  { %872 = vmatmul.mubr.bf16.vlgmr.msra.gmra.mrb[0].mxu0 %v408_v35  ;;  %v471_v42 = vpop.permute.xlu1 %470  ;;  %v378_v35 = vld [vmem:[#allocation7 + $0x30] sm:$0xff] }
 0x119   :  { %v204_v36 = vpop.permute.xlu0 %203  ;;  %v499_v62 = vadd.f32 %v471_v42, %v451_v48  ;;  %v638_v42 = vpack.c.bf16 %v629_v23, %v628_v12 }
 0x11a   :  { %225 = vrot.lane.b32.xlu1 %v9547_v55, %s9019_s26  ;;  %v233_v27 = vadd.f32 %v204_v36, %v9263_v19  ;;  %v639_v36 = vpack.c.bf16 %v631_v11, %v630_v17 }
 0x11b   :  { %440 = vrot.lane.b32.xlu0 %v9587_v9, %s9019_s26  ;;  %8438 = vmatprep.mubr.bf16.mxu1 %v638_v42 }
 0x11c   :  { %v287_v44 = vpop.permute.xlu1 %286  ;;  %8439 = vmatmul.mubr.bf16.gmra.mrb[12].mxu1 %v639_v36 }
 0x11d   :  { %v469_v0 = vpop.permute.xlu0 %468  ;;  %v315_v51 = vadd.f32 %v287_v44, %v234_v6 }
 0x11e   :  { %490 = vrot.lane.b32.xlu1 %v9674_v43, %s9020_s4  ;;  %v498_v8 = vadd.f32 %v469_v0, %v450_v59 }
 0x11f   :  { %223 = vrot.lane.b32.xlu0 %v9536_v52, %s9019_s26 }
 0x120   :  { %v519_v63 = vpop.permute.xlu1 %518 }
 0x121   :  { %v285_v33 = vpop.permute.xlu0 %284  ;;  %v547_v29 = vadd.f32 %v519_v63, %v499_v62  ;;  %v8814_v63 = vld [vmem:[%s14675_s0 + $0x28] sm:$0xff] }
 0x122   :  { %306 = vrot.lane.b32.xlu1 %v9587_v9, %s9020_s4  ;;  %v314_v5 = vadd.f32 %v285_v33, %v233_v27 }
 0x123   :  { %488 = vrot.lane.b32.xlu0 %v9687_v49, %s9020_s4  ;;  %v579_v20 = vmul.f32 %v563_v16, %v547_v29 }
 0x124   :  { %v335_v9 = vpop.permute.xlu1 %334 }
 0x125   :  { %v517_v13 = vpop.permute.xlu0 %516  ;;  %v363_v14 = vadd.f32 %v335_v9, %v315_v51 }
 0x126   :  { %v546_v32 = vadd.f32 %v517_v13, %v498_v8  ;;  %538 = vrot.lane.b32.xlu1 %v9606_v31, %s9021_s23  ;;  %v564_v13 = vld [vmem:[#allocation7 + $0x68] sm:$0xff] }
 0x127   :  { %304 = vrot.lane.b32.xlu0 %v9581_v7, %s9020_s4  ;;  %v395_v7 = vmul.f32 %v379_v28, %v363_v14 }
 0x128   :  { %v578_v2 = vmul.f32 %v562_v21, %v546_v32  ;;  %v427_v47 = vpop.permute.xlu1 %426  ;;  %v565_v21 = vld [vmem:[#allocation7 + $0x80] sm:$0xff] }
 0x129   :  { %v333_v40 = vpop.permute.xlu0 %332  ;;  %v453_v1 = vadd.f32 %v8814_v63, %v427_v47  ;;  %v567_v63 = vld [vmem:[#allocation7 + $0xb0] sm:$0xff] }
 0x12a   :  { %v362_v0 = vadd.f32 %v333_v40, %v314_v5  ;;  %v593_v19 = vpack.c.bf16 %v579_v20, %v578_v2  ;;  %354 = vrot.lane.b32.xlu1 %v9687_v49, %s9021_s23 }
 0x12b   :  { %536 = vrot.lane.b32.xlu0 %v9561_v58, %s9021_s23 }
 0x12c   :  { %v394_v44 = vmul.f32 %v378_v35, %v362_v0  ;;  %879 = vmatprep.mubr.bf16.mxu0 %v593_v19  ;;  %v210_v33 = vpop.permute.xlu1 %209 }
 0x12d   :  { %v425_v48 = vpop.permute.xlu0 %424  ;;  %v236_v11 = vadd.f32 %v210_v33, %v9378_v50  ;;  %v381_v50 = vld [vmem:[#allocation7 + $0x78] sm:$0xff]  ;;  %v8817_v33 = vld [vmem:[%s14675_s0 + $0x30] sm:$0xff] }
 0x12e   :  { %v409_v53 = vpack.c.bf16 %v395_v7, %v394_v44  ;;  %446 = vrot.lane.b32.xlu1 %v9291_v26, %s9019_s26  ;;  %v452_v6 = vadd.f32 %v8815_v30, %v425_v48 }
 0x12f   :  { %352 = vrot.lane.b32.xlu0 %v9616_v34, %s9021_s23 }
 0x130   :  { %880 = vmatmul.mubr.bf16.gmra.mrb[4].mxu0 %v409_v53  ;;  %v475_v59 = vpop.permute.xlu1 %474 }
 0x131   :  { %v208_v57 = vpop.permute.xlu0 %207  ;;  %v501_v8 = vadd.f32 %v475_v59, %v453_v1  ;;  %v566_v1 = vld [vmem:[#allocation7 + $0x98] sm:$0xff] }
 0x132   :  { %229 = vrot.lane.b32.xlu1 %v9606_v31, %s9019_s26  ;;  %v235_v23 = vadd.f32 %v208_v57, %v9399_v54  ;;  %v9742_v54 = vld [vmem:[%s14675_s0 + $0x78] sm:$0xff] }
 0x133   :  { %444 = vrot.lane.b32.xlu0 %v264_v10, %s9019_s26 }
 0x134   :  { %v291_v62 = vpop.permute.xlu1 %290 }
 0x135   :  { %v473_v61 = vpop.permute.xlu0 %472  ;;  %v317_v17 = vadd.f32 %v291_v62, %v236_v11 }
 0x136   :  { %494 = vrot.lane.b32.xlu1 %v9331_v37, %s9020_s4  ;;  %v500_v12 = vadd.f32 %v473_v61, %v452_v6 }
 0x137   :  { %227 = vrot.lane.b32.xlu0 %v9561_v58, %s9019_s26 }
 0x138   :  { %v523_v29 = vpop.permute.xlu1 %522 }
 0x139   :  { %v289_v26 = vpop.permute.xlu0 %288  ;;  %v549_v16 = vadd.f32 %v523_v29, %v501_v8 }
 0x13a   :  { %310 = vrot.lane.b32.xlu1 %v264_v10, %s9020_s4  ;;  %v316_v32 = vadd.f32 %v289_v26, %v235_v23  ;;  %v380_v10 = vld [vmem:[#allocation7 + $0x60] sm:$0xff] }
 0x13b   :  { %492 = vrot.lane.b32.xlu0 %v9641_v22, %s9020_s4  ;;  %v581_v9 = vmul.f32 %v565_v21, %v549_v16  ;;  %v383_v21 = vld [vmem:[#allocation7 + $0xa8] sm:$0xff] }
 0x13c   :  { %v339_v51 = vpop.permute.xlu1 %338 }
 0x13d   :  { %v521_v37 = vpop.permute.xlu0 %520  ;;  %v365_v20 = vadd.f32 %v339_v51, %v317_v17 }
 0x13e   :  { %v548_v27 = vadd.f32 %v521_v37, %v500_v12  ;;  %542 = vrot.lane.b32.xlu1 %v9634_v41, %s9021_s23 }
 0x13f   :  { %308 = vrot.lane.b32.xlu0 %v9661_v24, %s9020_s4  ;;  %v397_v24 = vmul.f32 %v381_v50, %v365_v20 }
 0x140   :  { %v580_v5 = vmul.f32 %v564_v13, %v548_v27  ;;  %v431_v28 = vpop.permute.xlu1 %430  ;;  %v382_v13 = vld [vmem:[#allocation7 + $0x90] sm:$0xff] }
 0x141   :  { %v337_v2 = vpop.permute.xlu0 %336  ;;  %v455_v44 = vadd.f32 %v431_v28, %v9442_v15 }
 0x142   :  { %v364_v14 = vadd.f32 %v337_v2, %v316_v32  ;;  %v594_v35 = vpack.c.bf16 %v581_v9, %v580_v5  ;;  %358 = vrot.lane.b32.xlu1 %v9641_v22, %s9021_s23  ;;  %v8818_v2 = vld [vmem:[%s14675_s0 + $0x48] sm:$0xff] }
 0x143   :  { %540 = vrot.lane.b32.xlu0 %v9742_v54, %s9021_s23 }
 0x144   :  { %v396_v40 = vmul.f32 %v380_v10, %v364_v14  ;;  %887 = vmatprep.mubr.bf16.mxu0 %v594_v35  ;;  %v214_v42 = vpop.permute.xlu1 %213  ;;  %v8819_v35 = vld [vmem:[%s14675_s0 + $0x40] sm:$0xff] }
 0x145   :  { %v429_v41 = vpop.permute.xlu0 %428  ;;  %v238_v59 = vadd.f32 %v214_v42, %v9454_v18 }
 0x146   :  { %v410_v0 = vpack.c.bf16 %v397_v24, %v396_v40  ;;  %v454_v22 = vadd.f32 %v8817_v33, %v429_v41 }
 0x147   :  { %356 = vrot.lane.b32.xlu0 %v9674_v43, %s9021_s23 }
 0x148   :  { %888 = vmatmul.mubr.bf16.gmra.mrb[8].mxu0 %v410_v0  ;;  %v479_v19 = vpop.permute.xlu1 %478 }
 0x149   :  { %v212_v47 = vpop.permute.xlu0 %211  ;;  %v503_v53 = vadd.f32 %v479_v19, %v455_v44  ;;  %v569_v19 = vld [vmem:[#allocation7 + $0xe0] sm:$0xff] }
 0x14a   :  { %v237_v30 = vadd.f32 %v212_v47, %v9470_v25 }
 0x14c   :  { %v295_v7 = vpop.permute.xlu1 %294 }
 0x14d   :  { %v477_v36 = vpop.permute.xlu0 %476  ;;  %v319_v6 = vadd.f32 %v295_v7, %v238_v59 }
 0x14e   :  { %v502_v61 = vadd.f32 %v477_v36, %v454_v22  ;;  %v568_v36 = vld [vmem:[#allocation7 + $0xc8] sm:$0xff] }
 0x150   :  { %v527_v57 = vpop.permute.xlu1 %526 }
 0x151   :  { %v293_v48 = vpop.permute.xlu0 %292  ;;  %v551_v62 = vadd.f32 %v527_v57, %v503_v53 }
 0x152   :  { %v318_v29 = vadd.f32 %v293_v48, %v237_v30 }
 0x153   :  { %v583_v11 = vmul.f32 %v567_v63, %v551_v62  ;;  %v385_v62 = vld [vmem:[#allocation7 + $0xd8] sm:$0xff]  ;;  %v384_v63 = vld [vmem:[#allocation7 + $0xc0] sm:$0xff] }
 0x154   :  { %v343_v15 = vpop.permute.xlu1 %342 }
 0x155   :  { %v525_v26 = vpop.permute.xlu0 %524  ;;  %v367_v16 = vadd.f32 %v343_v15, %v319_v6 }
 0x156   :  { %v550_v8 = vadd.f32 %v525_v26, %v502_v61 }
 0x157   :  { %v399_v27 = vmul.f32 %v383_v21, %v367_v16 }
 0x158   :  { %v582_v12 = vmul.f32 %v566_v1, %v550_v8  ;;  %v435_v17 = vpop.permute.xlu1 %434 }
 0x159   :  { %v341_v37 = vpop.permute.xlu0 %340  ;;  %v457_v14 = vadd.f32 %v8818_v2, %v435_v17 }
 0x15a   :  { %v366_v23 = vadd.f32 %v341_v37, %v318_v29  ;;  %v595_v18 = vpack.c.bf16 %v583_v11, %v582_v12 }
 0x15c   :  { %v398_v51 = vmul.f32 %v382_v13, %v366_v23  ;;  %895 = vmatprep.mubr.bf16.mxu0 %v595_v18  ;;  %v218_v9 = vpop.permute.xlu1 %217 }
 0x15d   :  { %v433_v32 = vpop.permute.xlu0 %432  ;;  %v240_v42 = vadd.f32 %v218_v9, %v9501_v39  ;;  %v571_v9 = vld [vmem:[#allocation7 + $0x110] sm:$0xff] }
 0x15e   :  { %v411_v5 = vpack.c.bf16 %v399_v27, %v398_v51  ;;  %v456_v24 = vadd.f32 %v8819_v35, %v433_v32 }
 0x160   :  { %896 = vmatmul.mubr.bf16.gmra.mrb[12].mxu0 %v411_v5  ;;  %v483_v20 = vpop.permute.xlu1 %482  ;;  %v570_v5 = vld [vmem:[#allocation7 + $0xf8] sm:$0xff] }
 0x161   :  { %v216_v25 = vpop.permute.xlu0 %215  ;;  %v505_v40 = vadd.f32 %v483_v20, %v457_v14 }
 0x162   :  { %v239_v44 = vadd.f32 %v216_v25, %v9514_v46 }
 0x164   :  { %v299_v10 = vpop.permute.xlu1 %298 }
 0x165   :  { %v481_v50 = vpop.permute.xlu0 %480  ;;  %v321_v48 = vadd.f32 %v299_v10, %v240_v42 }
 0x166   :  { %v504_v0 = vadd.f32 %v481_v50, %v456_v24 }
 0x168   :  { %v531_v41 = vpop.permute.xlu1 %530 }
 0x169   :  { %v297_v28 = vpop.permute.xlu0 %296  ;;  %v553_v47 = vadd.f32 %v531_v41, %v505_v40  ;;  %v386_v40 = vld [vmem:[#allocation7 + $0xf0] sm:$0xff] }
 0x16a   :  { %v320_v53 = vadd.f32 %v297_v28, %v239_v44 }
 0x16b   :  { %v585_v57 = vmul.f32 %v569_v19, %v553_v47 }
 0x16c   :  { %v347_v22 = vpop.permute.xlu1 %346 }
 0x16d   :  { %v529_v7 = vpop.permute.xlu0 %528  ;;  %v369_v61 = vadd.f32 %v347_v22, %v321_v48 }
 0x16e   :  { %v552_v33 = vadd.f32 %v529_v7, %v504_v0 }
 0x16f   :  { %v401_v6 = vmul.f32 %v385_v62, %v369_v61 }
 0x170   :  { %v584_v59 = vmul.f32 %v568_v36, %v552_v33  ;;  %v439_v30 = vpop.permute.xlu1 %438 }
 0x171   :  { %v345_v1 = vpop.permute.xlu0 %344  ;;  %v459_v13 = vadd.f32 %v439_v30, %v9536_v52 }
 0x172   :  { %v368_v26 = vadd.f32 %v345_v1, %v320_v53  ;;  %v596_v39 = vpack.c.bf16 %v585_v57, %v584_v59 }
 0x174   :  { %v400_v8 = vmul.f32 %v384_v63, %v368_v26  ;;  %903 = vmatprep.mubr.bf16.mxu0 %v596_v39  ;;  %v222_v29 = vpop.permute.xlu1 %221 }
 0x175   :  { %v437_v15 = vpop.permute.xlu0 %436  ;;  %v242_v27 = vadd.f32 %v222_v29, %v9555_v56 }
 0x176   :  { %v412_v11 = vpack.c.bf16 %v401_v6, %v400_v8  ;;  %v458_v23 = vadd.f32 %v437_v15, %v9506_v45  ;;  %v387_v45 = vld [vmem:[#allocation7 + $0x108] sm:$0xff]  ;;  %v573_v8 = vld [vmem:[#allocation7 + $0x140] sm:$0xff] }
 0x177   :  { %v572_v15 = vld [vmem:[#allocation7 + $0x128] sm:$0xff] }
 0x178   :  { %904 = vmatmul.mubr.bf16.gmra.mrb[16].mxu0 %v412_v11  ;;  %v487_v12 = vpop.permute.xlu1 %486 }
 0x179   :  { %v220_v46 = vpop.permute.xlu0 %219  ;;  %v507_v17 = vadd.f32 %v487_v12, %v459_v13 }
 0x17a   :  { %v241_v20 = vadd.f32 %v220_v46, %v9569_v60 }
 0x17c   :  { %v303_v21 = vpop.permute.xlu1 %302 }
 0x17d   :  { %v485_v16 = vpop.permute.xlu0 %484  ;;  %v323_v50 = vadd.f32 %v303_v21, %v242_v27  ;;  %v9768_v24 = vpop.f32.mrb[0].mxu1 }
 0x17e   :  { %v506_v51 = vadd.f32 %v485_v16, %v458_v23  ;;  %v9770_v56 = vpop.f32.mrb[1].mxu1 }
 0x17f   :  { %v9772_v19 = vpop.f32.mrb[2].mxu1 }
 0x180   :  { %v535_v18 = vpop.permute.xlu1 %534  ;;  %v9774_v60 = vpop.f32.mrb[3].mxu1 }
 0x181   :  { %v301_v37 = vpop.permute.xlu0 %300  ;;  %v555_v32 = vadd.f32 %v535_v18, %v507_v17  ;;  %v389_v17 = vld [vmem:[#allocation7 + $0x138] sm:$0xff] }
 0x182   :  { %v322_v14 = vadd.f32 %v301_v37, %v241_v20 }
 0x183   :  { %v587_v28 = vmul.f32 %v571_v9, %v555_v32 }
 0x184   :  { %v351_v2 = vpop.permute.xlu1 %350 }
 0x185   :  { %v533_v25 = vpop.permute.xlu0 %532  ;;  %v371_v35 = vadd.f32 %v351_v2, %v323_v50 }
 0x186   :  { %v554_v10 = vadd.f32 %v533_v25, %v506_v51 }
 0x187   :  { %v403_v36 = vmul.f32 %v387_v45, %v371_v35 }
 0x188   :  { %v586_v52 = vmul.f32 %v570_v5, %v554_v10  ;;  %v443_v0 = vpop.permute.xlu1 %442 }
 0x189   :  { %v349_v41 = vpop.permute.xlu0 %348  ;;  %v461_v61 = vadd.f32 %v443_v0, %v9561_v58 }
 0x18a   :  { %v370_v42 = vadd.f32 %v349_v41, %v322_v14  ;;  %v597_v47 = vpack.c.bf16 %v587_v28, %v586_v52 }
 0x18c   :  { %v402_v7 = vmul.f32 %v386_v40, %v370_v42  ;;  %911 = vmatprep.mubr.bf16.mxu0 %v597_v47  ;;  %v226_v48 = vpop.permute.xlu1 %225 }
 0x18d   :  { %v441_v44 = vpop.permute.xlu0 %440  ;;  %v244_v30 = vadd.f32 %v226_v48, %v9616_v34  ;;  %v388_v34 = vld [vmem:[#allocation7 + $0x120] sm:$0xff] }
 0x18e   :  { %v413_v33 = vpack.c.bf16 %v403_v36, %v402_v7  ;;  %v460_v63 = vadd.f32 %v441_v44, %v9547_v55  ;;  %v575_v7 = vld [vmem:[#allocation7 + $0x170] sm:$0xff]  ;;  %v574_v44 = vld [vmem:[#allocation7 + $0x158] sm:$0xff] }
 0x190   :  { %912 = vmatmul.mubr.bf16.gmra.mrb[20].mxu0 %v413_v33  ;;  %v491_v53 = vpop.permute.xlu1 %490 }
 0x191   :  { %v224_v22 = vpop.permute.xlu0 %223  ;;  %v509_v1 = vadd.f32 %v491_v53, %v461_v61 }
 0x192   :  { %v243_v11 = vadd.f32 %v224_v22, %v9629_v38 }
 0x194   :  { %v307_v59 = vpop.permute.xlu1 %306 }
 0x195   :  { %v489_v57 = vpop.permute.xlu0 %488  ;;  %v325_v46 = vadd.f32 %v307_v59, %v244_v30 }
 0x196   :  { %v508_v39 = vadd.f32 %v489_v57, %v460_v63  ;;  %v391_v63 = vld [vmem:[#allocation7 + $0x168] sm:$0xff] }
 0x198   :  { %v539_v26 = vpop.permute.xlu1 %538 }
 0x199   :  { %v305_v62 = vpop.permute.xlu0 %304  ;;  %v557_v6 = vadd.f32 %v539_v26, %v509_v1  ;;  %v9780_v21 = vpop.f32.mrb[4].mxu1 }
 0x19a   :  { %v324_v58 = vadd.f32 %v305_v62, %v243_v11  ;;  %v9782_v23 = vpop.f32.mrb[5].mxu1 }
 0x19b   :  { %v589_v13 = vmul.f32 %v573_v8, %v557_v6  ;;  %v9784_v27 = vpop.f32.mrb[6].mxu1 }
 0x19c   :  { %v355_v16 = vpop.permute.xlu1 %354  ;;  %v9786_v38 = vpop.f32.mrb[7].mxu1 }
 0x19d   :  { %v537_v29 = vpop.permute.xlu0 %536  ;;  %v373_v55 = vadd.f32 %v355_v16, %v325_v46 }
 0x19e   :  { %v556_v12 = vadd.f32 %v537_v29, %v508_v39 }
 0x19f   :  { %v405_v5 = vmul.f32 %v389_v17, %v373_v55 }
 0x1a0   :  { %v588_v37 = vmul.f32 %v572_v15, %v556_v12  ;;  %v447_v32 = vpop.permute.xlu1 %446  ;;  %v9800_v12 = vld [vmem:[#allocation10] ss:$0 sm:$0xff] }
 0x1a1   :  { %v353_v18 = vpop.permute.xlu0 %352  ;;  %v463_v35 = vadd.f32 %v9742_v54, %v447_v32 }
 0x1a2   :  { %v372_v51 = vadd.f32 %v353_v18, %v324_v58  ;;  %v598_v9 = vpack.c.bf16 %v589_v13, %v588_v37 }
 0x1a4   :  { %v404_v25 = vmul.f32 %v388_v34, %v372_v51  ;;  %919 = vmatprep.mubr.bf16.mxu0 %v598_v9  ;;  %v230_v50 = vpop.permute.xlu1 %229 }
 0x1a5   :  { %v445_v20 = vpop.permute.xlu0 %444  ;;  %v246_v0 = vadd.f32 %v230_v50, %v9674_v43 }
 0x1a6   :  { %v414_v10 = vpack.c.bf16 %v405_v5, %v404_v25  ;;  %v462_v40 = vadd.f32 %v445_v20, %v9606_v31  ;;  %v390_v31 = vld [vmem:[#allocation7 + $0x150] sm:$0xff] }
 0x1a8   :  { %920 = vmatmul.mubr.bf16.gmra.mrb[24].mxu0 %v414_v10  ;;  %v495_v14 = vpop.permute.xlu1 %494 }
 0x1a9   :  { %v228_v2 = vpop.permute.xlu0 %227  ;;  %v511_v41 = vadd.f32 %v495_v14, %v463_v35 }
 0x1aa   :  { %v245_v33 = vadd.f32 %v228_v2, %v9687_v49 }
 0x1ac   :  { %v311_v52 = vpop.permute.xlu1 %310 }
 0x1ad   :  { %v493_v28 = vpop.permute.xlu0 %492  ;;  %v327_v22 = vadd.f32 %v311_v52, %v246_v0 }
 0x1ae   :  { %v510_v47 = vadd.f32 %v493_v28, %v462_v40 }
 0x1b0   :  { %v543_v42 = vpop.permute.xlu1 %542 }
 0x1b1   :  { %v309_v45 = vpop.permute.xlu0 %308  ;;  %v559_v36 = vadd.f32 %v543_v42, %v511_v41 }
 0x1b2   :  { %v326_v59 = vadd.f32 %v309_v45, %v245_v33 }
 0x1b3   :  { %v591_v61 = vmul.f32 %v575_v7, %v559_v36 }
 0x1b4   :  { %v359_v57 = vpop.permute.xlu1 %358 }
 0x1b5   :  { %v541_v48 = vpop.permute.xlu0 %540  ;;  %v375_v62 = vadd.f32 %v359_v57, %v327_v22 }
 0x1b6   :  { %v558_v53 = vadd.f32 %v541_v48, %v510_v47 }
 0x1b7   :  { %v407_v43 = vmul.f32 %v391_v63, %v375_v62 }
 0x1b8   :  { %v590_v54 = vmul.f32 %v574_v44, %v558_v53 }
 0x1b9   :  { %v357_v1 = vpop.permute.xlu0 %356 }
 0x1ba   :  { %v374_v26 = vadd.f32 %v357_v1, %v326_v59  ;;  %v599_v30 = vpack.c.bf16 %v591_v61, %v590_v54 }
 0x1bc   :  { %v406_v39 = vmul.f32 %v390_v31, %v374_v26  ;;  %927 = vmatprep.mubr.bf16.mxu0 %v599_v30 }
 0x1be   :  { %v415_v6 = vpack.c.bf16 %v407_v43, %v406_v39 }
 0x1bf   :  { %v9792_v8 = vpop.f32.mrb[8].mxu1 }
 0x1c0   :  { %928 = vmatmul.mubr.bf16.gmra.mrb[28].mxu0 %v415_v6  ;;  %v9794_v49 = vpop.f32.mrb[9].mxu1 }
 0x1c1   :  { %v9796_v15 = vpop.f32.mrb[10].mxu1 }
 0x1c2   :  { %v9798_v29 = vpop.f32.mrb[11].mxu1 }
 0x1eb   :  { %v7924_v11 = vpop.f32.mrb[0].mxu0 }
 0x1ec   :  { %v7925_v46 = vpop.f32.mrb[1].mxu0 }
 0x1ed   :  { %v7926_v16 = vadd.f32 %v7925_v46, %v7924_v11  ;;  %v7927_v58 = vpop.f32.mrb[2].mxu0 }
 0x1ee   :  { %v7928_v13 = vpop.f32.mrb[3].mxu0 }
 0x1ef   :  { %v7929_v37 = vadd.f32 %v7928_v13, %v7927_v58  ;;  %v874_v55 = vadd.f32 %v7926_v16, %v9800_v12  ;;  %v9816_v50 = vpop.f32.mrb[12].mxu1  ;;  %v8646_v16 = vld [vmem:[%s14677_s2 + $0x140] sm:$0xff]  }
 0x1f0   :  { %8442 = vmatprep.subr.bf16.mxu0 %v8646_v16 }
 0x1f1   :  { %v971_v17 = vadd.f32 %v9770_v56, %v874_v55  ;;  %v877_v34 = vadd.f32 %v7929_v37, %v9800_v12  ;;  %v9818_v56 = vpop.f32.mrb[13].mxu1  ;;  %8443 = vmatpush3.bf16.msra.mxu0 %v8646_v16  ;;  %v8648_v37 = vld [vmem:[%s14677_s2 + $0x150] sm:$0xff]  }
 0x1f2   :  { %v9820_v10 = vpop.f32.mrb[14].mxu1 }
 0x1f3   :  { %v9805_v18 = vmax.f32 %v971_v17, 0.0  ;;  %v974_v51 = vadd.f32 %v9774_v60, %v877_v34  ;;  %v9822_v60 = vpop.f32.mrb[15].mxu1 }
 0x1f5   :  { %v9808_v32 = vmax.f32 %v974_v51, 0.0  ;;  %v1070_v9 = vmul.f32 %v9805_v18, %v9805_v18 }
 0x1f7   :  { %v1049_v5 = vadd.f32 %v9808_v32, %v9805_v18  ;;  %v1071_v25 = vmul.f32 %v9808_v32, %v9808_v32 }
 0x1f9   :  { %v1086_v20 = vadd.f32 %v1071_v25, %v1070_v9 }
 0x203   :  { %v7930_v2 = vpop.f32.mrb[4].mxu0 }
 0x204   :  { %v7931_v14 = vpop.f32.mrb[5].mxu0 }
 0x205   :  { %v7932_v28 = vadd.f32 %v7931_v14, %v7930_v2  ;;  %v7933_v52 = vpop.f32.mrb[6].mxu0 }
 0x206   :  { %v7934_v35 = vpop.f32.mrb[7].mxu0 }
 0x207   :  { %v882_v45 = vadd.f32 %v7932_v28, %v9800_v12  ;;  %v7935_v40 = vadd.f32 %v7934_v35, %v7933_v52  ;;  %v8650_v28 = vld [vmem:[%s14677_s2 + $0x160] sm:$0xff]  }
 0x209   :  { %v979_v41 = vadd.f32 %v9768_v24, %v882_v45  ;;  %v885_v42 = vadd.f32 %v7935_v40, %v9800_v12 }
 0x20b   :  { %v9827_v0 = vmax.f32 %v979_v41, 0.0  ;;  %v982_v47 = vadd.f32 %v9772_v19, %v885_v42 }
 0x20d   :  { %v1072_v36 = vmul.f32 %v9827_v0, %v9827_v0  ;;  %v9832_v7 = vmax.f32 %v982_v47, 0.0  ;;  %v1050_v44 = vadd.f32 %v1049_v5, %v9827_v0  ;;  %v8649_v5 = vld [vmem:[%s14677_s2 + $0x158] sm:$0xff]   ;;  %v8652_v47 = vld [vmem:[%s14677_s2 + $0x170] sm:$0xff]  }
 0x20f   :  { %v1073_v48 = vmul.f32 %v9832_v7, %v9832_v7  ;;  %v1051_v33 = vadd.f32 %v1050_v44, %v9832_v7  ;;  %v1087_v22 = vadd.f32 %v1086_v20, %v1072_v36  ;;  %v8653_v36 = vld [vmem:[%s14677_s2 + $0x178] sm:$0xff]  }
 0x211   :  { %v1088_v24 = vadd.f32 %v1087_v22, %v1073_v48 }
 0x21b   :  { %v7936_v53 = vpop.f32.mrb[8].mxu0 }
 0x21c   :  { %v7937_v57 = vpop.f32.mrb[9].mxu0 }
 0x21d   :  { %v7938_v59 = vadd.f32 %v7937_v57, %v7936_v53  ;;  %v7939_v61 = vpop.f32.mrb[10].mxu0 }
 0x21e   :  { %v7940_v54 = vpop.f32.mrb[11].mxu0 }
 0x21f   :  { %v7941_v19 = vadd.f32 %v7940_v54, %v7939_v61  ;;  %v890_v62 = vadd.f32 %v7938_v59, %v9800_v12 }
 0x221   :  { %v987_v63 = vadd.f32 %v9782_v23, %v890_v62  ;;  %v893_v31 = vadd.f32 %v7941_v19, %v9800_v12 }
 0x223   :  { %v9841_v1 = vmax.f32 %v987_v63, 0.0  ;;  %v990_v26 = vadd.f32 %v9786_v38, %v893_v31  ;;  %v8647_v38 = vld [vmem:[%s14677_s2 + $0x148] sm:$0xff]  }
 0x224   :  { %8444 = vmatprep.subr.bf16.mxu0 %v8647_v38 }
 0x225   :  { %v1052_v30 = vadd.f32 %v1051_v33, %v9841_v1  ;;  %v1074_v43 = vmul.f32 %v9841_v1, %v9841_v1  ;;  %v9847_v39 = vmax.f32 %v990_v26, 0.0  ;;  %8445 = vmatpush3.bf16.msra.mxu0 %v8647_v38 }
 0x226   :  { %8446 = vmatprep.subr.bf16.mxu0 %v8648_v37 }
 0x227   :  { %v1089_v6 = vadd.f32 %v1088_v24, %v1074_v43  ;;  %v1053_v11 = vadd.f32 %v1052_v30, %v9847_v39  ;;  %v1075_v46 = vmul.f32 %v9847_v39, %v9847_v39 }
 0x229   :  { %v1090_v23 = vadd.f32 %v1089_v6, %v1075_v46  ;;  %8447 = vmatpush3.bf16.msra.mxu0 %v8648_v37 }
 0x22a   :  { %8448 = vmatprep.subr.bf16.mxu0 %v8649_v5 }
 0x22d   :  { %8449 = vmatpush3.bf16.msra.mxu0 %v8649_v5 }
 0x22e   :  { %8450 = vmatprep.subr.bf16.mxu0 %v8650_v28 }
 0x231   :  { %8451 = vmatpush3.bf16.msra.mxu0 %v8650_v28 }
 0x233   :  { %v7942_v58 = vpop.f32.mrb[12].mxu0 }
 0x234   :  { %v7943_v13 = vpop.f32.mrb[13].mxu0 }
 0x235   :  { %v7944_v55 = vadd.f32 %v7943_v13, %v7942_v58  ;;  %v7945_v17 = vpop.f32.mrb[14].mxu0 }
 0x236   :  { %v7946_v34 = vpop.f32.mrb[15].mxu0 }
 0x237   :  { %v898_v51 = vadd.f32 %v7944_v55, %v9800_v12  ;;  %v7947_v9 = vadd.f32 %v7946_v34, %v7945_v17 }
 0x239   :  { %v995_v25 = vadd.f32 %v9780_v21, %v898_v51  ;;  %v901_v20 = vadd.f32 %v7947_v9, %v9800_v12 }
 0x23b   :  { %v9867_v2 = vmax.f32 %v995_v25, 0.0  ;;  %v998_v14 = vadd.f32 %v9784_v27, %v901_v20  ;;  %v8651_v27 = vld [vmem:[%s14677_s2 + $0x168] sm:$0xff]  }
 0x23c   :  { %8452 = vmatprep.subr.bf16.mxu0 %v8651_v27 }
 0x23d   :  { %v1076_v52 = vmul.f32 %v9867_v2, %v9867_v2  ;;  %v9875_v35 = vmax.f32 %v998_v14, 0.0  ;;  %v1054_v45 = vadd.f32 %v1053_v11, %v9867_v2  ;;  %8453 = vmatpush3.bf16.msra.mxu0 %v8651_v27 }
 0x23e   :  { %8454 = vmatprep.subr.bf16.mxu0 %v8652_v47 }
 0x23f   :  { %v1077_v21 = vmul.f32 %v9875_v35, %v9875_v35  ;;  %v1055_v40 = vadd.f32 %v1054_v45, %v9875_v35  ;;  %v1091_v41 = vadd.f32 %v1090_v23, %v1076_v52 }
 0x241   :  { %v1092_v42 = vadd.f32 %v1091_v41, %v1077_v21  ;;  %8455 = vmatpush3.bf16.msra.mxu0 %v8652_v47 }
 0x242   :  { %8456 = vmatprep.subr.bf16.mxu0 %v8653_v36 }
 0x245   :  { %8457 = vmatpush3.bf16.msra.mxu0 %v8653_v36 }
 0x24b   :  { %v7948_v44 = vpop.f32.mrb[16].mxu0 }
 0x24c   :  { %v7949_v48 = vpop.f32.mrb[17].mxu0 }
 0x24d   :  { %v7950_v33 = vadd.f32 %v7949_v48, %v7948_v44  ;;  %v7951_v22 = vpop.f32.mrb[18].mxu0 }
 0x24e   :  { %v7952_v24 = vpop.f32.mrb[19].mxu0 }
 0x24f   :  { %v7953_v53 = vadd.f32 %v7952_v24, %v7951_v22  ;;  %v906_v57 = vadd.f32 %v7950_v33, %v9800_v12 }
 0x251   :  { %v1003_v59 = vadd.f32 %v9794_v49, %v906_v57  ;;  %v909_v61 = vadd.f32 %v7953_v53, %v9800_v12 }
 0x253   :  { %v9893_v54 = vmax.f32 %v1003_v59, 0.0  ;;  %v1006_v19 = vadd.f32 %v9798_v29, %v909_v61 }
 0x255   :  { %v1056_v62 = vadd.f32 %v1055_v40, %v9893_v54  ;;  %v1078_v63 = vmul.f32 %v9893_v54, %v9893_v54  ;;  %v9899_v31 = vmax.f32 %v1006_v19, 0.0 }
 0x257   :  { %v1093_v26 = vadd.f32 %v1092_v42, %v1078_v63  ;;  %v1057_v30 = vadd.f32 %v1056_v62, %v9899_v31  ;;  %v1079_v43 = vmul.f32 %v9899_v31, %v9899_v31 }
 0x259   :  { %v1094_v49 = vadd.f32 %v1093_v26, %v1079_v43 }
 0x263   :  { %v7954_v6 = vpop.f32.mrb[20].mxu0 }
 0x264   :  { %v7955_v11 = vpop.f32.mrb[21].mxu0 }
 0x265   :  { %v7956_v46 = vadd.f32 %v7955_v11, %v7954_v6  ;;  %v7957_v23 = vpop.f32.mrb[22].mxu0 }
 0x266   :  { %v7958_v16 = vpop.f32.mrb[23].mxu0 }
 0x267   :  { %v914_v29 = vadd.f32 %v7956_v46, %v9800_v12  ;;  %v7959_v38 = vadd.f32 %v7958_v16, %v7957_v23 }
 0x269   :  { %v1011_v58 = vadd.f32 %v9792_v8, %v914_v29  ;;  %v917_v13 = vadd.f32 %v7959_v38, %v9800_v12 }
 0x26b   :  { %v9907_v37 = vmax.f32 %v1011_v58, 0.0  ;;  %v1014_v55 = vadd.f32 %v9796_v15, %v917_v13 }
 0x26d   :  { %v1080_v17 = vmul.f32 %v9907_v37, %v9907_v37  ;;  %v9912_v34 = vmax.f32 %v1014_v55, 0.0  ;;  %v1058_v51 = vadd.f32 %v1057_v30, %v9907_v37 }
 0x26f   :  { %v1081_v9 = vmul.f32 %v9912_v34, %v9912_v34  ;;  %v1059_v5 = vadd.f32 %v1058_v51, %v9912_v34  ;;  %v1095_v25 = vadd.f32 %v1094_v49, %v1080_v17 }
 0x271   :  { %v1096_v8 = vadd.f32 %v1095_v25, %v1081_v9 }
 0x27b   :  { %v7960_v20 = vpop.f32.mrb[24].mxu0 }
 0x27c   :  { %v7961_v14 = vpop.f32.mrb[25].mxu0 }
 0x27d   :  { %v7962_v28 = vadd.f32 %v7961_v14, %v7960_v20  ;;  %v7963_v52 = vpop.f32.mrb[26].mxu0 }
 0x27e   :  { %v7964_v45 = vpop.f32.mrb[27].mxu0 }
 0x27f   :  { %v7965_v15 = vadd.f32 %v7964_v45, %v7963_v52  ;;  %v922_v21 = vadd.f32 %v7962_v28, %v9800_v12 }
 0x281   :  { %v1019_v40 = vadd.f32 %v9818_v56, %v922_v21  ;;  %v925_v41 = vadd.f32 %v7965_v15, %v9800_v12 }
 0x283   :  { %v9921_v27 = vmax.f32 %v1019_v40, 0.0  ;;  %v1022_v42 = vadd.f32 %v9822_v60, %v925_v41 }
 0x285   :  { %v1060_v47 = vadd.f32 %v1059_v5, %v9921_v27  ;;  %v1082_v36 = vmul.f32 %v9921_v27, %v9921_v27  ;;  %v9927_v44 = vmax.f32 %v1022_v42, 0.0 }
 0x287   :  { %v1097_v48 = vadd.f32 %v1096_v8, %v1082_v36  ;;  %v1061_v33 = vadd.f32 %v1060_v47, %v9927_v44  ;;  %v1083_v22 = vmul.f32 %v9927_v44, %v9927_v44 }
 0x289   :  { %v1098_v56 = vadd.f32 %v1097_v48, %v1083_v22 }
 0x293   :  { %v7966_v24 = vpop.f32.mrb[28].mxu0 }
 0x294   :  { %v7967_v53 = vpop.f32.mrb[29].mxu0 }
 0x295   :  { %v7968_v57 = vadd.f32 %v7967_v53, %v7966_v24  ;;  %v7969_v59 = vpop.f32.mrb[30].mxu0 }
 0x296   :  { %v7970_v61 = vpop.f32.mrb[31].mxu0 }
 0x297   :  { %v930_v60 = vadd.f32 %v7968_v57, %v9800_v12  ;;  %v7971_v19 = vadd.f32 %v7970_v61, %v7969_v59 }
 0x299   :  { %v1027_v62 = vadd.f32 %v9816_v50, %v930_v60  ;;  %v933_v63 = vadd.f32 %v7971_v19, %v9800_v12 }
 0x29b   :  { %v9935_v26 = vmax.f32 %v1027_v62, 0.0  ;;  %v1030_v30 = vadd.f32 %v9820_v10, %v933_v63 }
 0x29d   :  { %v1062_v43 = vadd.f32 %v1061_v33, %v9935_v26  ;;  %v1084_v49 = vmul.f32 %v9935_v26, %v9935_v26  ;;  %v1048_v6 = vmax.f32 %v1030_v30, 0.0 }
 0x29f   :  { %v1099_v11 = vadd.f32 %v1098_v56, %v1084_v49  ;;  %v1063_v46 = vadd.f32 %v1062_v43, %v1048_v6  ;;  %v1085_v23 = vmul.f32 %v1048_v6, %v1048_v6  ;;  %v9984_v56 = vld [vmem:[#allocation13] ss:$0 sm:$0xff] }
 0x2a1   :  { %v1064_v16 = vrot.slane %v1063_v46, 4  ;;  %v1100_v29 = vadd.f32 %v1099_v11, %v1085_v23 }
 0x2a3   :  { %v1065_v38 = vadd.f32 %v1064_v16, %v1063_v46  ;;  %v1101_v58 = vrot.slane %v1100_v29, 4 }
 0x2a5   :  { %v1066_v50 = vrot.slane %v1065_v38, 2  ;;  %v1102_v13 = vadd.f32 %v1101_v58, %v1100_v29 }
 0x2a7   :  { %v1067_v12 = vadd.f32 %v1066_v50, %v1065_v38  ;;  %v1103_v55 = vrot.slane %v1102_v13, 2 }
 0x2a9   :  { %v1068_v17 = vrot.slane %v1067_v12, 1  ;;  %v1104_v51 = vadd.f32 %v1103_v55, %v1102_v13 }
 0x2ab   :  { %v1069_v10 = vadd.f32 %v1068_v17, %v1067_v12  ;;  %v1105_v9 = vrot.slane %v1104_v51, 1  ;;  %v1655_v12 = vld [vmem:[#allocation7 + $0x10] sm:$0xff] }
 0x2ad   :  { %v1106_v5 = vadd.f32 %v1105_v9, %v1104_v51  ;;  %v9941_v25 = vmul.f32 0.0078125, %v1069_v10  ;;  %v1656_v10 = vld [vmem:[#allocation7 + $0x28] sm:$0xff] }
 0x2af   :  { %v1108_v8 = vmul.f32 0.0078125, %v1106_v5  ;;  %v1109_v20 = vmul.f32 %v9941_v25, %v9941_v25  ;;  %v1126_v14 = vsub.f32 %v1048_v6, %v9941_v25  ;;  %v1111_v28 = vsub.f32 %v9805_v18, %v9941_v25 }
 0x2b0   :  { %v1112_v52 = vsub.f32 %v9808_v32, %v9941_v25  ;;  %v1113_v45 = vsub.f32 %v9827_v0, %v9941_v25  ;;  %v1114_v15 = vsub.f32 %v9832_v7, %v9941_v25  ;;  %v1115_v21 = vsub.f32 %v9841_v1, %v9941_v25 }
 0x2b1   :  { %v1110_v40 = vsub.f32 %v1108_v8, %v1109_v20  ;;  %v1116_v41 = vsub.f32 %v9847_v39, %v9941_v25  ;;  %v1117_v42 = vsub.f32 %v9867_v2, %v9941_v25  ;;  %v1118_v18 = vsub.f32 %v9875_v35, %v9941_v25  ;;  %v1657_v8 = vld [vmem:[#allocation7 + $0x40] sm:$0xff]  ;;  %v1658_v20 = vld [vmem:[#allocation7 + $0x58] sm:$0xff] }
 0x2b2   :  { %v1119_v32 = vsub.f32 %v9893_v54, %v9941_v25  ;;  %v1120_v0 = vsub.f32 %v9899_v31, %v9941_v25  ;;  %v1121_v7 = vsub.f32 %v9907_v37, %v9941_v25  ;;  %v1122_v1 = vsub.f32 %v9912_v34, %v9941_v25  ;;  %v9978_v31 = vld [vmem:[#allocation12] ss:$0 sm:$0xff] }
 0x2b3   :  { %v1127_v47 = vadd.f32 1e-05, %v1110_v40  ;;  %v1123_v39 = vsub.f32 %v9921_v27, %v9941_v25  ;;  %v1124_v2 = vsub.f32 %v9927_v44, %v9941_v25  ;;  %v1125_v35 = vsub.f32 %v9935_v26, %v9941_v25 }
 0x2b5   :  { %8794 = vrsqrt.f32 %v1127_v47 }
 0x2bf   :  { %v9976_v54 = vpop.eup %8794 }
 0x2c0   :  { %v1144_v36 = vmul.f32 %v9976_v54, %v1126_v14  ;;  %v1129_v48 = vmul.f32 %v9976_v54, %v1111_v28  ;;  %v1130_v33 = vmul.f32 %v9976_v54, %v1112_v52  ;;  %v1131_v22 = vmul.f32 %v9976_v54, %v1113_v45 }
 0x2c1   :  { %v1132_v24 = vmul.f32 %v9976_v54, %v1114_v15  ;;  %v1133_v53 = vmul.f32 %v9976_v54, %v1115_v21  ;;  %v1134_v57 = vmul.f32 %v9976_v54, %v1116_v41  ;;  %v1135_v59 = vmul.f32 %v9976_v54, %v1117_v42 }
 0x2c2   :  { %v1167_v61 = vmul.f32 %v9978_v31, %v1144_v36  ;;  %v1152_v60 = vmul.f32 %v9978_v31, %v1129_v48  ;;  %v1153_v19 = vmul.f32 %v9978_v31, %v1130_v33  ;;  %v1154_v62 = vmul.f32 %v9978_v31, %v1131_v22  ;;  %v1659_v36 = vld [vmem:[#allocation7 + $0x70] sm:$0xff]  ;;  %v1660_v33 = vld [vmem:[#allocation7 + $0x88] sm:$0xff] }
 0x2c3   :  { %v1155_v63 = vmul.f32 %v9978_v31, %v1132_v24  ;;  %v1156_v30 = vmul.f32 %v9978_v31, %v1133_v53  ;;  %v1157_v43 = vmul.f32 %v9978_v31, %v1134_v57  ;;  %v1136_v49 = vmul.f32 %v9976_v54, %v1118_v18 }
 0x2c4   :  { %v9999_v6 = vadd.f32 %v9984_v56, %v1167_v61  ;;  %v10002_v11 = vadd.f32 %v9984_v56, %v1152_v60  ;;  %v10005_v46 = vadd.f32 %v9984_v56, %v1153_v19  ;;  %v10008_v23 = vadd.f32 %v9984_v56, %v1154_v62 }
 0x2c5   :  { %v10011_v16 = vadd.f32 %v9984_v56, %v1155_v63  ;;  %v10014_v29 = vadd.f32 %v9984_v56, %v1156_v30  ;;  %v10017_v38 = vadd.f32 %v9984_v56, %v1157_v43  ;;  %v1158_v58 = vmul.f32 %v9978_v31, %v1135_v59  ;;  %v1661_v63 = vld [vmem:[#allocation7 + $0xa0] sm:$0xff] }
 0x2c6   :  { %14771 = vst [vmem:[#allocation26_spill] sm:$0xff] %v9999_v6  ;;  %14772 = vst [vmem:[#allocation27_spill] sm:$0xff] %v10002_v11  ;;  %1255 = vrot.lane.b32.xlu0 %v9999_v6, %s9019_s26  ;;  %1257 = vrot.lane.b32.xlu1 %v10002_v11, %s9019_s26  ;;  %v1304_v50 = vrot.slane %v10005_v46, 1  ;;  %v1305_v13 = vrot.slane %v10008_v23, 1  ;;  %v1159_v55 = vmul.f32 %v9978_v31, %v1136_v49 }
 0x2c7   :  { %14773 = vst [vmem:[#allocation28_spill] sm:$0xff] %v10005_v46  ;;  %14774 = vst [vmem:[#allocation29_spill] sm:$0xff] %v10008_v23  ;;  %v1137_v17 = vmul.f32 %v9976_v54, %v1119_v32  ;;  %v1306_v51 = vrot.slane %v10011_v16, 1  ;;  %v1307_v9 = vrot.slane %v10014_v29, 1  ;;  %v1308_v5 = vrot.slane %v10017_v38, 1 }
 0x2c8   :  { %14775 = vst [vmem:[#allocation30_spill] sm:$0xff] %v10011_v16  ;;  %14776 = vst [vmem:[#allocation31_spill] sm:$0xff] %v10014_v29  ;;  %v10032_v14 = vadd.f32 %v9984_v56, %v1158_v58  ;;  %v10038_v28 = vsel %vm263_vm0, %v1304_v50, %v1305_v13  ;;  %v10041_v52 = vadd.f32 %v9984_v56, %v1159_v55  ;;  %v1662_v58 = vld [vmem:[#allocation7 + $0xb8] sm:$0xff] }
 0x2c9   :  { %14777 = vst [vmem:[#allocation32_spill] sm:$0xff] %v10017_v38  ;;  %v1138_v45 = vmul.f32 %v9976_v54, %v1120_v0  ;;  %v1160_v15 = vmul.f32 %v9978_v31, %v1137_v17  ;;  %v10047_v21 = vsel %vm263_vm0, %v1305_v13, %v1306_v51  ;;  %v1671_v40 = vmul.f32 %v1655_v12, %v10038_v28 }
 0x2ca   :  { %14778 = vst [vmem:[#allocation33_spill] sm:$0xff] %v10032_v14  ;;  %14779 = vst [vmem:[#allocation34_spill] sm:$0xff] %v10041_v52  ;;  %v10052_v41 = vsel %vm263_vm0, %v1307_v9, %v1308_v5  ;;  %v10056_v42 = vsel %vm263_vm0, %v1306_v51, %v1307_v9  ;;  %1567 = vrot.lane.b32.xlu0 %v10005_v46, %s9021_s23  ;;  %1569 = vrot.lane.b32.xlu1 %v10008_v23, %s9021_s23  ;;  %v1309_v47 = vrot.slane %v10032_v14, 1 }
 0x2cb   :  { %v1672_v18 = vmul.f32 %v1656_v10, %v10047_v21  ;;  %v1673_v32 = vmul.f32 %v1657_v8, %v10056_v42  ;;  %v1674_v0 = vmul.f32 %v1658_v20, %v10052_v41  ;;  %v1310_v48 = vrot.slane %v10041_v52, 1  ;;  %v1663_v20 = vld [vmem:[#allocation7 + $0xd0] sm:$0xff] }
 0x2cc   :  { %v1161_v22 = vmul.f32 %v9978_v31, %v1138_v45  ;;  %v10069_v24 = vadd.f32 %v9984_v56, %v1160_v15  ;;  %v1139_v53 = vmul.f32 %v9976_v54, %v1121_v7  ;;  %v10077_v61 = vsel %vm263_vm0, %v1308_v5, %v1309_v47  ;;  %v1664_v45 = vld [vmem:[#allocation7 + $0xe8] sm:$0xff] }
 0x2cd   :  { %v1687_v57 = vpack.c.bf16 %v1672_v18, %v1671_v40  ;;  %v1688_v59 = vpack.c.bf16 %v1674_v0, %v1673_v32  ;;  %v1140_v60 = vmul.f32 %v9976_v54, %v1122_v1  ;;  %v10085_v19 = vsel %vm263_vm0, %v1309_v47, %v1310_v48 }
 0x2ce   :  { %14780 = vst [vmem:[#allocation35_spill] sm:$0xff] %v10069_v24  ;;  %v1675_v62 = vmul.f32 %v1659_v36, %v10077_v61  ;;  %v10089_v37 = vadd.f32 %v9984_v56, %v1161_v22  ;;  %v1311_v7 = vrot.slane %v10069_v24, 1  ;;  %1259 = vrot.lane.b32.xlu0 %v10005_v46, %s9019_s26  ;;  %v1676_v34 = vmul.f32 %v1660_v33, %v10085_v19  ;;  %v1666_v36 = vld [vmem:[#allocation7 + $0x118] sm:$0xff] }
 0x2cf   :  { %8458 = vmatprep.mubr.bf16.mxu0 %v1687_v57  ;;  %v1162_v1 = vmul.f32 %v9978_v31, %v1139_v53  ;;  %v1163_v30 = vmul.f32 %v9978_v31, %v1140_v60  ;;  %1261 = vrot.lane.b32.xlu1 %v10008_v23, %s9019_s26  ;;  %v1141_v13 = vmul.f32 %v9976_v54, %v1123_v39  ;;  %v1318_v33 = vrot.slane %v9999_v6, 1  ;;  %v1667_v60 = vld [vmem:[#allocation7 + $0x130] sm:$0xff] }
 0x2d0   :  { %14781 = vst [vmem:[#allocation36_spill] sm:$0xff] %v10089_v37  ;;  %8459 = vmatmul.mubr.bf16.vlgmr.msra.gmra.mrb[32].mxu0 %v1688_v59  ;;  %v1312_v43 = vrot.slane %v10089_v37, 1  ;;  %v10102_v49 = vsel %vm263_vm0, %v1310_v48, %v1311_v7  ;;  %v1142_v12 = vmul.f32 %v9976_v54, %v1124_v2  ;;  %v1689_v55 = vpack.c.bf16 %v1676_v34, %v1675_v62 }
 0x2d1   :  { %v1677_v17 = vmul.f32 %v1661_v63, %v10102_v49  ;;  %v10114_v51 = vadd.f32 %v9984_v56, %v1162_v1  ;;  %v10117_v10 = vadd.f32 %v9984_v56, %v1163_v30  ;;  %v1164_v27 = vmul.f32 %v9978_v31, %v1141_v13 }
 0x2d2   :  { %v10121_v9 = vsel %vm263_vm0, %v1311_v7, %v1312_v43  ;;  %v1165_v39 = vmul.f32 %v9978_v31, %v1142_v12  ;;  %v1143_v44 = vmul.f32 %v9976_v54, %v1125_v35  ;;  %8462 = vmatprep.mubr.bf16.mxu0 %v1689_v55  ;;  %1571 = vrot.lane.b32.xlu0 %v10011_v16, %s9021_s23  ;;  %v1303_v1 = vrot.slane %v10002_v11, 1 }
 0x2d3   :  { %14782 = vst [vmem:[#allocation37_spill] sm:$0xff] %v10114_v51  ;;  %14783 = vst [vmem:[#allocation38_spill] sm:$0xff] %v10117_v10  ;;  %v1678_v2 = vmul.f32 %v1662_v58, %v10121_v9  ;;  %v1313_v5 = vrot.slane %v10114_v51, 1  ;;  %v1314_v8 = vrot.slane %v10117_v10, 1  ;;  %1573 = vrot.lane.b32.xlu1 %v10014_v29, %s9021_s23  ;;  %v10137_v15 = vadd.f32 %v9984_v56, %v1164_v27  ;;  %v1670_v27 = vld [vmem:[#allocation7 + $0x178] sm:$0xff] }
 0x2d4   :  { %v10140_v26 = vadd.f32 %v9984_v56, %v1165_v39  ;;  %v1166_v25 = vmul.f32 %v9978_v31, %v1143_v44  ;;  %v1665_v31 = vld [vmem:[#allocation7 + $0x100] sm:$0xff]  ;;  %v10195_v12 = vsel %vm263_vm0, %v1303_v1, %v1304_v50  ;;  %v10199_v55 = vsel %vm263_vm0, %v1318_v33, %v1303_v1  ;;  %v8669_v1 = vld [vmem:[%s14677_s2 + $0xf8] sm:$0xff]  }
 0x2d5   :  { %14784 = vst [vmem:[#allocation39_spill] sm:$0xff] %v10137_v15  ;;  %v1690_v35 = vpack.c.bf16 %v1678_v2, %v1677_v17  ;;  %v10145_v54 = vsel %vm263_vm0, %v1313_v5, %v1314_v8  ;;  %v10149_v40 = vsel %vm263_vm0, %v1312_v43, %v1313_v5  ;;  %v1315_v0 = vrot.slane %v10137_v15, 1  ;;  %v1669_v17 = vld [vmem:[#allocation7 + $0x160] sm:$0xff] }
 0x2d6   :  { %14785 = vst [vmem:[#allocation40_spill] sm:$0xff] %v10140_v26  ;;  %v1679_v18 = vmul.f32 %v1663_v20, %v10149_v40  ;;  %v1680_v32 = vmul.f32 %v1664_v45, %v10145_v54  ;;  %v1316_v47 = vrot.slane %v10140_v26, 1  ;;  %1263 = vrot.lane.b32.xlu0 %v10011_v16, %s9019_s26  ;;  %v10158_v48 = vadd.f32 %v9984_v56, %v1166_v25  ;;  %v1668_v56 = vld [vmem:[#allocation7 + $0x148] sm:$0xff]  ;;  %v8654_v2 = vld [vmem:[%s14677_s2 + $0x100] sm:$0xff]  }
 0x2d7   :  { %1265 = vrot.lane.b32.xlu1 %v10014_v29, %s9019_s26  ;;  %v10169_v57 = vsel %vm263_vm0, %v1314_v8, %v1315_v0  ;;  %v1685_v39 = vmul.f32 %v1669_v17, %v10199_v55  ;;  %v1686_v44 = vmul.f32 %v1670_v27, %v10195_v12  ;;  %v8655_v5 = vld [vmem:[%s14677_s2 + $0xc0] sm:$0xff]   ;;  %7988 = vmatprep.subr.bf16.mxu1 %v8654_v2  ;;  %v8656_v8 = vld [vmem:[%s14677_s2 + $0x108] sm:$0xff]   ;;  %v8658_v45 = vld [vmem:[%s14677_s2 + $0x110] sm:$0xff]   ;;  %v1228_v27 = vrot.slane %v10017_v38, 7 }
 0x2d8   :  { %14786 = vst [vmem:[#allocation41_spill] sm:$0xff] %v10158_v48  ;;  %8463 = vmatmul.mubr.bf16.gmra.mrb[36].mxu0 %v1690_v35  ;;  %v1691_v22 = vpack.c.bf16 %v1680_v32, %v1679_v18  ;;  %v10165_v53 = vsel %vm263_vm0, %v1315_v0, %v1316_v47  ;;  %v1317_v59 = vrot.slane %v10158_v48, 1  ;;  %v1681_v62 = vmul.f32 %v1665_v31, %v10169_v57  ;;  %v8657_v20 = vld [vmem:[%s14677_s2 + $0xc8] sm:$0xff]   ;;  %v8659_v25 = vld [vmem:[%s14677_s2 + $0xd0] sm:$0xff]   ;;  %v8660_v35 = vld [vmem:[%s14677_s2 + $0x118] sm:$0xff]  }
 0x2d9   :  { %v1682_v7 = vmul.f32 %v1666_v36, %v10165_v53  ;;  %v1694_v50 = vpack.c.bf16 %v1686_v44, %v1685_v39  ;;  %7989 = vmatpush3.bf16.msra.mxu1 %v8655_v5  ;;  %v8661_v18 = vld [vmem:[%s14677_s2 + $0xd8] sm:$0xff]   ;;  %v8662_v32 = vld [vmem:[%s14677_s2 + $0x120] sm:$0xff]   ;;  %v8665_v31 = vld [vmem:[%s14677_s2 + $0xe8] sm:$0xff]   ;;  %v1229_v39 = vrot.slane %v10032_v14, 7  ;;  %v1230_v44 = vrot.slane %v10041_v52, 7 }
 0x2da   :  { %8466 = vmatprep.mubr.bf16.mxu0 %v1691_v22  ;;  %1575 = vrot.lane.b32.xlu0 %v10017_v38, %s9021_s23  ;;  %v10178_v63 = vsel %vm263_vm0, %v1317_v59, %v1318_v33  ;;  %v10182_v34 = vsel %vm263_vm0, %v1316_v47, %v1317_v59  ;;  %v8663_v0 = vld [vmem:[%s14677_s2 + $0xe0] sm:$0xff]   ;;  %v8664_v47 = vld [vmem:[%s14677_s2 + $0x128] sm:$0xff]   ;;  %v8666_v36 = vld [vmem:[%s14677_s2 + $0x130] sm:$0xff]   ;;  %v1224_v33 = vrot.slane %v10005_v46, 7  ;;  %v1223_v22 = vrot.slane %v10002_v11, 7 }
 0x2db   :  { %1577 = vrot.lane.b32.xlu1 %v10032_v14, %s9021_s23  ;;  %v1683_v30 = vmul.f32 %v1667_v60, %v10182_v34  ;;  %v1684_v43 = vmul.f32 %v1668_v56, %v10178_v63  ;;  %v1692_v58 = vpack.c.bf16 %v1682_v7, %v1681_v62  ;;  %7990 = vmatprep.subr.bf16.mxu1 %v8656_v8  ;;  %v8667_v59 = vld [vmem:[%s14677_s2 + $0xf0] sm:$0xff]   ;;  %v1225_v60 = vrot.slane %v10008_v23, 7  ;;  %v8668_v7 = vld [vmem:[%s14677_s2 + $0x138] sm:$0xff]  }
 0x2dc   :  { %v10292_v56 = vsel %vm182_vm1, %v1223_v22, %v1224_v33  ;;  %v1236_v3 = vrot.slane %v10140_v26, 7 }
 0x2dd   :  { %v1693_v13 = vpack.c.bf16 %v1684_v43, %v1683_v30  ;;  %7991 = vmatpush3.bf16.msra.mxu1 %v8657_v20  ;;  %v10296_v62 = vsel %vm182_vm1, %v1224_v33, %v1225_v60  ;;  %v14692_v30 = vrot.slane %v9999_v6, 7 }
 0x2de   :  { %1267 = vrot.lane.b32.xlu0 %v10017_v38, %s9019_s26  ;;  %7992 = vmatprep.subr.bf16.mxu1 %v8658_v45 }
 0x2df   :  { %1269 = vrot.lane.b32.xlu1 %v10032_v14, %s9019_s26  ;;  %v10317_v43 = vsel %vm182_vm1, %v14692_v30, %v1223_v22 }
 0x2e0   :  { %8467 = vmatmul.mubr.bf16.gmra.mrb[40].mxu0 %v1692_v58  ;;  %v1226_v58 = vrot.slane %v10011_v16, 7 }
 0x2e1   :  { %8470 = vmatprep.mubr.bf16.mxu0 %v1693_v13  ;;  %7993 = vmatpush3.bf16.msra.mxu1 %v8659_v25  ;;  %v1227_v13 = vrot.slane %v10014_v29, 7 }
 0x2e2   :  { %1579 = vrot.lane.b32.xlu0 %v10041_v52, %s9021_s23  ;;  %7994 = vmatprep.subr.bf16.mxu1 %v8660_v35 }
 0x2e3   :  { %1581 = vrot.lane.b32.xlu1 %v10069_v24, %s9021_s23  ;;  %v10335_v17 = vsel %vm182_vm1, %v1226_v58, %v1227_v13 }
 0x2e5   :  { %7995 = vmatpush3.bf16.msra.mxu1 %v8661_v18 }
 0x2e6   :  { %1271 = vrot.lane.b32.xlu0 %v10041_v52, %s9019_s26  ;;  %7996 = vmatprep.subr.bf16.mxu1 %v8662_v32  ;;  %v1232_v32 = vrot.slane %v10089_v37, 7 }
 0x2e7   :  { %1273 = vrot.lane.b32.xlu1 %v10069_v24, %s9019_s26 }
 0x2e8   :  { %8471 = vmatmul.mubr.bf16.gmra.mrb[44].mxu0 %v1694_v50  ;;  %v1231_v50 = vrot.slane %v10069_v24, 7 }
 0x2e9   :  { %7997 = vmatpush3.bf16.msra.mxu1 %v8663_v0 }
 0x2ea   :  { %1583 = vrot.lane.b32.xlu0 %v10089_v37, %s9021_s23  ;;  %7998 = vmatprep.subr.bf16.mxu1 %v8664_v47  ;;  %v10391_v5 = vsel %vm182_vm1, %v1230_v44, %v1231_v50  ;;  %v10429_v47 = vsel %vm182_vm1, %v1231_v50, %v1232_v32 }
 0x2eb   :  { %1585 = vrot.lane.b32.xlu1 %v10114_v51, %s9021_s23 }
 0x2ed   :  { %7999 = vmatpush3.bf16.msra.mxu1 %v8665_v31 }
 0x2ee   :  { %1275 = vrot.lane.b32.xlu0 %v10089_v37, %s9019_s26  ;;  %8000 = vmatprep.subr.bf16.mxu1 %v8666_v36 }
 0x2ef   :  { %1277 = vrot.lane.b32.xlu1 %v10114_v51, %s9019_s26 }
 0x2f1   :  { %8001 = vmatpush3.bf16.msra.mxu1 %v8667_v59 }
 0x2f2   :  { %1587 = vrot.lane.b32.xlu0 %v10117_v10, %s9021_s23  ;;  %8002 = vmatprep.subr.bf16.mxu1 %v8668_v7 }
 0x2f3   :  { %1589 = vrot.lane.b32.xlu1 %v10137_v15, %s9021_s23 }
 0x2f5   :  { %8003 = vmatpush3.bf16.msra.mxu1 %v8669_v1  ;;  %v1234_v1 = vrot.slane %v10117_v10, 7 }
 0x2f6   :  { %1279 = vrot.lane.b32.xlu0 %v10117_v10, %s9019_s26 }
 0x2f7   :  { %1281 = vrot.lane.b32.xlu1 %v10137_v15, %s9019_s26 }
 0x2fa   :  { %1591 = vrot.lane.b32.xlu0 %v10140_v26, %s9021_s23 }
 0x2fb   :  { %1593 = vrot.lane.b32.xlu1 %v10158_v48, %s9021_s23 }
 0x2fe   :  { %1283 = vrot.lane.b32.xlu0 %v10140_v26, %s9019_s26 }
 0x2ff   :  { %1285 = vrot.lane.b32.xlu1 %v10158_v48, %s9019_s26 }
 0x302   :  { %1595 = vrot.lane.b32.xlu0 %v9999_v6, %s9021_s23 }
 0x303   :  { %1597 = vrot.lane.b32.xlu1 %v10002_v11, %s9021_s23 }
 0x306   :  { %1471 = vrot.lane.b32.xlu0 %v10195_v12, %s9019_s26 }
 0x307   :  { %1473 = vrot.lane.b32.xlu1 %v10038_v28, %s9019_s26 }
 0x30a   :  { %1519 = vrot.lane.b32.xlu0 %v10292_v56, %s9020_s4 }
 0x30b   :  { %1521 = vrot.lane.b32.xlu1 %v10296_v62, %s9020_s4 }
 0x30e   :  { %1335 = vrot.lane.b32.xlu0 %v10199_v55, %s9020_s4 }
 0x30f   :  { %1337 = vrot.lane.b32.xlu1 %v10195_v12, %s9020_s4  ;;  %v10331_v12 = vsel %vm182_vm1, %v1225_v60, %v1226_v58 }
 0x312   :  { %1383 = vrot.lane.b32.xlu0 %v10317_v43, %s9021_s23 }
 0x313   :  { %1385 = vrot.lane.b32.xlu1 %v10292_v56, %s9021_s23 }
 0x316   :  { %1475 = vrot.lane.b32.xlu0 %v10047_v21, %s9019_s26 }
 0x317   :  { %1477 = vrot.lane.b32.xlu1 %v10056_v42, %s9019_s26 }
 0x31a   :  { %1523 = vrot.lane.b32.xlu0 %v10331_v12, %s9020_s4 }
 0x31b   :  { %1525 = vrot.lane.b32.xlu1 %v10335_v17, %s9020_s4 }
 0x31e   :  { %1339 = vrot.lane.b32.xlu0 %v10038_v28, %s9020_s4  ;;  %v10357_v28 = vsel %vm182_vm1, %v1227_v13, %v1228_v27 }
 0x31f   :  { %1341 = vrot.lane.b32.xlu1 %v10047_v21, %s9020_s4  ;;  %v10361_v21 = vsel %vm182_vm1, %v1228_v27, %v1229_v39 }
 0x322   :  { %1387 = vrot.lane.b32.xlu0 %v10296_v62, %s9021_s23 }
 0x323   :  { %1389 = vrot.lane.b32.xlu1 %v10331_v12, %s9021_s23 }
 0x326   :  { %1479 = vrot.lane.b32.xlu0 %v10052_v41, %s9019_s26 }
 0x327   :  { %1481 = vrot.lane.b32.xlu1 %v10077_v61, %s9019_s26 }
 0x32a   :  { %1527 = vrot.lane.b32.xlu0 %v10357_v28, %s9020_s4 }
 0x32b   :  { %1529 = vrot.lane.b32.xlu1 %v10361_v21, %s9020_s4 }
 0x32e   :  { %1343 = vrot.lane.b32.xlu0 %v10056_v42, %s9020_s4 }
 0x32f   :  { %1345 = vrot.lane.b32.xlu1 %v10052_v41, %s9020_s4  ;;  %v10387_v41 = vsel %vm182_vm1, %v1229_v39, %v1230_v44 }
 0x332   :  { %1391 = vrot.lane.b32.xlu0 %v10335_v17, %s9021_s23 }
 0x333   :  { %1393 = vrot.lane.b32.xlu1 %v10357_v28, %s9021_s23 }
 0x336   :  { %1483 = vrot.lane.b32.xlu0 %v10085_v19, %s9019_s26 }
 0x337   :  { %1485 = vrot.lane.b32.xlu1 %v10102_v49, %s9019_s26 }
 0x338   :  { %v10381_v42 = vpop.permute.xlu0 %1255  ;;  %v10383_v2 = vpop.permute.xlu1 %1257 }
 0x33a   :  { %1531 = vrot.lane.b32.xlu0 %v10387_v41, %s9020_s4 }
 0x33b   :  { %1533 = vrot.lane.b32.xlu1 %v10391_v5, %s9020_s4 }
 0x33c   :  { %v10397_v8 = vpop.permute.xlu0 %1567  ;;  %v10399_v20 = vpop.permute.xlu1 %1569 }
 0x33e   :  { %1347 = vrot.lane.b32.xlu0 %v10077_v61, %s9020_s4  ;;  %v1233_v61 = vrot.slane %v10114_v51, 7 }
 0x33f   :  { %1349 = vrot.lane.b32.xlu1 %v10085_v19, %s9020_s4 }
 0x340   :  { %v10405_v45 = vpop.permute.xlu0 %1259  ;;  %v10433_v31 = vsel %vm182_vm1, %v1232_v32, %v1233_v61  ;;  %v10471_v13 = vsel %vm182_vm1, %v1233_v61, %v1234_v1 }
 0x341   :  { %v10407_v25 = vpop.permute.xlu1 %1261  ;;  %14787 = vst [vmem:[#allocation42_spill] sm:$0xff] %v10471_v13 }
 0x342   :  { %1395 = vrot.lane.b32.xlu0 %v10361_v21, %s9021_s23 }
 0x343   :  { %1397 = vrot.lane.b32.xlu1 %v10387_v41, %s9021_s23 }
 0x344   :  { %v10413_v35 = vpop.permute.xlu0 %1571 }
 0x345   :  { %v10415_v18 = vpop.permute.xlu1 %1573 }
 0x346   :  { %1487 = vrot.lane.b32.xlu0 %v10121_v9, %s9019_s26 }
 0x347   :  { %1489 = vrot.lane.b32.xlu1 %v10149_v40, %s9019_s26 }
 0x348   :  { %v10423_v19 = vpop.permute.xlu0 %1263 }
 0x349   :  { %v10425_v0 = vpop.permute.xlu1 %1265 }
 0x34a   :  { %1535 = vrot.lane.b32.xlu0 %v10429_v47, %s9020_s4 }
 0x34b   :  { %1537 = vrot.lane.b32.xlu1 %v10433_v31, %s9020_s4 }
 0x34c   :  { %v10439_v36 = vpop.permute.xlu0 %1575 }
 0x34d   :  { %v10441_v33 = vpop.permute.xlu1 %1577 }
 0x34e   :  { %1351 = vrot.lane.b32.xlu0 %v10102_v49, %s9020_s4  ;;  %v1235_v49 = vrot.slane %v10137_v15, 7 }
 0x34f   :  { %1353 = vrot.lane.b32.xlu1 %v10121_v9, %s9020_s4 }
 0x350   :  { %v10447_v22 = vpop.permute.xlu0 %1267  ;;  %v10475_v27 = vsel %vm182_vm1, %v1234_v1, %v1235_v49 }
 0x351   :  { %v10449_v59 = vpop.permute.xlu1 %1269  ;;  %14788 = vst [vmem:[#allocation43_spill] sm:$0xff] %v10475_v27 }
 0x352   :  { %1399 = vrot.lane.b32.xlu0 %v10391_v5, %s9021_s23 }
 0x353   :  { %1401 = vrot.lane.b32.xlu1 %v10429_v47, %s9021_s23 }
 0x354   :  { %v10455_v60 = vpop.permute.xlu0 %1579 }
 0x355   :  { %v10457_v7 = vpop.permute.xlu1 %1581 }
 0x356   :  { %1491 = vrot.lane.b32.xlu0 %v10145_v54, %s9019_s26 }
 0x357   :  { %1493 = vrot.lane.b32.xlu1 %v10169_v57, %s9019_s26 }
 0x358   :  { %v10465_v9 = vpop.permute.xlu0 %1271 }
 0x359   :  { %v10467_v58 = vpop.permute.xlu1 %1273 }
 0x35a   :  { %1539 = vrot.lane.b32.xlu0 %v10471_v13, %s9020_s4 }
 0x35b   :  { %1541 = vrot.lane.b32.xlu1 %v10475_v27, %s9020_s4 }
 0x35c   :  { %v10481_v39 = vpop.permute.xlu0 %1583 }
 0x35d   :  { %v10483_v44 = vpop.permute.xlu1 %1585 }
 0x35e   :  { %1355 = vrot.lane.b32.xlu0 %v10149_v40, %s9020_s4  ;;  %v1237_v40 = vrot.slane %v10158_v48, 7 }
 0x35f   :  { %1357 = vrot.lane.b32.xlu1 %v10145_v54, %s9020_s4 }
 0x360   :  { %v10489_v50 = vpop.permute.xlu0 %1275  ;;  %v10517_v15 = vsel %vm182_vm1, %v1236_v3, %v1237_v40 }
 0x361   :  { %v10491_v32 = vpop.permute.xlu1 %1277 }
 0x362   :  { %1403 = vrot.lane.b32.xlu0 %v10433_v31, %s9021_s23 }
 0x363   :  { %1405 = vrot.lane.b32.xlu1 %v10471_v13, %s9021_s23  ;;  %v10513_v13 = vsel %vm182_vm1, %v1235_v49, %v1236_v3 }
 0x364   :  { %v10497_v61 = vpop.permute.xlu0 %1587  ;;  %14791 = vst [vmem:[#allocation46_spill] sm:$0xff] %v10513_v13 }
 0x365   :  { %v10499_v1 = vpop.permute.xlu1 %1589 }
 0x366   :  { %1495 = vrot.lane.b32.xlu0 %v10165_v53, %s9019_s26 }
 0x367   :  { %1497 = vrot.lane.b32.xlu1 %v10182_v34, %s9019_s26 }
 0x368   :  { %v10507_v54 = vpop.permute.xlu0 %1279 }
 0x369   :  { %14789 = vst [vmem:[#allocation44_spill] sm:$0xff] %v10507_v54  ;;  %v10509_v30 = vpop.permute.xlu1 %1281 }
 0x36a   :  { %14790 = vst [vmem:[#allocation45_spill] sm:$0xff] %v10509_v30  ;;  %1543 = vrot.lane.b32.xlu0 %v10513_v13, %s9020_s4 }
 0x36b   :  { %1545 = vrot.lane.b32.xlu1 %v10517_v15, %s9020_s4 }
 0x36c   :  { %v10523_v48 = vpop.permute.xlu0 %1591 }
 0x36d   :  { %14792 = vst [vmem:[#allocation47_spill] sm:$0xff] %v10523_v48  ;;  %v10525_v26 = vpop.permute.xlu1 %1593  ;;  %v1615_v48 = vld [vmem:[#allocation7 + $0x8] sm:$0xff] }
 0x36e   :  { %14793 = vst [vmem:[#allocation48_spill] sm:$0xff] %v10525_v26  ;;  %1359 = vrot.lane.b32.xlu0 %v10169_v57, %s9020_s4  ;;  %v14798_v57 = vrot.slane %v9999_v6, 7 }
 0x36f   :  { %1361 = vrot.lane.b32.xlu1 %v10165_v53, %s9020_s4 }
 0x370   :  { %v10531_v49 = vpop.permute.xlu0 %1283 }
 0x371   :  { %14794 = vst [vmem:[#allocation49_spill] sm:$0xff] %v10531_v49  ;;  %v10533_v3 = vpop.permute.xlu1 %1285 }
 0x372   :  { %14795 = vst [vmem:[#allocation50_spill] sm:$0xff] %v10533_v3  ;;  %1407 = vrot.lane.b32.xlu0 %v10475_v27, %s9021_s23  ;;  %v1239_v3 = vsel %vm182_vm1, %v1237_v40, %v14798_v57 }
 0x373   :  { %1409 = vrot.lane.b32.xlu1 %v10513_v13, %s9021_s23 }
 0x374   :  { %v10539_v30 = vpop.permute.xlu0 %1595 }
 0x375   :  { %14796 = vst [vmem:[#allocation51_spill] sm:$0xff] %v10539_v30  ;;  %v10541_v54 = vpop.permute.xlu1 %1597 }
 0x376   :  { %14797 = vst [vmem:[#allocation52_spill] sm:$0xff] %v10541_v54  ;;  %1499 = vrot.lane.b32.xlu0 %v10178_v63, %s9019_s26 }
 0x377   :  { %1501 = vrot.lane.b32.xlu1 %v10199_v55, %s9019_s26 }
 0x378   :  { %v1472_v53 = vpop.permute.xlu0 %1471 }
 0x379   :  { %v1474_v49 = vpop.permute.xlu1 %1473  ;;  %v1503_v13 = vadd.f32 %v1472_v53, %v10002_v11  ;;  %v1287_v11 = vadd.f32 %v10381_v42, %v1239_v3 }
 0x37a   :  { %1547 = vrot.lane.b32.xlu0 %v1239_v3, %s9020_s4  ;;  %v1504_v54 = vadd.f32 %v1474_v49, %v10005_v46 }
 0x37b   :  { %1549 = vrot.lane.b32.xlu1 %v10317_v43, %s9020_s4 }
 0x37c   :  { %v1520_v30 = vpop.permute.xlu0 %1519 }
 0x37d   :  { %v1522_v27 = vpop.permute.xlu1 %1521  ;;  %v1551_v26 = vadd.f32 %v1520_v30, %v1503_v13  ;;  %v1288_v30 = vadd.f32 %v10383_v2, %v10317_v43 }
 0x37e   :  { %v1552_v55 = vadd.f32 %v1522_v27, %v1504_v54  ;;  %1363 = vrot.lane.b32.xlu0 %v10182_v34, %s9020_s4 }
 0x37f   :  { %v1599_v40 = vadd.f32 %v10397_v8, %v1551_v26  ;;  %1365 = vrot.lane.b32.xlu1 %v10178_v63, %s9020_s4  ;;  %v1431_v8 = vld [vmem:[#allocation7] sm:$0xff] }
 0x380   :  { %v1600_v53 = vadd.f32 %v10399_v20, %v1552_v55  ;;  %v1336_v57 = vpop.permute.xlu0 %1335  ;;  %v1432_v20 = vld [vmem:[#allocation7 + $0x18] sm:$0xff] }
 0x381   :  { %v1631_v49 = vmul.f32 %v1615_v48, %v1599_v40  ;;  %v1338_v46 = vpop.permute.xlu1 %1337  ;;  %v1367_v34 = vadd.f32 %v1336_v57, %v1287_v11 }
 0x382   :  { %v1632_v13 = vmul.f32 %v1616_v4, %v1600_v53  ;;  %1411 = vrot.lane.b32.xlu0 %v10517_v15, %s9021_s23  ;;  %v1368_v26 = vadd.f32 %v1338_v46, %v1288_v30  ;;  %v1618_v30 = vld [vmem:[#allocation7 + $0x50] sm:$0xff] }
 0x383   :  { %1413 = vrot.lane.b32.xlu1 %v1239_v3, %s9021_s23 }
 0x384   :  { %v1384_v63 = vpop.permute.xlu0 %1383  ;;  %v1647_v27 = vpack.c.bf16 %v1632_v13, %v1631_v49  ;;  %v1617_v49 = vld [vmem:[#allocation7 + $0x38] sm:$0xff] }
 0x385   :  { %v1386_v54 = vpop.permute.xlu1 %1385  ;;  %v1415_v55 = vadd.f32 %v1384_v63, %v1367_v34 }
 0x386   :  { %v1416_v42 = vadd.f32 %v1386_v54, %v1368_v26  ;;  %1928 = vmatprep.mubr.bf16.mxu1 %v1647_v27 }
 0x387   :  { %v1447_v48 = vmul.f32 %v1431_v8, %v1415_v55  ;;  %v1289_v8 = vadd.f32 %v10405_v45, %v10292_v56 }
 0x388   :  { %v1448_v40 = vmul.f32 %v1432_v20, %v1416_v42  ;;  %v1476_v6 = vpop.permute.xlu0 %1475  ;;  %v1433_v42 = vld [vmem:[#allocation7 + $0x30] sm:$0xff] }
 0x389   :  { %v1478_v43 = vpop.permute.xlu1 %1477  ;;  %v1505_v2 = vadd.f32 %v1476_v6, %v10008_v23  ;;  %v1290_v6 = vadd.f32 %v10407_v25, %v10296_v62 }
 0x38a   :  { %v1463_v4 = vpack.c.bf16 %v1448_v40, %v1447_v48  ;;  %v1506_v11 = vadd.f32 %v1478_v43, %v10011_v16  ;;  %v1434_v43 = vld [vmem:[#allocation7 + $0x48] sm:$0xff] }
 0x38c   :  { %1929 = vmatmul.mubr.bf16.vlgmr.msra.gmra.mrb[16].mxu1 %v1463_v4  ;;  %v1524_v3 = vpop.permute.xlu0 %1523 }
 0x38d   :  { %v1526_v46 = vpop.permute.xlu1 %1525  ;;  %v1553_v53 = vadd.f32 %v1524_v3, %v1505_v2 }
 0x38e   :  { %v1554_v57 = vadd.f32 %v1526_v46, %v1506_v11 }
 0x38f   :  { %v1601_v13 = vadd.f32 %v10413_v35, %v1553_v53 }
 0x390   :  { %v1602_v34 = vadd.f32 %v10415_v18, %v1554_v57  ;;  %v1340_v26 = vpop.permute.xlu0 %1339 }
 0x391   :  { %v1633_v63 = vmul.f32 %v1617_v49, %v1601_v13  ;;  %v1342_v27 = vpop.permute.xlu1 %1341  ;;  %v1369_v54 = vadd.f32 %v1340_v26, %v1289_v8  ;;  %v1620_v13 = vld [vmem:[#allocation7 + $0x80] sm:$0xff] }
 0x392   :  { %v1634_v20 = vmul.f32 %v1618_v30, %v1602_v34  ;;  %v1370_v55 = vadd.f32 %v1342_v27, %v1290_v6  ;;  %v1619_v30 = vld [vmem:[#allocation7 + $0x68] sm:$0xff] }
 0x394   :  { %v1388_v48 = vpop.permute.xlu0 %1387  ;;  %v1648_v40 = vpack.c.bf16 %v1634_v20, %v1633_v63  ;;  %v1291_v63 = vadd.f32 %v10423_v19, %v10331_v12  ;;  %v1292_v20 = vadd.f32 %v10425_v0, %v10335_v17  ;;  %v1436_v12 = vld [vmem:[#allocation7 + $0x78] sm:$0xff] }
 0x395   :  { %v1390_v4 = vpop.permute.xlu1 %1389  ;;  %v1417_v35 = vadd.f32 %v1388_v48, %v1369_v54 }
 0x396   :  { %v1418_v2 = vadd.f32 %v1390_v4, %v1370_v55  ;;  %1936 = vmatprep.mubr.bf16.mxu1 %v1648_v40 }
 0x397   :  { %v1449_v18 = vmul.f32 %v1433_v42, %v1417_v35 }
 0x398   :  { %v1450_v11 = vmul.f32 %v1434_v43, %v1418_v2  ;;  %v1480_v3 = vpop.permute.xlu0 %1479 }
 0x399   :  { %v1482_v56 = vpop.permute.xlu1 %1481  ;;  %v1507_v46 = vadd.f32 %v1480_v3, %v10014_v29 }
 0x39a   :  { %v1464_v45 = vpack.c.bf16 %v1450_v11, %v1449_v18  ;;  %v1508_v62 = vadd.f32 %v1482_v56, %v10017_v38 }
 0x39c   :  { %1937 = vmatmul.mubr.bf16.gmra.mrb[20].mxu1 %v1464_v45  ;;  %v1528_v25 = vpop.permute.xlu0 %1527 }
 0x39d   :  { %v1530_v53 = vpop.permute.xlu1 %1529  ;;  %v1555_v57 = vadd.f32 %v1528_v25, %v1507_v46 }
 0x39e   :  { %v1556_v49 = vadd.f32 %v1530_v53, %v1508_v62 }
 0x39f   :  { %v1603_v34 = vadd.f32 %v10439_v36, %v1555_v57  ;;  %v1435_v36 = vld [vmem:[#allocation7 + $0x60] sm:$0xff] }
 0x3a0   :  { %v1604_v26 = vadd.f32 %v10441_v33, %v1556_v49  ;;  %v1344_v8 = vpop.permute.xlu0 %1343 }
 0x3a1   :  { %v1635_v27 = vmul.f32 %v1619_v30, %v1603_v34  ;;  %v1346_v6 = vpop.permute.xlu1 %1345  ;;  %v1371_v42 = vadd.f32 %v1344_v8, %v1291_v63  ;;  %v1622_v8 = vld [vmem:[#allocation7 + $0xb0] sm:$0xff] }
 0x3a2   :  { %v1636_v54 = vmul.f32 %v1620_v13, %v1604_v26  ;;  %v1372_v40 = vadd.f32 %v1346_v6, %v1292_v20  ;;  %v1621_v26 = vld [vmem:[#allocation7 + $0x98] sm:$0xff]  ;;  %v1293_v20 = vadd.f32 %v10447_v22, %v10357_v28  ;;  %v1438_v28 = vld [vmem:[#allocation7 + $0xa8] sm:$0xff] }
 0x3a3   :  { %v10584_v55 = vpop.f32.mrb[32].mxu0 }
 0x3a4   :  { %v10586_v48 = vpop.f32.mrb[33].mxu0  ;;  %v1392_v33 = vpop.permute.xlu0 %1391  ;;  %v1649_v4 = vpack.c.bf16 %v1636_v54, %v1635_v27 }
 0x3a5   :  { %v10588_v43 = vpop.f32.mrb[34].mxu0  ;;  %v1394_v19 = vpop.permute.xlu1 %1393  ;;  %v1419_v2 = vadd.f32 %v1392_v33, %v1371_v42 }
 0x3a6   :  { %v10590_v35 = vpop.f32.mrb[35].mxu0  ;;  %v1420_v18 = vadd.f32 %v1394_v19, %v1372_v40  ;;  %1944 = vmatprep.mubr.bf16.mxu1 %v1649_v4  ;;  %v1294_v40 = vadd.f32 %v10449_v59, %v10361_v21 }
 0x3a7   :  { %v1451_v17 = vmul.f32 %v1435_v36, %v1419_v2 }
 0x3a8   :  { %v1452_v0 = vmul.f32 %v1436_v12, %v1420_v18  ;;  %v1484_v11 = vpop.permute.xlu0 %1483 }
 0x3a9   :  { %v1486_v3 = vpop.permute.xlu1 %1485  ;;  %v1509_v46 = vadd.f32 %v1484_v11, %v10032_v14 }
 0x3aa   :  { %v1465_v45 = vpack.c.bf16 %v1452_v0, %v1451_v17  ;;  %v1510_v25 = vadd.f32 %v1486_v3, %v10041_v52 }
 0x3ab   :  { %v10592_v56 = vpop.f32.mrb[36].mxu0 }
 0x3ac   :  { %v10595_v62 = vpop.f32.mrb[37].mxu0  ;;  %1945 = vmatmul.mubr.bf16.gmra.mrb[24].mxu1 %v1465_v45  ;;  %v1532_v57 = vpop.permute.xlu0 %1531 }
 0x3ad   :  { %v10598_v53 = vpop.f32.mrb[38].mxu0  ;;  %v1534_v30 = vpop.permute.xlu1 %1533  ;;  %v1557_v13 = vadd.f32 %v1532_v57, %v1509_v46 }
 0x3ae   :  { %v10600_v49 = vpop.f32.mrb[39].mxu0  ;;  %v1558_v34 = vadd.f32 %v1534_v30, %v1510_v25 }
 0x3af   :  { %v1605_v63 = vadd.f32 %v10455_v60, %v1557_v13  ;;  %v1437_v60 = vld [vmem:[#allocation7 + $0x90] sm:$0xff] }
 0x3b0   :  { %v1606_v27 = vadd.f32 %v10457_v7, %v1558_v34  ;;  %v1348_v6 = vpop.permute.xlu0 %1347 }
 0x3b1   :  { %v1637_v54 = vmul.f32 %v1621_v26, %v1605_v63  ;;  %v1350_v42 = vpop.permute.xlu1 %1349  ;;  %v1373_v4 = vadd.f32 %v1348_v6, %v1293_v20  ;;  %v1623_v20 = vld [vmem:[#allocation7 + $0xc8] sm:$0xff] }
 0x3b2   :  { %v1638_v36 = vmul.f32 %v1622_v8, %v1606_v27  ;;  %v1374_v19 = vadd.f32 %v1350_v42, %v1294_v40 }
 0x3b3   :  { %v10608_v33 = vpop.f32.mrb[40].mxu0 }
 0x3b4   :  { %v10610_v12 = vpop.f32.mrb[41].mxu0  ;;  %v1396_v7 = vpop.permute.xlu0 %1395  ;;  %v1650_v18 = vpack.c.bf16 %v1638_v36, %v1637_v54  ;;  %v1624_v54 = vld [vmem:[#allocation7 + $0xe0] sm:$0xff] }
 0x3b5   :  { %v10612_v2 = vpop.f32.mrb[42].mxu0  ;;  %v1398_v22 = vpop.permute.xlu1 %1397  ;;  %v1421_v0 = vadd.f32 %v1396_v7, %v1373_v4  ;;  %v1295_v4 = vadd.f32 %v10465_v9, %v10387_v41  ;;  %v1296_v7 = vadd.f32 %v10467_v58, %v10391_v5 }
 0x3b6   :  { %v10614_v17 = vpop.f32.mrb[43].mxu0  ;;  %v1422_v11 = vadd.f32 %v1398_v22, %v1374_v19  ;;  %1952 = vmatprep.mubr.bf16.mxu1 %v1650_v18 }
 0x3b7   :  { %v1453_v21 = vmul.f32 %v1437_v60, %v1421_v0  ;;  %v1439_v0 = vld [vmem:[#allocation7 + $0xc0] sm:$0xff] }
 0x3b8   :  { %v1454_v59 = vmul.f32 %v1438_v28, %v1422_v11  ;;  %v1488_v3 = vpop.permute.xlu0 %1487 }
 0x3b9   :  { %v1490_v45 = vpop.permute.xlu1 %1489  ;;  %v1511_v57 = vadd.f32 %v1488_v3, %v10069_v24 }
 0x3ba   :  { %v1466_v25 = vpack.c.bf16 %v1454_v59, %v1453_v21  ;;  %v1512_v13 = vadd.f32 %v1490_v45, %v10089_v37  ;;  %v1440_v59 = vld [vmem:[#allocation7 + $0xd8] sm:$0xff] }
 0x3bb   :  { %v10616_v46 = vpop.f32.mrb[44].mxu0 }
 0x3bc   :  { %v10619_v30 = vpop.f32.mrb[45].mxu0  ;;  %1953 = vmatmul.mubr.bf16.gmra.mrb[28].mxu1 %v1466_v25  ;;  %v1536_v26 = vpop.permute.xlu0 %1535 }
 0x3bd   :  { %v10622_v34 = vpop.f32.mrb[46].mxu0  ;;  %v1538_v63 = vpop.permute.xlu1 %1537  ;;  %v1559_v27 = vadd.f32 %v1536_v26, %v1511_v57 }
 0x3be   :  { %v10624_v8 = vpop.f32.mrb[47].mxu0  ;;  %v1560_v6 = vadd.f32 %v1538_v63, %v1512_v13 }
 0x3bf   :  { %v1607_v42 = vadd.f32 %v10481_v39, %v1559_v27 }
 0x3c0   :  { %v1608_v40 = vadd.f32 %v10483_v44, %v1560_v6  ;;  %v1352_v36 = vpop.permute.xlu0 %1351  ;;  %v1625_v6 = vld [vmem:[#allocation7 + $0xf8] sm:$0xff] }
 0x3c1   :  { %v1639_v19 = vmul.f32 %v1623_v20, %v1607_v42  ;;  %v1354_v60 = vpop.permute.xlu1 %1353  ;;  %v1375_v28 = vadd.f32 %v1352_v36, %v1295_v4  ;;  %v1626_v20 = vld [vmem:[#allocation7 + $0x110] sm:$0xff]  ;;  %v1297_v36 = vadd.f32 %v10489_v50, %v10429_v47 }
 0x3c2   :  { %v1640_v18 = vmul.f32 %v1624_v54, %v1608_v40  ;;  %v1376_v22 = vadd.f32 %v1354_v60, %v1296_v7  ;;  %v1298_v60 = vadd.f32 %v10491_v32, %v10433_v31 }
 0x3c4   :  { %v1400_v11 = vpop.permute.xlu0 %1399  ;;  %v1651_v21 = vpack.c.bf16 %v1640_v18, %v1639_v19 }
 0x3c5   :  { %v1402_v3 = vpop.permute.xlu1 %1401  ;;  %v1423_v39 = vadd.f32 %v1400_v11, %v1375_v28 }
 0x3c6   :  { %v1424_v45 = vadd.f32 %v1402_v3, %v1376_v22  ;;  %1960 = vmatprep.mubr.bf16.mxu1 %v1651_v21  ;;  %v1441_v22 = vld [vmem:[#allocation7 + $0xf0] sm:$0xff]  ;;  %v1442_v21 = vld [vmem:[#allocation7 + $0x108] sm:$0xff] }
 0x3c7   :  { %v1455_v44 = vmul.f32 %v1439_v0, %v1423_v39 }
 0x3c8   :  { %v1456_v25 = vmul.f32 %v1440_v59, %v1424_v45  ;;  %v1492_v57 = vpop.permute.xlu0 %1491 }
 0x3c9   :  { %v1494_v41 = vpop.permute.xlu1 %1493  ;;  %v1513_v13 = vadd.f32 %v1492_v57, %v10114_v51  ;;  %v14800_v57 = vld [vmem:[#allocation40_spill] sm:$0xff] }
 0x3ca   :  { %v1467_v9 = vpack.c.bf16 %v1456_v25, %v1455_v44  ;;  %v1514_v5 = vadd.f32 %v1494_v41, %v10117_v10  ;;  %v14799_v44 = vld [vmem:[#allocation39_spill] sm:$0xff] }
 0x3cc   :  { %1961 = vmatmul.mubr.bf16.gmra.mrb[32].mxu1 %v1467_v9  ;;  %v1540_v58 = vpop.permute.xlu0 %1539 }
 0x3cd   :  { %v1542_v26 = vpop.permute.xlu1 %1541  ;;  %v1561_v63 = vadd.f32 %v1540_v58, %v1513_v13  ;;  %v1628_v58 = vld [vmem:[#allocation7 + $0x140] sm:$0xff] }
 0x3ce   :  { %v1562_v27 = vadd.f32 %v1542_v26, %v1514_v5  ;;  %v1627_v5 = vld [vmem:[#allocation7 + $0x128] sm:$0xff] }
 0x3cf   :  { %v1609_v54 = vadd.f32 %v10497_v61, %v1561_v63  ;;  %v14801_v26 = vld [vmem:[#allocation47_spill] sm:$0xff] }
 0x3d0   :  { %v1610_v42 = vadd.f32 %v10499_v1, %v1562_v27  ;;  %v1356_v40 = vpop.permute.xlu0 %1355  ;;  %v14802_v27 = vld [vmem:[#allocation48_spill] sm:$0xff] }
 0x3d1   :  { %v1641_v4 = vmul.f32 %v1625_v6, %v1609_v54  ;;  %v1358_v19 = vpop.permute.xlu1 %1357  ;;  %v1377_v18 = vadd.f32 %v1356_v40, %v1297_v36  ;;  %v14803_v54 = vld [vmem:[#allocation42_spill] sm:$0xff] }
 0x3d2   :  { %v1642_v7 = vmul.f32 %v1626_v20, %v1610_v42  ;;  %v1378_v28 = vadd.f32 %v1358_v19, %v1298_v60  ;;  %v14804_v42 = vld [vmem:[#allocation44_spill] sm:$0xff]  ;;  %v14805_v19 = vld [vmem:[#allocation43_spill] sm:$0xff]  ;;  %v14806_v60 = vld [vmem:[#allocation45_spill] sm:$0xff] }
 0x3d3   :  { %v1299_v40 = vadd.f32 %v14804_v42, %v14803_v54  ;;  %v14810_v54 = vld [vmem:[#allocation52_spill] sm:$0xff] }
 0x3d4   :  { %v1404_v0 = vpop.permute.xlu0 %1403  ;;  %v1652_v11 = vpack.c.bf16 %v1642_v7, %v1641_v4  ;;  %v1300_v7 = vadd.f32 %v14806_v60, %v14805_v19 }
 0x3d5   :  { %v1406_v59 = vpop.permute.xlu1 %1405  ;;  %v1425_v61 = vadd.f32 %v1404_v0, %v1377_v18  ;;  %v1443_v0 = vld [vmem:[#allocation7 + $0x120] sm:$0xff] }
 0x3d6   :  { %v1426_v3 = vadd.f32 %v1406_v59, %v1378_v28  ;;  %1968 = vmatprep.mubr.bf16.mxu1 %v1652_v11  ;;  %v1444_v59 = vld [vmem:[#allocation7 + $0x138] sm:$0xff] }
 0x3d7   :  { %v1457_v1 = vmul.f32 %v1441_v22, %v1425_v61 }
 0x3d8   :  { %v1458_v39 = vmul.f32 %v1442_v21, %v1426_v3  ;;  %v1496_v45 = vpop.permute.xlu0 %1495 }
 0x3d9   :  { %v1498_v47 = vpop.permute.xlu1 %1497  ;;  %v1515_v25 = vadd.f32 %v1496_v45, %v14799_v44 }
 0x3da   :  { %v1468_v50 = vpack.c.bf16 %v1458_v39, %v1457_v1  ;;  %v1516_v31 = vadd.f32 %v1498_v47, %v14800_v57 }
 0x3dc   :  { %1969 = vmatmul.mubr.bf16.gmra.mrb[36].mxu1 %v1468_v50  ;;  %v1544_v32 = vpop.permute.xlu0 %1543 }
 0x3dd   :  { %v1546_v41 = vpop.permute.xlu1 %1545  ;;  %v1563_v9 = vadd.f32 %v1544_v32, %v1515_v25 }
 0x3de   :  { %v1564_v13 = vadd.f32 %v1546_v41, %v1516_v31  ;;  %v14807_v31 = vld [vmem:[#allocation41_spill] sm:$0xff]  ;;  %v14808_v41 = vld [vmem:[#allocation26_spill] sm:$0xff] }
 0x3df   :  { %v1611_v63 = vadd.f32 %v14801_v26, %v1563_v9 }
 0x3e0   :  { %v1612_v6 = vadd.f32 %v14802_v27, %v1564_v13  ;;  %v1360_v20 = vpop.permute.xlu0 %1359  ;;  %v1630_v27 = vld [vmem:[#allocation7 + $0x170] sm:$0xff] }
 0x3e1   :  { %v1643_v36 = vmul.f32 %v1627_v5, %v1611_v63  ;;  %v1362_v4 = vpop.permute.xlu1 %1361  ;;  %v1379_v28 = vadd.f32 %v1360_v20, %v1299_v40  ;;  %v1629_v63 = vld [vmem:[#allocation7 + $0x158] sm:$0xff] }
 0x3e2   :  { %v1644_v18 = vmul.f32 %v1628_v58, %v1612_v6  ;;  %v1380_v22 = vadd.f32 %v1362_v4, %v1300_v7  ;;  %v14809_v6 = vld [vmem:[#allocation51_spill] sm:$0xff]  ;;  %v14812_v4 = vld [vmem:[#allocation49_spill] sm:$0xff] }
 0x3e4   :  { %v1408_v11 = vpop.permute.xlu0 %1407  ;;  %v1653_v21 = vpack.c.bf16 %v1644_v18, %v1643_v36  ;;  %v14811_v36 = vld [vmem:[#allocation46_spill] sm:$0xff] }
 0x3e5   :  { %v1410_v61 = vpop.permute.xlu1 %1409  ;;  %v1427_v3 = vadd.f32 %v1408_v11, %v1379_v28  ;;  %v1301_v19 = vadd.f32 %v14812_v4, %v14811_v36  ;;  %v14813_v18 = vld [vmem:[#allocation50_spill] sm:$0xff] }
 0x3e6   :  { %v1428_v1 = vadd.f32 %v1410_v61, %v1380_v22  ;;  %1976 = vmatprep.mubr.bf16.mxu1 %v1653_v21  ;;  %v1302_v28 = vadd.f32 %v14813_v18, %v10517_v15  ;;  %v1445_v21 = vld [vmem:[#allocation7 + $0x150] sm:$0xff] }
 0x3e7   :  { %v1459_v39 = vmul.f32 %v1443_v0, %v1427_v3  ;;  %v1446_v3 = vld [vmem:[#allocation7 + $0x168] sm:$0xff] }
 0x3e8   :  { %v1460_v45 = vmul.f32 %v1444_v59, %v1428_v1  ;;  %v1500_v47 = vpop.permute.xlu0 %1499 }
 0x3e9   :  { %v1502_v50 = vpop.permute.xlu1 %1501  ;;  %v1517_v32 = vadd.f32 %v1500_v47, %v14807_v31 }
 0x3ea   :  { %v1469_v25 = vpack.c.bf16 %v1460_v45, %v1459_v39  ;;  %v1518_v9 = vadd.f32 %v1502_v50, %v14808_v41 }
 0x3ec   :  { %1977 = vmatmul.mubr.bf16.gmra.mrb[40].mxu1 %v1469_v25  ;;  %v1548_v13 = vpop.permute.xlu0 %1547 }
 0x3ed   :  { %v1550_v5 = vpop.permute.xlu1 %1549  ;;  %v1565_v58 = vadd.f32 %v1548_v13, %v1517_v32 }
 0x3ee   :  { %v1566_v26 = vadd.f32 %v1550_v5, %v1518_v9  ;;  %v10656_v9 = vld [vmem:[#allocation10 + $0x1] ss:$0 sm:$0xff] }
 0x3ef   :  { %v1613_v20 = vadd.f32 %v14809_v6, %v1565_v58 }
 0x3f0   :  { %v1614_v42 = vadd.f32 %v14810_v54, %v1566_v26  ;;  %v1364_v40 = vpop.permute.xlu0 %1363 }
 0x3f1   :  { %v1645_v60 = vmul.f32 %v1629_v63, %v1613_v20  ;;  %v1366_v7 = vpop.permute.xlu1 %1365  ;;  %v1381_v0 = vadd.f32 %v1364_v40, %v1301_v19 }
 0x3f2   :  { %v1646_v22 = vmul.f32 %v1630_v27, %v1614_v42  ;;  %v1382_v11 = vadd.f32 %v1366_v7, %v1302_v28 }
 0x3f4   :  { %v1412_v59 = vpop.permute.xlu0 %1411  ;;  %v1654_v61 = vpack.c.bf16 %v1646_v22, %v1645_v60 }
 0x3f5   :  { %v1414_v1 = vpop.permute.xlu1 %1413  ;;  %v1429_v39 = vadd.f32 %v1412_v59, %v1381_v0 }
 0x3f6   :  { %v1430_v45 = vadd.f32 %v1414_v1, %v1382_v11  ;;  %1984 = vmatprep.mubr.bf16.mxu1 %v1654_v61 }
 0x3f7   :  { %v1461_v47 = vmul.f32 %v1445_v21, %v1429_v39 }
 0x3f8   :  { %v1462_v50 = vmul.f32 %v1446_v3, %v1430_v45 }
 0x3fa   :  { %v1470_v25 = vpack.c.bf16 %v1462_v50, %v1461_v47  ;;  %v8670_v50 = vld [vmem:[%s14677_s2 + $0x200] sm:$0xff]  }
 0x3fb   :  { %8474 = vmatprep.subr.bf16.mxu1 %v8670_v50 }
 0x3fc   :  { %1985 = vmatmul.mubr.bf16.gmra.mrb[44].mxu1 %v1470_v25 }
 0x3fd   :  { %8475 = vmatpush3.bf16.msra.mxu1 %v8670_v50 }
 0x45f   :  { %v8004_v32 = vpop.f32.mrb[16].mxu1 }
 0x460   :  { %v8005_v13 = vpop.f32.mrb[17].mxu1 }
 0x461   :  { %v8006_v15 = vadd.f32 %v8005_v13, %v8004_v32  ;;  %v8007_v5 = vpop.f32.mrb[18].mxu1 }
 0x462   :  { %v8008_v58 = vpop.f32.mrb[19].mxu1 }
 0x463   :  { %v1931_v26 = vadd.f32 %v8006_v15, %v10656_v9  ;;  %v8009_v63 = vadd.f32 %v8008_v58, %v8007_v5  ;;  %v8672_v58 = vld [vmem:[%s14677_s2 + $0x210] sm:$0xff]  }
 0x465   :  { %v2028_v27 = vadd.f32 %v10586_v48, %v1931_v26  ;;  %v1934_v6 = vadd.f32 %v8009_v63, %v10656_v9 }
 0x467   :  { %v10661_v20 = vmax.f32 %v2028_v27, 0.0  ;;  %v2031_v54 = vadd.f32 %v10590_v35, %v1934_v6 }
 0x469   :  { %v10664_v42 = vmax.f32 %v2031_v54, 0.0  ;;  %v2127_v40 = vmul.f32 %v10661_v20, %v10661_v20  ;;  %v8673_v54 = vld [vmem:[%s14677_s2 + $0x218] sm:$0xff]  }
 0x46b   :  { %v2106_v36 = vadd.f32 %v10664_v42, %v10661_v20  ;;  %v2128_v4 = vmul.f32 %v10664_v42, %v10664_v42 }
 0x46d   :  { %v2143_v19 = vadd.f32 %v2128_v4, %v2127_v40 }
 0x46f   :  { %v8010_v60 = vpop.f32.mrb[20].mxu1 }
 0x470   :  { %v8011_v48 = vpop.f32.mrb[21].mxu1 }
 0x471   :  { %v8012_v7 = vadd.f32 %v8011_v48, %v8010_v60  ;;  %v8013_v18 = vpop.f32.mrb[22].mxu1 }
 0x472   :  { %v8014_v28 = vpop.f32.mrb[23].mxu1 }
 0x473   :  { %v1939_v22 = vadd.f32 %v8012_v7, %v10656_v9  ;;  %v8015_v35 = vadd.f32 %v8014_v28, %v8013_v18  ;;  %v8675_v28 = vld [vmem:[%s14677_s2 + $0x228] sm:$0xff]  }
 0x475   :  { %v2036_v0 = vadd.f32 %v10584_v55, %v1939_v22  ;;  %v1942_v11 = vadd.f32 %v8015_v35, %v10656_v9 }
 0x477   :  { %v10675_v21 = vmax.f32 %v2036_v0, 0.0  ;;  %v2039_v59 = vadd.f32 %v10588_v43, %v1942_v11  ;;  %v8671_v43 = vld [vmem:[%s14677_s2 + $0x208] sm:$0xff]  }
 0x478   :  { %8476 = vmatprep.subr.bf16.mxu1 %v8671_v43 }
 0x479   :  { %v2107_v61 = vadd.f32 %v2106_v36, %v10675_v21  ;;  %v2129_v3 = vmul.f32 %v10675_v21, %v10675_v21  ;;  %v10681_v1 = vmax.f32 %v2039_v59, 0.0  ;;  %8477 = vmatpush3.bf16.msra.mxu1 %v8671_v43 }
 0x47a   :  { %8478 = vmatprep.subr.bf16.mxu1 %v8672_v58 }
 0x47b   :  { %v2144_v39 = vadd.f32 %v2143_v19, %v2129_v3  ;;  %v2108_v45 = vadd.f32 %v2107_v61, %v10681_v1  ;;  %v2130_v47 = vmul.f32 %v10681_v1, %v10681_v1  ;;  %v8676_v61 = vld [vmem:[%s14677_s2 + $0x230] sm:$0xff]  }
 0x47d   :  { %v2145_v55 = vadd.f32 %v2144_v39, %v2130_v47  ;;  %8479 = vmatpush3.bf16.msra.mxu1 %v8672_v58 }
 0x47e   :  { %8480 = vmatprep.subr.bf16.mxu1 %v8673_v54 }
 0x47f   :  { %v8016_v25 = vpop.f32.mrb[24].mxu1 }
 0x480   :  { %v8017_v32 = vpop.f32.mrb[25].mxu1 }
 0x481   :  { %v8018_v13 = vadd.f32 %v8017_v32, %v8016_v25  ;;  %v8019_v15 = vpop.f32.mrb[26].mxu1  ;;  %8481 = vmatpush3.bf16.msra.mxu1 %v8673_v54 }
 0x482   :  { %v8020_v5 = vpop.f32.mrb[27].mxu1 }
 0x483   :  { %v1947_v26 = vadd.f32 %v8018_v13, %v10656_v9  ;;  %v8021_v63 = vadd.f32 %v8020_v5, %v8019_v15 }
 0x485   :  { %v2044_v27 = vadd.f32 %v10595_v62, %v1947_v26  ;;  %v1950_v6 = vadd.f32 %v8021_v63, %v10656_v9  ;;  %v8674_v62 = vld [vmem:[%s14677_s2 + $0x220] sm:$0xff]  }
 0x486   :  { %8482 = vmatprep.subr.bf16.mxu1 %v8674_v62 }
 0x487   :  { %v10701_v40 = vmax.f32 %v2044_v27, 0.0  ;;  %v2047_v36 = vadd.f32 %v10600_v49, %v1950_v6  ;;  %8483 = vmatpush3.bf16.msra.mxu1 %v8674_v62 }
 0x488   :  { %8484 = vmatprep.subr.bf16.mxu1 %v8675_v28 }
 0x489   :  { %v2109_v4 = vadd.f32 %v2108_v45, %v10701_v40  ;;  %v2131_v19 = vmul.f32 %v10701_v40, %v10701_v40  ;;  %v10707_v60 = vmax.f32 %v2047_v36, 0.0 }
 0x48b   :  { %v2146_v48 = vadd.f32 %v2145_v55, %v2131_v19  ;;  %v2110_v7 = vadd.f32 %v2109_v4, %v10707_v60  ;;  %v2132_v18 = vmul.f32 %v10707_v60, %v10707_v60  ;;  %8485 = vmatpush3.bf16.msra.mxu1 %v8675_v28  ;;  %v8677_v55 = vld [vmem:[%s14677_s2 + $0x238] sm:$0xff]  }
 0x48c   :  { %8486 = vmatprep.subr.bf16.mxu1 %v8676_v61 }
 0x48d   :  { %v2147_v49 = vadd.f32 %v2146_v48, %v2132_v18 }
 0x48f   :  { %v8022_v22 = vpop.f32.mrb[28].mxu1  ;;  %8487 = vmatpush3.bf16.msra.mxu1 %v8676_v61 }
 0x490   :  { %v8023_v35 = vpop.f32.mrb[29].mxu1  ;;  %8488 = vmatprep.subr.bf16.mxu1 %v8677_v55 }
 0x491   :  { %v8024_v0 = vadd.f32 %v8023_v35, %v8022_v22  ;;  %v8025_v11 = vpop.f32.mrb[30].mxu1 }
 0x492   :  { %v8026_v59 = vpop.f32.mrb[31].mxu1 }
 0x493   :  { %v1955_v3 = vadd.f32 %v8024_v0, %v10656_v9  ;;  %v8027_v39 = vadd.f32 %v8026_v59, %v8025_v11  ;;  %8489 = vmatpush3.bf16.msra.mxu1 %v8677_v55 }
 0x495   :  { %v2052_v45 = vadd.f32 %v10592_v56, %v1955_v3  ;;  %v1958_v47 = vadd.f32 %v8027_v39, %v10656_v9 }
 0x497   :  { %v10727_v50 = vmax.f32 %v2052_v45, 0.0  ;;  %v2055_v43 = vadd.f32 %v10598_v53, %v1958_v47 }
 0x499   :  { %v2111_v25 = vadd.f32 %v2110_v7, %v10727_v50  ;;  %v2133_v32 = vmul.f32 %v10727_v50, %v10727_v50  ;;  %v10733_v13 = vmax.f32 %v2055_v43, 0.0 }
 0x49b   :  { %v2148_v56 = vadd.f32 %v2147_v49, %v2133_v32  ;;  %v2112_v15 = vadd.f32 %v2111_v25, %v10733_v13  ;;  %v2134_v5 = vmul.f32 %v10733_v13, %v10733_v13 }
 0x49d   :  { %v2149_v58 = vadd.f32 %v2148_v56, %v2134_v5 }
 0x49f   :  { %v8028_v26 = vpop.f32.mrb[32].mxu1 }
 0x4a0   :  { %v8029_v63 = vpop.f32.mrb[33].mxu1 }
 0x4a1   :  { %v8030_v53 = vadd.f32 %v8029_v63, %v8028_v26  ;;  %v8031_v27 = vpop.f32.mrb[34].mxu1 }
 0x4a2   :  { %v8032_v6 = vpop.f32.mrb[35].mxu1 }
 0x4a3   :  { %v1963_v54 = vadd.f32 %v8030_v53, %v10656_v9  ;;  %v8033_v36 = vadd.f32 %v8032_v6, %v8031_v27 }
 0x4a5   :  { %v2060_v4 = vadd.f32 %v10610_v12, %v1963_v54  ;;  %v1966_v19 = vadd.f32 %v8033_v36, %v10656_v9 }
 0x4a7   :  { %v10741_v62 = vmax.f32 %v2060_v4, 0.0  ;;  %v2063_v48 = vadd.f32 %v10614_v17, %v1966_v19 }
 0x4a9   :  { %v2113_v7 = vadd.f32 %v2112_v15, %v10741_v62  ;;  %v2135_v18 = vmul.f32 %v10741_v62, %v10741_v62  ;;  %v10747_v49 = vmax.f32 %v2063_v48, 0.0 }
 0x4ab   :  { %v2150_v28 = vadd.f32 %v2149_v58, %v2135_v18  ;;  %v2114_v22 = vadd.f32 %v2113_v7, %v10747_v49  ;;  %v2136_v35 = vmul.f32 %v10747_v49, %v10747_v49 }
 0x4ad   :  { %v2151_v12 = vadd.f32 %v2150_v28, %v2136_v35 }
 0x4af   :  { %v8034_v0 = vpop.f32.mrb[36].mxu1 }
 0x4b0   :  { %v8035_v11 = vpop.f32.mrb[37].mxu1 }
 0x4b1   :  { %v8036_v59 = vadd.f32 %v8035_v11, %v8034_v0  ;;  %v8037_v61 = vpop.f32.mrb[38].mxu1 }
 0x4b2   :  { %v8038_v3 = vpop.f32.mrb[39].mxu1 }
 0x4b3   :  { %v1971_v17 = vadd.f32 %v8036_v59, %v10656_v9  ;;  %v8039_v39 = vadd.f32 %v8038_v3, %v8037_v61 }
 0x4b5   :  { %v2068_v45 = vadd.f32 %v10608_v33, %v1971_v17  ;;  %v1974_v47 = vadd.f32 %v8039_v39, %v10656_v9 }
 0x4b7   :  { %v10755_v55 = vmax.f32 %v2068_v45, 0.0  ;;  %v2071_v43 = vadd.f32 %v10612_v2, %v1974_v47 }
 0x4b9   :  { %v2115_v25 = vadd.f32 %v2114_v22, %v10755_v55  ;;  %v2137_v32 = vmul.f32 %v10755_v55, %v10755_v55  ;;  %v10761_v56 = vmax.f32 %v2071_v43, 0.0 }
 0x4bb   :  { %v2152_v15 = vadd.f32 %v2151_v12, %v2137_v32  ;;  %v2116_v5 = vadd.f32 %v2115_v25, %v10761_v56  ;;  %v2138_v58 = vmul.f32 %v10761_v56, %v10761_v56 }
 0x4bd   :  { %v2153_v33 = vadd.f32 %v2152_v15, %v2138_v58 }
 0x4bf   :  { %v8040_v26 = vpop.f32.mrb[40].mxu1 }
 0x4c0   :  { %v8041_v63 = vpop.f32.mrb[41].mxu1 }
 0x4c1   :  { %v8042_v53 = vadd.f32 %v8041_v63, %v8040_v26  ;;  %v8043_v27 = vpop.f32.mrb[42].mxu1 }
 0x4c2   :  { %v8044_v6 = vpop.f32.mrb[43].mxu1 }
 0x4c3   :  { %v1979_v2 = vadd.f32 %v8042_v53, %v10656_v9  ;;  %v8045_v54 = vadd.f32 %v8044_v6, %v8043_v27 }
 0x4c5   :  { %v2076_v36 = vadd.f32 %v10619_v30, %v1979_v2  ;;  %v1982_v4 = vadd.f32 %v8045_v54, %v10656_v9 }
 0x4c7   :  { %v10769_v19 = vmax.f32 %v2076_v36, 0.0  ;;  %v2079_v48 = vadd.f32 %v10624_v8, %v1982_v4 }
 0x4c9   :  { %v2117_v7 = vadd.f32 %v2116_v5, %v10769_v19  ;;  %v2139_v18 = vmul.f32 %v10769_v19, %v10769_v19  ;;  %v10775_v28 = vmax.f32 %v2079_v48, 0.0 }
 0x4cb   :  { %v2154_v22 = vadd.f32 %v2153_v33, %v2139_v18  ;;  %v2118_v35 = vadd.f32 %v2117_v7, %v10775_v28  ;;  %v2140_v12 = vmul.f32 %v10775_v28, %v10775_v28 }
 0x4cd   :  { %v2155_v30 = vadd.f32 %v2154_v22, %v2140_v12 }
 0x4cf   :  { %v8046_v0 = vpop.f32.mrb[44].mxu1 }
 0x4d0   :  { %v8047_v11 = vpop.f32.mrb[45].mxu1 }
 0x4d1   :  { %v8048_v59 = vadd.f32 %v8047_v11, %v8046_v0  ;;  %v8049_v61 = vpop.f32.mrb[46].mxu1 }
 0x4d2   :  { %v8050_v3 = vpop.f32.mrb[47].mxu1 }
 0x4d3   :  { %v1987_v8 = vadd.f32 %v8048_v59, %v10656_v9  ;;  %v8051_v17 = vadd.f32 %v8050_v3, %v8049_v61 }
 0x4d5   :  { %v2084_v39 = vadd.f32 %v10616_v46, %v1987_v8  ;;  %v1990_v45 = vadd.f32 %v8051_v17, %v10656_v9 }
 0x4d7   :  { %v10783_v47 = vmax.f32 %v2084_v39, 0.0  ;;  %v2087_v43 = vadd.f32 %v10622_v34, %v1990_v45 }
 0x4d9   :  { %v2119_v25 = vadd.f32 %v2118_v35, %v10783_v47  ;;  %v2141_v32 = vmul.f32 %v10783_v47, %v10783_v47  ;;  %v2105_v15 = vmax.f32 %v2087_v43, 0.0 }
 0x4db   :  { %v2156_v5 = vadd.f32 %v2155_v30, %v2141_v32  ;;  %v2120_v58 = vadd.f32 %v2119_v25, %v2105_v15  ;;  %v2142_v33 = vmul.f32 %v2105_v15, %v2105_v15  ;;  %v10832_v32 = vld [vmem:[#allocation13 + $0x1] ss:$0 sm:$0xff] }
 0x4dd   :  { %v2121_v26 = vrot.slane %v2120_v58, 4  ;;  %v2157_v63 = vadd.f32 %v2156_v5, %v2142_v33 }
 0x4df   :  { %v2122_v53 = vadd.f32 %v2121_v26, %v2120_v58  ;;  %v2158_v27 = vrot.slane %v2157_v63, 4 }
 0x4e1   :  { %v2123_v46 = vrot.slane %v2122_v53, 2  ;;  %v2159_v6 = vadd.f32 %v2158_v27, %v2157_v63 }
 0x4e3   :  { %v2124_v9 = vadd.f32 %v2123_v46, %v2122_v53  ;;  %v2160_v2 = vrot.slane %v2159_v6, 2 }
 0x4e5   :  { %v2125_v54 = vrot.slane %v2124_v9, 1  ;;  %v2161_v36 = vadd.f32 %v2160_v2, %v2159_v6 }
 0x4e7   :  { %v2126_v34 = vadd.f32 %v2125_v54, %v2124_v9  ;;  %v2162_v4 = vrot.slane %v2161_v36, 1 }
 0x4e9   :  { %v2163_v48 = vadd.f32 %v2162_v4, %v2161_v36  ;;  %v10789_v7 = vmul.f32 0.0078125, %v2126_v34 }
 0x4eb   :  { %v2165_v18 = vmul.f32 0.0078125, %v2163_v48  ;;  %v2166_v22 = vmul.f32 %v10789_v7, %v10789_v7  ;;  %v2183_v35 = vsub.f32 %v2105_v15, %v10789_v7  ;;  %v2168_v12 = vsub.f32 %v10661_v20, %v10789_v7 }
 0x4ec   :  { %v2169_v30 = vsub.f32 %v10664_v42, %v10789_v7  ;;  %v2170_v0 = vsub.f32 %v10675_v21, %v10789_v7  ;;  %v2171_v11 = vsub.f32 %v10681_v1, %v10789_v7  ;;  %v2172_v59 = vsub.f32 %v10701_v40, %v10789_v7 }
 0x4ed   :  { %v2167_v61 = vsub.f32 %v2165_v18, %v2166_v22  ;;  %v2173_v3 = vsub.f32 %v10707_v60, %v10789_v7  ;;  %v2174_v8 = vsub.f32 %v10727_v50, %v10789_v7  ;;  %v2175_v20 = vsub.f32 %v10733_v13, %v10789_v7 }
 0x4ee   :  { %v2176_v42 = vsub.f32 %v10741_v62, %v10789_v7  ;;  %v2177_v21 = vsub.f32 %v10747_v49, %v10789_v7  ;;  %v2178_v1 = vsub.f32 %v10755_v55, %v10789_v7  ;;  %v2179_v40 = vsub.f32 %v10761_v56, %v10789_v7  ;;  %v10826_v49 = vld [vmem:[#allocation12 + $0x1] ss:$0 sm:$0xff] }
 0x4ef   :  { %v2184_v17 = vadd.f32 1e-05, %v2167_v61  ;;  %v2180_v60 = vsub.f32 %v10769_v19, %v10789_v7  ;;  %v2181_v50 = vsub.f32 %v10775_v28, %v10789_v7  ;;  %v2182_v13 = vsub.f32 %v10783_v47, %v10789_v7 }
 0x4f1   :  { %8796 = vrsqrt.f32 %v2184_v17  ;;  %v2716_v17 = vld [vmem:[#allocation7 + $0x40] sm:$0xff] }
 0x4fb   :  { %v10824_v62 = vpop.eup %8796 }
 0x4fc   :  { %v2201_v39 = vmul.f32 %v10824_v62, %v2183_v35  ;;  %v2186_v45 = vmul.f32 %v10824_v62, %v2168_v12  ;;  %v2187_v43 = vmul.f32 %v10824_v62, %v2169_v30  ;;  %v2188_v25 = vmul.f32 %v10824_v62, %v2170_v0  ;;  %v2714_v0 = vld [vmem:[#allocation7 + $0x10] sm:$0xff] }
 0x4fd   :  { %v2189_v15 = vmul.f32 %v10824_v62, %v2171_v11  ;;  %v2190_v5 = vmul.f32 %v10824_v62, %v2172_v59  ;;  %v2191_v58 = vmul.f32 %v10824_v62, %v2173_v3  ;;  %v2192_v33 = vmul.f32 %v10824_v62, %v2174_v8  ;;  %v2715_v3 = vld [vmem:[#allocation7 + $0x28] sm:$0xff] }
 0x4fe   :  { %v2225_v26 = vmul.f32 %v10826_v49, %v2201_v39  ;;  %v2210_v63 = vmul.f32 %v10826_v49, %v2186_v45  ;;  %v2211_v53 = vmul.f32 %v10826_v49, %v2187_v43  ;;  %v2212_v27 = vmul.f32 %v10826_v49, %v2188_v25  ;;  %v2717_v39 = vld [vmem:[#allocation7 + $0x58] sm:$0xff]  ;;  %v2675_v43 = vld [vmem:[#allocation7 + $0x20] sm:$0xff] }
 0x4ff   :  { %v2213_v46 = vmul.f32 %v10826_v49, %v2189_v15  ;;  %v2214_v6 = vmul.f32 %v10826_v49, %v2190_v5  ;;  %v2215_v9 = vmul.f32 %v10826_v49, %v2191_v58  ;;  %v2193_v2 = vmul.f32 %v10824_v62, %v2175_v20 }
 0x500   :  { %v10847_v54 = vadd.f32 %v10832_v32, %v2225_v26  ;;  %v10850_v36 = vadd.f32 %v10832_v32, %v2210_v63  ;;  %v10853_v34 = vadd.f32 %v10832_v32, %v2211_v53  ;;  %v10856_v4 = vadd.f32 %v10832_v32, %v2212_v27 }
 0x501   :  { %v10859_v48 = vadd.f32 %v10832_v32, %v2213_v46  ;;  %v10862_v18 = vadd.f32 %v10832_v32, %v2214_v6  ;;  %v10865_v22 = vadd.f32 %v10832_v32, %v2215_v9  ;;  %v2216_v35 = vmul.f32 %v10826_v49, %v2192_v33  ;;  %v2718_v6 = vld [vmem:[#allocation7 + $0x70] sm:$0xff] }
 0x502   :  { %14814 = vst [vmem:[#allocation47_spill] sm:$0xff] %v10847_v54  ;;  %2314 = vrot.lane.b32.xlu0 %v10847_v54, %s9019_s26  ;;  %2316 = vrot.lane.b32.xlu1 %v10850_v36, %s9019_s26  ;;  %v2363_v12 = vrot.slane %v10853_v34, 1  ;;  %v2364_v30 = vrot.slane %v10856_v4, 1  ;;  %v2217_v11 = vmul.f32 %v10826_v49, %v2193_v2  ;;  %v2194_v59 = vmul.f32 %v10824_v62, %v2176_v42  ;;  %v2719_v2 = vld [vmem:[#allocation7 + $0x88] sm:$0xff] }
 0x503   :  { %v2365_v61 = vrot.slane %v10859_v48, 1  ;;  %v2366_v8 = vrot.slane %v10862_v18, 1  ;;  %v2367_v20 = vrot.slane %v10865_v22, 1  ;;  %v10880_v45 = vadd.f32 %v10832_v32, %v2216_v35 }
 0x504   :  { %v10886_v25 = vsel %vm263_vm0, %v2363_v12, %v2364_v30  ;;  %v10889_v42 = vadd.f32 %v10832_v32, %v2217_v11  ;;  %v2195_v15 = vmul.f32 %v10824_v62, %v2177_v21  ;;  %v2218_v5 = vmul.f32 %v10826_v49, %v2194_v59 }
 0x505   :  { %v10895_v58 = vsel %vm263_vm0, %v2364_v30, %v2365_v61  ;;  %v2730_v33 = vmul.f32 %v2714_v0, %v10886_v25  ;;  %v10900_v26 = vsel %vm263_vm0, %v2366_v8, %v2367_v20  ;;  %v10904_v63 = vsel %vm263_vm0, %v2365_v61, %v2366_v8 }
 0x506   :  { %2626 = vrot.lane.b32.xlu0 %v10853_v34, %s9021_s23  ;;  %2628 = vrot.lane.b32.xlu1 %v10856_v4, %s9021_s23  ;;  %v2731_v21 = vmul.f32 %v2715_v3, %v10895_v58  ;;  %v2732_v53 = vmul.f32 %v2716_v17, %v10904_v63  ;;  %v2733_v27 = vmul.f32 %v2717_v39, %v10900_v26  ;;  %v2368_v46 = vrot.slane %v10880_v45, 1  ;;  %v2720_v39 = vld [vmem:[#allocation7 + $0xa0] sm:$0xff] }
 0x507   :  { %v2369_v9 = vrot.slane %v10889_v42, 1  ;;  %v2219_v35 = vmul.f32 %v10826_v49, %v2195_v15  ;;  %v10917_v30 = vadd.f32 %v10832_v32, %v2218_v5  ;;  %v2196_v0 = vmul.f32 %v10824_v62, %v2178_v1 }
 0x508   :  { %v2746_v11 = vpack.c.bf16 %v2731_v21, %v2730_v33  ;;  %v2747_v59 = vpack.c.bf16 %v2733_v27, %v2732_v53  ;;  %v10925_v61 = vsel %vm263_vm0, %v2367_v20, %v2368_v46  ;;  %v2197_v3 = vmul.f32 %v10824_v62, %v2179_v40  ;;  %v2721_v33 = vld [vmem:[#allocation7 + $0xb8] sm:$0xff] }
 0x509   :  { %v10933_v8 = vsel %vm263_vm0, %v2368_v46, %v2369_v9  ;;  %v2734_v17 = vmul.f32 %v2718_v6, %v10925_v61  ;;  %v10937_v55 = vadd.f32 %v10832_v32, %v2219_v35  ;;  %v2370_v1 = vrot.slane %v10917_v30, 1 }
 0x50a   :  { %8490 = vmatprep.mubr.bf16.mxu1 %v2746_v11  ;;  %2318 = vrot.lane.b32.xlu0 %v10853_v34, %s9019_s26  ;;  %v2735_v56 = vmul.f32 %v2719_v2, %v10933_v8  ;;  %v2220_v40 = vmul.f32 %v10826_v49, %v2196_v0  ;;  %v2221_v20 = vmul.f32 %v10826_v49, %v2197_v3  ;;  %v2722_v11 = vld [vmem:[#allocation7 + $0xd0] sm:$0xff] }
 0x50b   :  { %8491 = vmatmul.mubr.bf16.vlgmr.msra.gmra.mrb[48].mxu1 %v2747_v59  ;;  %2320 = vrot.lane.b32.xlu1 %v10856_v4, %s9019_s26  ;;  %v2371_v15 = vrot.slane %v10937_v55, 1  ;;  %v10950_v5 = vsel %vm263_vm0, %v2369_v9, %v2370_v1  ;;  %v2198_v21 = vmul.f32 %v10824_v62, %v2180_v60  ;;  %v2199_v53 = vmul.f32 %v10824_v62, %v2181_v50  ;;  %v2723_v59 = vld [vmem:[#allocation7 + $0xe8] sm:$0xff] }
 0x50c   :  { %v2748_v27 = vpack.c.bf16 %v2735_v56, %v2734_v17  ;;  %v2736_v46 = vmul.f32 %v2720_v39, %v10950_v5  ;;  %v10962_v6 = vadd.f32 %v10832_v32, %v2220_v40  ;;  %v10965_v9 = vadd.f32 %v10832_v32, %v2221_v20  ;;  %v2725_v20 = vld [vmem:[#allocation7 + $0x118] sm:$0xff] }
 0x50d   :  { %v10969_v2 = vsel %vm263_vm0, %v2370_v1, %v2371_v15  ;;  %v2222_v19 = vmul.f32 %v10826_v49, %v2198_v21  ;;  %v2223_v60 = vmul.f32 %v10826_v49, %v2199_v53  ;;  %v2200_v28 = vmul.f32 %v10824_v62, %v2182_v13 }
 0x50e   :  { %8494 = vmatprep.mubr.bf16.mxu1 %v2748_v27  ;;  %2630 = vrot.lane.b32.xlu0 %v10859_v48, %s9021_s23  ;;  %v2737_v50 = vmul.f32 %v2721_v33, %v10969_v2  ;;  %v2372_v35 = vrot.slane %v10962_v6, 1  ;;  %v2373_v0 = vrot.slane %v10965_v9, 1  ;;  %v2377_v21 = vrot.slane %v10847_v54, 1 }
 0x50f   :  { %2632 = vrot.lane.b32.xlu1 %v10862_v18, %s9021_s23  ;;  %v10985_v3 = vadd.f32 %v10832_v32, %v2222_v19  ;;  %v10988_v47 = vadd.f32 %v10832_v32, %v2223_v60  ;;  %v2224_v7 = vmul.f32 %v10826_v49, %v2200_v28  ;;  %v2724_v49 = vld [vmem:[#allocation7 + $0x100] sm:$0xff]  ;;  %v2726_v19 = vld [vmem:[#allocation7 + $0x130] sm:$0xff]  ;;  %v2293_v51 = vrot.slane %v10965_v9, 7 }
 0x510   :  { %v2749_v13 = vpack.c.bf16 %v2737_v50, %v2736_v46  ;;  %v10993_v62 = vsel %vm263_vm0, %v2372_v35, %v2373_v0  ;;  %v10997_v17 = vsel %vm263_vm0, %v2371_v15, %v2372_v35 }
 0x511   :  { %14816 = vst [vmem:[#allocation48_spill] sm:$0xff] %v10985_v3  ;;  %14817 = vst [vmem:[#allocation42_spill] sm:$0xff] %v10988_v47  ;;  %v2738_v1 = vmul.f32 %v2722_v11, %v10997_v17  ;;  %v2739_v39 = vmul.f32 %v2723_v59, %v10993_v62  ;;  %v2374_v56 = vrot.slane %v10985_v3, 1  ;;  %v2375_v40 = vrot.slane %v10988_v47, 1 }
 0x512   :  { %2322 = vrot.lane.b32.xlu0 %v10859_v48, %s9019_s26  ;;  %v11006_v33 = vadd.f32 %v10832_v32, %v2224_v7  ;;  %v2727_v32 = vld [vmem:[#allocation7 + $0x148] sm:$0xff]  ;;  %v2295_v23 = vrot.slane %v10988_v47, 7 }
 0x513   :  { %8495 = vmatmul.mubr.bf16.gmra.mrb[52].mxu1 %v2749_v13  ;;  %2324 = vrot.lane.b32.xlu1 %v10862_v18, %s9019_s26  ;;  %v2750_v15 = vpack.c.bf16 %v2739_v39, %v2738_v1  ;;  %v11013_v53 = vsel %vm263_vm0, %v2374_v56, %v2375_v40  ;;  %v11017_v27 = vsel %vm263_vm0, %v2373_v0, %v2374_v56  ;;  %v2362_v0 = vrot.slane %v10850_v36, 1  ;;  %v2728_v56 = vld [vmem:[#allocation7 + $0x160] sm:$0xff] }
 0x514   :  { %14818 = vst [vmem:[#allocation44_spill] sm:$0xff] %v11006_v33  ;;  %v2376_v46 = vrot.slane %v11006_v33, 1  ;;  %v2740_v60 = vmul.f32 %v2724_v49, %v11017_v27  ;;  %v2741_v28 = vmul.f32 %v2725_v20, %v11013_v53 }
 0x515   :  { %8498 = vmatprep.mubr.bf16.mxu1 %v2750_v15  ;;  %v11043_v1 = vsel %vm263_vm0, %v2362_v0, %v2363_v12  ;;  %v11047_v39 = vsel %vm263_vm0, %v2377_v21, %v2362_v0  ;;  %v8679_v15 = vld [vmem:[%s14677_s2 + $0x180] sm:$0xff]   ;;  %v8685_v0 = vld [vmem:[%s14677_s2 + $0x198] sm:$0xff]  }
 0x516   :  { %2634 = vrot.lane.b32.xlu0 %v10865_v22, %s9021_s23  ;;  %v11026_v50 = vsel %vm263_vm0, %v2376_v46, %v2377_v21  ;;  %v11030_v35 = vsel %vm263_vm0, %v2375_v40, %v2376_v46  ;;  %v2751_v7 = vpack.c.bf16 %v2741_v28, %v2740_v60  ;;  %v2729_v40 = vld [vmem:[#allocation7 + $0x178] sm:$0xff]  ;;  %v2744_v49 = vmul.f32 %v2728_v56, %v11047_v39  ;;  %v8680_v46 = vld [vmem:[%s14677_s2 + $0x1c8] sm:$0xff]   ;;  %v8683_v60 = vld [vmem:[%s14677_s2 + $0x190] sm:$0xff]  }
 0x517   :  { %2636 = vrot.lane.b32.xlu1 %v10880_v45, %s9021_s23  ;;  %v2742_v11 = vmul.f32 %v2726_v19, %v11030_v35  ;;  %v2743_v59 = vmul.f32 %v2727_v32, %v11026_v50  ;;  %v2745_v20 = vmul.f32 %v2729_v40, %v11043_v1  ;;  %v8678_v21 = vld [vmem:[%s14677_s2 + $0x1c0] sm:$0xff]   ;;  %v8681_v19 = vld [vmem:[%s14677_s2 + $0x188] sm:$0xff]   ;;  %v8682_v32 = vld [vmem:[%s14677_s2 + $0x1d0] sm:$0xff]   ;;  %v2283_v40 = vrot.slane %v10853_v34, 7 }
 0x518   :  { %8068 = vmatprep.subr.bf16.mxu0 %v8678_v21  ;;  %v8684_v28 = vld [vmem:[%s14677_s2 + $0x1d8] sm:$0xff]   ;;  %v8690_v56 = vld [vmem:[%s14677_s2 + $0x1f0] sm:$0xff]  }
 0x519   :  { %v2752_v13 = vpack.c.bf16 %v2743_v59, %v2742_v11  ;;  %v2753_v12 = vpack.c.bf16 %v2745_v20, %v2744_v49  ;;  %8069 = vmatpush3.bf16.msra.mxu0 %v8679_v15  ;;  %v8686_v11 = vld [vmem:[%s14677_s2 + $0x1e0] sm:$0xff]   ;;  %v2282_v49 = vrot.slane %v10850_v36, 7  ;;  %v8691_v20 = vld [vmem:[%s14677_s2 + $0x1b0] sm:$0xff]  }
 0x51a   :  { %2326 = vrot.lane.b32.xlu0 %v10865_v22, %s9019_s26  ;;  %8070 = vmatprep.subr.bf16.mxu0 %v8680_v46  ;;  %v8687_v59 = vld [vmem:[%s14677_s2 + $0x1a0] sm:$0xff]   ;;  %v8692_v46 = vld [vmem:[%s14677_s2 + $0x1f8] sm:$0xff]  }
 0x51b   :  { %8499 = vmatmul.mubr.bf16.gmra.mrb[56].mxu1 %v2751_v7  ;;  %2328 = vrot.lane.b32.xlu1 %v10880_v45, %s9019_s26  ;;  %v8688_v7 = vld [vmem:[%s14677_s2 + $0x1e8] sm:$0xff]   ;;  %v11140_v21 = vsel %vm182_vm1, %v2282_v49, %v2283_v40 }
 0x51c   :  { %8502 = vmatprep.mubr.bf16.mxu1 %v2752_v13  ;;  %v8689_v13 = vld [vmem:[%s14677_s2 + $0x1a8] sm:$0xff]  }
 0x51d   :  { %8071 = vmatpush3.bf16.msra.mxu0 %v8681_v19  ;;  %v8693_v19 = vld [vmem:[%s14677_s2 + $0x1b8] sm:$0xff]  }
 0x51e   :  { %2638 = vrot.lane.b32.xlu0 %v10889_v42, %s9021_s23  ;;  %8072 = vmatprep.subr.bf16.mxu0 %v8682_v32  ;;  %v14708_v32 = vrot.slane %v10847_v54, 7 }
 0x51f   :  { %2640 = vrot.lane.b32.xlu1 %v10917_v30, %s9021_s23 }
 0x521   :  { %8073 = vmatpush3.bf16.msra.mxu0 %v8683_v60  ;;  %v11165_v60 = vsel %vm182_vm1, %v14708_v32, %v2282_v49 }
 0x522   :  { %2330 = vrot.lane.b32.xlu0 %v10889_v42, %s9019_s26  ;;  %8074 = vmatprep.subr.bf16.mxu0 %v8684_v28  ;;  %v2285_v28 = vrot.slane %v10859_v48, 7 }
 0x523   :  { %2332 = vrot.lane.b32.xlu1 %v10917_v30, %s9019_s26  ;;  %8503 = vmatmul.mubr.bf16.gmra.mrb[60].mxu1 %v2753_v12  ;;  %v2284_v12 = vrot.slane %v10856_v4, 7 }
 0x525   :  { %8075 = vmatpush3.bf16.msra.mxu0 %v8685_v0  ;;  %v11144_v15 = vsel %vm182_vm1, %v2283_v40, %v2284_v12  ;;  %v2286_v0 = vrot.slane %v10862_v18, 7 }
 0x526   :  { %2642 = vrot.lane.b32.xlu0 %v10937_v55, %s9021_s23  ;;  %8076 = vmatprep.subr.bf16.mxu0 %v8686_v11 }
 0x527   :  { %2644 = vrot.lane.b32.xlu1 %v10962_v6, %s9021_s23  ;;  %v11183_v11 = vsel %vm182_vm1, %v2285_v28, %v2286_v0 }
 0x529   :  { %8077 = vmatpush3.bf16.msra.mxu0 %v8687_v59  ;;  %v2287_v59 = vrot.slane %v10865_v22, 7 }
 0x52a   :  { %2334 = vrot.lane.b32.xlu0 %v10937_v55, %s9019_s26  ;;  %8078 = vmatprep.subr.bf16.mxu0 %v8688_v7  ;;  %v2288_v7 = vrot.slane %v10880_v45, 7 }
 0x52b   :  { %2336 = vrot.lane.b32.xlu1 %v10962_v6, %s9019_s26 }
 0x52d   :  { %8079 = vmatpush3.bf16.msra.mxu0 %v8689_v13  ;;  %v2289_v13 = vrot.slane %v10889_v42, 7 }
 0x52e   :  { %2646 = vrot.lane.b32.xlu0 %v10965_v9, %s9021_s23  ;;  %8080 = vmatprep.subr.bf16.mxu0 %v8690_v56  ;;  %v2290_v56 = vrot.slane %v10917_v30, 7 }
 0x52f   :  { %2648 = vrot.lane.b32.xlu1 %v10985_v3, %s9021_s23 }
 0x530   :  { %v11239_v49 = vsel %vm182_vm1, %v2289_v13, %v2290_v56 }
 0x531   :  { %8081 = vmatpush3.bf16.msra.mxu0 %v8691_v20 }
 0x532   :  { %2338 = vrot.lane.b32.xlu0 %v10965_v9, %s9019_s26  ;;  %8082 = vmatprep.subr.bf16.mxu0 %v8692_v46 }
 0x533   :  { %2340 = vrot.lane.b32.xlu1 %v10985_v3, %s9019_s26 }
 0x535   :  { %8083 = vmatpush3.bf16.msra.mxu0 %v8693_v19 }
 0x536   :  { %2650 = vrot.lane.b32.xlu0 %v10988_v47, %s9021_s23 }
 0x537   :  { %2652 = vrot.lane.b32.xlu1 %v11006_v33, %s9021_s23 }
 0x53a   :  { %2342 = vrot.lane.b32.xlu0 %v10988_v47, %s9019_s26 }
 0x53b   :  { %2344 = vrot.lane.b32.xlu1 %v11006_v33, %s9019_s26 }
 0x53e   :  { %2654 = vrot.lane.b32.xlu0 %v10847_v54, %s9021_s23 }
 0x53f   :  { %2656 = vrot.lane.b32.xlu1 %v10850_v36, %s9021_s23 }
 0x542   :  { %2530 = vrot.lane.b32.xlu0 %v11043_v1, %s9019_s26 }
 0x543   :  { %2532 = vrot.lane.b32.xlu1 %v10886_v25, %s9019_s26 }
 0x546   :  { %2578 = vrot.lane.b32.xlu0 %v11140_v21, %s9020_s4 }
 0x547   :  { %2580 = vrot.lane.b32.xlu1 %v11144_v15, %s9020_s4 }
 0x54a   :  { %2394 = vrot.lane.b32.xlu0 %v11047_v39, %s9020_s4 }
 0x54b   :  { %2396 = vrot.lane.b32.xlu1 %v11043_v1, %s9020_s4  ;;  %v11179_v1 = vsel %vm182_vm1, %v2284_v12, %v2285_v28 }
 0x54e   :  { %2442 = vrot.lane.b32.xlu0 %v11165_v60, %s9021_s23 }
 0x54f   :  { %2444 = vrot.lane.b32.xlu1 %v11140_v21, %s9021_s23 }
 0x552   :  { %2534 = vrot.lane.b32.xlu0 %v10895_v58, %s9019_s26 }
 0x553   :  { %2536 = vrot.lane.b32.xlu1 %v10904_v63, %s9019_s26 }
 0x556   :  { %2582 = vrot.lane.b32.xlu0 %v11179_v1, %s9020_s4 }
 0x557   :  { %2584 = vrot.lane.b32.xlu1 %v11183_v11, %s9020_s4 }
 0x55a   :  { %2398 = vrot.lane.b32.xlu0 %v10886_v25, %s9020_s4  ;;  %v11205_v25 = vsel %vm182_vm1, %v2286_v0, %v2287_v59 }
 0x55b   :  { %2400 = vrot.lane.b32.xlu1 %v10895_v58, %s9020_s4  ;;  %v11209_v58 = vsel %vm182_vm1, %v2287_v59, %v2288_v7  ;;  %v2291_v59 = vrot.slane %v10937_v55, 7 }
 0x55e   :  { %2446 = vrot.lane.b32.xlu0 %v11144_v15, %s9021_s23 }
 0x55f   :  { %2448 = vrot.lane.b32.xlu1 %v11179_v1, %s9021_s23 }
 0x562   :  { %2538 = vrot.lane.b32.xlu0 %v10900_v26, %s9019_s26 }
 0x563   :  { %2540 = vrot.lane.b32.xlu1 %v10925_v61, %s9019_s26 }
 0x566   :  { %2586 = vrot.lane.b32.xlu0 %v11205_v25, %s9020_s4 }
 0x567   :  { %2588 = vrot.lane.b32.xlu1 %v11209_v58, %s9020_s4 }
 0x56a   :  { %2402 = vrot.lane.b32.xlu0 %v10904_v63, %s9020_s4 }
 0x56b   :  { %2404 = vrot.lane.b32.xlu1 %v10900_v26, %s9020_s4  ;;  %v11235_v26 = vsel %vm182_vm1, %v2288_v7, %v2289_v13  ;;  %v11277_v13 = vsel %vm182_vm1, %v2290_v56, %v2291_v59 }
 0x56e   :  { %2450 = vrot.lane.b32.xlu0 %v11183_v11, %s9021_s23 }
 0x56f   :  { %2452 = vrot.lane.b32.xlu1 %v11205_v25, %s9021_s23 }
 0x572   :  { %2542 = vrot.lane.b32.xlu0 %v10933_v8, %s9019_s26 }
 0x573   :  { %2544 = vrot.lane.b32.xlu1 %v10950_v5, %s9019_s26 }
 0x574   :  { %v11229_v63 = vpop.permute.xlu0 %2314  ;;  %v11231_v40 = vpop.permute.xlu1 %2316 }
 0x576   :  { %2590 = vrot.lane.b32.xlu0 %v11235_v26, %s9020_s4 }
 0x577   :  { %2592 = vrot.lane.b32.xlu1 %v11239_v49, %s9020_s4 }
 0x578   :  { %v11245_v20 = vpop.permute.xlu0 %2626  ;;  %v11247_v12 = vpop.permute.xlu1 %2628 }
 0x57a   :  { %2406 = vrot.lane.b32.xlu0 %v10925_v61, %s9020_s4  ;;  %v2292_v61 = vrot.slane %v10962_v6, 7 }
 0x57b   :  { %2408 = vrot.lane.b32.xlu1 %v10933_v8, %s9020_s4 }
 0x57c   :  { %v11253_v46 = vpop.permute.xlu0 %2318  ;;  %v11281_v32 = vsel %vm182_vm1, %v2291_v59, %v2292_v61  ;;  %v11319_v24 = vsel %vm182_vm1, %v2292_v61, %v2293_v51 }
 0x57d   :  { %v11255_v19 = vpop.permute.xlu1 %2320  ;;  %14819 = vst [vmem:[#allocation43_spill] sm:$0xff] %v11319_v24 }
 0x57e   :  { %2454 = vrot.lane.b32.xlu0 %v11209_v58, %s9021_s23 }
 0x57f   :  { %2456 = vrot.lane.b32.xlu1 %v11235_v26, %s9021_s23 }
 0x580   :  { %v11261_v28 = vpop.permute.xlu0 %2630 }
 0x581   :  { %v11263_v0 = vpop.permute.xlu1 %2632 }
 0x582   :  { %2546 = vrot.lane.b32.xlu0 %v10969_v2, %s9019_s26 }
 0x583   :  { %2548 = vrot.lane.b32.xlu1 %v10997_v17, %s9019_s26 }
 0x584   :  { %v11271_v8 = vpop.permute.xlu0 %2322 }
 0x585   :  { %v11273_v7 = vpop.permute.xlu1 %2324 }
 0x586   :  { %2594 = vrot.lane.b32.xlu0 %v11277_v13, %s9020_s4 }
 0x587   :  { %2596 = vrot.lane.b32.xlu1 %v11281_v32, %s9020_s4 }
 0x588   :  { %v11287_v31 = vpop.permute.xlu0 %2634 }
 0x589   :  { %v11289_v57 = vpop.permute.xlu1 %2636 }
 0x58a   :  { %2410 = vrot.lane.b32.xlu0 %v10950_v5, %s9020_s4  ;;  %v2294_v5 = vrot.slane %v10985_v3, 7 }
 0x58b   :  { %2412 = vrot.lane.b32.xlu1 %v10969_v2, %s9020_s4 }
 0x58c   :  { %v11295_v56 = vpop.permute.xlu0 %2326  ;;  %v11323_v52 = vsel %vm182_vm1, %v2293_v51, %v2294_v5 }
 0x58d   :  { %v11297_v59 = vpop.permute.xlu1 %2328  ;;  %14820 = vst [vmem:[#allocation45_spill] sm:$0xff] %v11323_v52 }
 0x58e   :  { %2458 = vrot.lane.b32.xlu0 %v11239_v49, %s9021_s23 }
 0x58f   :  { %2460 = vrot.lane.b32.xlu1 %v11277_v13, %s9021_s23 }
 0x590   :  { %v11303_v44 = vpop.permute.xlu0 %2638 }
 0x591   :  { %v11305_v10 = vpop.permute.xlu1 %2640 }
 0x592   :  { %2550 = vrot.lane.b32.xlu0 %v10993_v62, %s9019_s26 }
 0x593   :  { %2552 = vrot.lane.b32.xlu1 %v11017_v27, %s9019_s26 }
 0x594   :  { %v11313_v2 = vpop.permute.xlu0 %2330 }
 0x595   :  { %v11315_v37 = vpop.permute.xlu1 %2332 }
 0x596   :  { %2598 = vrot.lane.b32.xlu0 %v11319_v24, %s9020_s4 }
 0x597   :  { %2600 = vrot.lane.b32.xlu1 %v11323_v52, %s9020_s4 }
 0x598   :  { %v11329_v14 = vpop.permute.xlu0 %2642 }
 0x599   :  { %v11331_v38 = vpop.permute.xlu1 %2644 }
 0x59a   :  { %2414 = vrot.lane.b32.xlu0 %v10997_v17, %s9020_s4  ;;  %v2296_v17 = vrot.slane %v11006_v33, 7 }
 0x59b   :  { %2416 = vrot.lane.b32.xlu1 %v10993_v62, %s9020_s4 }
 0x59c   :  { %v11337_v61 = vpop.permute.xlu0 %2334  ;;  %v11365_v3 = vsel %vm182_vm1, %v2295_v23, %v2296_v17 }
 0x59d   :  { %v11339_v51 = vpop.permute.xlu1 %2336 }
 0x59e   :  { %2462 = vrot.lane.b32.xlu0 %v11281_v32, %s9021_s23 }
 0x59f   :  { %2464 = vrot.lane.b32.xlu1 %v11319_v24, %s9021_s23  ;;  %v11361_v24 = vsel %vm182_vm1, %v2294_v5, %v2295_v23 }
 0x5a0   :  { %v11345_v29 = vpop.permute.xlu0 %2646  ;;  %14823 = vst [vmem:[#allocation46_spill] sm:$0xff] %v11361_v24 }
 0x5a1   :  { %v11347_v16 = vpop.permute.xlu1 %2648 }
 0x5a2   :  { %2554 = vrot.lane.b32.xlu0 %v11013_v53, %s9019_s26 }
 0x5a3   :  { %2556 = vrot.lane.b32.xlu1 %v11030_v35, %s9019_s26 }
 0x5a4   :  { %v11355_v62 = vpop.permute.xlu0 %2338 }
 0x5a5   :  { %14821 = vst [vmem:[#allocation51_spill] sm:$0xff] %v11355_v62  ;;  %v11357_v41 = vpop.permute.xlu1 %2340 }
 0x5a6   :  { %14822 = vst [vmem:[#allocation52_spill] sm:$0xff] %v11357_v41  ;;  %2602 = vrot.lane.b32.xlu0 %v11361_v24, %s9020_s4 }
 0x5a7   :  { %2604 = vrot.lane.b32.xlu1 %v11365_v3, %s9020_s4 }
 0x5a8   :  { %v11371_v33 = vpop.permute.xlu0 %2650 }
 0x5a9   :  { %14824 = vst [vmem:[#allocation49_spill] sm:$0xff] %v11371_v33  ;;  %v11373_v47 = vpop.permute.xlu1 %2652  ;;  %v2674_v33 = vld [vmem:[#allocation7 + $0x8] sm:$0xff] }
 0x5aa   :  { %14825 = vst [vmem:[#allocation50_spill] sm:$0xff] %v11373_v47  ;;  %2418 = vrot.lane.b32.xlu0 %v11017_v27, %s9020_s4  ;;  %v14830_v27 = vrot.slane %v10847_v54, 7 }
 0x5ab   :  { %2420 = vrot.lane.b32.xlu1 %v11013_v53, %s9020_s4 }
 0x5ac   :  { %v11379_v5 = vpop.permute.xlu0 %2342 }
 0x5ad   :  { %14826 = vst [vmem:[#allocation53_spill] sm:$0xff] %v11379_v5  ;;  %v11381_v23 = vpop.permute.xlu1 %2344 }
 0x5ae   :  { %14827 = vst [vmem:[#allocation54_spill] sm:$0xff] %v11381_v23  ;;  %2466 = vrot.lane.b32.xlu0 %v11323_v52, %s9021_s23  ;;  %v2298_v23 = vsel %vm182_vm1, %v2296_v17, %v14830_v27 }
 0x5af   :  { %2468 = vrot.lane.b32.xlu1 %v11361_v24, %s9021_s23  ;;  %v2346_v27 = vadd.f32 %v11229_v63, %v2298_v23 }
 0x5b0   :  { %v11387_v41 = vpop.permute.xlu0 %2654 }
 0x5b1   :  { %14828 = vst [vmem:[#allocation55_spill] sm:$0xff] %v11387_v41  ;;  %v11389_v62 = vpop.permute.xlu1 %2656 }
 0x5b2   :  { %14829 = vst [vmem:[#allocation56_spill] sm:$0xff] %v11389_v62  ;;  %2558 = vrot.lane.b32.xlu0 %v11026_v50, %s9019_s26 }
 0x5b3   :  { %2560 = vrot.lane.b32.xlu1 %v11047_v39, %s9019_s26 }
 0x5b4   :  { %v2531_v53 = vpop.permute.xlu0 %2530 }
 0x5b5   :  { %v2533_v5 = vpop.permute.xlu1 %2532  ;;  %v2562_v24 = vadd.f32 %v2531_v53, %v10850_v36 }
 0x5b6   :  { %2606 = vrot.lane.b32.xlu0 %v2298_v23, %s9020_s4  ;;  %v2563_v62 = vadd.f32 %v2533_v5, %v10853_v34 }
 0x5b7   :  { %2608 = vrot.lane.b32.xlu1 %v11165_v60, %s9020_s4 }
 0x5b8   :  { %v2579_v41 = vpop.permute.xlu0 %2578 }
 0x5b9   :  { %v2581_v52 = vpop.permute.xlu1 %2580  ;;  %v2610_v47 = vadd.f32 %v2579_v41, %v2562_v24 }
 0x5ba   :  { %v2611_v39 = vadd.f32 %v2581_v52, %v2563_v62  ;;  %2422 = vrot.lane.b32.xlu0 %v11030_v35, %s9020_s4  ;;  %v2347_v52 = vadd.f32 %v11231_v40, %v11165_v60  ;;  %v2490_v35 = vld [vmem:[#allocation7] sm:$0xff] }
 0x5bb   :  { %v2658_v17 = vadd.f32 %v11245_v20, %v2610_v47  ;;  %2424 = vrot.lane.b32.xlu1 %v11026_v50, %s9020_s4 }
 0x5bc   :  { %v2659_v36 = vadd.f32 %v11247_v12, %v2611_v39  ;;  %v2395_v53 = vpop.permute.xlu0 %2394  ;;  %v2491_v12 = vld [vmem:[#allocation7 + $0x18] sm:$0xff] }
 0x5bd   :  { %v2690_v34 = vmul.f32 %v2674_v33, %v2658_v17  ;;  %v2397_v5 = vpop.permute.xlu1 %2396  ;;  %v2426_v41 = vadd.f32 %v2395_v53, %v2346_v27 }
 0x5be   :  { %v2691_v24 = vmul.f32 %v2675_v43, %v2659_v36  ;;  %2470 = vrot.lane.b32.xlu0 %v11365_v3, %s9021_s23  ;;  %v2427_v47 = vadd.f32 %v2397_v5, %v2347_v52  ;;  %v2677_v52 = vld [vmem:[#allocation7 + $0x50] sm:$0xff] }
 0x5bf   :  { %2472 = vrot.lane.b32.xlu1 %v2298_v23, %s9021_s23 }
 0x5c0   :  { %v2443_v50 = vpop.permute.xlu0 %2442  ;;  %v2706_v20 = vpack.c.bf16 %v2691_v24, %v2690_v34  ;;  %v2676_v34 = vld [vmem:[#allocation7 + $0x38] sm:$0xff] }
 0x5c1   :  { %v2445_v62 = vpop.permute.xlu1 %2444  ;;  %v2474_v39 = vadd.f32 %v2443_v50, %v2426_v41 }
 0x5c2   :  { %v2475_v63 = vadd.f32 %v2445_v62, %v2427_v47  ;;  %2987 = vmatprep.mubr.bf16.mxu0 %v2706_v20  ;;  %v2492_v62 = vld [vmem:[#allocation7 + $0x30] sm:$0xff] }
 0x5c3   :  { %v2506_v33 = vmul.f32 %v2490_v35, %v2474_v39  ;;  %v2348_v35 = vadd.f32 %v11253_v46, %v11140_v21 }
 0x5c4   :  { %v2507_v17 = vmul.f32 %v2491_v12, %v2475_v63  ;;  %v2535_v54 = vpop.permute.xlu0 %2534 }
 0x5c5   :  { %v2537_v60 = vpop.permute.xlu1 %2536  ;;  %v2564_v40 = vadd.f32 %v2535_v54, %v10856_v4  ;;  %v2349_v54 = vadd.f32 %v11255_v19, %v11144_v15 }
 0x5c6   :  { %v2522_v43 = vpack.c.bf16 %v2507_v17, %v2506_v33  ;;  %v2565_v36 = vadd.f32 %v2537_v60, %v10859_v48  ;;  %v2493_v33 = vld [vmem:[#allocation7 + $0x48] sm:$0xff] }
 0x5c8   :  { %2988 = vmatmul.mubr.bf16.vlgmr.msra.gmra.mrb[48].mxu0 %v2522_v43  ;;  %v2583_v23 = vpop.permute.xlu0 %2582 }
 0x5c9   :  { %v2585_v53 = vpop.permute.xlu1 %2584  ;;  %v2612_v27 = vadd.f32 %v2583_v23, %v2564_v40 }
 0x5ca   :  { %v2613_v5 = vadd.f32 %v2585_v53, %v2565_v36 }
 0x5cb   :  { %v2660_v24 = vadd.f32 %v11261_v28, %v2612_v27 }
 0x5cc   :  { %v2661_v41 = vadd.f32 %v11263_v0, %v2613_v5  ;;  %v2399_v47 = vpop.permute.xlu0 %2398  ;;  %v2678_v5 = vld [vmem:[#allocation7 + $0x68] sm:$0xff] }
 0x5cd   :  { %v2692_v50 = vmul.f32 %v2676_v34, %v2660_v24  ;;  %v2401_v20 = vpop.permute.xlu1 %2400  ;;  %v2428_v48 = vadd.f32 %v2399_v47, %v2348_v35  ;;  %v2679_v34 = vld [vmem:[#allocation7 + $0x80] sm:$0xff]  ;;  %v2350_v47 = vadd.f32 %v11271_v8, %v11179_v1  ;;  %v2495_v1 = vld [vmem:[#allocation7 + $0x78] sm:$0xff] }
 0x5ce   :  { %v2693_v4 = vmul.f32 %v2677_v52, %v2661_v41  ;;  %v2429_v12 = vadd.f32 %v2401_v20, %v2349_v54 }
 0x5d0   :  { %v2447_v39 = vpop.permute.xlu0 %2446  ;;  %v2707_v63 = vpack.c.bf16 %v2693_v4, %v2692_v50 }
 0x5d1   :  { %v2449_v17 = vpop.permute.xlu1 %2448  ;;  %v2476_v28 = vadd.f32 %v2447_v39, %v2428_v48 }
 0x5d2   :  { %v2477_v60 = vadd.f32 %v2449_v17, %v2429_v12  ;;  %2995 = vmatprep.mubr.bf16.mxu0 %v2707_v63 }
 0x5d3   :  { %v2508_v0 = vmul.f32 %v2492_v62, %v2476_v28 }
 0x5d4   :  { %v2509_v43 = vmul.f32 %v2493_v33, %v2477_v60  ;;  %v2539_v40 = vpop.permute.xlu0 %2538 }
 0x5d5   :  { %v2541_v21 = vpop.permute.xlu1 %2540  ;;  %v2566_v36 = vadd.f32 %v2539_v40, %v10862_v18  ;;  %v2351_v18 = vadd.f32 %v11273_v7, %v11183_v11 }
 0x5d6   :  { %v2523_v46 = vpack.c.bf16 %v2509_v43, %v2508_v0  ;;  %v2567_v15 = vadd.f32 %v2541_v21, %v10865_v22 }
 0x5d8   :  { %2996 = vmatmul.mubr.bf16.gmra.mrb[52].mxu0 %v2523_v46  ;;  %v2587_v19 = vpop.permute.xlu0 %2586 }
 0x5d9   :  { %v2589_v23 = vpop.permute.xlu1 %2588  ;;  %v2614_v53 = vadd.f32 %v2587_v19, %v2566_v36 }
 0x5da   :  { %v2615_v27 = vadd.f32 %v2589_v23, %v2567_v15 }
 0x5db   :  { %v2662_v52 = vadd.f32 %v11287_v31, %v2614_v53  ;;  %v2494_v31 = vld [vmem:[#allocation7 + $0x60] sm:$0xff] }
 0x5dc   :  { %v2663_v24 = vadd.f32 %v11289_v57, %v2615_v27  ;;  %v2403_v41 = vpop.permute.xlu0 %2402  ;;  %v2680_v27 = vld [vmem:[#allocation7 + $0x98] sm:$0xff] }
 0x5dd   :  { %v2694_v35 = vmul.f32 %v2678_v5, %v2662_v52  ;;  %v2405_v50 = vpop.permute.xlu1 %2404  ;;  %v2430_v54 = vadd.f32 %v2403_v41, %v2350_v47  ;;  %v2681_v5 = vld [vmem:[#allocation7 + $0xb0] sm:$0xff]  ;;  %v2353_v47 = vadd.f32 %v11297_v59, %v11209_v58 }
 0x5de   :  { %v2695_v22 = vmul.f32 %v2679_v34, %v2663_v24  ;;  %v11432_v20 = vpop.f32.mrb[48].mxu1  ;;  %v2431_v48 = vadd.f32 %v2405_v50, %v2351_v18  ;;  %v2352_v24 = vadd.f32 %v11295_v56, %v11205_v25  ;;  %v2497_v25 = vld [vmem:[#allocation7 + $0xa8] sm:$0xff] }
 0x5df   :  { %v11434_v4 = vpop.f32.mrb[49].mxu1 }
 0x5e0   :  { %v11436_v12 = vpop.f32.mrb[50].mxu1  ;;  %v2451_v57 = vpop.permute.xlu0 %2450  ;;  %v2708_v62 = vpack.c.bf16 %v2695_v22, %v2694_v35 }
 0x5e1   :  { %v11438_v39 = vpop.f32.mrb[51].mxu1  ;;  %v2453_v8 = vpop.permute.xlu1 %2452  ;;  %v2478_v63 = vadd.f32 %v2451_v57, %v2430_v54 }
 0x5e2   :  { %v2479_v33 = vadd.f32 %v2453_v8, %v2431_v48  ;;  %3003 = vmatprep.mubr.bf16.mxu0 %v2708_v62 }
 0x5e3   :  { %v2510_v11 = vmul.f32 %v2494_v31, %v2478_v63 }
 0x5e4   :  { %v2511_v7 = vmul.f32 %v2495_v1, %v2479_v33  ;;  %v2543_v17 = vpop.permute.xlu0 %2542 }
 0x5e5   :  { %v2545_v28 = vpop.permute.xlu1 %2544  ;;  %v2568_v43 = vadd.f32 %v2543_v17, %v10880_v45 }
 0x5e6   :  { %v11440_v60 = vpop.f32.mrb[52].mxu1  ;;  %v2524_v0 = vpack.c.bf16 %v2511_v7, %v2510_v11  ;;  %v2569_v21 = vadd.f32 %v2545_v28, %v10889_v42 }
 0x5e7   :  { %v11443_v40 = vpop.f32.mrb[53].mxu1 }
 0x5e8   :  { %3004 = vmatmul.mubr.bf16.gmra.mrb[56].mxu0 %v2524_v0  ;;  %v11446_v46 = vpop.f32.mrb[54].mxu1  ;;  %v2591_v36 = vpop.permute.xlu0 %2590 }
 0x5e9   :  { %v11448_v15 = vpop.f32.mrb[55].mxu1  ;;  %v2593_v19 = vpop.permute.xlu1 %2592  ;;  %v2616_v23 = vadd.f32 %v2591_v36, %v2568_v43 }
 0x5ea   :  { %v2617_v53 = vadd.f32 %v2593_v19, %v2569_v21 }
 0x5eb   :  { %v2664_v34 = vadd.f32 %v11303_v44, %v2616_v23  ;;  %v2496_v44 = vld [vmem:[#allocation7 + $0x90] sm:$0xff] }
 0x5ec   :  { %v2665_v52 = vadd.f32 %v11305_v10, %v2617_v53  ;;  %v2407_v45 = vpop.permute.xlu0 %2406  ;;  %v2682_v53 = vld [vmem:[#allocation7 + $0xc8] sm:$0xff] }
 0x5ed   :  { %v2696_v42 = vmul.f32 %v2680_v27, %v2664_v34  ;;  %v2409_v41 = vpop.permute.xlu1 %2408  ;;  %v2432_v18 = vadd.f32 %v2407_v45, %v2352_v24  ;;  %v2683_v27 = vld [vmem:[#allocation7 + $0xe0] sm:$0xff]  ;;  %v2355_v24 = vadd.f32 %v11315_v37, %v11239_v49 }
 0x5ee   :  { %v2697_v35 = vmul.f32 %v2681_v5, %v2665_v52  ;;  %v11456_v50 = vpop.f32.mrb[56].mxu1  ;;  %v2433_v54 = vadd.f32 %v2409_v41, %v2353_v47  ;;  %v2354_v52 = vadd.f32 %v11313_v2, %v11235_v26 }
 0x5ef   :  { %v11458_v22 = vpop.f32.mrb[57].mxu1 }
 0x5f0   :  { %v11460_v48 = vpop.f32.mrb[58].mxu1  ;;  %v2455_v10 = vpop.permute.xlu0 %2454  ;;  %v2709_v31 = vpack.c.bf16 %v2697_v35, %v2696_v42  ;;  %v2498_v35 = vld [vmem:[#allocation7 + $0xc0] sm:$0xff] }
 0x5f1   :  { %v11462_v57 = vpop.f32.mrb[59].mxu1  ;;  %v2457_v56 = vpop.permute.xlu1 %2456  ;;  %v2480_v62 = vadd.f32 %v2455_v10, %v2432_v18 }
 0x5f2   :  { %v2481_v1 = vadd.f32 %v2457_v56, %v2433_v54  ;;  %3011 = vmatprep.mubr.bf16.mxu0 %v2709_v31 }
 0x5f3   :  { %v2512_v58 = vmul.f32 %v2496_v44, %v2480_v62  ;;  %v2499_v44 = vld [vmem:[#allocation7 + $0xd8] sm:$0xff] }
 0x5f4   :  { %v2513_v59 = vmul.f32 %v2497_v25, %v2481_v1  ;;  %v2547_v8 = vpop.permute.xlu0 %2546 }
 0x5f5   :  { %v2549_v63 = vpop.permute.xlu1 %2548  ;;  %v2570_v7 = vadd.f32 %v2547_v8, %v10917_v30  ;;  %v2684_v8 = vld [vmem:[#allocation7 + $0xf8] sm:$0xff] }
 0x5f6   :  { %v11464_v33 = vpop.f32.mrb[60].mxu1  ;;  %v2525_v11 = vpack.c.bf16 %v2513_v59, %v2512_v58  ;;  %v2571_v28 = vadd.f32 %v2549_v63, %v10937_v55  ;;  %v2685_v63 = vld [vmem:[#allocation7 + $0x110] sm:$0xff] }
 0x5f7   :  { %v11467_v17 = vpop.f32.mrb[61].mxu1 }
 0x5f8   :  { %3012 = vmatmul.mubr.bf16.gmra.mrb[60].mxu0 %v2525_v11  ;;  %v11470_v0 = vpop.f32.mrb[62].mxu1  ;;  %v2595_v43 = vpop.permute.xlu0 %2594 }
 0x5f9   :  { %v11472_v21 = vpop.f32.mrb[63].mxu1  ;;  %v2597_v36 = vpop.permute.xlu1 %2596  ;;  %v2618_v19 = vadd.f32 %v2595_v43, %v2570_v7  ;;  %v2356_v43 = vadd.f32 %v11337_v61, %v11277_v13 }
 0x5fa   :  { %v2619_v23 = vadd.f32 %v2597_v36, %v2571_v28 }
 0x5fb   :  { %v2666_v5 = vadd.f32 %v11329_v14, %v2618_v19 }
 0x5fc   :  { %v2667_v34 = vadd.f32 %v11331_v38, %v2619_v23  ;;  %v2411_v30 = vpop.permute.xlu0 %2410 }
 0x5fd   :  { %v2698_v55 = vmul.f32 %v2682_v53, %v2666_v5  ;;  %v2413_v45 = vpop.permute.xlu1 %2412  ;;  %v2434_v41 = vadd.f32 %v2411_v30, %v2354_v52  ;;  %v2501_v30 = vld [vmem:[#allocation7 + $0x108] sm:$0xff] }
 0x5fe   :  { %v2699_v42 = vmul.f32 %v2683_v27, %v2667_v34  ;;  %v2435_v47 = vadd.f32 %v2413_v45, %v2355_v24  ;;  %v2500_v27 = vld [vmem:[#allocation7 + $0xf0] sm:$0xff] }
 0x600   :  { %v2459_v18 = vpop.permute.xlu0 %2458  ;;  %v2710_v54 = vpack.c.bf16 %v2699_v42, %v2698_v55  ;;  %v14831_v42 = vld [vmem:[#allocation48_spill] sm:$0xff] }
 0x601   :  { %v2461_v10 = vpop.permute.xlu1 %2460  ;;  %v2482_v14 = vadd.f32 %v2459_v18, %v2434_v41 }
 0x602   :  { %v2483_v31 = vadd.f32 %v2461_v10, %v2435_v47  ;;  %3019 = vmatprep.mubr.bf16.mxu0 %v2710_v54  ;;  %v14832_v47 = vld [vmem:[#allocation42_spill] sm:$0xff] }
 0x603   :  { %v2514_v38 = vmul.f32 %v2498_v35, %v2482_v14  ;;  %v2687_v10 = vld [vmem:[#allocation7 + $0x140] sm:$0xff]  ;;  %v14833_v14 = vld [vmem:[#allocation49_spill] sm:$0xff] }
 0x604   :  { %v2515_v25 = vmul.f32 %v2499_v44, %v2483_v31  ;;  %v2551_v56 = vpop.permute.xlu0 %2550  ;;  %v2686_v44 = vld [vmem:[#allocation7 + $0x128] sm:$0xff] }
 0x605   :  { %v2553_v26 = vpop.permute.xlu1 %2552  ;;  %v2572_v62 = vadd.f32 %v2551_v56, %v10962_v6  ;;  %v2357_v6 = vadd.f32 %v11339_v51, %v11281_v32 }
 0x606   :  { %v2526_v2 = vpack.c.bf16 %v2515_v25, %v2514_v38  ;;  %v2573_v37 = vadd.f32 %v2553_v26, %v10965_v9  ;;  %v14834_v38 = vld [vmem:[#allocation50_spill] sm:$0xff]  ;;  %v14835_v26 = vld [vmem:[#allocation43_spill] sm:$0xff] }
 0x608   :  { %3020 = vmatmul.mubr.bf16.gmra.mrb[64].mxu0 %v2526_v2  ;;  %v2599_v49 = vpop.permute.xlu0 %2598  ;;  %v14836_v2 = vld [vmem:[#allocation51_spill] sm:$0xff] }
 0x609   :  { %v2601_v1 = vpop.permute.xlu1 %2600  ;;  %v2620_v58 = vadd.f32 %v2599_v49, %v2572_v62  ;;  %v2358_v62 = vadd.f32 %v14836_v2, %v14835_v26  ;;  %v2504_v2 = vld [vmem:[#allocation7 + $0x150] sm:$0xff] }
 0x60a   :  { %v2621_v59 = vadd.f32 %v2601_v1, %v2573_v37  ;;  %v14837_v1 = vld [vmem:[#allocation45_spill] sm:$0xff] }
 0x60b   :  { %v2668_v11 = vadd.f32 %v11345_v29, %v2620_v58  ;;  %v14838_v58 = vld [vmem:[#allocation52_spill] sm:$0xff] }
 0x60c   :  { %v2669_v7 = vadd.f32 %v11347_v16, %v2621_v59  ;;  %v2415_v28 = vpop.permute.xlu0 %2414  ;;  %v2359_v59 = vadd.f32 %v14838_v58, %v14837_v1 }
 0x60d   :  { %v2700_v36 = vmul.f32 %v2684_v8, %v2668_v11  ;;  %v2417_v19 = vpop.permute.xlu1 %2416  ;;  %v2436_v23 = vadd.f32 %v2415_v28, %v2356_v43 }
 0x60e   :  { %v2701_v9 = vmul.f32 %v2685_v63, %v2669_v7  ;;  %v2437_v53 = vadd.f32 %v2417_v19, %v2357_v6  ;;  %v2502_v7 = vld [vmem:[#allocation7 + $0x120] sm:$0xff] }
 0x610   :  { %v2463_v5 = vpop.permute.xlu0 %2462  ;;  %v2711_v34 = vpack.c.bf16 %v2701_v9, %v2700_v36  ;;  %v2503_v36 = vld [vmem:[#allocation7 + $0x138] sm:$0xff] }
 0x611   :  { %v2465_v52 = vpop.permute.xlu1 %2464  ;;  %v2484_v29 = vadd.f32 %v2463_v5, %v2436_v23 }
 0x612   :  { %v2485_v55 = vadd.f32 %v2465_v52, %v2437_v53  ;;  %3027 = vmatprep.mubr.bf16.mxu0 %v2711_v34 }
 0x613   :  { %v2516_v16 = vmul.f32 %v2500_v27, %v2484_v29  ;;  %v14840_v29 = vld [vmem:[#allocation47_spill] sm:$0xff] }
 0x614   :  { %v2517_v45 = vmul.f32 %v2501_v30, %v2485_v55  ;;  %v2555_v24 = vpop.permute.xlu0 %2554  ;;  %v14839_v30 = vld [vmem:[#allocation44_spill] sm:$0xff] }
 0x615   :  { %v2557_v13 = vpop.permute.xlu1 %2556  ;;  %v2574_v41 = vadd.f32 %v2555_v24, %v14831_v42  ;;  %v2689_v42 = vld [vmem:[#allocation7 + $0x170] sm:$0xff] }
 0x616   :  { %v2527_v61 = vpack.c.bf16 %v2517_v45, %v2516_v16  ;;  %v2575_v32 = vadd.f32 %v2557_v13, %v14832_v47 }
 0x618   :  { %3028 = vmatmul.mubr.bf16.gmra.mrb[68].mxu0 %v2527_v61  ;;  %v2603_v51 = vpop.permute.xlu0 %2602  ;;  %v2688_v61 = vld [vmem:[#allocation7 + $0x158] sm:$0xff] }
 0x619   :  { %v2605_v35 = vpop.permute.xlu1 %2604  ;;  %v2622_v18 = vadd.f32 %v2603_v51, %v2574_v41  ;;  %v14841_v41 = vld [vmem:[#allocation55_spill] sm:$0xff] }
 0x61a   :  { %v2623_v54 = vadd.f32 %v2605_v35, %v2575_v32  ;;  %v14842_v32 = vld [vmem:[#allocation56_spill] sm:$0xff] }
 0x61b   :  { %v2670_v31 = vadd.f32 %v14833_v14, %v2622_v18  ;;  %v14843_v18 = vld [vmem:[#allocation46_spill] sm:$0xff] }
 0x61c   :  { %v2671_v25 = vadd.f32 %v14834_v38, %v2623_v54  ;;  %v2419_v56 = vpop.permute.xlu0 %2418  ;;  %v14844_v54 = vld [vmem:[#allocation53_spill] sm:$0xff] }
 0x61d   :  { %v2702_v37 = vmul.f32 %v2686_v44, %v2670_v31  ;;  %v2421_v49 = vpop.permute.xlu1 %2420  ;;  %v2438_v63 = vadd.f32 %v2419_v56, %v2358_v62  ;;  %v2360_v44 = vadd.f32 %v14844_v54, %v14843_v18  ;;  %v14845_v31 = vld [vmem:[#allocation54_spill] sm:$0xff] }
 0x61e   :  { %v2703_v8 = vmul.f32 %v2687_v10, %v2671_v25  ;;  %v2439_v11 = vadd.f32 %v2421_v49, %v2359_v59  ;;  %v2361_v38 = vadd.f32 %v14845_v31, %v11365_v3  ;;  %v2505_v49 = vld [vmem:[#allocation7 + $0x168] sm:$0xff] }
 0x620   :  { %v2467_v28 = vpop.permute.xlu0 %2466  ;;  %v2712_v43 = vpack.c.bf16 %v2703_v8, %v2702_v37 }
 0x621   :  { %v2469_v19 = vpop.permute.xlu1 %2468  ;;  %v2486_v6 = vadd.f32 %v2467_v28, %v2438_v63  ;;  %v11504_v28 = vld [vmem:[#allocation10 + $0x2] ss:$0 sm:$0xff] }
 0x622   :  { %v2487_v9 = vadd.f32 %v2469_v19, %v2439_v11  ;;  %3035 = vmatprep.mubr.bf16.mxu0 %v2712_v43 }
 0x623   :  { %v2518_v23 = vmul.f32 %v2502_v7, %v2486_v6 }
 0x624   :  { %v2519_v53 = vmul.f32 %v2503_v36, %v2487_v9  ;;  %v2559_v27 = vpop.permute.xlu0 %2558 }
 0x625   :  { %v2561_v5 = vpop.permute.xlu1 %2560  ;;  %v2576_v52 = vadd.f32 %v2559_v27, %v14839_v30 }
 0x626   :  { %v2528_v34 = vpack.c.bf16 %v2519_v53, %v2518_v23  ;;  %v2577_v55 = vadd.f32 %v2561_v5, %v14840_v29 }
 0x628   :  { %3036 = vmatmul.mubr.bf16.gmra.mrb[72].mxu0 %v2528_v34  ;;  %v2607_v16 = vpop.permute.xlu0 %2606 }
 0x629   :  { %v2609_v45 = vpop.permute.xlu1 %2608  ;;  %v2624_v24 = vadd.f32 %v2607_v16, %v2576_v52 }
 0x62a   :  { %v2625_v13 = vadd.f32 %v2609_v45, %v2577_v55 }
 0x62b   :  { %v2672_v47 = vadd.f32 %v14841_v41, %v2624_v24 }
 0x62c   :  { %v2673_v51 = vadd.f32 %v14842_v32, %v2625_v13  ;;  %v2423_v35 = vpop.permute.xlu0 %2422 }
 0x62d   :  { %v2704_v10 = vmul.f32 %v2688_v61, %v2672_v47  ;;  %v2425_v14 = vpop.permute.xlu1 %2424  ;;  %v2440_v56 = vadd.f32 %v2423_v35, %v2360_v44  ;;  %v8694_v44 = vld [vmem:[%s14677_s2 + $0x2c0] sm:$0xff]  }
 0x62e   :  { %v2705_v25 = vmul.f32 %v2689_v42, %v2673_v51  ;;  %v2441_v26 = vadd.f32 %v2425_v14, %v2361_v38  ;;  %8506 = vmatprep.subr.bf16.mxu0 %v8694_v44 }
 0x62f   :  { %8507 = vmatpush3.bf16.msra.mxu0 %v8694_v44 }
 0x630   :  { %v2471_v62 = vpop.permute.xlu0 %2470  ;;  %v2713_v37 = vpack.c.bf16 %v2705_v25, %v2704_v10  ;;  %v8695_v10 = vld [vmem:[%s14677_s2 + $0x2c8] sm:$0xff]  }
 0x631   :  { %v2473_v1 = vpop.permute.xlu1 %2472  ;;  %v2488_v58 = vadd.f32 %v2471_v62, %v2440_v56  ;;  %8508 = vmatprep.subr.bf16.mxu0 %v8695_v10  ;;  %v8696_v56 = vld [vmem:[%s14677_s2 + $0x2d0] sm:$0xff]  }
 0x632   :  { %v2489_v59 = vadd.f32 %v2473_v1, %v2441_v26  ;;  %3043 = vmatprep.mubr.bf16.mxu0 %v2713_v37  ;;  %v8697_v1 = vld [vmem:[%s14677_s2 + $0x2d8] sm:$0xff]  }
 0x633   :  { %v2520_v8 = vmul.f32 %v2504_v2, %v2488_v58  ;;  %8509 = vmatpush3.bf16.msra.mxu0 %v8695_v10 }
 0x634   :  { %v2521_v63 = vmul.f32 %v2505_v49, %v2489_v59  ;;  %8510 = vmatprep.subr.bf16.mxu0 %v8696_v56 }
 0x636   :  { %v2529_v11 = vpack.c.bf16 %v2521_v63, %v2520_v8 }
 0x637   :  { %8511 = vmatpush3.bf16.msra.mxu0 %v8696_v56 }
 0x638   :  { %3044 = vmatmul.mubr.bf16.gmra.mrb[76].mxu0 %v2529_v11  ;;  %8512 = vmatprep.subr.bf16.mxu0 %v8697_v1 }
 0x63b   :  { %8513 = vmatpush3.bf16.msra.mxu0 %v8697_v1 }
 0x69b   :  { %v8084_v7 = vpop.f32.mrb[48].mxu0 }
 0x69c   :  { %v8085_v43 = vpop.f32.mrb[49].mxu0 }
 0x69d   :  { %v8086_v3 = vadd.f32 %v8085_v43, %v8084_v7  ;;  %v8087_v36 = vpop.f32.mrb[50].mxu0  ;;  %v8699_v7 = vld [vmem:[%s14677_s2 + $0x2e8] sm:$0xff]  }
 0x69e   :  { %v8088_v19 = vpop.f32.mrb[51].mxu0 }
 0x69f   :  { %v2990_v6 = vadd.f32 %v8086_v3, %v11504_v28  ;;  %v8089_v9 = vadd.f32 %v8088_v19, %v8087_v36 }
 0x6a1   :  { %v11508_v23 = vadd.f32 %v11434_v4, %v2990_v6  ;;  %v2993_v53 = vadd.f32 %v8089_v9, %v11504_v28  ;;  %v8700_v9 = vld [vmem:[%s14677_s2 + $0x2f0] sm:$0xff]  }
 0x6a3   :  { %v11512_v27 = vadd.f32 %v11438_v39, %v2993_v53  ;;  %v3170_v5 = vmul.f32 %v11508_v23, %v11508_v23 }
 0x6a5   :  { %v3149_v34 = vadd.f32 %v11512_v27, %v11508_v23  ;;  %v3171_v30 = vmul.f32 %v11512_v27, %v11512_v27 }
 0x6a7   :  { %v3186_v52 = vadd.f32 %v3171_v30, %v3170_v5 }
 0x6ab   :  { %v8090_v29 = vpop.f32.mrb[52].mxu0 }
 0x6ac   :  { %v8091_v55 = vpop.f32.mrb[53].mxu0 }
 0x6ad   :  { %v8092_v16 = vadd.f32 %v8091_v55, %v8090_v29  ;;  %v8093_v4 = vpop.f32.mrb[54].mxu0  ;;  %v8701_v29 = vld [vmem:[%s14677_s2 + $0x2f8] sm:$0xff]  }
 0x6ae   :  { %v8094_v45 = vpop.f32.mrb[55].mxu0 }
 0x6af   :  { %v2998_v24 = vadd.f32 %v8092_v16, %v11504_v28  ;;  %v8095_v13 = vadd.f32 %v8094_v45, %v8093_v4 }
 0x6b1   :  { %v11522_v39 = vadd.f32 %v11432_v20, %v2998_v24  ;;  %v3001_v61 = vadd.f32 %v8095_v13, %v11504_v28 }
 0x6b3   :  { %v3150_v42 = vadd.f32 %v3149_v34, %v11522_v39  ;;  %v3172_v41 = vmul.f32 %v11522_v39, %v11522_v39  ;;  %v11529_v47 = vadd.f32 %v11436_v12, %v3001_v61 }
 0x6b5   :  { %v3187_v32 = vadd.f32 %v3186_v52, %v3172_v41  ;;  %v3151_v51 = vadd.f32 %v3150_v42, %v11529_v47  ;;  %v3173_v35 = vmul.f32 %v11529_v47, %v11529_v47 }
 0x6b7   :  { %v3188_v18 = vadd.f32 %v3187_v32, %v3173_v35 }
 0x6bb   :  { %v8096_v54 = vpop.f32.mrb[56].mxu0 }
 0x6bc   :  { %v8097_v20 = vpop.f32.mrb[57].mxu0 }
 0x6bd   :  { %v8098_v14 = vadd.f32 %v8097_v20, %v8096_v54  ;;  %v8099_v12 = vpop.f32.mrb[58].mxu0 }
 0x6be   :  { %v8100_v31 = vpop.f32.mrb[59].mxu0 }
 0x6bf   :  { %v3006_v38 = vadd.f32 %v8098_v14, %v11504_v28  ;;  %v8101_v25 = vadd.f32 %v8100_v31, %v8099_v12 }
 0x6c1   :  { %v11545_v26 = vadd.f32 %v11443_v40, %v3006_v38  ;;  %v3009_v2 = vadd.f32 %v8101_v25, %v11504_v28 }
 0x6c3   :  { %v3152_v62 = vadd.f32 %v3151_v51, %v11545_v26  ;;  %v3174_v37 = vmul.f32 %v11545_v26, %v11545_v26  ;;  %v11552_v49 = vadd.f32 %v11448_v15, %v3009_v2  ;;  %v8698_v15 = vld [vmem:[%s14677_s2 + $0x2e0] sm:$0xff]  }
 0x6c4   :  { %8514 = vmatprep.subr.bf16.mxu0 %v8698_v15 }
 0x6c5   :  { %v3189_v58 = vadd.f32 %v3188_v18, %v3174_v37  ;;  %v3153_v40 = vadd.f32 %v3152_v62, %v11552_v49  ;;  %v3175_v59 = vmul.f32 %v11552_v49, %v11552_v49  ;;  %8515 = vmatpush3.bf16.msra.mxu0 %v8698_v15 }
 0x6c6   :  { %8516 = vmatprep.subr.bf16.mxu0 %v8699_v7 }
 0x6c7   :  { %v3190_v8 = vadd.f32 %v3189_v58, %v3175_v59 }
 0x6c9   :  { %8517 = vmatpush3.bf16.msra.mxu0 %v8699_v7 }
 0x6ca   :  { %8518 = vmatprep.subr.bf16.mxu0 %v8700_v9 }
 0x6cb   :  { %v8102_v63 = vpop.f32.mrb[60].mxu0 }
 0x6cc   :  { %v8103_v11 = vpop.f32.mrb[61].mxu0 }
 0x6cd   :  { %v8104_v43 = vadd.f32 %v8103_v11, %v8102_v63  ;;  %v8105_v3 = vpop.f32.mrb[62].mxu0  ;;  %8519 = vmatpush3.bf16.msra.mxu0 %v8700_v9 }
 0x6ce   :  { %v8106_v36 = vpop.f32.mrb[63].mxu0  ;;  %8520 = vmatprep.subr.bf16.mxu0 %v8701_v29 }
 0x6cf   :  { %v3014_v19 = vadd.f32 %v8104_v43, %v11504_v28  ;;  %v8107_v6 = vadd.f32 %v8106_v36, %v8105_v3 }
 0x6d1   :  { %v11571_v53 = vadd.f32 %v11440_v60, %v3014_v19  ;;  %v3017_v5 = vadd.f32 %v8107_v6, %v11504_v28  ;;  %8521 = vmatpush3.bf16.msra.mxu0 %v8701_v29 }
 0x6d3   :  { %v3154_v34 = vadd.f32 %v3153_v40, %v11571_v53  ;;  %v3176_v30 = vmul.f32 %v11571_v53, %v11571_v53  ;;  %v11578_v52 = vadd.f32 %v11446_v46, %v3017_v5 }
 0x6d5   :  { %v3191_v55 = vadd.f32 %v3190_v8, %v3176_v30  ;;  %v3155_v60 = vadd.f32 %v3154_v34, %v11578_v52  ;;  %v3177_v16 = vmul.f32 %v11578_v52, %v11578_v52 }
 0x6d7   :  { %v3192_v4 = vadd.f32 %v3191_v55, %v3177_v16 }
 0x6db   :  { %v8108_v45 = vpop.f32.mrb[64].mxu0 }
 0x6dc   :  { %v8109_v24 = vpop.f32.mrb[65].mxu0 }
 0x6dd   :  { %v8110_v46 = vadd.f32 %v8109_v24, %v8108_v45  ;;  %v8111_v13 = vpop.f32.mrb[66].mxu0 }
 0x6de   :  { %v8112_v61 = vpop.f32.mrb[67].mxu0 }
 0x6df   :  { %v3022_v42 = vadd.f32 %v8110_v46, %v11504_v28  ;;  %v8113_v41 = vadd.f32 %v8112_v61, %v8111_v13 }
 0x6e1   :  { %v11588_v32 = vadd.f32 %v11458_v22, %v3022_v42  ;;  %v3025_v51 = vadd.f32 %v8113_v41, %v11504_v28 }
 0x6e3   :  { %v3156_v35 = vadd.f32 %v3155_v60, %v11588_v32  ;;  %v3178_v18 = vmul.f32 %v11588_v32, %v11588_v32  ;;  %v11595_v54 = vadd.f32 %v11462_v57, %v3025_v51 }
 0x6e5   :  { %v3193_v20 = vadd.f32 %v3192_v4, %v3178_v18  ;;  %v3157_v44 = vadd.f32 %v3156_v35, %v11595_v54  ;;  %v3179_v10 = vmul.f32 %v11595_v54, %v11595_v54 }
 0x6e7   :  { %v3194_v14 = vadd.f32 %v3193_v20, %v3179_v10 }
 0x6eb   :  { %v8114_v12 = vpop.f32.mrb[68].mxu0 }
 0x6ec   :  { %v8115_v22 = vpop.f32.mrb[69].mxu0 }
 0x6ed   :  { %v8116_v31 = vadd.f32 %v8115_v22, %v8114_v12  ;;  %v8117_v38 = vpop.f32.mrb[70].mxu0 }
 0x6ee   :  { %v8118_v25 = vpop.f32.mrb[71].mxu0 }
 0x6ef   :  { %v3030_v56 = vadd.f32 %v8116_v31, %v11504_v28  ;;  %v8119_v2 = vadd.f32 %v8118_v25, %v8117_v38 }
 0x6f1   :  { %v11602_v62 = vadd.f32 %v11456_v50, %v3030_v56  ;;  %v3033_v57 = vadd.f32 %v8119_v2, %v11504_v28 }
 0x6f3   :  { %v3158_v37 = vadd.f32 %v3157_v44, %v11602_v62  ;;  %v3180_v1 = vmul.f32 %v11602_v62, %v11602_v62  ;;  %v11609_v58 = vadd.f32 %v11460_v48, %v3033_v57 }
 0x6f5   :  { %v3195_v40 = vadd.f32 %v3194_v14, %v3180_v1  ;;  %v3159_v59 = vadd.f32 %v3158_v37, %v11609_v58  ;;  %v3181_v8 = vmul.f32 %v11609_v58, %v11609_v58 }
 0x6f7   :  { %v3196_v15 = vadd.f32 %v3195_v40, %v3181_v8 }
 0x6fb   :  { %v8120_v63 = vpop.f32.mrb[72].mxu0 }
 0x6fc   :  { %v8121_v50 = vpop.f32.mrb[73].mxu0 }
 0x6fd   :  { %v8122_v11 = vadd.f32 %v8121_v50, %v8120_v63  ;;  %v8123_v7 = vpop.f32.mrb[74].mxu0 }
 0x6fe   :  { %v8124_v43 = vpop.f32.mrb[75].mxu0 }
 0x6ff   :  { %v3038_v3 = vadd.f32 %v8122_v11, %v11504_v28  ;;  %v8125_v36 = vadd.f32 %v8124_v43, %v8123_v7 }
 0x701   :  { %v11616_v19 = vadd.f32 %v11467_v17, %v3038_v3  ;;  %v3041_v48 = vadd.f32 %v8125_v36, %v11504_v28  ;;  %v11674_v3 = vld [vmem:[#allocation12 + $0x2] ss:$0 sm:$0xff] }
 0x703   :  { %v3160_v6 = vadd.f32 %v3159_v59, %v11616_v19  ;;  %v3182_v9 = vmul.f32 %v11616_v19, %v11616_v19  ;;  %v11623_v5 = vadd.f32 %v11472_v21, %v3041_v48 }
 0x705   :  { %v3197_v34 = vadd.f32 %v3196_v15, %v3182_v9  ;;  %v3161_v30 = vadd.f32 %v3160_v6, %v11623_v5  ;;  %v3183_v29 = vmul.f32 %v11623_v5, %v11623_v5 }
 0x707   :  { %v3198_v55 = vadd.f32 %v3197_v34, %v3183_v29  ;;  %v11680_v34 = vld [vmem:[#allocation13 + $0x2] ss:$0 sm:$0xff] }
 0x70b   :  { %v8126_v60 = vpop.f32.mrb[76].mxu0 }
 0x70c   :  { %v8127_v17 = vpop.f32.mrb[77].mxu0 }
 0x70d   :  { %v8128_v16 = vadd.f32 %v8127_v17, %v8126_v60  ;;  %v8129_v4 = vpop.f32.mrb[78].mxu0 }
 0x70e   :  { %v8130_v45 = vpop.f32.mrb[79].mxu0 }
 0x70f   :  { %v3046_v24 = vadd.f32 %v8128_v16, %v11504_v28  ;;  %v8131_v46 = vadd.f32 %v8130_v45, %v8129_v4 }
 0x711   :  { %v11630_v13 = vadd.f32 %v11464_v33, %v3046_v24  ;;  %v3049_v21 = vadd.f32 %v8131_v46, %v11504_v28 }
 0x713   :  { %v3162_v61 = vadd.f32 %v3161_v30, %v11630_v13  ;;  %v3184_v42 = vmul.f32 %v11630_v13, %v11630_v13  ;;  %v3146_v41 = vadd.f32 %v11470_v0, %v3049_v21 }
 0x715   :  { %v3199_v51 = vadd.f32 %v3198_v55, %v3184_v42  ;;  %v3163_v35 = vadd.f32 %v3162_v61, %v3146_v41  ;;  %v3185_v18 = vmul.f32 %v3146_v41, %v3146_v41 }
 0x717   :  { %v3164_v20 = vrot.slane %v3163_v35, 4  ;;  %v3200_v44 = vadd.f32 %v3199_v51, %v3185_v18 }
 0x719   :  { %v3165_v10 = vadd.f32 %v3164_v20, %v3163_v35  ;;  %v3201_v14 = vrot.slane %v3200_v44, 4 }
 0x71b   :  { %v3166_v12 = vrot.slane %v3165_v10, 2  ;;  %v3202_v22 = vadd.f32 %v3201_v14, %v3200_v44  ;;  %v14846_v14 = vld [vmem:[#allocation26_spill] sm:$0xff] }
 0x71d   :  { %v3167_v33 = vadd.f32 %v3166_v12, %v3165_v10  ;;  %v3203_v31 = vrot.slane %v3202_v22, 2 }
 0x71f   :  { %v3168_v38 = vrot.slane %v3167_v33, 1  ;;  %v3204_v28 = vadd.f32 %v3203_v31, %v3202_v22  ;;  %v14847_v22 = vld [vmem:[#allocation27_spill] sm:$0xff]  ;;  %v14848_v31 = vld [vmem:[#allocation28_spill] sm:$0xff] }
 0x721   :  { %v3169_v25 = vadd.f32 %v3168_v38, %v3167_v33  ;;  %v3205_v56 = vrot.slane %v3204_v28, 1 }
 0x723   :  { %v3206_v2 = vadd.f32 %v3205_v56, %v3204_v28  ;;  %v11637_v57 = vmul.f32 0.0078125, %v3169_v25  ;;  %v14849_v28 = vld [vmem:[#allocation29_spill] sm:$0xff]  ;;  %v14850_v56 = vld [vmem:[#allocation30_spill] sm:$0xff] }
 0x725   :  { %v3208_v37 = vmul.f32 0.0078125, %v3206_v2  ;;  %v3209_v0 = vmul.f32 %v11637_v57, %v11637_v57  ;;  %v3226_v1 = vsub.f32 %v3146_v41, %v11637_v57  ;;  %v3211_v40 = vsub.f32 %v11508_v23, %v11637_v57 }
 0x726   :  { %v3212_v59 = vsub.f32 %v11512_v27, %v11637_v57  ;;  %v3213_v8 = vsub.f32 %v11522_v39, %v11637_v57  ;;  %v3214_v15 = vsub.f32 %v11529_v47, %v11637_v57  ;;  %v3215_v63 = vsub.f32 %v11545_v26, %v11637_v57 }
 0x727   :  { %v3210_v50 = vsub.f32 %v3208_v37, %v3209_v0  ;;  %v3216_v11 = vsub.f32 %v11552_v49, %v11637_v57  ;;  %v3217_v7 = vsub.f32 %v11571_v53, %v11637_v57  ;;  %v3218_v23 = vsub.f32 %v11578_v52, %v11637_v57  ;;  %v14851_v37 = vld [vmem:[#allocation31_spill] sm:$0xff] }
 0x728   :  { %v3219_v27 = vsub.f32 %v11588_v32, %v11637_v57  ;;  %v3220_v39 = vsub.f32 %v11595_v54, %v11637_v57  ;;  %v3221_v47 = vsub.f32 %v11602_v62, %v11637_v57  ;;  %v3222_v26 = vsub.f32 %v11609_v58, %v11637_v57 }
 0x729   :  { %v3227_v43 = vadd.f32 1e-05, %v3210_v50  ;;  %v3223_v49 = vsub.f32 %v11616_v19, %v11637_v57  ;;  %v3224_v53 = vsub.f32 %v11623_v5, %v11637_v57  ;;  %v3225_v52 = vsub.f32 %v11630_v13, %v11637_v57  ;;  %v3812_v57 = vld [vmem:[#allocation7 + $0xb8] sm:$0xff] }
 0x72b   :  { %8798 = vrsqrt.f32 %v3227_v43 }
 0x735   :  { %v11672_v32 = vpop.eup %8798 }
 0x736   :  { %v3244_v36 = vmul.f32 %v11672_v32, %v3226_v1  ;;  %v3229_v48 = vmul.f32 %v11672_v32, %v3211_v40  ;;  %v3230_v6 = vmul.f32 %v11672_v32, %v3212_v59  ;;  %v3231_v9 = vmul.f32 %v11672_v32, %v3213_v8  ;;  %v14852_v1 = vld [vmem:[#allocation32_spill] sm:$0xff] }
 0x737   :  { %v3232_v30 = vmul.f32 %v11672_v32, %v3214_v15  ;;  %v3233_v29 = vmul.f32 %v11672_v32, %v3215_v63  ;;  %v3234_v55 = vmul.f32 %v11672_v32, %v3216_v11  ;;  %v3235_v60 = vmul.f32 %v11672_v32, %v3217_v7 }
 0x738   :  { %v3268_v17 = vmul.f32 %v11674_v3, %v3244_v36  ;;  %v3253_v16 = vmul.f32 %v11674_v3, %v3229_v48  ;;  %v3254_v4 = vmul.f32 %v11674_v3, %v3230_v6  ;;  %v3255_v45 = vmul.f32 %v11674_v3, %v3231_v9  ;;  %v3805_v6 = vld [vmem:[#allocation7 + $0x10] sm:$0xff] }
 0x739   :  { %v3256_v24 = vmul.f32 %v11674_v3, %v3232_v30  ;;  %v3257_v46 = vmul.f32 %v11674_v3, %v3233_v29  ;;  %v3258_v21 = vmul.f32 %v11674_v3, %v3234_v55  ;;  %v3236_v61 = vmul.f32 %v11672_v32, %v3218_v23  ;;  %v3806_v55 = vld [vmem:[#allocation7 + $0x28] sm:$0xff] }
 0x73a   :  { %v3292_v42 = vadd.f32 %v11680_v34, %v3268_v17  ;;  %v3277_v41 = vadd.f32 %v11680_v34, %v3253_v16  ;;  %v3278_v51 = vadd.f32 %v11680_v34, %v3254_v4  ;;  %v3279_v35 = vadd.f32 %v11680_v34, %v3255_v45  ;;  %v3807_v16 = vld [vmem:[#allocation7 + $0x40] sm:$0xff]  ;;  %v3808_v4 = vld [vmem:[#allocation7 + $0x58] sm:$0xff] }
 0x73b   :  { %v3280_v18 = vadd.f32 %v11680_v34, %v3256_v24  ;;  %v3281_v20 = vadd.f32 %v11680_v34, %v3257_v46  ;;  %v3282_v44 = vadd.f32 %v11680_v34, %v3258_v21  ;;  %v3259_v10 = vmul.f32 %v11674_v3, %v3235_v60  ;;  %v14860_v45 = vld [vmem:[#allocation33_spill] sm:$0xff]  ;;  %v3766_v46 = vld [vmem:[#allocation7 + $0x20] sm:$0xff] }
 0x73c   :  { %v3324_v12 = vadd.f32 %v3292_v42, %v14846_v14  ;;  %v3309_v33 = vadd.f32 %v3277_v41, %v14847_v22  ;;  %v3310_v38 = vadd.f32 %v3278_v51, %v14848_v31  ;;  %v3311_v25 = vadd.f32 %v3279_v35, %v14849_v28 }
 0x73d   :  { %v3312_v2 = vadd.f32 %v3280_v18, %v14850_v56  ;;  %v3313_v0 = vadd.f32 %v3281_v20, %v14851_v37  ;;  %v3314_v40 = vadd.f32 %v3282_v44, %v14852_v1  ;;  %v3260_v59 = vmul.f32 %v11674_v3, %v3236_v61  ;;  %v14862_v61 = vld [vmem:[#allocation34_spill] sm:$0xff]  ;;  %v3810_v37 = vld [vmem:[#allocation7 + $0x88] sm:$0xff] }
 0x73e   :  { %v11710_v8 = vmax.f32 %v3324_v12, 0.0  ;;  %v11712_v15 = vmax.f32 %v3309_v33, 0.0  ;;  %v11714_v63 = vmax.f32 %v3310_v38, 0.0  ;;  %v11716_v50 = vmax.f32 %v3311_v25, 0.0  ;;  %v3809_v25 = vld [vmem:[#allocation7 + $0x70] sm:$0xff]  ;;  %v14865_v1 = vld [vmem:[#allocation35_spill] sm:$0xff] }
 0x73f   :  { %v11718_v11 = vmax.f32 %v3312_v2, 0.0  ;;  %v11720_v7 = vmax.f32 %v3313_v0, 0.0  ;;  %v11722_v23 = vmax.f32 %v3314_v40, 0.0  ;;  %v3283_v43 = vadd.f32 %v11680_v34, %v3259_v10 }
 0x740   :  { %14853 = vst [vmem:[#allocation48_spill] sm:$0xff] %v11710_v8  ;;  %14854 = vst [vmem:[#allocation42_spill] sm:$0xff] %v11712_v15  ;;  %3405 = vrot.lane.b32.xlu0 %v11710_v8, %s9019_s26  ;;  %3407 = vrot.lane.b32.xlu1 %v11712_v15, %s9019_s26  ;;  %v3454_v36 = vrot.slane %v11714_v63, 1  ;;  %v3455_v48 = vrot.slane %v11716_v50, 1  ;;  %v3284_v9 = vadd.f32 %v11680_v34, %v3260_v59 }
 0x741   :  { %14855 = vst [vmem:[#allocation49_spill] sm:$0xff] %v11714_v63  ;;  %14856 = vst [vmem:[#allocation50_spill] sm:$0xff] %v11716_v50  ;;  %v3237_v30 = vmul.f32 %v11672_v32, %v3219_v27  ;;  %v3456_v29 = vrot.slane %v11718_v11, 1  ;;  %v3457_v60 = vrot.slane %v11720_v7, 1  ;;  %v3458_v17 = vrot.slane %v11722_v23, 1 }
 0x742   :  { %14857 = vst [vmem:[#allocation43_spill] sm:$0xff] %v11718_v11  ;;  %14858 = vst [vmem:[#allocation51_spill] sm:$0xff] %v11720_v7  ;;  %v3315_v24 = vadd.f32 %v3283_v43, %v14860_v45  ;;  %v11741_v21 = vsel %vm263_vm0, %v3454_v36, %v3455_v48  ;;  %v3316_v42 = vadd.f32 %v3284_v9, %v14862_v61  ;;  %v14870_v61 = vld [vmem:[#allocation38_spill] sm:$0xff] }
 0x743   :  { %14859 = vst [vmem:[#allocation45_spill] sm:$0xff] %v11722_v23  ;;  %v3238_v27 = vmul.f32 %v11672_v32, %v3220_v39  ;;  %v3261_v41 = vmul.f32 %v11674_v3, %v3237_v30  ;;  %v11751_v51 = vsel %vm263_vm0, %v3455_v48, %v3456_v29  ;;  %v3821_v35 = vmul.f32 %v3805_v6, %v11741_v21  ;;  %v14866_v48 = vld [vmem:[#allocation36_spill] sm:$0xff] }
 0x744   :  { %v11756_v18 = vsel %vm263_vm0, %v3457_v60, %v3458_v17  ;;  %v11760_v20 = vsel %vm263_vm0, %v3456_v29, %v3457_v60  ;;  %3717 = vrot.lane.b32.xlu0 %v11714_v63, %s9021_s23  ;;  %3719 = vrot.lane.b32.xlu1 %v11716_v50, %s9021_s23  ;;  %v3822_v54 = vmul.f32 %v3806_v55, %v11751_v51  ;;  %v11769_v10 = vmax.f32 %v3315_v24, 0.0  ;;  %v14869_v24 = vld [vmem:[#allocation37_spill] sm:$0xff] }
 0x745   :  { %v3823_v39 = vmul.f32 %v3807_v16, %v11760_v20  ;;  %v3824_v44 = vmul.f32 %v3808_v4, %v11756_v18  ;;  %v11771_v14 = vmax.f32 %v3316_v42, 0.0  ;;  %v3262_v12 = vmul.f32 %v11674_v3, %v3238_v27 }
 0x746   :  { %14863 = vst [vmem:[#allocation52_spill] sm:$0xff] %v11769_v10  ;;  %v3285_v22 = vadd.f32 %v11680_v34, %v3261_v41  ;;  %v3239_v33 = vmul.f32 %v11672_v32, %v3221_v47  ;;  %v3837_v31 = vpack.c.bf16 %v3822_v54, %v3821_v35  ;;  %v3459_v28 = vrot.slane %v11769_v10, 1 }
 0x747   :  { %14864 = vst [vmem:[#allocation44_spill] sm:$0xff] %v11771_v14  ;;  %v3838_v38 = vpack.c.bf16 %v3824_v44, %v3823_v39  ;;  %v3240_v56 = vmul.f32 %v11672_v32, %v3222_v26  ;;  %v3460_v2 = vrot.slane %v11771_v14, 1  ;;  %v3286_v0 = vadd.f32 %v11680_v34, %v3262_v12  ;;  %v14873_v12 = vld [vmem:[#allocation39_spill] sm:$0xff] }
 0x748   :  { %v3317_v40 = vadd.f32 %v3285_v22, %v14865_v1  ;;  %v3263_v62 = vmul.f32 %v11674_v3, %v3239_v33  ;;  %8522 = vmatprep.mubr.bf16.mxu0 %v3837_v31  ;;  %3409 = vrot.lane.b32.xlu0 %v11714_v63, %s9019_s26  ;;  %v11792_v47 = vsel %vm263_vm0, %v3458_v17, %v3459_v28  ;;  %v3811_v17 = vld [vmem:[#allocation7 + $0xa0] sm:$0xff]  ;;  %v3468_v1 = vrot.slane %v11710_v8, 1 }
 0x749   :  { %v3264_v58 = vmul.f32 %v11674_v3, %v3240_v56  ;;  %v3241_v26 = vmul.f32 %v11672_v32, %v3223_v49  ;;  %8523 = vmatmul.mubr.bf16.vlgmr.msra.gmra.mrb[80].mxu0 %v3838_v38  ;;  %3411 = vrot.lane.b32.xlu1 %v11716_v50, %s9019_s26  ;;  %v11803_v59 = vsel %vm263_vm0, %v3459_v28, %v3460_v2  ;;  %v3813_v28 = vld [vmem:[#allocation7 + $0xd0] sm:$0xff] }
 0x74a   :  { %v3825_v43 = vmul.f32 %v3809_v25, %v11792_v47  ;;  %v3318_v6 = vadd.f32 %v3286_v0, %v14866_v48  ;;  %v11807_v9 = vmax.f32 %v3317_v40, 0.0  ;;  %v3826_v30 = vmul.f32 %v3810_v37, %v11803_v59  ;;  %v3814_v25 = vld [vmem:[#allocation7 + $0xe8] sm:$0xff]  ;;  %v14874_v56 = vld [vmem:[#allocation40_spill] sm:$0xff]  ;;  %v14876_v0 = vld [vmem:[#allocation41_spill] sm:$0xff] }
 0x74b   :  { %v3287_v19 = vadd.f32 %v11680_v34, %v3263_v62  ;;  %v3288_v49 = vadd.f32 %v11680_v34, %v3264_v58  ;;  %v3242_v29 = vmul.f32 %v11672_v32, %v3224_v53  ;;  %v3265_v16 = vmul.f32 %v11674_v3, %v3241_v26 }
 0x74c   :  { %14867 = vst [vmem:[#allocation47_spill] sm:$0xff] %v11807_v9  ;;  %v11816_v55 = vmax.f32 %v3318_v6, 0.0  ;;  %v3461_v60 = vrot.slane %v11807_v9, 1  ;;  %v3243_v4 = vmul.f32 %v11672_v32, %v3225_v52  ;;  %v3839_v45 = vpack.c.bf16 %v3826_v30, %v3825_v43  ;;  %3721 = vrot.lane.b32.xlu0 %v11718_v11, %s9021_s23  ;;  %v3815_v30 = vld [vmem:[#allocation7 + $0x100] sm:$0xff] }
 0x74d   :  { %v3319_v5 = vadd.f32 %v3287_v19, %v14869_v24  ;;  %v3320_v53 = vadd.f32 %v3288_v49, %v14870_v61  ;;  %v3266_v42 = vmul.f32 %v11674_v3, %v3242_v29  ;;  %3723 = vrot.lane.b32.xlu1 %v11720_v7, %s9021_s23  ;;  %v3289_v52 = vadd.f32 %v11680_v34, %v3265_v16  ;;  %v3816_v29 = vld [vmem:[#allocation7 + $0x118] sm:$0xff] }
 0x74e   :  { %14868 = vst [vmem:[#allocation55_spill] sm:$0xff] %v11816_v55  ;;  %v3462_v27 = vrot.slane %v11816_v55, 1  ;;  %v11834_v13 = vsel %vm263_vm0, %v3460_v2, %v3461_v60  ;;  %v3267_v32 = vmul.f32 %v11674_v3, %v3243_v4  ;;  %8526 = vmatprep.mubr.bf16.mxu0 %v3839_v45  ;;  %v3817_v4 = vld [vmem:[#allocation7 + $0x130] sm:$0xff]  ;;  %v3818_v45 = vld [vmem:[#allocation7 + $0x148] sm:$0xff] }
 0x74f   :  { %v3827_v41 = vmul.f32 %v3811_v17, %v11834_v13  ;;  %v11839_v35 = vmax.f32 %v3319_v5, 0.0  ;;  %v11841_v54 = vmax.f32 %v3320_v53, 0.0  ;;  %v3290_v39 = vadd.f32 %v11680_v34, %v3266_v42 }
 0x750   :  { %v11846_v44 = vsel %vm263_vm0, %v3461_v60, %v3462_v27  ;;  %v3321_v22 = vadd.f32 %v3289_v52, %v14873_v12  ;;  %v3291_v33 = vadd.f32 %v11680_v34, %v3267_v32  ;;  %3413 = vrot.lane.b32.xlu0 %v11718_v11, %s9019_s26 }
 0x751   :  { %14871 = vst [vmem:[#allocation56_spill] sm:$0xff] %v11839_v35  ;;  %14872 = vst [vmem:[#allocation46_spill] sm:$0xff] %v11841_v54  ;;  %v3828_v3 = vmul.f32 %v3812_v57, %v11846_v44  ;;  %v3463_v31 = vrot.slane %v11839_v35, 1  ;;  %v3464_v38 = vrot.slane %v11841_v54, 1  ;;  %v3322_v2 = vadd.f32 %v3290_v39, %v14874_v56  ;;  %3415 = vrot.lane.b32.xlu1 %v11720_v7, %s9019_s26  ;;  %v8705_v56 = vld [vmem:[%s14677_s2 + $0x248] sm:$0xff]  }
 0x752   :  { %v11858_v37 = vmax.f32 %v3321_v22, 0.0  ;;  %v3323_v34 = vadd.f32 %v3291_v33, %v14876_v0  ;;  %v3819_v22 = vld [vmem:[#allocation7 + $0x160] sm:$0xff]  ;;  %v3820_v33 = vld [vmem:[#allocation7 + $0x178] sm:$0xff]  ;;  %v8707_v0 = vld [vmem:[%s14677_s2 + $0x250] sm:$0xff]  }
 0x753   :  { %v3840_v40 = vpack.c.bf16 %v3828_v3, %v3827_v41  ;;  %v11864_v62 = vsel %vm263_vm0, %v3463_v31, %v3464_v38  ;;  %v11868_v58 = vsel %vm263_vm0, %v3462_v27, %v3463_v31  ;;  %v11870_v26 = vmax.f32 %v3322_v2, 0.0  ;;  %v8706_v2 = vld [vmem:[%s14677_s2 + $0x290] sm:$0xff]  }
 0x754   :  { %14875 = vst [vmem:[#allocation53_spill] sm:$0xff] %v11858_v37  ;;  %v3829_v43 = vmul.f32 %v3813_v28, %v11868_v58  ;;  %v3830_v48 = vmul.f32 %v3814_v25, %v11864_v62  ;;  %v3465_v6 = vrot.slane %v11858_v37, 1  ;;  %v11875_v19 = vmax.f32 %v3323_v34, 0.0  ;;  %3725 = vrot.lane.b32.xlu0 %v11722_v23, %s9021_s23  ;;  %v8703_v28 = vld [vmem:[%s14677_s2 + $0x240] sm:$0xff]   ;;  %v8704_v25 = vld [vmem:[%s14677_s2 + $0x288] sm:$0xff]   ;;  %v8708_v34 = vld [vmem:[%s14677_s2 + $0x298] sm:$0xff]  }
 0x755   :  { %14877 = vst [vmem:[#allocation54_spill] sm:$0xff] %v11870_v26  ;;  %8527 = vmatmul.mubr.bf16.gmra.mrb[84].mxu0 %v3840_v40  ;;  %v3466_v49 = vrot.slane %v11870_v26, 1  ;;  %3727 = vrot.lane.b32.xlu1 %v11769_v10, %s9021_s23  ;;  %v3453_v27 = vrot.slane %v11712_v15, 1  ;;  %v8710_v40 = vld [vmem:[%s14677_s2 + $0x2a0] sm:$0xff]  }
 0x756   :  { %14878 = vst [vmem:[#allocation26_spill] sm:$0xff] %v11875_v19  ;;  %v3841_v60 = vpack.c.bf16 %v3830_v48, %v3829_v43  ;;  %v11884_v17 = vsel %vm263_vm0, %v3464_v38, %v3465_v6  ;;  %v3467_v16 = vrot.slane %v11875_v19, 1  ;;  %v8702_v38 = vld [vmem:[%s14677_s2 + $0x280] sm:$0xff]   ;;  %v8712_v48 = vld [vmem:[%s14677_s2 + $0x2a8] sm:$0xff]  }
 0x757   :  { %v11889_v24 = vsel %vm263_vm0, %v3465_v6, %v3466_v49  ;;  %v3831_v5 = vmul.f32 %v3815_v30, %v11884_v17  ;;  %v11912_v39 = vsel %vm263_vm0, %v3453_v27, %v3454_v36  ;;  %v11916_v12 = vsel %vm263_vm0, %v3468_v1, %v3453_v27  ;;  %8148 = vmatprep.subr.bf16.mxu1 %v8702_v38  ;;  %v8711_v43 = vld [vmem:[%s14677_s2 + $0x260] sm:$0xff]   ;;  %v8713_v6 = vld [vmem:[%s14677_s2 + $0x268] sm:$0xff]   ;;  %v8714_v30 = vld [vmem:[%s14677_s2 + $0x2b0] sm:$0xff]  }
 0x758   :  { %8530 = vmatprep.mubr.bf16.mxu0 %v3841_v60  ;;  %v3832_v61 = vmul.f32 %v3816_v29, %v11889_v24  ;;  %v11895_v53 = vsel %vm263_vm0, %v3467_v16, %v3468_v1  ;;  %v11899_v42 = vsel %vm263_vm0, %v3466_v49, %v3467_v16  ;;  %3417 = vrot.lane.b32.xlu0 %v11722_v23, %s9019_s26  ;;  %v8709_v1 = vld [vmem:[%s14677_s2 + $0x258] sm:$0xff]   ;;  %v3374_v49 = vrot.slane %v11714_v63, 7  ;;  %v8715_v60 = vld [vmem:[%s14677_s2 + $0x270] sm:$0xff]  }
 0x759   :  { %v3833_v57 = vmul.f32 %v3817_v4, %v11899_v42  ;;  %v3834_v52 = vmul.f32 %v3818_v45, %v11895_v53  ;;  %3419 = vrot.lane.b32.xlu1 %v11769_v10, %s9019_s26  ;;  %v3835_v3 = vmul.f32 %v3819_v22, %v11916_v12  ;;  %v3836_v31 = vmul.f32 %v3820_v33, %v11912_v39 }
 0x75a   :  { %v3842_v32 = vpack.c.bf16 %v3832_v61, %v3831_v5  ;;  %8149 = vmatpush3.bf16.msra.mxu1 %v8703_v28  ;;  %v3373_v29 = vrot.slane %v11712_v15, 7  ;;  %v3375_v16 = vrot.slane %v11716_v50, 7  ;;  %v8716_v5 = vld [vmem:[%s14677_s2 + $0x2b8] sm:$0xff]   ;;  %v14727_v27 = vrot.slane %v11710_v8, 7 }
 0x75b   :  { %v3843_v41 = vpack.c.bf16 %v3834_v52, %v3833_v57  ;;  %v3844_v36 = vpack.c.bf16 %v3836_v31, %v3835_v3  ;;  %8150 = vmatprep.subr.bf16.mxu1 %v8704_v25  ;;  %v8717_v61 = vld [vmem:[%s14677_s2 + $0x278] sm:$0xff]   ;;  %v3376_v52 = vrot.slane %v11718_v11, 7  ;;  %v3378_v22 = vrot.slane %v11722_v23, 7 }
 0x75c   :  { %3729 = vrot.lane.b32.xlu0 %v11771_v14, %s9021_s23  ;;  %v12007_v4 = vsel %vm182_vm1, %v3373_v29, %v3374_v49  ;;  %v12011_v45 = vsel %vm182_vm1, %v3374_v49, %v3375_v16  ;;  %v12032_v57 = vsel %vm182_vm1, %v14727_v27, %v3373_v29  ;;  %v3379_v33 = vrot.slane %v11769_v10, 7 }
 0x75d   :  { %8531 = vmatmul.mubr.bf16.gmra.mrb[88].mxu0 %v3842_v32  ;;  %3731 = vrot.lane.b32.xlu1 %v11807_v9, %s9021_s23  ;;  %v3377_v32 = vrot.slane %v11720_v7, 7  ;;  %v3380_v3 = vrot.slane %v11771_v14, 7  ;;  %v3381_v31 = vrot.slane %v11807_v9, 7 }
 0x75e   :  { %8534 = vmatprep.mubr.bf16.mxu0 %v3843_v41  ;;  %8151 = vmatpush3.bf16.msra.mxu1 %v8705_v56  ;;  %v12046_v41 = vsel %vm182_vm1, %v3375_v16, %v3376_v52 }
 0x75f   :  { %8152 = vmatprep.subr.bf16.mxu1 %v8706_v2  ;;  %v12106_v38 = vsel %vm182_vm1, %v3380_v3, %v3381_v31 }
 0x760   :  { %3421 = vrot.lane.b32.xlu0 %v11771_v14, %s9019_s26 }
 0x761   :  { %3423 = vrot.lane.b32.xlu1 %v11807_v9, %s9019_s26 }
 0x762   :  { %8153 = vmatpush3.bf16.msra.mxu1 %v8707_v0 }
 0x763   :  { %8154 = vmatprep.subr.bf16.mxu1 %v8708_v34 }
 0x764   :  { %3733 = vrot.lane.b32.xlu0 %v11816_v55, %s9021_s23 }
 0x765   :  { %8535 = vmatmul.mubr.bf16.gmra.mrb[92].mxu0 %v3844_v36  ;;  %3735 = vrot.lane.b32.xlu1 %v11839_v35, %s9021_s23 }
 0x766   :  { %8155 = vmatpush3.bf16.msra.mxu1 %v8709_v1  ;;  %v3382_v1 = vrot.slane %v11816_v55, 7 }
 0x767   :  { %8156 = vmatprep.subr.bf16.mxu1 %v8710_v40 }
 0x768   :  { %3425 = vrot.lane.b32.xlu0 %v11816_v55, %s9019_s26 }
 0x769   :  { %3427 = vrot.lane.b32.xlu1 %v11839_v35, %s9019_s26 }
 0x76a   :  { %8157 = vmatpush3.bf16.msra.mxu1 %v8711_v43  ;;  %v12144_v43 = vsel %vm182_vm1, %v3381_v31, %v3382_v1 }
 0x76b   :  { %8158 = vmatprep.subr.bf16.mxu1 %v8712_v48 }
 0x76c   :  { %3737 = vrot.lane.b32.xlu0 %v11841_v54, %s9021_s23 }
 0x76d   :  { %3739 = vrot.lane.b32.xlu1 %v11858_v37, %s9021_s23 }
 0x76e   :  { %8159 = vmatpush3.bf16.msra.mxu1 %v8713_v6 }
 0x76f   :  { %8160 = vmatprep.subr.bf16.mxu1 %v8714_v30 }
 0x770   :  { %3429 = vrot.lane.b32.xlu0 %v11841_v54, %s9019_s26 }
 0x771   :  { %3431 = vrot.lane.b32.xlu1 %v11858_v37, %s9019_s26 }
 0x772   :  { %8161 = vmatpush3.bf16.msra.mxu1 %v8715_v60 }
 0x773   :  { %8162 = vmatprep.subr.bf16.mxu1 %v8716_v5  ;;  %v3384_v5 = vrot.slane %v11841_v54, 7 }
 0x774   :  { %3741 = vrot.lane.b32.xlu0 %v11870_v26, %s9021_s23 }
 0x775   :  { %3743 = vrot.lane.b32.xlu1 %v11875_v19, %s9021_s23 }
 0x776   :  { %8163 = vmatpush3.bf16.msra.mxu1 %v8717_v61 }
 0x778   :  { %3433 = vrot.lane.b32.xlu0 %v11870_v26, %s9019_s26 }
 0x779   :  { %3435 = vrot.lane.b32.xlu1 %v11875_v19, %s9019_s26 }
 0x77c   :  { %3745 = vrot.lane.b32.xlu0 %v11710_v8, %s9021_s23 }
 0x77d   :  { %3747 = vrot.lane.b32.xlu1 %v11712_v15, %s9021_s23 }
 0x780   :  { %3621 = vrot.lane.b32.xlu0 %v11912_v39, %s9019_s26 }
 0x781   :  { %3623 = vrot.lane.b32.xlu1 %v11741_v21, %s9019_s26 }
 0x784   :  { %3669 = vrot.lane.b32.xlu0 %v12007_v4, %s9020_s4 }
 0x785   :  { %3671 = vrot.lane.b32.xlu1 %v12011_v45, %s9020_s4 }
 0x788   :  { %3485 = vrot.lane.b32.xlu0 %v11916_v12, %s9020_s4 }
 0x789   :  { %3487 = vrot.lane.b32.xlu1 %v11912_v39, %s9020_s4  ;;  %v12050_v39 = vsel %vm182_vm1, %v3376_v52, %v3377_v32 }
 0x78c   :  { %3533 = vrot.lane.b32.xlu0 %v12032_v57, %s9021_s23 }
 0x78d   :  { %3535 = vrot.lane.b32.xlu1 %v12007_v4, %s9021_s23 }
 0x790   :  { %3625 = vrot.lane.b32.xlu0 %v11751_v51, %s9019_s26 }
 0x791   :  { %3627 = vrot.lane.b32.xlu1 %v11760_v20, %s9019_s26 }
 0x794   :  { %3673 = vrot.lane.b32.xlu0 %v12046_v41, %s9020_s4 }
 0x795   :  { %3675 = vrot.lane.b32.xlu1 %v12050_v39, %s9020_s4 }
 0x798   :  { %3489 = vrot.lane.b32.xlu0 %v11741_v21, %s9020_s4  ;;  %v12072_v21 = vsel %vm182_vm1, %v3377_v32, %v3378_v22 }
 0x799   :  { %3491 = vrot.lane.b32.xlu1 %v11751_v51, %s9020_s4  ;;  %v12076_v51 = vsel %vm182_vm1, %v3378_v22, %v3379_v33 }
 0x79c   :  { %3537 = vrot.lane.b32.xlu0 %v12011_v45, %s9021_s23 }
 0x79d   :  { %3539 = vrot.lane.b32.xlu1 %v12046_v41, %s9021_s23 }
 0x7a0   :  { %3629 = vrot.lane.b32.xlu0 %v11756_v18, %s9019_s26 }
 0x7a1   :  { %3631 = vrot.lane.b32.xlu1 %v11792_v47, %s9019_s26 }
 0x7a4   :  { %3677 = vrot.lane.b32.xlu0 %v12072_v21, %s9020_s4 }
 0x7a5   :  { %3679 = vrot.lane.b32.xlu1 %v12076_v51, %s9020_s4 }
 0x7a8   :  { %3493 = vrot.lane.b32.xlu0 %v11760_v20, %s9020_s4 }
 0x7a9   :  { %3495 = vrot.lane.b32.xlu1 %v11756_v18, %s9020_s4  ;;  %v12102_v18 = vsel %vm182_vm1, %v3379_v33, %v3380_v3 }
 0x7ac   :  { %3541 = vrot.lane.b32.xlu0 %v12050_v39, %s9021_s23 }
 0x7ad   :  { %3543 = vrot.lane.b32.xlu1 %v12072_v21, %s9021_s23 }
 0x7b0   :  { %3633 = vrot.lane.b32.xlu0 %v11803_v59, %s9019_s26 }
 0x7b1   :  { %3635 = vrot.lane.b32.xlu1 %v11834_v13, %s9019_s26 }
 0x7b2   :  { %v12096_v20 = vpop.permute.xlu0 %3405  ;;  %v12098_v36 = vpop.permute.xlu1 %3407 }
 0x7b4   :  { %3681 = vrot.lane.b32.xlu0 %v12102_v18, %s9020_s4 }
 0x7b5   :  { %3683 = vrot.lane.b32.xlu1 %v12106_v38, %s9020_s4 }
 0x7b6   :  { %v12112_v28 = vpop.permute.xlu0 %3717  ;;  %v12114_v25 = vpop.permute.xlu1 %3719 }
 0x7b8   :  { %3497 = vrot.lane.b32.xlu0 %v11792_v47, %s9020_s4  ;;  %v3383_v47 = vrot.slane %v11839_v35, 7 }
 0x7b9   :  { %3499 = vrot.lane.b32.xlu1 %v11803_v59, %s9020_s4 }
 0x7ba   :  { %v12120_v56 = vpop.permute.xlu0 %3409  ;;  %v12148_v48 = vsel %vm182_vm1, %v3382_v1, %v3383_v47  ;;  %v12186_v52 = vsel %vm182_vm1, %v3383_v47, %v3384_v5 }
 0x7bb   :  { %v12122_v2 = vpop.permute.xlu1 %3411  ;;  %14879 = vst [vmem:[#allocation27_spill] sm:$0xff] %v12186_v52 }
 0x7bc   :  { %3545 = vrot.lane.b32.xlu0 %v12076_v51, %s9021_s23 }
 0x7bd   :  { %3547 = vrot.lane.b32.xlu1 %v12102_v18, %s9021_s23 }
 0x7be   :  { %v12128_v0 = vpop.permute.xlu0 %3721 }
 0x7bf   :  { %v12130_v34 = vpop.permute.xlu1 %3723 }
 0x7c0   :  { %3637 = vrot.lane.b32.xlu0 %v11846_v44, %s9019_s26 }
 0x7c1   :  { %3639 = vrot.lane.b32.xlu1 %v11868_v58, %s9019_s26 }
 0x7c2   :  { %v12138_v59 = vpop.permute.xlu0 %3413 }
 0x7c3   :  { %v12140_v40 = vpop.permute.xlu1 %3415 }
 0x7c4   :  { %3685 = vrot.lane.b32.xlu0 %v12144_v43, %s9020_s4 }
 0x7c5   :  { %3687 = vrot.lane.b32.xlu1 %v12148_v48, %s9020_s4 }
 0x7c6   :  { %v12154_v6 = vpop.permute.xlu0 %3725 }
 0x7c7   :  { %v12156_v30 = vpop.permute.xlu1 %3727 }
 0x7c8   :  { %3501 = vrot.lane.b32.xlu0 %v11834_v13, %s9020_s4  ;;  %v3385_v13 = vrot.slane %v11858_v37, 7 }
 0x7c9   :  { %3503 = vrot.lane.b32.xlu1 %v11846_v44, %s9020_s4 }
 0x7ca   :  { %v12162_v49 = vpop.permute.xlu0 %3417  ;;  %v12190_v32 = vsel %vm182_vm1, %v3384_v5, %v3385_v13  ;;  %v3386_v5 = vrot.slane %v11870_v26, 7 }
 0x7cb   :  { %v12164_v29 = vpop.permute.xlu1 %3419  ;;  %14880 = vst [vmem:[#allocation28_spill] sm:$0xff] %v12190_v32 }
 0x7cc   :  { %3549 = vrot.lane.b32.xlu0 %v12106_v38, %s9021_s23 }
 0x7cd   :  { %3551 = vrot.lane.b32.xlu1 %v12144_v43, %s9021_s23 }
 0x7ce   :  { %v12170_v60 = vpop.permute.xlu0 %3729 }
 0x7cf   :  { %v12172_v16 = vpop.permute.xlu1 %3731 }
 0x7d0   :  { %3641 = vrot.lane.b32.xlu0 %v11864_v62, %s9019_s26 }
 0x7d1   :  { %3643 = vrot.lane.b32.xlu1 %v11884_v17, %s9019_s26 }
 0x7d2   :  { %v12180_v44 = vpop.permute.xlu0 %3421 }
 0x7d3   :  { %v12182_v61 = vpop.permute.xlu1 %3423 }
 0x7d4   :  { %3689 = vrot.lane.b32.xlu0 %v12186_v52, %s9020_s4 }
 0x7d5   :  { %3691 = vrot.lane.b32.xlu1 %v12190_v32, %s9020_s4 }
 0x7d6   :  { %v12196_v22 = vpop.permute.xlu0 %3733 }
 0x7d7   :  { %v12198_v33 = vpop.permute.xlu1 %3735 }
 0x7d8   :  { %3505 = vrot.lane.b32.xlu0 %v11868_v58, %s9020_s4  ;;  %v3387_v58 = vrot.slane %v11875_v19, 7 }
 0x7d9   :  { %3507 = vrot.lane.b32.xlu1 %v11864_v62, %s9020_s4 }
 0x7da   :  { %v12204_v3 = vpop.permute.xlu0 %3425  ;;  %v12232_v37 = vsel %vm182_vm1, %v3386_v5, %v3387_v58 }
 0x7db   :  { %v12206_v31 = vpop.permute.xlu1 %3427 }
 0x7dc   :  { %3553 = vrot.lane.b32.xlu0 %v12148_v48, %s9021_s23 }
 0x7dd   :  { %3555 = vrot.lane.b32.xlu1 %v12186_v52, %s9021_s23  ;;  %v12228_v52 = vsel %vm182_vm1, %v3385_v13, %v3386_v5 }
 0x7de   :  { %v12212_v1 = vpop.permute.xlu0 %3737  ;;  %14883 = vst [vmem:[#allocation31_spill] sm:$0xff] %v12228_v52 }
 0x7df   :  { %v12214_v47 = vpop.permute.xlu1 %3739 }
 0x7e0   :  { %3645 = vrot.lane.b32.xlu0 %v11889_v24, %s9019_s26 }
 0x7e1   :  { %3647 = vrot.lane.b32.xlu1 %v11899_v42, %s9019_s26 }
 0x7e2   :  { %v12222_v62 = vpop.permute.xlu0 %3429 }
 0x7e3   :  { %14881 = vst [vmem:[#allocation29_spill] sm:$0xff] %v12222_v62  ;;  %v12224_v27 = vpop.permute.xlu1 %3431 }
 0x7e4   :  { %14882 = vst [vmem:[#allocation30_spill] sm:$0xff] %v12224_v27  ;;  %3693 = vrot.lane.b32.xlu0 %v12228_v52, %s9020_s4 }
 0x7e5   :  { %3695 = vrot.lane.b32.xlu1 %v12232_v37, %s9020_s4 }
 0x7e6   :  { %v12238_v19 = vpop.permute.xlu0 %3741 }
 0x7e7   :  { %14884 = vst [vmem:[#allocation32_spill] sm:$0xff] %v12238_v19  ;;  %v12240_v26 = vpop.permute.xlu1 %3743  ;;  %v3765_v19 = vld [vmem:[#allocation7 + $0x8] sm:$0xff] }
 0x7e8   :  { %14885 = vst [vmem:[#allocation33_spill] sm:$0xff] %v12240_v26  ;;  %3509 = vrot.lane.b32.xlu0 %v11884_v17, %s9020_s4 }
 0x7e9   :  { %3511 = vrot.lane.b32.xlu1 %v11889_v24, %s9020_s4  ;;  %v14890_v24 = vrot.slane %v11710_v8, 7 }
 0x7ea   :  { %v12246_v13 = vpop.permute.xlu0 %3433 }
 0x7eb   :  { %14886 = vst [vmem:[#allocation34_spill] sm:$0xff] %v12246_v13  ;;  %v12248_v5 = vpop.permute.xlu1 %3435 }
 0x7ec   :  { %14887 = vst [vmem:[#allocation35_spill] sm:$0xff] %v12248_v5  ;;  %3557 = vrot.lane.b32.xlu0 %v12190_v32, %s9021_s23  ;;  %v3389_v5 = vsel %vm182_vm1, %v3387_v58, %v14890_v24 }
 0x7ed   :  { %3559 = vrot.lane.b32.xlu1 %v12228_v52, %s9021_s23 }
 0x7ee   :  { %v12254_v27 = vpop.permute.xlu0 %3745 }
 0x7ef   :  { %14888 = vst [vmem:[#allocation36_spill] sm:$0xff] %v12254_v27  ;;  %v12256_v62 = vpop.permute.xlu1 %3747 }
 0x7f0   :  { %14889 = vst [vmem:[#allocation37_spill] sm:$0xff] %v12256_v62  ;;  %3649 = vrot.lane.b32.xlu0 %v11895_v53, %s9019_s26 }
 0x7f1   :  { %3651 = vrot.lane.b32.xlu1 %v11916_v12, %s9019_s26 }
 0x7f2   :  { %v3622_v17 = vpop.permute.xlu0 %3621 }
 0x7f3   :  { %v3624_v13 = vpop.permute.xlu1 %3623  ;;  %v3653_v52 = vadd.f32 %v3622_v17, %v11712_v15  ;;  %v3437_v15 = vadd.f32 %v12096_v20, %v3389_v5 }
 0x7f4   :  { %3697 = vrot.lane.b32.xlu0 %v3389_v5, %s9020_s4  ;;  %v3654_v62 = vadd.f32 %v3624_v13, %v11714_v63 }
 0x7f5   :  { %3699 = vrot.lane.b32.xlu1 %v12032_v57, %s9020_s4 }
 0x7f6   :  { %v3670_v27 = vpop.permute.xlu0 %3669 }
 0x7f7   :  { %v3672_v32 = vpop.permute.xlu1 %3671  ;;  %v3701_v26 = vadd.f32 %v3670_v27, %v3653_v52  ;;  %v3438_v27 = vadd.f32 %v12098_v36, %v12032_v57 }
 0x7f8   :  { %v3702_v12 = vadd.f32 %v3672_v32, %v3654_v62  ;;  %3513 = vrot.lane.b32.xlu0 %v11899_v42, %s9020_s4 }
 0x7f9   :  { %v3749_v58 = vadd.f32 %v12112_v28, %v3701_v26  ;;  %3515 = vrot.lane.b32.xlu1 %v11895_v53, %s9020_s4  ;;  %v3581_v28 = vld [vmem:[#allocation7] sm:$0xff] }
 0x7fa   :  { %v3750_v17 = vadd.f32 %v12114_v25, %v3702_v12  ;;  %v3486_v24 = vpop.permute.xlu0 %3485  ;;  %v3582_v25 = vld [vmem:[#allocation7 + $0x18] sm:$0xff] }
 0x7fb   :  { %v3781_v13 = vmul.f32 %v3765_v19, %v3749_v58  ;;  %v3488_v63 = vpop.permute.xlu1 %3487  ;;  %v3517_v42 = vadd.f32 %v3486_v24, %v3437_v15 }
 0x7fc   :  { %v3782_v52 = vmul.f32 %v3766_v46, %v3750_v17  ;;  %3561 = vrot.lane.b32.xlu0 %v12232_v37, %s9021_s23  ;;  %v3518_v26 = vadd.f32 %v3488_v63, %v3438_v27  ;;  %v3768_v27 = vld [vmem:[#allocation7 + $0x50] sm:$0xff] }
 0x7fd   :  { %3563 = vrot.lane.b32.xlu1 %v3389_v5, %s9021_s23 }
 0x7fe   :  { %v3534_v53 = vpop.permute.xlu0 %3533  ;;  %v3797_v32 = vpack.c.bf16 %v3782_v52, %v3781_v13  ;;  %v3767_v13 = vld [vmem:[#allocation7 + $0x38] sm:$0xff] }
 0x7ff   :  { %v3536_v62 = vpop.permute.xlu1 %3535  ;;  %v3565_v12 = vadd.f32 %v3534_v53, %v3517_v42 }
 0x800   :  { %v3566_v20 = vadd.f32 %v3536_v62, %v3518_v26  ;;  %4078 = vmatprep.mubr.bf16.mxu1 %v3797_v32 }
 0x801   :  { %v3597_v19 = vmul.f32 %v3581_v28, %v3565_v12  ;;  %v3439_v28 = vadd.f32 %v12120_v56, %v12007_v4 }
 0x802   :  { %v3598_v58 = vmul.f32 %v3582_v25, %v3566_v20  ;;  %v3626_v8 = vpop.permute.xlu0 %3625  ;;  %v3583_v20 = vld [vmem:[#allocation7 + $0x30] sm:$0xff] }
 0x803   :  { %v3628_v57 = vpop.permute.xlu1 %3627  ;;  %v3655_v36 = vadd.f32 %v3626_v8, %v11716_v50  ;;  %v3440_v8 = vadd.f32 %v12122_v2, %v12011_v45 }
 0x804   :  { %v3613_v46 = vpack.c.bf16 %v3598_v58, %v3597_v19  ;;  %v3656_v15 = vadd.f32 %v3628_v57, %v11718_v11  ;;  %v3584_v57 = vld [vmem:[#allocation7 + $0x48] sm:$0xff] }
 0x806   :  { %4079 = vmatmul.mubr.bf16.vlgmr.msra.gmra.mrb[64].mxu1 %v3613_v46  ;;  %v3674_v5 = vpop.permute.xlu0 %3673 }
 0x807   :  { %v3676_v63 = vpop.permute.xlu1 %3675  ;;  %v3703_v17 = vadd.f32 %v3674_v5, %v3655_v36 }
 0x808   :  { %v3704_v24 = vadd.f32 %v3676_v63, %v3656_v15 }
 0x809   :  { %v3751_v52 = vadd.f32 %v12128_v0, %v3703_v17 }
 0x80a   :  { %v3752_v42 = vadd.f32 %v12130_v34, %v3704_v24  ;;  %v3490_v26 = vpop.permute.xlu0 %3489 }
 0x80b   :  { %v3783_v53 = vmul.f32 %v3767_v13, %v3751_v52  ;;  %v3492_v32 = vpop.permute.xlu1 %3491  ;;  %v3519_v62 = vadd.f32 %v3490_v26, %v3439_v28  ;;  %v3770_v52 = vld [vmem:[#allocation7 + $0x80] sm:$0xff] }
 0x80c   :  { %v3784_v25 = vmul.f32 %v3768_v27, %v3752_v42  ;;  %v3520_v12 = vadd.f32 %v3492_v32, %v3440_v8  ;;  %v3769_v27 = vld [vmem:[#allocation7 + $0x68] sm:$0xff] }
 0x80e   :  { %v3538_v19 = vpop.permute.xlu0 %3537  ;;  %v3798_v58 = vpack.c.bf16 %v3784_v25, %v3783_v53  ;;  %v3441_v53 = vadd.f32 %v12138_v59, %v12046_v41  ;;  %v3442_v25 = vadd.f32 %v12140_v40, %v12050_v39  ;;  %v3586_v41 = vld [vmem:[#allocation7 + $0x78] sm:$0xff] }
 0x80f   :  { %v3540_v46 = vpop.permute.xlu1 %3539  ;;  %v3567_v0 = vadd.f32 %v3538_v19, %v3519_v62 }
 0x810   :  { %v3568_v36 = vadd.f32 %v3540_v46, %v3520_v12  ;;  %4086 = vmatprep.mubr.bf16.mxu1 %v3798_v58 }
 0x811   :  { %v3599_v34 = vmul.f32 %v3583_v20, %v3567_v0 }
 0x812   :  { %v3600_v15 = vmul.f32 %v3584_v57, %v3568_v36  ;;  %v3630_v5 = vpop.permute.xlu0 %3629 }
 0x813   :  { %v3632_v4 = vpop.permute.xlu1 %3631  ;;  %v3657_v63 = vadd.f32 %v3630_v5, %v11720_v7 }
 0x814   :  { %v3614_v56 = vpack.c.bf16 %v3600_v15, %v3599_v34  ;;  %v3658_v45 = vadd.f32 %v3632_v4, %v11722_v23 }
 0x816   :  { %4087 = vmatmul.mubr.bf16.gmra.mrb[68].mxu1 %v3614_v56  ;;  %v3678_v2 = vpop.permute.xlu0 %3677 }
 0x817   :  { %v3680_v17 = vpop.permute.xlu1 %3679  ;;  %v3705_v24 = vadd.f32 %v3678_v2, %v3657_v63 }
 0x818   :  { %v3706_v13 = vadd.f32 %v3680_v17, %v3658_v45 }
 0x819   :  { %v3753_v42 = vadd.f32 %v12154_v6, %v3705_v24  ;;  %v3585_v6 = vld [vmem:[#allocation7 + $0x60] sm:$0xff] }
 0x81a   :  { %v3754_v26 = vadd.f32 %v12156_v30, %v3706_v13  ;;  %v3494_v28 = vpop.permute.xlu0 %3493 }
 0x81b   :  { %v3785_v32 = vmul.f32 %v3769_v27, %v3753_v42  ;;  %v3496_v8 = vpop.permute.xlu1 %3495  ;;  %v3521_v20 = vadd.f32 %v3494_v28, %v3441_v53 }
 0x81c   :  { %v3786_v62 = vmul.f32 %v3770_v52, %v3754_v26  ;;  %v12299_v12 = vpop.f32.mrb[80].mxu0  ;;  %v3522_v58 = vadd.f32 %v3496_v8, %v3442_v25  ;;  %v3771_v52 = vld [vmem:[#allocation7 + $0x98] sm:$0xff]  ;;  %v3772_v26 = vld [vmem:[#allocation7 + $0xb0] sm:$0xff]  ;;  %v3443_v25 = vadd.f32 %v12162_v49, %v12072_v21 }
 0x81d   :  { %v12301_v19 = vpop.f32.mrb[81].mxu0 }
 0x81e   :  { %v12303_v57 = vpop.f32.mrb[82].mxu0  ;;  %v3542_v30 = vpop.permute.xlu0 %3541  ;;  %v3799_v46 = vpack.c.bf16 %v3786_v62, %v3785_v32 }
 0x81f   :  { %v12305_v0 = vpop.f32.mrb[83].mxu0  ;;  %v3544_v59 = vpop.permute.xlu1 %3543  ;;  %v3569_v36 = vadd.f32 %v3542_v30, %v3521_v20 }
 0x820   :  { %v3570_v34 = vadd.f32 %v3544_v59, %v3522_v58  ;;  %4094 = vmatprep.mubr.bf16.mxu1 %v3799_v46  ;;  %v3444_v58 = vadd.f32 %v12164_v29, %v12076_v51 }
 0x821   :  { %v3601_v39 = vmul.f32 %v3585_v6, %v3569_v36 }
 0x822   :  { %v3602_v40 = vmul.f32 %v3586_v41, %v3570_v34  ;;  %v3634_v15 = vpop.permute.xlu0 %3633  ;;  %v3587_v41 = vld [vmem:[#allocation7 + $0x90] sm:$0xff]  ;;  %v3588_v34 = vld [vmem:[#allocation7 + $0xa8] sm:$0xff] }
 0x823   :  { %v3636_v5 = vpop.permute.xlu1 %3635  ;;  %v3659_v56 = vadd.f32 %v3634_v15, %v11769_v10 }
 0x824   :  { %v3615_v4 = vpack.c.bf16 %v3602_v40, %v3601_v39  ;;  %v3660_v63 = vadd.f32 %v3636_v5, %v11771_v14 }
 0x826   :  { %4095 = vmatmul.mubr.bf16.gmra.mrb[72].mxu1 %v3615_v4  ;;  %v3682_v45 = vpop.permute.xlu0 %3681 }
 0x827   :  { %v3684_v17 = vpop.permute.xlu1 %3683  ;;  %v3707_v24 = vadd.f32 %v3682_v45, %v3659_v56 }
 0x828   :  { %v12309_v2 = vpop.f32.mrb[84].mxu0  ;;  %v3708_v27 = vadd.f32 %v3684_v17, %v3660_v63 }
 0x829   :  { %v12311_v13 = vpop.f32.mrb[85].mxu0  ;;  %v3755_v28 = vadd.f32 %v12170_v60, %v3707_v24 }
 0x82a   :  { %v12313_v42 = vpop.f32.mrb[86].mxu0  ;;  %v3756_v32 = vadd.f32 %v12172_v16, %v3708_v27  ;;  %v3498_v8 = vpop.permute.xlu0 %3497 }
 0x82b   :  { %v12316_v53 = vpop.f32.mrb[87].mxu0  ;;  %v3787_v62 = vmul.f32 %v3771_v52, %v3755_v28  ;;  %v3500_v20 = vpop.permute.xlu1 %3499  ;;  %v3523_v30 = vadd.f32 %v3498_v8, %v3443_v25  ;;  %v3774_v25 = vld [vmem:[#allocation7 + $0xe0] sm:$0xff] }
 0x82c   :  { %v3788_v6 = vmul.f32 %v3772_v26, %v3756_v32  ;;  %v3524_v46 = vadd.f32 %v3500_v20, %v3444_v58  ;;  %v3773_v32 = vld [vmem:[#allocation7 + $0xc8] sm:$0xff] }
 0x82e   :  { %v3546_v59 = vpop.permute.xlu0 %3545  ;;  %v3800_v36 = vpack.c.bf16 %v3788_v6, %v3787_v62 }
 0x82f   :  { %v3548_v39 = vpop.permute.xlu1 %3547  ;;  %v3571_v16 = vadd.f32 %v3546_v59, %v3523_v30  ;;  %v3445_v30 = vadd.f32 %v12180_v44, %v12102_v18  ;;  %v3446_v59 = vadd.f32 %v12182_v61, %v12106_v38 }
 0x830   :  { %v12323_v60 = vpop.f32.mrb[88].mxu0  ;;  %v3572_v15 = vadd.f32 %v3548_v39, %v3524_v46  ;;  %4102 = vmatprep.mubr.bf16.mxu1 %v3800_v36 }
 0x831   :  { %v12325_v40 = vpop.f32.mrb[89].mxu0  ;;  %v3603_v49 = vmul.f32 %v3587_v41, %v3571_v16  ;;  %v3589_v16 = vld [vmem:[#allocation7 + $0xc0] sm:$0xff] }
 0x832   :  { %v12327_v21 = vpop.f32.mrb[90].mxu0  ;;  %v3604_v51 = vmul.f32 %v3588_v34, %v3572_v15  ;;  %v3638_v29 = vpop.permute.xlu0 %3637 }
 0x833   :  { %v12329_v5 = vpop.f32.mrb[91].mxu0  ;;  %v3640_v4 = vpop.permute.xlu1 %3639  ;;  %v3661_v63 = vadd.f32 %v3638_v29, %v11807_v9 }
 0x834   :  { %v3616_v56 = vpack.c.bf16 %v3604_v51, %v3603_v49  ;;  %v3662_v45 = vadd.f32 %v3640_v4, %v11816_v55 }
 0x836   :  { %4103 = vmatmul.mubr.bf16.gmra.mrb[76].mxu1 %v3616_v56  ;;  %v3686_v17 = vpop.permute.xlu0 %3685 }
 0x837   :  { %v3688_v27 = vpop.permute.xlu1 %3687  ;;  %v3709_v52 = vadd.f32 %v3686_v17, %v3661_v63 }
 0x838   :  { %v12333_v24 = vpop.f32.mrb[92].mxu0  ;;  %v3710_v28 = vadd.f32 %v3688_v27, %v3662_v45 }
 0x839   :  { %v12335_v26 = vpop.f32.mrb[93].mxu0  ;;  %v3757_v62 = vadd.f32 %v12196_v22, %v3709_v52  ;;  %v3590_v22 = vld [vmem:[#allocation7 + $0xd8] sm:$0xff] }
 0x83a   :  { %v12337_v8 = vpop.f32.mrb[94].mxu0  ;;  %v3758_v58 = vadd.f32 %v12198_v33, %v3710_v28  ;;  %v3502_v6 = vpop.permute.xlu0 %3501  ;;  %v3775_v28 = vld [vmem:[#allocation7 + $0xf8] sm:$0xff] }
 0x83b   :  { %v12340_v20 = vpop.f32.mrb[95].mxu0  ;;  %v3789_v46 = vmul.f32 %v3773_v32, %v3757_v62  ;;  %v3504_v41 = vpop.permute.xlu1 %3503  ;;  %v3525_v34 = vadd.f32 %v3502_v6, %v3445_v30  ;;  %v3776_v32 = vld [vmem:[#allocation7 + $0x110] sm:$0xff]  ;;  %v3447_v6 = vadd.f32 %v12204_v3, %v12144_v43 }
 0x83c   :  { %v3790_v36 = vmul.f32 %v3774_v25, %v3758_v58  ;;  %v3526_v39 = vadd.f32 %v3504_v41, %v3446_v59  ;;  %v3448_v41 = vadd.f32 %v12206_v31, %v12148_v48 }
 0x83e   :  { %v3550_v15 = vpop.permute.xlu0 %3549  ;;  %v3801_v49 = vpack.c.bf16 %v3790_v36, %v3789_v46 }
 0x83f   :  { %v3552_v51 = vpop.permute.xlu1 %3551  ;;  %v3573_v29 = vadd.f32 %v3550_v15, %v3525_v34 }
 0x840   :  { %v3574_v4 = vadd.f32 %v3552_v51, %v3526_v39  ;;  %4110 = vmatprep.mubr.bf16.mxu1 %v3801_v49  ;;  %v3591_v39 = vld [vmem:[#allocation7 + $0xf0] sm:$0xff]  ;;  %v3592_v49 = vld [vmem:[#allocation7 + $0x108] sm:$0xff] }
 0x841   :  { %v3605_v33 = vmul.f32 %v3589_v16, %v3573_v29 }
 0x842   :  { %v3606_v56 = vmul.f32 %v3590_v22, %v3574_v4  ;;  %v3642_v63 = vpop.permute.xlu0 %3641 }
 0x843   :  { %v3644_v18 = vpop.permute.xlu1 %3643  ;;  %v3663_v45 = vadd.f32 %v3642_v63, %v11839_v35  ;;  %v14892_v63 = vld [vmem:[#allocation54_spill] sm:$0xff] }
 0x844   :  { %v3617_v44 = vpack.c.bf16 %v3606_v56, %v3605_v33  ;;  %v3664_v38 = vadd.f32 %v3644_v18, %v11841_v54  ;;  %v14891_v33 = vld [vmem:[#allocation53_spill] sm:$0xff] }
 0x846   :  { %4111 = vmatmul.mubr.bf16.gmra.mrb[80].mxu1 %v3617_v44  ;;  %v3690_v61 = vpop.permute.xlu0 %3689 }
 0x847   :  { %v3692_v17 = vpop.permute.xlu1 %3691  ;;  %v3711_v27 = vadd.f32 %v3690_v61, %v3663_v45  ;;  %v3778_v61 = vld [vmem:[#allocation7 + $0x140] sm:$0xff] }
 0x848   :  { %v3712_v52 = vadd.f32 %v3692_v17, %v3664_v38  ;;  %v3777_v38 = vld [vmem:[#allocation7 + $0x128] sm:$0xff]  ;;  %v14893_v17 = vld [vmem:[#allocation32_spill] sm:$0xff] }
 0x849   :  { %v3759_v25 = vadd.f32 %v12212_v1, %v3711_v27 }
 0x84a   :  { %v3760_v62 = vadd.f32 %v12214_v47, %v3712_v52  ;;  %v3506_v58 = vpop.permute.xlu0 %3505  ;;  %v14894_v52 = vld [vmem:[#allocation33_spill] sm:$0xff] }
 0x84b   :  { %v3791_v30 = vmul.f32 %v3775_v28, %v3759_v25  ;;  %v3508_v46 = vpop.permute.xlu1 %3507  ;;  %v3527_v36 = vadd.f32 %v3506_v58, %v3447_v6  ;;  %v14895_v25 = vld [vmem:[#allocation27_spill] sm:$0xff] }
 0x84c   :  { %v3792_v59 = vmul.f32 %v3776_v32, %v3760_v62  ;;  %v3528_v34 = vadd.f32 %v3508_v46, %v3448_v41  ;;  %v14896_v62 = vld [vmem:[#allocation29_spill] sm:$0xff]  ;;  %v14897_v46 = vld [vmem:[#allocation28_spill] sm:$0xff]  ;;  %v14898_v41 = vld [vmem:[#allocation30_spill] sm:$0xff] }
 0x84d   :  { %v3449_v58 = vadd.f32 %v14896_v62, %v14895_v25  ;;  %v14902_v25 = vld [vmem:[#allocation37_spill] sm:$0xff] }
 0x84e   :  { %v3554_v16 = vpop.permute.xlu0 %3553  ;;  %v3802_v15 = vpack.c.bf16 %v3792_v59, %v3791_v30  ;;  %v3450_v59 = vadd.f32 %v14898_v41, %v14897_v46 }
 0x84f   :  { %v3556_v22 = vpop.permute.xlu1 %3555  ;;  %v3575_v1 = vadd.f32 %v3554_v16, %v3527_v36  ;;  %v3593_v16 = vld [vmem:[#allocation7 + $0x120] sm:$0xff] }
 0x850   :  { %v3576_v51 = vadd.f32 %v3556_v22, %v3528_v34  ;;  %4118 = vmatprep.mubr.bf16.mxu1 %v3802_v15  ;;  %v3594_v22 = vld [vmem:[#allocation7 + $0x138] sm:$0xff] }
 0x851   :  { %v3607_v47 = vmul.f32 %v3591_v39, %v3575_v1 }
 0x852   :  { %v3608_v29 = vmul.f32 %v3592_v49, %v3576_v51  ;;  %v3646_v4 = vpop.permute.xlu0 %3645 }
 0x853   :  { %v3648_v43 = vpop.permute.xlu1 %3647  ;;  %v3665_v56 = vadd.f32 %v3646_v4, %v14891_v33 }
 0x854   :  { %v3618_v3 = vpack.c.bf16 %v3608_v29, %v3607_v47  ;;  %v3666_v48 = vadd.f32 %v3648_v43, %v14892_v63 }
 0x856   :  { %4119 = vmatmul.mubr.bf16.gmra.mrb[84].mxu1 %v3618_v3  ;;  %v3694_v31 = vpop.permute.xlu0 %3693 }
 0x857   :  { %v3696_v18 = vpop.permute.xlu1 %3695  ;;  %v3713_v44 = vadd.f32 %v3694_v31, %v3665_v56 }
 0x858   :  { %v3714_v45 = vadd.f32 %v3696_v18, %v3666_v48  ;;  %v14899_v48 = vld [vmem:[#allocation26_spill] sm:$0xff]  ;;  %v14900_v18 = vld [vmem:[#allocation48_spill] sm:$0xff] }
 0x859   :  { %v3761_v27 = vadd.f32 %v14893_v17, %v3713_v44 }
 0x85a   :  { %v3762_v28 = vadd.f32 %v14894_v52, %v3714_v45  ;;  %v3510_v32 = vpop.permute.xlu0 %3509  ;;  %v3780_v52 = vld [vmem:[#allocation7 + $0x170] sm:$0xff] }
 0x85b   :  { %v3793_v6 = vmul.f32 %v3777_v38, %v3761_v27  ;;  %v3512_v30 = vpop.permute.xlu1 %3511  ;;  %v3529_v34 = vadd.f32 %v3510_v32, %v3449_v58  ;;  %v3779_v27 = vld [vmem:[#allocation7 + $0x158] sm:$0xff] }
 0x85c   :  { %v3794_v36 = vmul.f32 %v3778_v61, %v3762_v28  ;;  %v3530_v39 = vadd.f32 %v3512_v30, %v3450_v59  ;;  %v14901_v28 = vld [vmem:[#allocation36_spill] sm:$0xff]  ;;  %v14904_v30 = vld [vmem:[#allocation34_spill] sm:$0xff] }
 0x85e   :  { %v3558_v15 = vpop.permute.xlu0 %3557  ;;  %v3803_v49 = vpack.c.bf16 %v3794_v36, %v3793_v6  ;;  %v14903_v6 = vld [vmem:[#allocation31_spill] sm:$0xff] }
 0x85f   :  { %v3560_v1 = vpop.permute.xlu1 %3559  ;;  %v3577_v51 = vadd.f32 %v3558_v15, %v3529_v34  ;;  %v3451_v46 = vadd.f32 %v14904_v30, %v14903_v6  ;;  %v14905_v36 = vld [vmem:[#allocation35_spill] sm:$0xff] }
 0x860   :  { %v3578_v47 = vadd.f32 %v3560_v1, %v3530_v39  ;;  %4126 = vmatprep.mubr.bf16.mxu1 %v3803_v49  ;;  %v3452_v34 = vadd.f32 %v14905_v36, %v12232_v37  ;;  %v3595_v49 = vld [vmem:[#allocation7 + $0x150] sm:$0xff] }
 0x861   :  { %v3609_v29 = vmul.f32 %v3593_v16, %v3577_v51  ;;  %v3596_v51 = vld [vmem:[#allocation7 + $0x168] sm:$0xff] }
 0x862   :  { %v3610_v4 = vmul.f32 %v3594_v22, %v3578_v47  ;;  %v3650_v43 = vpop.permute.xlu0 %3649 }
 0x863   :  { %v3652_v3 = vpop.permute.xlu1 %3651  ;;  %v3667_v31 = vadd.f32 %v3650_v43, %v14899_v48 }
 0x864   :  { %v3619_v56 = vpack.c.bf16 %v3610_v4, %v3609_v29  ;;  %v3668_v44 = vadd.f32 %v3652_v3, %v14900_v18 }
 0x866   :  { %4127 = vmatmul.mubr.bf16.gmra.mrb[88].mxu1 %v3619_v56  ;;  %v3698_v45 = vpop.permute.xlu0 %3697 }
 0x867   :  { %v3700_v38 = vpop.permute.xlu1 %3699  ;;  %v3715_v61 = vadd.f32 %v3698_v45, %v3667_v31 }
 0x868   :  { %v3716_v17 = vadd.f32 %v3700_v38, %v3668_v44  ;;  %v12371_v44 = vld [vmem:[#allocation10 + $0x3] ss:$0 sm:$0xff] }
 0x869   :  { %v3763_v32 = vadd.f32 %v14901_v28, %v3715_v61 }
 0x86a   :  { %v3764_v62 = vadd.f32 %v14902_v25, %v3716_v17  ;;  %v3514_v58 = vpop.permute.xlu0 %3513 }
 0x86b   :  { %v3795_v41 = vmul.f32 %v3779_v27, %v3763_v32  ;;  %v3516_v59 = vpop.permute.xlu1 %3515  ;;  %v3531_v16 = vadd.f32 %v3514_v58, %v3451_v46 }
 0x86c   :  { %v3796_v39 = vmul.f32 %v3780_v52, %v3764_v62  ;;  %v3532_v15 = vadd.f32 %v3516_v59, %v3452_v34 }
 0x86e   :  { %v3562_v22 = vpop.permute.xlu0 %3561  ;;  %v3804_v1 = vpack.c.bf16 %v3796_v39, %v3795_v41 }
 0x86f   :  { %v3564_v47 = vpop.permute.xlu1 %3563  ;;  %v3579_v29 = vadd.f32 %v3562_v22, %v3531_v16 }
 0x870   :  { %v3580_v4 = vadd.f32 %v3564_v47, %v3532_v15  ;;  %4134 = vmatprep.mubr.bf16.mxu1 %v3804_v1 }
 0x871   :  { %v3611_v43 = vmul.f32 %v3595_v49, %v3579_v29 }
 0x872   :  { %v3612_v3 = vmul.f32 %v3596_v51, %v3580_v4 }
 0x874   :  { %v3620_v56 = vpack.c.bf16 %v3612_v3, %v3611_v43  ;;  %v8718_v3 = vld [vmem:[%s14677_s2 + $0x380] sm:$0xff]  }
 0x875   :  { %8538 = vmatprep.subr.bf16.mxu1 %v8718_v3 }
 0x876   :  { %4135 = vmatmul.mubr.bf16.gmra.mrb[92].mxu1 %v3620_v56 }
 0x877   :  { %8539 = vmatpush3.bf16.msra.mxu1 %v8718_v3 }
 0x8d9   :  { %v8164_v31 = vpop.f32.mrb[64].mxu1 }
 0x8da   :  { %v8165_v45 = vpop.f32.mrb[65].mxu1 }
 0x8db   :  { %v8166_v37 = vadd.f32 %v8165_v45, %v8164_v31  ;;  %v8167_v38 = vpop.f32.mrb[66].mxu1 }
 0x8dc   :  { %v8168_v61 = vpop.f32.mrb[67].mxu1 }
 0x8dd   :  { %v4081_v17 = vadd.f32 %v8166_v37, %v12371_v44  ;;  %v8169_v27 = vadd.f32 %v8168_v61, %v8167_v38  ;;  %v8720_v61 = vld [vmem:[%s14677_s2 + $0x390] sm:$0xff]  }
 0x8df   :  { %v4178_v52 = vadd.f32 %v12301_v19, %v4081_v17  ;;  %v4084_v28 = vadd.f32 %v8169_v27, %v12371_v44 }
 0x8e1   :  { %v12376_v32 = vmax.f32 %v4178_v52, 0.0  ;;  %v4181_v25 = vadd.f32 %v12305_v0, %v4084_v28 }
 0x8e3   :  { %v12379_v62 = vmax.f32 %v4181_v25, 0.0  ;;  %v4277_v58 = vmul.f32 %v12376_v32, %v12376_v32  ;;  %v8721_v25 = vld [vmem:[%s14677_s2 + $0x398] sm:$0xff]  }
 0x8e5   :  { %v4256_v6 = vadd.f32 %v12379_v62, %v12376_v32  ;;  %v4278_v30 = vmul.f32 %v12379_v62, %v12379_v62 }
 0x8e7   :  { %v4293_v46 = vadd.f32 %v4278_v30, %v4277_v58 }
 0x8e9   :  { %v8170_v41 = vpop.f32.mrb[68].mxu1 }
 0x8ea   :  { %v8171_v19 = vpop.f32.mrb[69].mxu1 }
 0x8eb   :  { %v8172_v59 = vadd.f32 %v8171_v19, %v8170_v41  ;;  %v8173_v36 = vpop.f32.mrb[70].mxu1 }
 0x8ec   :  { %v8174_v34 = vpop.f32.mrb[71].mxu1 }
 0x8ed   :  { %v4089_v39 = vadd.f32 %v8172_v59, %v12371_v44  ;;  %v8175_v0 = vadd.f32 %v8174_v34, %v8173_v36  ;;  %v8723_v34 = vld [vmem:[%s14677_s2 + $0x3a8] sm:$0xff]  }
 0x8ef   :  { %v4186_v16 = vadd.f32 %v12299_v12, %v4089_v39  ;;  %v4092_v15 = vadd.f32 %v8175_v0, %v12371_v44 }
 0x8f1   :  { %v12390_v49 = vmax.f32 %v4186_v16, 0.0  ;;  %v4189_v22 = vadd.f32 %v12303_v57, %v4092_v15  ;;  %v8719_v57 = vld [vmem:[%s14677_s2 + $0x388] sm:$0xff]  }
 0x8f2   :  { %8540 = vmatprep.subr.bf16.mxu1 %v8719_v57 }
 0x8f3   :  { %v4257_v1 = vadd.f32 %v4256_v6, %v12390_v49  ;;  %v4279_v51 = vmul.f32 %v12390_v49, %v12390_v49  ;;  %v12396_v47 = vmax.f32 %v4189_v22, 0.0  ;;  %8541 = vmatpush3.bf16.msra.mxu1 %v8719_v57 }
 0x8f4   :  { %8542 = vmatprep.subr.bf16.mxu1 %v8720_v61 }
 0x8f5   :  { %v4294_v29 = vadd.f32 %v4293_v46, %v4279_v51  ;;  %v4258_v4 = vadd.f32 %v4257_v1, %v12396_v47  ;;  %v4280_v43 = vmul.f32 %v12396_v47, %v12396_v47  ;;  %v8724_v1 = vld [vmem:[%s14677_s2 + $0x3b0] sm:$0xff]  }
 0x8f7   :  { %v4295_v12 = vadd.f32 %v4294_v29, %v4280_v43  ;;  %8543 = vmatpush3.bf16.msra.mxu1 %v8720_v61 }
 0x8f8   :  { %8544 = vmatprep.subr.bf16.mxu1 %v8721_v25 }
 0x8f9   :  { %v8176_v56 = vpop.f32.mrb[72].mxu1 }
 0x8fa   :  { %v8177_v31 = vpop.f32.mrb[73].mxu1 }
 0x8fb   :  { %v8178_v45 = vadd.f32 %v8177_v31, %v8176_v56  ;;  %v8179_v37 = vpop.f32.mrb[74].mxu1  ;;  %8545 = vmatpush3.bf16.msra.mxu1 %v8721_v25 }
 0x8fc   :  { %v8180_v38 = vpop.f32.mrb[75].mxu1 }
 0x8fd   :  { %v4097_v17 = vadd.f32 %v8178_v45, %v12371_v44  ;;  %v8181_v27 = vadd.f32 %v8180_v38, %v8179_v37 }
 0x8ff   :  { %v4194_v52 = vadd.f32 %v12311_v13, %v4097_v17  ;;  %v4100_v28 = vadd.f32 %v8181_v27, %v12371_v44  ;;  %v8722_v13 = vld [vmem:[%s14677_s2 + $0x3a0] sm:$0xff]  }
 0x900   :  { %8546 = vmatprep.subr.bf16.mxu1 %v8722_v13 }
 0x901   :  { %v12416_v58 = vmax.f32 %v4194_v52, 0.0  ;;  %v4197_v6 = vadd.f32 %v12316_v53, %v4100_v28  ;;  %8547 = vmatpush3.bf16.msra.mxu1 %v8722_v13 }
 0x902   :  { %8548 = vmatprep.subr.bf16.mxu1 %v8723_v34 }
 0x903   :  { %v4259_v30 = vadd.f32 %v4258_v4, %v12416_v58  ;;  %v4281_v46 = vmul.f32 %v12416_v58, %v12416_v58  ;;  %v12422_v41 = vmax.f32 %v4197_v6, 0.0 }
 0x905   :  { %v4296_v19 = vadd.f32 %v4295_v12, %v4281_v46  ;;  %v4260_v59 = vadd.f32 %v4259_v30, %v12422_v41  ;;  %v4282_v36 = vmul.f32 %v12422_v41, %v12422_v41  ;;  %8549 = vmatpush3.bf16.msra.mxu1 %v8723_v34  ;;  %v8725_v12 = vld [vmem:[%s14677_s2 + $0x3b8] sm:$0xff]  }
 0x906   :  { %8550 = vmatprep.subr.bf16.mxu1 %v8724_v1 }
 0x907   :  { %v4297_v53 = vadd.f32 %v4296_v19, %v4282_v36 }
 0x909   :  { %v8182_v39 = vpop.f32.mrb[76].mxu1  ;;  %8551 = vmatpush3.bf16.msra.mxu1 %v8724_v1 }
 0x90a   :  { %v8183_v0 = vpop.f32.mrb[77].mxu1  ;;  %8552 = vmatprep.subr.bf16.mxu1 %v8725_v12 }
 0x90b   :  { %v8184_v16 = vadd.f32 %v8183_v0, %v8182_v39  ;;  %v8185_v15 = vpop.f32.mrb[78].mxu1 }
 0x90c   :  { %v8186_v22 = vpop.f32.mrb[79].mxu1 }
 0x90d   :  { %v4105_v51 = vadd.f32 %v8184_v16, %v12371_v44  ;;  %v8187_v29 = vadd.f32 %v8186_v22, %v8185_v15  ;;  %8553 = vmatpush3.bf16.msra.mxu1 %v8725_v12 }
 0x90f   :  { %v4202_v4 = vadd.f32 %v12309_v2, %v4105_v51  ;;  %v4108_v43 = vadd.f32 %v8187_v29, %v12371_v44 }
 0x911   :  { %v12442_v3 = vmax.f32 %v4202_v4, 0.0  ;;  %v4205_v57 = vadd.f32 %v12313_v42, %v4108_v43 }
 0x913   :  { %v4261_v56 = vadd.f32 %v4260_v59, %v12442_v3  ;;  %v4283_v31 = vmul.f32 %v12442_v3, %v12442_v3  ;;  %v12448_v45 = vmax.f32 %v4205_v57, 0.0 }
 0x915   :  { %v4298_v2 = vadd.f32 %v4297_v53, %v4283_v31  ;;  %v4262_v37 = vadd.f32 %v4261_v56, %v12448_v45  ;;  %v4284_v38 = vmul.f32 %v12448_v45, %v12448_v45 }
 0x917   :  { %v4299_v61 = vadd.f32 %v4298_v2, %v4284_v38 }
 0x919   :  { %v8188_v17 = vpop.f32.mrb[80].mxu1 }
 0x91a   :  { %v8189_v27 = vpop.f32.mrb[81].mxu1 }
 0x91b   :  { %v8190_v42 = vadd.f32 %v8189_v27, %v8188_v17  ;;  %v8191_v52 = vpop.f32.mrb[82].mxu1 }
 0x91c   :  { %v8192_v28 = vpop.f32.mrb[83].mxu1 }
 0x91d   :  { %v4113_v25 = vadd.f32 %v8190_v42, %v12371_v44  ;;  %v8193_v6 = vadd.f32 %v8192_v28, %v8191_v52 }
 0x91f   :  { %v4210_v30 = vadd.f32 %v12325_v40, %v4113_v25  ;;  %v4116_v46 = vadd.f32 %v8193_v6, %v12371_v44 }
 0x921   :  { %v12456_v13 = vmax.f32 %v4210_v30, 0.0  ;;  %v4213_v19 = vadd.f32 %v12329_v5, %v4116_v46 }
 0x923   :  { %v4263_v59 = vadd.f32 %v4262_v37, %v12456_v13  ;;  %v4285_v36 = vmul.f32 %v12456_v13, %v12456_v13  ;;  %v12462_v53 = vmax.f32 %v4213_v19, 0.0 }
 0x925   :  { %v4300_v34 = vadd.f32 %v4299_v61, %v4285_v36  ;;  %v4264_v39 = vadd.f32 %v4263_v59, %v12462_v53  ;;  %v4286_v0 = vmul.f32 %v12462_v53, %v12462_v53 }
 0x927   :  { %v4301_v40 = vadd.f32 %v4300_v34, %v4286_v0 }
 0x929   :  { %v8194_v16 = vpop.f32.mrb[84].mxu1 }
 0x92a   :  { %v8195_v15 = vpop.f32.mrb[85].mxu1 }
 0x92b   :  { %v8196_v22 = vadd.f32 %v8195_v15, %v8194_v16  ;;  %v8197_v1 = vpop.f32.mrb[86].mxu1 }
 0x92c   :  { %v8198_v51 = vpop.f32.mrb[87].mxu1 }
 0x92d   :  { %v4121_v5 = vadd.f32 %v8196_v22, %v12371_v44  ;;  %v8199_v29 = vadd.f32 %v8198_v51, %v8197_v1 }
 0x92f   :  { %v4218_v4 = vadd.f32 %v12323_v60, %v4121_v5  ;;  %v4124_v43 = vadd.f32 %v8199_v29, %v12371_v44 }
 0x931   :  { %v12470_v12 = vmax.f32 %v4218_v4, 0.0  ;;  %v4221_v57 = vadd.f32 %v12327_v21, %v4124_v43 }
 0x933   :  { %v4265_v56 = vadd.f32 %v4264_v39, %v12470_v12  ;;  %v4287_v31 = vmul.f32 %v12470_v12, %v12470_v12  ;;  %v12476_v2 = vmax.f32 %v4221_v57, 0.0 }
 0x935   :  { %v4302_v37 = vadd.f32 %v4301_v40, %v4287_v31  ;;  %v4266_v38 = vadd.f32 %v4265_v56, %v12476_v2  ;;  %v4288_v61 = vmul.f32 %v12476_v2, %v12476_v2 }
 0x937   :  { %v4303_v60 = vadd.f32 %v4302_v37, %v4288_v61 }
 0x939   :  { %v8200_v17 = vpop.f32.mrb[88].mxu1 }
 0x93a   :  { %v8201_v27 = vpop.f32.mrb[89].mxu1 }
 0x93b   :  { %v8202_v42 = vadd.f32 %v8201_v27, %v8200_v17  ;;  %v8203_v52 = vpop.f32.mrb[90].mxu1 }
 0x93c   :  { %v8204_v28 = vpop.f32.mrb[91].mxu1 }
 0x93d   :  { %v4129_v21 = vadd.f32 %v8202_v42, %v12371_v44  ;;  %v8205_v25 = vadd.f32 %v8204_v28, %v8203_v52 }
 0x93f   :  { %v4226_v6 = vadd.f32 %v12335_v26, %v4129_v21  ;;  %v4132_v30 = vadd.f32 %v8205_v25, %v12371_v44 }
 0x941   :  { %v12484_v46 = vmax.f32 %v4226_v6, 0.0  ;;  %v4229_v19 = vadd.f32 %v12340_v20, %v4132_v30 }
 0x943   :  { %v4267_v59 = vadd.f32 %v4266_v38, %v12484_v46  ;;  %v4289_v36 = vmul.f32 %v12484_v46, %v12484_v46  ;;  %v12490_v34 = vmax.f32 %v4229_v19, 0.0 }
 0x945   :  { %v4304_v39 = vadd.f32 %v4303_v60, %v4289_v36  ;;  %v4268_v0 = vadd.f32 %v4267_v59, %v12490_v34  ;;  %v4290_v40 = vmul.f32 %v12490_v34, %v12490_v34 }
 0x947   :  { %v4305_v26 = vadd.f32 %v4304_v39, %v4290_v40 }
 0x949   :  { %v8206_v16 = vpop.f32.mrb[92].mxu1 }
 0x94a   :  { %v8207_v15 = vpop.f32.mrb[93].mxu1 }
 0x94b   :  { %v8208_v22 = vadd.f32 %v8207_v15, %v8206_v16  ;;  %v8209_v1 = vpop.f32.mrb[94].mxu1 }
 0x94c   :  { %v8210_v51 = vpop.f32.mrb[95].mxu1 }
 0x94d   :  { %v4137_v20 = vadd.f32 %v8208_v22, %v12371_v44  ;;  %v8211_v5 = vadd.f32 %v8210_v51, %v8209_v1 }
 0x94f   :  { %v4234_v29 = vadd.f32 %v12333_v24, %v4137_v20  ;;  %v4140_v4 = vadd.f32 %v8211_v5, %v12371_v44 }
 0x951   :  { %v12498_v43 = vmax.f32 %v4234_v29, 0.0  ;;  %v4237_v57 = vadd.f32 %v12337_v8, %v4140_v4 }
 0x953   :  { %v4269_v56 = vadd.f32 %v4268_v0, %v12498_v43  ;;  %v4291_v31 = vmul.f32 %v12498_v43, %v12498_v43  ;;  %v4255_v37 = vmax.f32 %v4237_v57, 0.0 }
 0x955   :  { %v4306_v38 = vadd.f32 %v4305_v26, %v4291_v31  ;;  %v4270_v61 = vadd.f32 %v4269_v56, %v4255_v37  ;;  %v4292_v60 = vmul.f32 %v4255_v37, %v4255_v37  ;;  %v12547_v31 = vld [vmem:[#allocation13 + $0x3] ss:$0 sm:$0xff] }
 0x957   :  { %v4271_v17 = vrot.slane %v4270_v61, 4  ;;  %v4307_v27 = vadd.f32 %v4306_v38, %v4292_v60 }
 0x959   :  { %v4272_v42 = vadd.f32 %v4271_v17, %v4270_v61  ;;  %v4308_v52 = vrot.slane %v4307_v27, 4 }
 0x95b   :  { %v4273_v24 = vrot.slane %v4272_v42, 2  ;;  %v4309_v28 = vadd.f32 %v4308_v52, %v4307_v27 }
 0x95d   :  { %v4274_v44 = vadd.f32 %v4273_v24, %v4272_v42  ;;  %v4310_v21 = vrot.slane %v4309_v28, 2 }
 0x95f   :  { %v4275_v25 = vrot.slane %v4274_v44, 1  ;;  %v4311_v6 = vadd.f32 %v4310_v21, %v4309_v28 }
 0x961   :  { %v4276_v8 = vadd.f32 %v4275_v25, %v4274_v44  ;;  %v4312_v30 = vrot.slane %v4311_v6, 1 }
 0x963   :  { %v4313_v19 = vadd.f32 %v4312_v30, %v4311_v6  ;;  %v12504_v59 = vmul.f32 0.0078125, %v4276_v8 }
 0x965   :  { %v4315_v36 = vmul.f32 0.0078125, %v4313_v19  ;;  %v4316_v39 = vmul.f32 %v12504_v59, %v12504_v59  ;;  %v4333_v0 = vsub.f32 %v4255_v37, %v12504_v59  ;;  %v4318_v40 = vsub.f32 %v12376_v32, %v12504_v59 }
 0x966   :  { %v4319_v26 = vsub.f32 %v12379_v62, %v12504_v59  ;;  %v4320_v16 = vsub.f32 %v12390_v49, %v12504_v59  ;;  %v4321_v15 = vsub.f32 %v12396_v47, %v12504_v59  ;;  %v4322_v22 = vsub.f32 %v12416_v58, %v12504_v59 }
 0x967   :  { %v4317_v1 = vsub.f32 %v4315_v36, %v4316_v39  ;;  %v4323_v51 = vsub.f32 %v12422_v41, %v12504_v59  ;;  %v4324_v20 = vsub.f32 %v12442_v3, %v12504_v59  ;;  %v4325_v32 = vsub.f32 %v12448_v45, %v12504_v59 }
 0x968   :  { %v4326_v62 = vsub.f32 %v12456_v13, %v12504_v59  ;;  %v4327_v49 = vsub.f32 %v12462_v53, %v12504_v59  ;;  %v4328_v47 = vsub.f32 %v12470_v12, %v12504_v59  ;;  %v4329_v58 = vsub.f32 %v12476_v2, %v12504_v59  ;;  %v12541_v53 = vld [vmem:[#allocation12 + $0x3] ss:$0 sm:$0xff] }
 0x969   :  { %v4334_v5 = vadd.f32 1e-05, %v4317_v1  ;;  %v4330_v41 = vsub.f32 %v12484_v46, %v12504_v59  ;;  %v4331_v3 = vsub.f32 %v12490_v34, %v12504_v59  ;;  %v4332_v45 = vsub.f32 %v12498_v43, %v12504_v59 }
 0x96b   :  { %8800 = vrsqrt.f32 %v4334_v5  ;;  %v4866_v5 = vld [vmem:[#allocation7 + $0x40] sm:$0xff] }
 0x975   :  { %v12539_v13 = vpop.eup %8800 }
 0x976   :  { %v4351_v29 = vmul.f32 %v12539_v13, %v4333_v0  ;;  %v4336_v4 = vmul.f32 %v12539_v13, %v4318_v40  ;;  %v4337_v57 = vmul.f32 %v12539_v13, %v4319_v26  ;;  %v4338_v56 = vmul.f32 %v12539_v13, %v4320_v16  ;;  %v4864_v16 = vld [vmem:[#allocation7 + $0x10] sm:$0xff] }
 0x977   :  { %v4339_v37 = vmul.f32 %v12539_v13, %v4321_v15  ;;  %v4340_v38 = vmul.f32 %v12539_v13, %v4322_v22  ;;  %v4341_v61 = vmul.f32 %v12539_v13, %v4323_v51  ;;  %v4342_v60 = vmul.f32 %v12539_v13, %v4324_v20  ;;  %v4865_v51 = vld [vmem:[#allocation7 + $0x28] sm:$0xff] }
 0x978   :  { %v4375_v17 = vmul.f32 %v12541_v53, %v4351_v29  ;;  %v4360_v27 = vmul.f32 %v12541_v53, %v4336_v4  ;;  %v4361_v42 = vmul.f32 %v12541_v53, %v4337_v57  ;;  %v4362_v52 = vmul.f32 %v12541_v53, %v4338_v56  ;;  %v4867_v29 = vld [vmem:[#allocation7 + $0x58] sm:$0xff]  ;;  %v4825_v57 = vld [vmem:[#allocation7 + $0x20] sm:$0xff] }
 0x979   :  { %v4363_v24 = vmul.f32 %v12541_v53, %v4339_v37  ;;  %v4364_v28 = vmul.f32 %v12541_v53, %v4340_v38  ;;  %v4365_v44 = vmul.f32 %v12541_v53, %v4341_v61  ;;  %v4343_v21 = vmul.f32 %v12539_v13, %v4325_v32 }
 0x97a   :  { %v12562_v25 = vadd.f32 %v12547_v31, %v4375_v17  ;;  %v12565_v6 = vadd.f32 %v12547_v31, %v4360_v27  ;;  %v12568_v8 = vadd.f32 %v12547_v31, %v4361_v42  ;;  %v12571_v30 = vadd.f32 %v12547_v31, %v4362_v52 }
 0x97b   :  { %v12574_v19 = vadd.f32 %v12547_v31, %v4363_v24  ;;  %v12577_v36 = vadd.f32 %v12547_v31, %v4364_v28  ;;  %v12580_v39 = vadd.f32 %v12547_v31, %v4365_v44  ;;  %v4366_v0 = vmul.f32 %v12541_v53, %v4342_v60  ;;  %v4868_v28 = vld [vmem:[#allocation7 + $0x70] sm:$0xff] }
 0x97c   :  { %14906 = vst [vmem:[#allocation38_spill] sm:$0xff] %v12562_v25  ;;  %4464 = vrot.lane.b32.xlu0 %v12562_v25, %s9019_s26  ;;  %4466 = vrot.lane.b32.xlu1 %v12565_v6, %s9019_s26  ;;  %v4513_v40 = vrot.slane %v12568_v8, 1  ;;  %v4514_v26 = vrot.slane %v12571_v30, 1  ;;  %v4367_v15 = vmul.f32 %v12541_v53, %v4343_v21  ;;  %v4344_v22 = vmul.f32 %v12539_v13, %v4326_v62  ;;  %v4869_v21 = vld [vmem:[#allocation7 + $0x88] sm:$0xff] }
 0x97d   :  { %v4515_v1 = vrot.slane %v12574_v19, 1  ;;  %v4516_v20 = vrot.slane %v12577_v36, 1  ;;  %v4517_v32 = vrot.slane %v12580_v39, 1  ;;  %v12595_v4 = vadd.f32 %v12547_v31, %v4366_v0 }
 0x97e   :  { %v12601_v56 = vsel %vm263_vm0, %v4513_v40, %v4514_v26  ;;  %v12604_v62 = vadd.f32 %v12547_v31, %v4367_v15  ;;  %v4345_v37 = vmul.f32 %v12539_v13, %v4327_v49  ;;  %v4368_v38 = vmul.f32 %v12541_v53, %v4344_v22 }
 0x97f   :  { %v12610_v61 = vsel %vm263_vm0, %v4514_v26, %v4515_v1  ;;  %v4880_v60 = vmul.f32 %v4864_v16, %v12601_v56  ;;  %v12615_v17 = vsel %vm263_vm0, %v4516_v20, %v4517_v32  ;;  %v12619_v27 = vsel %vm263_vm0, %v4515_v1, %v4516_v20 }
 0x980   :  { %4776 = vrot.lane.b32.xlu0 %v12568_v8, %s9021_s23  ;;  %4778 = vrot.lane.b32.xlu1 %v12571_v30, %s9021_s23  ;;  %v4881_v49 = vmul.f32 %v4865_v51, %v12610_v61  ;;  %v4882_v42 = vmul.f32 %v4866_v5, %v12619_v27  ;;  %v4883_v52 = vmul.f32 %v4867_v29, %v12615_v17  ;;  %v4518_v24 = vrot.slane %v12595_v4, 1  ;;  %v4870_v29 = vld [vmem:[#allocation7 + $0xa0] sm:$0xff] }
 0x981   :  { %v4519_v44 = vrot.slane %v12604_v62, 1  ;;  %v4369_v0 = vmul.f32 %v12541_v53, %v4345_v37  ;;  %v12632_v26 = vadd.f32 %v12547_v31, %v4368_v38  ;;  %v4346_v16 = vmul.f32 %v12539_v13, %v4328_v47 }
 0x982   :  { %v4896_v15 = vpack.c.bf16 %v4881_v49, %v4880_v60  ;;  %v4897_v22 = vpack.c.bf16 %v4883_v52, %v4882_v42  ;;  %v12640_v1 = vsel %vm263_vm0, %v4517_v32, %v4518_v24  ;;  %v4347_v51 = vmul.f32 %v12539_v13, %v4329_v58  ;;  %v4871_v60 = vld [vmem:[#allocation7 + $0xb8] sm:$0xff] }
 0x983   :  { %v12648_v20 = vsel %vm263_vm0, %v4518_v24, %v4519_v44  ;;  %v4884_v5 = vmul.f32 %v4868_v28, %v12640_v1  ;;  %v12652_v12 = vadd.f32 %v12547_v31, %v4369_v0  ;;  %v4520_v47 = vrot.slane %v12632_v26, 1 }
 0x984   :  { %8554 = vmatprep.mubr.bf16.mxu1 %v4896_v15  ;;  %4468 = vrot.lane.b32.xlu0 %v12568_v8, %s9019_s26  ;;  %v4885_v2 = vmul.f32 %v4869_v21, %v12648_v20  ;;  %v4370_v58 = vmul.f32 %v12541_v53, %v4346_v16  ;;  %v4371_v32 = vmul.f32 %v12541_v53, %v4347_v51  ;;  %v4872_v15 = vld [vmem:[#allocation7 + $0xd0] sm:$0xff] }
 0x985   :  { %8555 = vmatmul.mubr.bf16.vlgmr.msra.gmra.mrb[96].mxu1 %v4897_v22  ;;  %4470 = vrot.lane.b32.xlu1 %v12571_v30, %s9019_s26  ;;  %v4521_v37 = vrot.slane %v12652_v12, 1  ;;  %v12665_v38 = vsel %vm263_vm0, %v4519_v44, %v4520_v47  ;;  %v4348_v49 = vmul.f32 %v12539_v13, %v4330_v41  ;;  %v4349_v42 = vmul.f32 %v12539_v13, %v4331_v3  ;;  %v4873_v22 = vld [vmem:[#allocation7 + $0xe8] sm:$0xff] }
 0x986   :  { %v4898_v52 = vpack.c.bf16 %v4885_v2, %v4884_v5  ;;  %v4886_v24 = vmul.f32 %v4870_v29, %v12665_v38  ;;  %v12677_v28 = vadd.f32 %v12547_v31, %v4370_v58  ;;  %v12680_v44 = vadd.f32 %v12547_v31, %v4371_v32  ;;  %v4875_v32 = vld [vmem:[#allocation7 + $0x118] sm:$0xff] }
 0x987   :  { %v12684_v21 = vsel %vm263_vm0, %v4520_v47, %v4521_v37  ;;  %v4372_v46 = vmul.f32 %v12541_v53, %v4348_v49  ;;  %v4373_v41 = vmul.f32 %v12541_v53, %v4349_v42  ;;  %v4350_v34 = vmul.f32 %v12539_v13, %v4332_v45 }
 0x988   :  { %8558 = vmatprep.mubr.bf16.mxu1 %v4898_v52  ;;  %4780 = vrot.lane.b32.xlu0 %v12574_v19, %s9021_s23  ;;  %v4887_v3 = vmul.f32 %v4871_v60, %v12684_v21  ;;  %v4522_v0 = vrot.slane %v12677_v28, 1  ;;  %v4523_v16 = vrot.slane %v12680_v44, 1  ;;  %v4527_v49 = vrot.slane %v12562_v25, 1 }
 0x989   :  { %4782 = vrot.lane.b32.xlu1 %v12577_v36, %s9021_s23  ;;  %v12700_v51 = vadd.f32 %v12547_v31, %v4372_v46  ;;  %v12703_v43 = vadd.f32 %v12547_v31, %v4373_v41  ;;  %v4374_v59 = vmul.f32 %v12541_v53, %v4350_v34  ;;  %v4874_v53 = vld [vmem:[#allocation7 + $0x100] sm:$0xff]  ;;  %v4876_v46 = vld [vmem:[#allocation7 + $0x130] sm:$0xff]  ;;  %v4443_v35 = vrot.slane %v12680_v44, 7 }
 0x98a   :  { %v4899_v45 = vpack.c.bf16 %v4887_v3, %v4886_v24  ;;  %v12708_v13 = vsel %vm263_vm0, %v4522_v0, %v4523_v16  ;;  %v12712_v5 = vsel %vm263_vm0, %v4521_v37, %v4522_v0 }
 0x98b   :  { %14908 = vst [vmem:[#allocation39_spill] sm:$0xff] %v12700_v51  ;;  %14909 = vst [vmem:[#allocation40_spill] sm:$0xff] %v12703_v43  ;;  %v4888_v47 = vmul.f32 %v4872_v15, %v12712_v5  ;;  %v4889_v29 = vmul.f32 %v4873_v22, %v12708_v13  ;;  %v4524_v2 = vrot.slane %v12700_v51, 1  ;;  %v4525_v58 = vrot.slane %v12703_v43, 1 }
 0x98c   :  { %4472 = vrot.lane.b32.xlu0 %v12574_v19, %s9019_s26  ;;  %v12721_v60 = vadd.f32 %v12547_v31, %v4374_v59  ;;  %v4877_v31 = vld [vmem:[#allocation7 + $0x148] sm:$0xff]  ;;  %v4445_v50 = vrot.slane %v12703_v43, 7 }
 0x98d   :  { %8559 = vmatmul.mubr.bf16.gmra.mrb[100].mxu1 %v4899_v45  ;;  %4474 = vrot.lane.b32.xlu1 %v12577_v36, %s9019_s26  ;;  %v4900_v37 = vpack.c.bf16 %v4889_v29, %v4888_v47  ;;  %v12728_v42 = vsel %vm263_vm0, %v4524_v2, %v4525_v58  ;;  %v12732_v52 = vsel %vm263_vm0, %v4523_v16, %v4524_v2  ;;  %v4512_v16 = vrot.slane %v12565_v6, 1  ;;  %v4878_v2 = vld [vmem:[#allocation7 + $0x160] sm:$0xff] }
 0x98e   :  { %14910 = vst [vmem:[#allocation41_spill] sm:$0xff] %v12721_v60  ;;  %v4526_v24 = vrot.slane %v12721_v60, 1  ;;  %v4890_v41 = vmul.f32 %v4874_v53, %v12732_v52  ;;  %v4891_v34 = vmul.f32 %v4875_v32, %v12728_v42 }
 0x98f   :  { %8562 = vmatprep.mubr.bf16.mxu1 %v4900_v37  ;;  %v12758_v47 = vsel %vm263_vm0, %v4512_v16, %v4513_v40  ;;  %v12762_v29 = vsel %vm263_vm0, %v4527_v49, %v4512_v16  ;;  %v8727_v37 = vld [vmem:[%s14677_s2 + $0x300] sm:$0xff]   ;;  %v8733_v16 = vld [vmem:[%s14677_s2 + $0x318] sm:$0xff]  }
 0x990   :  { %4784 = vrot.lane.b32.xlu0 %v12580_v39, %s9021_s23  ;;  %v12741_v3 = vsel %vm263_vm0, %v4526_v24, %v4527_v49  ;;  %v12745_v0 = vsel %vm263_vm0, %v4525_v58, %v4526_v24  ;;  %v4901_v59 = vpack.c.bf16 %v4891_v34, %v4890_v41  ;;  %v4879_v58 = vld [vmem:[#allocation7 + $0x178] sm:$0xff]  ;;  %v4894_v53 = vmul.f32 %v4878_v2, %v12762_v29  ;;  %v8728_v24 = vld [vmem:[%s14677_s2 + $0x348] sm:$0xff]   ;;  %v8731_v41 = vld [vmem:[%s14677_s2 + $0x310] sm:$0xff]  }
 0x991   :  { %4786 = vrot.lane.b32.xlu1 %v12595_v4, %s9021_s23  ;;  %v4892_v15 = vmul.f32 %v4876_v46, %v12745_v0  ;;  %v4893_v22 = vmul.f32 %v4877_v31, %v12741_v3  ;;  %v4895_v32 = vmul.f32 %v4879_v58, %v12758_v47  ;;  %v8726_v49 = vld [vmem:[%s14677_s2 + $0x340] sm:$0xff]   ;;  %v8729_v46 = vld [vmem:[%s14677_s2 + $0x308] sm:$0xff]   ;;  %v8730_v31 = vld [vmem:[%s14677_s2 + $0x350] sm:$0xff]   ;;  %v4433_v58 = vrot.slane %v12568_v8, 7 }
 0x992   :  { %8228 = vmatprep.subr.bf16.mxu0 %v8726_v49  ;;  %v8732_v34 = vld [vmem:[%s14677_s2 + $0x358] sm:$0xff]   ;;  %v8738_v2 = vld [vmem:[%s14677_s2 + $0x370] sm:$0xff]  }
 0x993   :  { %v4902_v45 = vpack.c.bf16 %v4893_v22, %v4892_v15  ;;  %v4903_v40 = vpack.c.bf16 %v4895_v32, %v4894_v53  ;;  %8229 = vmatpush3.bf16.msra.mxu0 %v8727_v37  ;;  %v8734_v15 = vld [vmem:[%s14677_s2 + $0x360] sm:$0xff]   ;;  %v4432_v53 = vrot.slane %v12565_v6, 7  ;;  %v8739_v32 = vld [vmem:[%s14677_s2 + $0x330] sm:$0xff]  }
 0x994   :  { %4476 = vrot.lane.b32.xlu0 %v12580_v39, %s9019_s26  ;;  %8230 = vmatprep.subr.bf16.mxu0 %v8728_v24  ;;  %v8735_v22 = vld [vmem:[%s14677_s2 + $0x320] sm:$0xff]   ;;  %v8740_v24 = vld [vmem:[%s14677_s2 + $0x378] sm:$0xff]  }
 0x995   :  { %8563 = vmatmul.mubr.bf16.gmra.mrb[104].mxu1 %v4901_v59  ;;  %4478 = vrot.lane.b32.xlu1 %v12595_v4, %s9019_s26  ;;  %v8736_v59 = vld [vmem:[%s14677_s2 + $0x368] sm:$0xff]   ;;  %v12855_v49 = vsel %vm182_vm1, %v4432_v53, %v4433_v58 }
 0x996   :  { %8566 = vmatprep.mubr.bf16.mxu1 %v4902_v45  ;;  %v8737_v45 = vld [vmem:[%s14677_s2 + $0x328] sm:$0xff]  }
 0x997   :  { %8231 = vmatpush3.bf16.msra.mxu0 %v8729_v46  ;;  %v8741_v46 = vld [vmem:[%s14677_s2 + $0x338] sm:$0xff]  }
 0x998   :  { %4788 = vrot.lane.b32.xlu0 %v12604_v62, %s9021_s23  ;;  %8232 = vmatprep.subr.bf16.mxu0 %v8730_v31  ;;  %v14742_v31 = vrot.slane %v12562_v25, 7 }
 0x999   :  { %4790 = vrot.lane.b32.xlu1 %v12632_v26, %s9021_s23 }
 0x99b   :  { %8233 = vmatpush3.bf16.msra.mxu0 %v8731_v41  ;;  %v12880_v41 = vsel %vm182_vm1, %v14742_v31, %v4432_v53 }
 0x99c   :  { %4480 = vrot.lane.b32.xlu0 %v12604_v62, %s9019_s26  ;;  %8234 = vmatprep.subr.bf16.mxu0 %v8732_v34  ;;  %v4435_v34 = vrot.slane %v12574_v19, 7 }
 0x99d   :  { %4482 = vrot.lane.b32.xlu1 %v12632_v26, %s9019_s26  ;;  %8567 = vmatmul.mubr.bf16.gmra.mrb[108].mxu1 %v4903_v40  ;;  %v4434_v40 = vrot.slane %v12571_v30, 7 }
 0x99f   :  { %8235 = vmatpush3.bf16.msra.mxu0 %v8733_v16  ;;  %v12859_v37 = vsel %vm182_vm1, %v4433_v58, %v4434_v40  ;;  %v4436_v16 = vrot.slane %v12577_v36, 7 }
 0x9a0   :  { %4792 = vrot.lane.b32.xlu0 %v12652_v12, %s9021_s23  ;;  %8236 = vmatprep.subr.bf16.mxu0 %v8734_v15 }
 0x9a1   :  { %4794 = vrot.lane.b32.xlu1 %v12677_v28, %s9021_s23  ;;  %v12898_v15 = vsel %vm182_vm1, %v4435_v34, %v4436_v16 }
 0x9a3   :  { %8237 = vmatpush3.bf16.msra.mxu0 %v8735_v22  ;;  %v4437_v22 = vrot.slane %v12580_v39, 7 }
 0x9a4   :  { %4484 = vrot.lane.b32.xlu0 %v12652_v12, %s9019_s26  ;;  %8238 = vmatprep.subr.bf16.mxu0 %v8736_v59  ;;  %v4438_v59 = vrot.slane %v12595_v4, 7 }
 0x9a5   :  { %4486 = vrot.lane.b32.xlu1 %v12677_v28, %s9019_s26 }
 0x9a7   :  { %8239 = vmatpush3.bf16.msra.mxu0 %v8737_v45  ;;  %v4439_v45 = vrot.slane %v12604_v62, 7 }
 0x9a8   :  { %4796 = vrot.lane.b32.xlu0 %v12680_v44, %s9021_s23  ;;  %8240 = vmatprep.subr.bf16.mxu0 %v8738_v2  ;;  %v4440_v2 = vrot.slane %v12632_v26, 7 }
 0x9a9   :  { %4798 = vrot.lane.b32.xlu1 %v12700_v51, %s9021_s23 }
 0x9aa   :  { %v12954_v53 = vsel %vm182_vm1, %v4439_v45, %v4440_v2 }
 0x9ab   :  { %8241 = vmatpush3.bf16.msra.mxu0 %v8739_v32 }
 0x9ac   :  { %4488 = vrot.lane.b32.xlu0 %v12680_v44, %s9019_s26  ;;  %8242 = vmatprep.subr.bf16.mxu0 %v8740_v24 }
 0x9ad   :  { %4490 = vrot.lane.b32.xlu1 %v12700_v51, %s9019_s26 }
 0x9af   :  { %8243 = vmatpush3.bf16.msra.mxu0 %v8741_v46 }
 0x9b0   :  { %4800 = vrot.lane.b32.xlu0 %v12703_v43, %s9021_s23 }
 0x9b1   :  { %4802 = vrot.lane.b32.xlu1 %v12721_v60, %s9021_s23 }
 0x9b4   :  { %4492 = vrot.lane.b32.xlu0 %v12703_v43, %s9019_s26 }
 0x9b5   :  { %4494 = vrot.lane.b32.xlu1 %v12721_v60, %s9019_s26 }
 0x9b8   :  { %4804 = vrot.lane.b32.xlu0 %v12562_v25, %s9021_s23 }
 0x9b9   :  { %4806 = vrot.lane.b32.xlu1 %v12565_v6, %s9021_s23 }
 0x9bc   :  { %4680 = vrot.lane.b32.xlu0 %v12758_v47, %s9019_s26 }
 0x9bd   :  { %4682 = vrot.lane.b32.xlu1 %v12601_v56, %s9019_s26 }
 0x9c0   :  { %4728 = vrot.lane.b32.xlu0 %v12855_v49, %s9020_s4 }
 0x9c1   :  { %4730 = vrot.lane.b32.xlu1 %v12859_v37, %s9020_s4 }
 0x9c4   :  { %4544 = vrot.lane.b32.xlu0 %v12762_v29, %s9020_s4 }
 0x9c5   :  { %4546 = vrot.lane.b32.xlu1 %v12758_v47, %s9020_s4  ;;  %v12894_v47 = vsel %vm182_vm1, %v4434_v40, %v4435_v34 }
 0x9c8   :  { %4592 = vrot.lane.b32.xlu0 %v12880_v41, %s9021_s23 }
 0x9c9   :  { %4594 = vrot.lane.b32.xlu1 %v12855_v49, %s9021_s23 }
 0x9cc   :  { %4684 = vrot.lane.b32.xlu0 %v12610_v61, %s9019_s26 }
 0x9cd   :  { %4686 = vrot.lane.b32.xlu1 %v12619_v27, %s9019_s26 }
 0x9d0   :  { %4732 = vrot.lane.b32.xlu0 %v12894_v47, %s9020_s4 }
 0x9d1   :  { %4734 = vrot.lane.b32.xlu1 %v12898_v15, %s9020_s4 }
 0x9d4   :  { %4548 = vrot.lane.b32.xlu0 %v12601_v56, %s9020_s4  ;;  %v12920_v56 = vsel %vm182_vm1, %v4436_v16, %v4437_v22 }
 0x9d5   :  { %4550 = vrot.lane.b32.xlu1 %v12610_v61, %s9020_s4  ;;  %v12924_v61 = vsel %vm182_vm1, %v4437_v22, %v4438_v59  ;;  %v4441_v22 = vrot.slane %v12652_v12, 7 }
 0x9d8   :  { %4596 = vrot.lane.b32.xlu0 %v12859_v37, %s9021_s23 }
 0x9d9   :  { %4598 = vrot.lane.b32.xlu1 %v12894_v47, %s9021_s23 }
 0x9dc   :  { %4688 = vrot.lane.b32.xlu0 %v12615_v17, %s9019_s26 }
 0x9dd   :  { %4690 = vrot.lane.b32.xlu1 %v12640_v1, %s9019_s26 }
 0x9e0   :  { %4736 = vrot.lane.b32.xlu0 %v12920_v56, %s9020_s4 }
 0x9e1   :  { %4738 = vrot.lane.b32.xlu1 %v12924_v61, %s9020_s4 }
 0x9e4   :  { %4552 = vrot.lane.b32.xlu0 %v12619_v27, %s9020_s4 }
 0x9e5   :  { %4554 = vrot.lane.b32.xlu1 %v12615_v17, %s9020_s4  ;;  %v12950_v17 = vsel %vm182_vm1, %v4438_v59, %v4439_v45  ;;  %v12992_v45 = vsel %vm182_vm1, %v4440_v2, %v4441_v22 }
 0x9e8   :  { %4600 = vrot.lane.b32.xlu0 %v12898_v15, %s9021_s23 }
 0x9e9   :  { %4602 = vrot.lane.b32.xlu1 %v12920_v56, %s9021_s23 }
 0x9ec   :  { %4692 = vrot.lane.b32.xlu0 %v12648_v20, %s9019_s26 }
 0x9ed   :  { %4694 = vrot.lane.b32.xlu1 %v12665_v38, %s9019_s26 }
 0x9ee   :  { %v12944_v27 = vpop.permute.xlu0 %4464  ;;  %v12946_v58 = vpop.permute.xlu1 %4466 }
 0x9f0   :  { %4740 = vrot.lane.b32.xlu0 %v12950_v17, %s9020_s4 }
 0x9f1   :  { %4742 = vrot.lane.b32.xlu1 %v12954_v53, %s9020_s4 }
 0x9f2   :  { %v12960_v32 = vpop.permute.xlu0 %4776  ;;  %v12962_v40 = vpop.permute.xlu1 %4778 }
 0x9f4   :  { %4556 = vrot.lane.b32.xlu0 %v12640_v1, %s9020_s4  ;;  %v4442_v1 = vrot.slane %v12677_v28, 7 }
 0x9f5   :  { %4558 = vrot.lane.b32.xlu1 %v12648_v20, %s9020_s4 }
 0x9f6   :  { %v12968_v24 = vpop.permute.xlu0 %4468  ;;  %v12996_v31 = vsel %vm182_vm1, %v4441_v22, %v4442_v1  ;;  %v13034_v9 = vsel %vm182_vm1, %v4442_v1, %v4443_v35 }
 0x9f7   :  { %v12970_v46 = vpop.permute.xlu1 %4470  ;;  %14911 = vst [vmem:[#allocation32_spill] sm:$0xff] %v13034_v9 }
 0x9f8   :  { %4604 = vrot.lane.b32.xlu0 %v12924_v61, %s9021_s23 }
 0x9f9   :  { %4606 = vrot.lane.b32.xlu1 %v12950_v17, %s9021_s23 }
 0x9fa   :  { %v12976_v34 = vpop.permute.xlu0 %4780 }
 0x9fb   :  { %v12978_v16 = vpop.permute.xlu1 %4782 }
 0x9fc   :  { %4696 = vrot.lane.b32.xlu0 %v12684_v21, %s9019_s26 }
 0x9fd   :  { %4698 = vrot.lane.b32.xlu1 %v12712_v5, %s9019_s26 }
 0x9fe   :  { %v12986_v20 = vpop.permute.xlu0 %4472 }
 0x9ff   :  { %v12988_v59 = vpop.permute.xlu1 %4474 }
 0xa00   :  { %4744 = vrot.lane.b32.xlu0 %v12992_v45, %s9020_s4 }
 0xa01   :  { %4746 = vrot.lane.b32.xlu1 %v12996_v31, %s9020_s4 }
 0xa02   :  { %v13002_v48 = vpop.permute.xlu0 %4784 }
 0xa03   :  { %v13004_v63 = vpop.permute.xlu1 %4786 }
 0xa04   :  { %4560 = vrot.lane.b32.xlu0 %v12665_v38, %s9020_s4  ;;  %v4444_v38 = vrot.slane %v12700_v51, 7 }
 0xa05   :  { %4562 = vrot.lane.b32.xlu1 %v12684_v21, %s9020_s4 }
 0xa06   :  { %v13010_v2 = vpop.permute.xlu0 %4476  ;;  %v13038_v14 = vsel %vm182_vm1, %v4443_v35, %v4444_v38 }
 0xa07   :  { %v13012_v22 = vpop.permute.xlu1 %4478  ;;  %14912 = vst [vmem:[#allocation33_spill] sm:$0xff] %v13038_v14 }
 0xa08   :  { %4608 = vrot.lane.b32.xlu0 %v12954_v53, %s9021_s23 }
 0xa09   :  { %4610 = vrot.lane.b32.xlu1 %v12992_v45, %s9021_s23 }
 0xa0a   :  { %v13018_v33 = vpop.permute.xlu0 %4788 }
 0xa0b   :  { %v13020_v54 = vpop.permute.xlu1 %4790 }
 0xa0c   :  { %4700 = vrot.lane.b32.xlu0 %v12708_v13, %s9019_s26 }
 0xa0d   :  { %4702 = vrot.lane.b32.xlu1 %v12732_v52, %s9019_s26 }
 0xa0e   :  { %v13028_v21 = vpop.permute.xlu0 %4480 }
 0xa0f   :  { %v13030_v55 = vpop.permute.xlu1 %4482 }
 0xa10   :  { %4748 = vrot.lane.b32.xlu0 %v13034_v9, %s9020_s4 }
 0xa11   :  { %4750 = vrot.lane.b32.xlu1 %v13038_v14, %s9020_s4 }
 0xa12   :  { %v13044_v10 = vpop.permute.xlu0 %4792 }
 0xa13   :  { %v13046_v23 = vpop.permute.xlu1 %4794 }
 0xa14   :  { %4564 = vrot.lane.b32.xlu0 %v12712_v5, %s9020_s4  ;;  %v4446_v5 = vrot.slane %v12721_v60, 7 }
 0xa15   :  { %4566 = vrot.lane.b32.xlu1 %v12708_v13, %s9020_s4 }
 0xa16   :  { %v13052_v1 = vpop.permute.xlu0 %4484  ;;  %v13080_v51 = vsel %vm182_vm1, %v4445_v50, %v4446_v5 }
 0xa17   :  { %v13054_v35 = vpop.permute.xlu1 %4486 }
 0xa18   :  { %4612 = vrot.lane.b32.xlu0 %v12996_v31, %s9021_s23 }
 0xa19   :  { %4614 = vrot.lane.b32.xlu1 %v13034_v9, %s9021_s23  ;;  %v13076_v9 = vsel %vm182_vm1, %v4444_v38, %v4445_v50 }
 0xa1a   :  { %v13060_v7 = vpop.permute.xlu0 %4796  ;;  %14915 = vst [vmem:[#allocation28_spill] sm:$0xff] %v13076_v9 }
 0xa1b   :  { %v13062_v11 = vpop.permute.xlu1 %4798 }
 0xa1c   :  { %4704 = vrot.lane.b32.xlu0 %v12728_v42, %s9019_s26 }
 0xa1d   :  { %4706 = vrot.lane.b32.xlu1 %v12745_v0, %s9019_s26 }
 0xa1e   :  { %v13070_v13 = vpop.permute.xlu0 %4488 }
 0xa1f   :  { %14913 = vst [vmem:[#allocation27_spill] sm:$0xff] %v13070_v13  ;;  %v13072_v18 = vpop.permute.xlu1 %4490 }
 0xa20   :  { %14914 = vst [vmem:[#allocation29_spill] sm:$0xff] %v13072_v18  ;;  %4752 = vrot.lane.b32.xlu0 %v13076_v9, %s9020_s4 }
 0xa21   :  { %4754 = vrot.lane.b32.xlu1 %v13080_v51, %s9020_s4 }
 0xa22   :  { %v13086_v60 = vpop.permute.xlu0 %4800 }
 0xa23   :  { %14916 = vst [vmem:[#allocation30_spill] sm:$0xff] %v13086_v60  ;;  %v13088_v43 = vpop.permute.xlu1 %4802  ;;  %v4824_v60 = vld [vmem:[#allocation7 + $0x8] sm:$0xff] }
 0xa24   :  { %14917 = vst [vmem:[#allocation36_spill] sm:$0xff] %v13088_v43  ;;  %4568 = vrot.lane.b32.xlu0 %v12732_v52, %s9020_s4  ;;  %v14922_v52 = vrot.slane %v12562_v25, 7 }
 0xa25   :  { %4570 = vrot.lane.b32.xlu1 %v12728_v42, %s9020_s4 }
 0xa26   :  { %v13094_v38 = vpop.permute.xlu0 %4492 }
 0xa27   :  { %14918 = vst [vmem:[#allocation37_spill] sm:$0xff] %v13094_v38  ;;  %v13096_v50 = vpop.permute.xlu1 %4494 }
 0xa28   :  { %14919 = vst [vmem:[#allocation31_spill] sm:$0xff] %v13096_v50  ;;  %4616 = vrot.lane.b32.xlu0 %v13038_v14, %s9021_s23  ;;  %v4448_v50 = vsel %vm182_vm1, %v4446_v5, %v14922_v52 }
 0xa29   :  { %4618 = vrot.lane.b32.xlu1 %v13076_v9, %s9021_s23  ;;  %v4496_v52 = vadd.f32 %v12944_v27, %v4448_v50 }
 0xa2a   :  { %v13102_v18 = vpop.permute.xlu0 %4804 }
 0xa2b   :  { %14920 = vst [vmem:[#allocation34_spill] sm:$0xff] %v13102_v18  ;;  %v13104_v13 = vpop.permute.xlu1 %4806 }
 0xa2c   :  { %14921 = vst [vmem:[#allocation35_spill] sm:$0xff] %v13104_v13  ;;  %4708 = vrot.lane.b32.xlu0 %v12741_v3, %s9019_s26 }
 0xa2d   :  { %4710 = vrot.lane.b32.xlu1 %v12762_v29, %s9019_s26 }
 0xa2e   :  { %v4681_v42 = vpop.permute.xlu0 %4680 }
 0xa2f   :  { %v4683_v38 = vpop.permute.xlu1 %4682  ;;  %v4712_v9 = vadd.f32 %v4681_v42, %v12565_v6 }
 0xa30   :  { %4756 = vrot.lane.b32.xlu0 %v4448_v50, %s9020_s4  ;;  %v4713_v13 = vadd.f32 %v4683_v38, %v12568_v8 }
 0xa31   :  { %4758 = vrot.lane.b32.xlu1 %v12880_v41, %s9020_s4 }
 0xa32   :  { %v4729_v18 = vpop.permute.xlu0 %4728 }
 0xa33   :  { %v4731_v14 = vpop.permute.xlu1 %4730  ;;  %v4760_v43 = vadd.f32 %v4729_v18, %v4712_v9 }
 0xa34   :  { %v4761_v29 = vadd.f32 %v4731_v14, %v4713_v13  ;;  %4572 = vrot.lane.b32.xlu0 %v12745_v0, %s9020_s4  ;;  %v4497_v14 = vadd.f32 %v12946_v58, %v12880_v41  ;;  %v4640_v0 = vld [vmem:[#allocation7] sm:$0xff] }
 0xa35   :  { %v4808_v5 = vadd.f32 %v12960_v32, %v4760_v43  ;;  %4574 = vrot.lane.b32.xlu1 %v12741_v3, %s9020_s4 }
 0xa36   :  { %v4809_v6 = vadd.f32 %v12962_v40, %v4761_v29  ;;  %v4545_v42 = vpop.permute.xlu0 %4544  ;;  %v4641_v40 = vld [vmem:[#allocation7 + $0x18] sm:$0xff] }
 0xa37   :  { %v4840_v8 = vmul.f32 %v4824_v60, %v4808_v5  ;;  %v4547_v38 = vpop.permute.xlu1 %4546  ;;  %v4576_v18 = vadd.f32 %v4545_v42, %v4496_v52 }
 0xa38   :  { %v4841_v9 = vmul.f32 %v4825_v57, %v4809_v6  ;;  %4620 = vrot.lane.b32.xlu0 %v13080_v51, %s9021_s23  ;;  %v4577_v43 = vadd.f32 %v4547_v38, %v4497_v14  ;;  %v4827_v14 = vld [vmem:[#allocation7 + $0x50] sm:$0xff] }
 0xa39   :  { %4622 = vrot.lane.b32.xlu1 %v4448_v50, %s9021_s23 }
 0xa3a   :  { %v4593_v3 = vpop.permute.xlu0 %4592  ;;  %v4856_v32 = vpack.c.bf16 %v4841_v9, %v4840_v8  ;;  %v4826_v8 = vld [vmem:[#allocation7 + $0x38] sm:$0xff] }
 0xa3b   :  { %v4595_v13 = vpop.permute.xlu1 %4594  ;;  %v4624_v29 = vadd.f32 %v4593_v3, %v4576_v18 }
 0xa3c   :  { %v4625_v27 = vadd.f32 %v4595_v13, %v4577_v43  ;;  %5137 = vmatprep.mubr.bf16.mxu0 %v4856_v32  ;;  %v4642_v13 = vld [vmem:[#allocation7 + $0x30] sm:$0xff] }
 0xa3d   :  { %v4656_v60 = vmul.f32 %v4640_v0, %v4624_v29  ;;  %v4498_v0 = vadd.f32 %v12968_v24, %v12855_v49 }
 0xa3e   :  { %v4657_v5 = vmul.f32 %v4641_v40, %v4625_v27  ;;  %v4685_v25 = vpop.permute.xlu0 %4684 }
 0xa3f   :  { %v4687_v41 = vpop.permute.xlu1 %4686  ;;  %v4714_v58 = vadd.f32 %v4685_v25, %v12571_v30  ;;  %v4499_v25 = vadd.f32 %v12970_v46, %v12859_v37 }
 0xa40   :  { %v4672_v57 = vpack.c.bf16 %v4657_v5, %v4656_v60  ;;  %v4715_v6 = vadd.f32 %v4687_v41, %v12574_v19  ;;  %v4643_v60 = vld [vmem:[#allocation7 + $0x48] sm:$0xff] }
 0xa42   :  { %5138 = vmatmul.mubr.bf16.vlgmr.msra.gmra.mrb[96].mxu0 %v4672_v57  ;;  %v4733_v50 = vpop.permute.xlu0 %4732 }
 0xa43   :  { %v4735_v42 = vpop.permute.xlu1 %4734  ;;  %v4762_v52 = vadd.f32 %v4733_v50, %v4714_v58 }
 0xa44   :  { %v4763_v38 = vadd.f32 %v4735_v42, %v4715_v6 }
 0xa45   :  { %v4810_v9 = vadd.f32 %v12976_v34, %v4762_v52 }
 0xa46   :  { %v4811_v18 = vadd.f32 %v12978_v16, %v4763_v38  ;;  %v4549_v43 = vpop.permute.xlu0 %4548  ;;  %v4828_v38 = vld [vmem:[#allocation7 + $0x68] sm:$0xff] }
 0xa47   :  { %v4842_v3 = vmul.f32 %v4826_v8, %v4810_v9  ;;  %v4551_v32 = vpop.permute.xlu1 %4550  ;;  %v4578_v19 = vadd.f32 %v4549_v43, %v4498_v0  ;;  %v4829_v8 = vld [vmem:[#allocation7 + $0x80] sm:$0xff]  ;;  %v4500_v43 = vadd.f32 %v12986_v20, %v12894_v47  ;;  %v4645_v47 = vld [vmem:[#allocation7 + $0x78] sm:$0xff] }
 0xa48   :  { %v4843_v30 = vmul.f32 %v4827_v14, %v4811_v18  ;;  %v4579_v40 = vadd.f32 %v4551_v32, %v4499_v25 }
 0xa4a   :  { %v4597_v29 = vpop.permute.xlu0 %4596  ;;  %v4857_v27 = vpack.c.bf16 %v4843_v30, %v4842_v3 }
 0xa4b   :  { %v4599_v5 = vpop.permute.xlu1 %4598  ;;  %v4626_v34 = vadd.f32 %v4597_v29, %v4578_v19 }
 0xa4c   :  { %v4627_v41 = vadd.f32 %v4599_v5, %v4579_v40  ;;  %5145 = vmatprep.mubr.bf16.mxu0 %v4857_v27 }
 0xa4d   :  { %v4658_v16 = vmul.f32 %v4642_v13, %v4626_v34 }
 0xa4e   :  { %v4659_v57 = vmul.f32 %v4643_v60, %v4627_v41  ;;  %v4689_v58 = vpop.permute.xlu0 %4688 }
 0xa4f   :  { %v4691_v49 = vpop.permute.xlu1 %4690  ;;  %v4716_v6 = vadd.f32 %v4689_v58, %v12577_v36  ;;  %v4501_v36 = vadd.f32 %v12988_v59, %v12898_v15 }
 0xa50   :  { %v4673_v24 = vpack.c.bf16 %v4659_v57, %v4658_v16  ;;  %v4717_v37 = vadd.f32 %v4691_v49, %v12580_v39 }
 0xa52   :  { %5146 = vmatmul.mubr.bf16.gmra.mrb[100].mxu0 %v4673_v24  ;;  %v4737_v46 = vpop.permute.xlu0 %4736 }
 0xa53   :  { %v4739_v50 = vpop.permute.xlu1 %4738  ;;  %v4764_v42 = vadd.f32 %v4737_v46, %v4716_v6 }
 0xa54   :  { %v4765_v52 = vadd.f32 %v4739_v50, %v4717_v37 }
 0xa55   :  { %v4812_v14 = vadd.f32 %v13002_v48, %v4764_v42  ;;  %v4644_v48 = vld [vmem:[#allocation7 + $0x60] sm:$0xff] }
 0xa56   :  { %v4813_v9 = vadd.f32 %v13004_v63, %v4765_v52  ;;  %v4553_v18 = vpop.permute.xlu0 %4552  ;;  %v4830_v52 = vld [vmem:[#allocation7 + $0x98] sm:$0xff] }
 0xa57   :  { %v4844_v0 = vmul.f32 %v4828_v38, %v4812_v14  ;;  %v4555_v3 = vpop.permute.xlu1 %4554  ;;  %v4580_v25 = vadd.f32 %v4553_v18, %v4500_v43  ;;  %v4831_v38 = vld [vmem:[#allocation7 + $0xb0] sm:$0xff]  ;;  %v4503_v43 = vadd.f32 %v13012_v22, %v12924_v61 }
 0xa58   :  { %v4845_v39 = vmul.f32 %v4829_v8, %v4813_v9  ;;  %v13147_v32 = vpop.f32.mrb[96].mxu1  ;;  %v4581_v19 = vadd.f32 %v4555_v3, %v4501_v36  ;;  %v4502_v9 = vadd.f32 %v13010_v2, %v12920_v56  ;;  %v4647_v56 = vld [vmem:[#allocation7 + $0xa8] sm:$0xff] }
 0xa59   :  { %v13149_v30 = vpop.f32.mrb[97].mxu1 }
 0xa5a   :  { %v13151_v40 = vpop.f32.mrb[98].mxu1  ;;  %v4601_v63 = vpop.permute.xlu0 %4600  ;;  %v4858_v13 = vpack.c.bf16 %v4845_v39, %v4844_v0 }
 0xa5b   :  { %v13153_v29 = vpop.f32.mrb[99].mxu1  ;;  %v4603_v20 = vpop.permute.xlu1 %4602  ;;  %v4628_v27 = vadd.f32 %v4601_v63, %v4580_v25 }
 0xa5c   :  { %v4629_v60 = vadd.f32 %v4603_v20, %v4581_v19  ;;  %5153 = vmatprep.mubr.bf16.mxu0 %v4858_v13 }
 0xa5d   :  { %v4660_v15 = vmul.f32 %v4644_v48, %v4628_v27 }
 0xa5e   :  { %v4661_v59 = vmul.f32 %v4645_v47, %v4629_v60  ;;  %v4693_v5 = vpop.permute.xlu0 %4692 }
 0xa5f   :  { %v4695_v34 = vpop.permute.xlu1 %4694  ;;  %v4718_v57 = vadd.f32 %v4693_v5, %v12595_v4 }
 0xa60   :  { %v13155_v41 = vpop.f32.mrb[100].mxu1  ;;  %v4674_v16 = vpack.c.bf16 %v4661_v59, %v4660_v15  ;;  %v4719_v49 = vadd.f32 %v4695_v34, %v12604_v62 }
 0xa61   :  { %v13158_v58 = vpop.f32.mrb[101].mxu1 }
 0xa62   :  { %5154 = vmatmul.mubr.bf16.gmra.mrb[104].mxu0 %v4674_v16  ;;  %v13161_v24 = vpop.f32.mrb[102].mxu1  ;;  %v4741_v6 = vpop.permute.xlu0 %4740 }
 0xa63   :  { %v13163_v37 = vpop.f32.mrb[103].mxu1  ;;  %v4743_v46 = vpop.permute.xlu1 %4742  ;;  %v4766_v50 = vadd.f32 %v4741_v6, %v4718_v57 }
 0xa64   :  { %v4767_v42 = vadd.f32 %v4743_v46, %v4719_v49 }
 0xa65   :  { %v4814_v8 = vadd.f32 %v13018_v33, %v4766_v50  ;;  %v4646_v33 = vld [vmem:[#allocation7 + $0x90] sm:$0xff] }
 0xa66   :  { %v4815_v14 = vadd.f32 %v13020_v54, %v4767_v42  ;;  %v4557_v4 = vpop.permute.xlu0 %4556  ;;  %v4832_v42 = vld [vmem:[#allocation7 + $0xc8] sm:$0xff] }
 0xa67   :  { %v4846_v62 = vmul.f32 %v4830_v52, %v4814_v8  ;;  %v4559_v18 = vpop.permute.xlu1 %4558  ;;  %v4582_v36 = vadd.f32 %v4557_v4, %v4502_v9  ;;  %v4833_v52 = vld [vmem:[#allocation7 + $0xe0] sm:$0xff]  ;;  %v4505_v9 = vadd.f32 %v13030_v55, %v12954_v53 }
 0xa68   :  { %v4847_v0 = vmul.f32 %v4831_v38, %v4815_v14  ;;  %v13171_v3 = vpop.f32.mrb[104].mxu1  ;;  %v4583_v25 = vadd.f32 %v4559_v18, %v4503_v43  ;;  %v4504_v14 = vadd.f32 %v13028_v21, %v12950_v17 }
 0xa69   :  { %v13173_v39 = vpop.f32.mrb[105].mxu1 }
 0xa6a   :  { %v13175_v19 = vpop.f32.mrb[106].mxu1  ;;  %v4605_v54 = vpop.permute.xlu0 %4604  ;;  %v4859_v48 = vpack.c.bf16 %v4847_v0, %v4846_v62  ;;  %v4648_v0 = vld [vmem:[#allocation7 + $0xc0] sm:$0xff] }
 0xa6b   :  { %v13177_v63 = vpop.f32.mrb[107].mxu1  ;;  %v4607_v2 = vpop.permute.xlu1 %4606  ;;  %v4630_v13 = vadd.f32 %v4605_v54, %v4582_v36 }
 0xa6c   :  { %v4631_v47 = vadd.f32 %v4607_v2, %v4583_v25  ;;  %5161 = vmatprep.mubr.bf16.mxu0 %v4859_v48 }
 0xa6d   :  { %v4662_v61 = vmul.f32 %v4646_v33, %v4630_v13  ;;  %v4649_v33 = vld [vmem:[#allocation7 + $0xd8] sm:$0xff] }
 0xa6e   :  { %v4663_v22 = vmul.f32 %v4647_v56, %v4631_v47  ;;  %v4697_v20 = vpop.permute.xlu0 %4696 }
 0xa6f   :  { %v4699_v27 = vpop.permute.xlu1 %4698  ;;  %v4720_v59 = vadd.f32 %v4697_v20, %v12632_v26  ;;  %v4834_v20 = vld [vmem:[#allocation7 + $0xf8] sm:$0xff] }
 0xa70   :  { %v13179_v60 = vpop.f32.mrb[108].mxu1  ;;  %v4675_v15 = vpack.c.bf16 %v4663_v22, %v4662_v61  ;;  %v4721_v34 = vadd.f32 %v4699_v27, %v12652_v12  ;;  %v4835_v27 = vld [vmem:[#allocation7 + $0x110] sm:$0xff] }
 0xa71   :  { %v13182_v5 = vpop.f32.mrb[109].mxu1 }
 0xa72   :  { %5162 = vmatmul.mubr.bf16.gmra.mrb[108].mxu0 %v4675_v15  ;;  %v13185_v16 = vpop.f32.mrb[110].mxu1  ;;  %v4745_v57 = vpop.permute.xlu0 %4744 }
 0xa73   :  { %v13187_v49 = vpop.f32.mrb[111].mxu1  ;;  %v4747_v6 = vpop.permute.xlu1 %4746  ;;  %v4768_v46 = vadd.f32 %v4745_v57, %v4720_v59  ;;  %v4506_v57 = vadd.f32 %v13052_v1, %v12992_v45 }
 0xa74   :  { %v4769_v50 = vadd.f32 %v4747_v6, %v4721_v34 }
 0xa75   :  { %v4816_v38 = vadd.f32 %v13044_v10, %v4768_v46 }
 0xa76   :  { %v4817_v8 = vadd.f32 %v13046_v23, %v4769_v50  ;;  %v4561_v26 = vpop.permute.xlu0 %4560 }
 0xa77   :  { %v4848_v12 = vmul.f32 %v4832_v42, %v4816_v38  ;;  %v4563_v4 = vpop.permute.xlu1 %4562  ;;  %v4584_v18 = vadd.f32 %v4561_v26, %v4504_v14  ;;  %v4651_v26 = vld [vmem:[#allocation7 + $0x108] sm:$0xff] }
 0xa78   :  { %v4849_v62 = vmul.f32 %v4833_v52, %v4817_v8  ;;  %v4585_v43 = vadd.f32 %v4563_v4, %v4505_v9  ;;  %v4650_v52 = vld [vmem:[#allocation7 + $0xf0] sm:$0xff] }
 0xa7a   :  { %v4609_v36 = vpop.permute.xlu0 %4608  ;;  %v4860_v25 = vpack.c.bf16 %v4849_v62, %v4848_v12  ;;  %v14923_v62 = vld [vmem:[#allocation39_spill] sm:$0xff] }
 0xa7b   :  { %v4611_v54 = vpop.permute.xlu1 %4610  ;;  %v4632_v10 = vadd.f32 %v4609_v36, %v4584_v18 }
 0xa7c   :  { %v4633_v48 = vadd.f32 %v4611_v54, %v4585_v43  ;;  %5169 = vmatprep.mubr.bf16.mxu0 %v4860_v25  ;;  %v14924_v43 = vld [vmem:[#allocation40_spill] sm:$0xff]  ;;  %v4837_v54 = vld [vmem:[#allocation7 + $0x140] sm:$0xff] }
 0xa7d   :  { %v4664_v23 = vmul.f32 %v4648_v0, %v4632_v10  ;;  %v14925_v10 = vld [vmem:[#allocation30_spill] sm:$0xff] }
 0xa7e   :  { %v4665_v56 = vmul.f32 %v4649_v33, %v4633_v48  ;;  %v4701_v2 = vpop.permute.xlu0 %4700  ;;  %v4836_v33 = vld [vmem:[#allocation7 + $0x128] sm:$0xff] }
 0xa7f   :  { %v4703_v17 = vpop.permute.xlu1 %4702  ;;  %v4722_v13 = vadd.f32 %v4701_v2, %v12677_v28  ;;  %v4507_v28 = vadd.f32 %v13054_v35, %v12996_v31 }
 0xa80   :  { %v4676_v21 = vpack.c.bf16 %v4665_v56, %v4664_v23  ;;  %v4723_v55 = vadd.f32 %v4703_v17, %v12680_v44  ;;  %v14926_v23 = vld [vmem:[#allocation36_spill] sm:$0xff] }
 0xa81   :  { %v14927_v17 = vld [vmem:[#allocation32_spill] sm:$0xff] }
 0xa82   :  { %5170 = vmatmul.mubr.bf16.gmra.mrb[112].mxu0 %v4676_v21  ;;  %v4749_v53 = vpop.permute.xlu0 %4748  ;;  %v14928_v21 = vld [vmem:[#allocation27_spill] sm:$0xff] }
 0xa83   :  { %v4751_v47 = vpop.permute.xlu1 %4750  ;;  %v4770_v61 = vadd.f32 %v4749_v53, %v4722_v13  ;;  %v4508_v13 = vadd.f32 %v14928_v21, %v14927_v17  ;;  %v4654_v21 = vld [vmem:[#allocation7 + $0x150] sm:$0xff] }
 0xa84   :  { %v4771_v22 = vadd.f32 %v4751_v47, %v4723_v55  ;;  %v14929_v47 = vld [vmem:[#allocation33_spill] sm:$0xff] }
 0xa85   :  { %v4818_v15 = vadd.f32 %v13060_v7, %v4770_v61  ;;  %v14930_v61 = vld [vmem:[#allocation29_spill] sm:$0xff] }
 0xa86   :  { %v4819_v59 = vadd.f32 %v13062_v11, %v4771_v22  ;;  %v4565_v34 = vpop.permute.xlu0 %4564  ;;  %v4509_v22 = vadd.f32 %v14930_v61, %v14929_v47 }
 0xa87   :  { %v4850_v6 = vmul.f32 %v4834_v20, %v4818_v15  ;;  %v4567_v46 = vpop.permute.xlu1 %4566  ;;  %v4586_v50 = vadd.f32 %v4565_v34, %v4506_v57 }
 0xa88   :  { %v4851_v44 = vmul.f32 %v4835_v27, %v4819_v59  ;;  %v4587_v42 = vadd.f32 %v4567_v46, %v4507_v28  ;;  %v4652_v59 = vld [vmem:[#allocation7 + $0x120] sm:$0xff] }
 0xa8a   :  { %v4613_v38 = vpop.permute.xlu0 %4612  ;;  %v4861_v8 = vpack.c.bf16 %v4851_v44, %v4850_v6  ;;  %v4653_v6 = vld [vmem:[#allocation7 + $0x138] sm:$0xff] }
 0xa8b   :  { %v4615_v14 = vpop.permute.xlu1 %4614  ;;  %v4634_v7 = vadd.f32 %v4613_v38, %v4586_v50 }
 0xa8c   :  { %v4635_v12 = vadd.f32 %v4615_v14, %v4587_v42  ;;  %5177 = vmatprep.mubr.bf16.mxu0 %v4861_v8 }
 0xa8d   :  { %v4666_v11 = vmul.f32 %v4650_v52, %v4634_v7  ;;  %v14932_v7 = vld [vmem:[#allocation38_spill] sm:$0xff] }
 0xa8e   :  { %v4667_v4 = vmul.f32 %v4651_v26, %v4635_v12  ;;  %v4705_v9 = vpop.permute.xlu0 %4704  ;;  %v14931_v26 = vld [vmem:[#allocation41_spill] sm:$0xff] }
 0xa8f   :  { %v4707_v45 = vpop.permute.xlu1 %4706  ;;  %v4724_v18 = vadd.f32 %v4705_v9, %v14923_v62  ;;  %v4839_v62 = vld [vmem:[#allocation7 + $0x170] sm:$0xff] }
 0xa90   :  { %v4677_v1 = vpack.c.bf16 %v4667_v4, %v4666_v11  ;;  %v4725_v31 = vadd.f32 %v4707_v45, %v14924_v43 }
 0xa92   :  { %5178 = vmatmul.mubr.bf16.gmra.mrb[116].mxu0 %v4677_v1  ;;  %v4753_v35 = vpop.permute.xlu0 %4752  ;;  %v4838_v1 = vld [vmem:[#allocation7 + $0x158] sm:$0xff] }
 0xa93   :  { %v4755_v0 = vpop.permute.xlu1 %4754  ;;  %v4772_v36 = vadd.f32 %v4753_v35, %v4724_v18  ;;  %v14933_v18 = vld [vmem:[#allocation34_spill] sm:$0xff] }
 0xa94   :  { %v4773_v25 = vadd.f32 %v4755_v0, %v4725_v31  ;;  %v14934_v31 = vld [vmem:[#allocation35_spill] sm:$0xff] }
 0xa95   :  { %v4820_v48 = vadd.f32 %v14925_v10, %v4772_v36  ;;  %v14935_v36 = vld [vmem:[#allocation28_spill] sm:$0xff] }
 0xa96   :  { %v4821_v56 = vadd.f32 %v14926_v23, %v4773_v25  ;;  %v4569_v2 = vpop.permute.xlu0 %4568  ;;  %v14936_v25 = vld [vmem:[#allocation37_spill] sm:$0xff] }
 0xa97   :  { %v4852_v55 = vmul.f32 %v4836_v33, %v4820_v48  ;;  %v4571_v53 = vpop.permute.xlu1 %4570  ;;  %v4588_v27 = vadd.f32 %v4569_v2, %v4508_v13  ;;  %v4510_v33 = vadd.f32 %v14936_v25, %v14935_v36  ;;  %v14937_v48 = vld [vmem:[#allocation31_spill] sm:$0xff] }
 0xa98   :  { %v4853_v20 = vmul.f32 %v4837_v54, %v4821_v56  ;;  %v4589_v15 = vadd.f32 %v4571_v53, %v4509_v22  ;;  %v4511_v23 = vadd.f32 %v14937_v48, %v13080_v51  ;;  %v4655_v53 = vld [vmem:[#allocation7 + $0x168] sm:$0xff] }
 0xa99   :  { %v8743_v25 = vld [vmem:[%s14677_s2 + $0x448] sm:$0xff]  }
 0xa9a   :  { %v4617_v34 = vpop.permute.xlu0 %4616  ;;  %v4862_v57 = vpack.c.bf16 %v4853_v20, %v4852_v55 }
 0xa9b   :  { %v4619_v46 = vpop.permute.xlu1 %4618  ;;  %v4636_v28 = vadd.f32 %v4617_v34, %v4588_v27  ;;  %v13219_v34 = vld [vmem:[#allocation10 + $0x4] ss:$0 sm:$0xff] }
 0xa9c   :  { %v4637_v44 = vadd.f32 %v4619_v46, %v4589_v15  ;;  %5185 = vmatprep.mubr.bf16.mxu0 %v4862_v57 }
 0xa9d   :  { %v4668_v50 = vmul.f32 %v4652_v59, %v4636_v28 }
 0xa9e   :  { %v4669_v42 = vmul.f32 %v4653_v6, %v4637_v44  ;;  %v4709_v52 = vpop.permute.xlu0 %4708 }
 0xa9f   :  { %v4711_v38 = vpop.permute.xlu1 %4710  ;;  %v4726_v14 = vadd.f32 %v4709_v52, %v14931_v26 }
 0xaa0   :  { %v4678_v8 = vpack.c.bf16 %v4669_v42, %v4668_v50  ;;  %v4727_v12 = vadd.f32 %v4711_v38, %v14932_v7 }
 0xaa2   :  { %5186 = vmatmul.mubr.bf16.gmra.mrb[120].mxu0 %v4678_v8  ;;  %v4757_v11 = vpop.permute.xlu0 %4756 }
 0xaa3   :  { %v4759_v4 = vpop.permute.xlu1 %4758  ;;  %v4774_v9 = vadd.f32 %v4757_v11, %v4726_v14 }
 0xaa4   :  { %v4775_v45 = vadd.f32 %v4759_v4, %v4727_v12 }
 0xaa5   :  { %v4822_v43 = vadd.f32 %v14933_v18, %v4774_v9 }
 0xaa6   :  { %v4823_v35 = vadd.f32 %v14934_v31, %v4775_v45  ;;  %v4573_v0 = vpop.permute.xlu0 %4572 }
 0xaa7   :  { %v4854_v54 = vmul.f32 %v4838_v1, %v4822_v43  ;;  %v4575_v10 = vpop.permute.xlu1 %4574  ;;  %v4590_v2 = vadd.f32 %v4573_v0, %v4510_v33 }
 0xaa8   :  { %v4855_v56 = vmul.f32 %v4839_v62, %v4823_v35  ;;  %v4591_v17 = vadd.f32 %v4575_v10, %v4511_v23 }
 0xaaa   :  { %v4621_v13 = vpop.permute.xlu0 %4620  ;;  %v4863_v55 = vpack.c.bf16 %v4855_v56, %v4854_v54  ;;  %v8744_v54 = vld [vmem:[%s14677_s2 + $0x450] sm:$0xff]  }
 0xaab   :  { %v4623_v47 = vpop.permute.xlu1 %4622  ;;  %v4638_v61 = vadd.f32 %v4621_v13, %v4590_v2 }
 0xaac   :  { %v4639_v22 = vadd.f32 %v4623_v47, %v4591_v17  ;;  %5193 = vmatprep.mubr.bf16.mxu0 %v4863_v55  ;;  %v8745_v17 = vld [vmem:[%s14677_s2 + $0x458] sm:$0xff]  }
 0xaad   :  { %v4670_v20 = vmul.f32 %v4654_v21, %v4638_v61  ;;  %v8746_v61 = vld [vmem:[%s14677_s2 + $0x460] sm:$0xff]  }
 0xaae   :  { %v4671_v27 = vmul.f32 %v4655_v53, %v4639_v22 }
 0xab0   :  { %v4679_v15 = vpack.c.bf16 %v4671_v27, %v4670_v20 }
 0xab2   :  { %5194 = vmatmul.mubr.bf16.gmra.mrb[124].mxu0 %v4679_v15 }
 0xb15   :  { %v8244_v59 = vpop.f32.mrb[96].mxu0 }
 0xb16   :  { %v8245_v57 = vpop.f32.mrb[97].mxu0 }
 0xb17   :  { %v8246_v51 = vadd.f32 %v8245_v57, %v8244_v59  ;;  %v8247_v6 = vpop.f32.mrb[98].mxu0  ;;  %v8748_v57 = vld [vmem:[%s14677_s2 + $0x470] sm:$0xff]  }
 0xb18   :  { %v8248_v46 = vpop.f32.mrb[99].mxu0 }
 0xb19   :  { %v5140_v28 = vadd.f32 %v8246_v51, %v13219_v34  ;;  %v8249_v44 = vadd.f32 %v8248_v46, %v8247_v6 }
 0xb1b   :  { %v13223_v50 = vadd.f32 %v13149_v30, %v5140_v28  ;;  %v5143_v42 = vadd.f32 %v8249_v44, %v13219_v34 }
 0xb1d   :  { %v13227_v52 = vadd.f32 %v13153_v29, %v5143_v42  ;;  %v5320_v38 = vmul.f32 %v13223_v50, %v13223_v50  ;;  %v8749_v42 = vld [vmem:[%s14677_s2 + $0x478] sm:$0xff]  }
 0xb1f   :  { %v5299_v8 = vadd.f32 %v13227_v52, %v13223_v50  ;;  %v5321_v26 = vmul.f32 %v13227_v52, %v13227_v52 }
 0xb21   :  { %v5336_v14 = vadd.f32 %v5321_v26, %v5320_v38 }
 0xb25   :  { %v8250_v7 = vpop.f32.mrb[100].mxu0 }
 0xb26   :  { %v8251_v12 = vpop.f32.mrb[101].mxu0 }
 0xb27   :  { %v8252_v11 = vadd.f32 %v8251_v12, %v8250_v7  ;;  %v8253_v30 = vpop.f32.mrb[102].mxu0 }
 0xb28   :  { %v8254_v4 = vpop.f32.mrb[103].mxu0 }
 0xb29   :  { %v5148_v9 = vadd.f32 %v8252_v11, %v13219_v34  ;;  %v8255_v45 = vadd.f32 %v8254_v4, %v8253_v30 }
 0xb2b   :  { %v13237_v29 = vadd.f32 %v13147_v32, %v5148_v9  ;;  %v5151_v1 = vadd.f32 %v8255_v45, %v13219_v34  ;;  %v8742_v32 = vld [vmem:[%s14677_s2 + $0x440] sm:$0xff]  }
 0xb2c   :  { %8570 = vmatprep.subr.bf16.mxu0 %v8742_v32 }
 0xb2d   :  { %v5300_v62 = vadd.f32 %v5299_v8, %v13237_v29  ;;  %v5322_v18 = vmul.f32 %v13237_v29, %v13237_v29  ;;  %v13244_v43 = vadd.f32 %v13151_v40, %v5151_v1  ;;  %8571 = vmatpush3.bf16.msra.mxu0 %v8742_v32 }
 0xb2e   :  { %8572 = vmatprep.subr.bf16.mxu0 %v8743_v25 }
 0xb2f   :  { %v5337_v31 = vadd.f32 %v5336_v14, %v5322_v18  ;;  %v5301_v35 = vadd.f32 %v5300_v62, %v13244_v43  ;;  %v5323_v0 = vmul.f32 %v13244_v43, %v13244_v43 }
 0xb31   :  { %v5338_v36 = vadd.f32 %v5337_v31, %v5323_v0  ;;  %8573 = vmatpush3.bf16.msra.mxu0 %v8743_v25 }
 0xb32   :  { %8574 = vmatprep.subr.bf16.mxu0 %v8744_v54 }
 0xb35   :  { %v8256_v33 = vpop.f32.mrb[104].mxu0  ;;  %8575 = vmatpush3.bf16.msra.mxu0 %v8744_v54 }
 0xb36   :  { %v8257_v40 = vpop.f32.mrb[105].mxu0  ;;  %8576 = vmatprep.subr.bf16.mxu0 %v8745_v17 }
 0xb37   :  { %v8258_v10 = vadd.f32 %v8257_v40, %v8256_v33  ;;  %v8259_v48 = vpop.f32.mrb[106].mxu0 }
 0xb38   :  { %v8260_v23 = vpop.f32.mrb[107].mxu0 }
 0xb39   :  { %v5156_v56 = vadd.f32 %v8258_v10, %v13219_v34  ;;  %v8261_v2 = vadd.f32 %v8260_v23, %v8259_v48  ;;  %8577 = vmatpush3.bf16.msra.mxu0 %v8745_v17 }
 0xb3a   :  { %8578 = vmatprep.subr.bf16.mxu0 %v8746_v61 }
 0xb3b   :  { %v13263_v21 = vadd.f32 %v13158_v58, %v5156_v56  ;;  %v5159_v13 = vadd.f32 %v8261_v2, %v13219_v34 }
 0xb3d   :  { %v5302_v55 = vadd.f32 %v5301_v35, %v13263_v21  ;;  %v5324_v53 = vmul.f32 %v13263_v21, %v13263_v21  ;;  %v13270_v47 = vadd.f32 %v13163_v37, %v5159_v13  ;;  %v8747_v37 = vld [vmem:[%s14677_s2 + $0x468] sm:$0xff]   ;;  %8579 = vmatpush3.bf16.msra.mxu0 %v8746_v61 }
 0xb3e   :  { %8580 = vmatprep.subr.bf16.mxu0 %v8747_v37 }
 0xb3f   :  { %v5339_v22 = vadd.f32 %v5338_v36, %v5324_v53  ;;  %v5303_v58 = vadd.f32 %v5302_v55, %v13270_v47  ;;  %v5325_v20 = vmul.f32 %v13270_v47, %v13270_v47 }
 0xb41   :  { %v5340_v27 = vadd.f32 %v5339_v22, %v5325_v20  ;;  %8581 = vmatpush3.bf16.msra.mxu0 %v8747_v37 }
 0xb42   :  { %8582 = vmatprep.subr.bf16.mxu0 %v8748_v57 }
 0xb45   :  { %v8262_v15 = vpop.f32.mrb[108].mxu0  ;;  %8583 = vmatpush3.bf16.msra.mxu0 %v8748_v57 }
 0xb46   :  { %v8263_v59 = vpop.f32.mrb[109].mxu0  ;;  %8584 = vmatprep.subr.bf16.mxu0 %v8749_v42 }
 0xb47   :  { %v8264_v51 = vadd.f32 %v8263_v59, %v8262_v15  ;;  %v8265_v6 = vpop.f32.mrb[110].mxu0 }
 0xb48   :  { %v8266_v46 = vpop.f32.mrb[111].mxu0 }
 0xb49   :  { %v5164_v28 = vadd.f32 %v8264_v51, %v13219_v34  ;;  %v8267_v44 = vadd.f32 %v8266_v46, %v8265_v6  ;;  %8585 = vmatpush3.bf16.msra.mxu0 %v8749_v42 }
 0xb4b   :  { %v13289_v38 = vadd.f32 %v13155_v41, %v5164_v28  ;;  %v5167_v8 = vadd.f32 %v8267_v44, %v13219_v34 }
 0xb4d   :  { %v5304_v26 = vadd.f32 %v5303_v58, %v13289_v38  ;;  %v5326_v14 = vmul.f32 %v13289_v38, %v13289_v38  ;;  %v13296_v7 = vadd.f32 %v13161_v24, %v5167_v8 }
 0xb4f   :  { %v5341_v12 = vadd.f32 %v5340_v27, %v5326_v14  ;;  %v5305_v11 = vadd.f32 %v5304_v26, %v13296_v7  ;;  %v5327_v30 = vmul.f32 %v13296_v7, %v13296_v7 }
 0xb51   :  { %v5342_v41 = vadd.f32 %v5341_v12, %v5327_v30 }
 0xb55   :  { %v8268_v4 = vpop.f32.mrb[112].mxu0 }
 0xb56   :  { %v8269_v9 = vpop.f32.mrb[113].mxu0 }
 0xb57   :  { %v8270_v45 = vadd.f32 %v8269_v9, %v8268_v4  ;;  %v8271_v1 = vpop.f32.mrb[114].mxu0 }
 0xb58   :  { %v8272_v62 = vpop.f32.mrb[115].mxu0 }
 0xb59   :  { %v5172_v18 = vadd.f32 %v8270_v45, %v13219_v34  ;;  %v8273_v31 = vadd.f32 %v8272_v62, %v8271_v1 }
 0xb5b   :  { %v13303_v24 = vadd.f32 %v13173_v39, %v5172_v18  ;;  %v5175_v35 = vadd.f32 %v8273_v31, %v13219_v34 }
 0xb5d   :  { %v5306_v0 = vadd.f32 %v5305_v11, %v13303_v24  ;;  %v5328_v36 = vmul.f32 %v13303_v24, %v13303_v24  ;;  %v13310_v32 = vadd.f32 %v13177_v63, %v5175_v35 }
 0xb5f   :  { %v5343_v25 = vadd.f32 %v5342_v41, %v5328_v36  ;;  %v5307_v33 = vadd.f32 %v5306_v0, %v13310_v32  ;;  %v5329_v40 = vmul.f32 %v13310_v32, %v13310_v32 }
 0xb61   :  { %v5344_v54 = vadd.f32 %v5343_v25, %v5329_v40 }
 0xb65   :  { %v8274_v10 = vpop.f32.mrb[116].mxu0 }
 0xb66   :  { %v8275_v39 = vpop.f32.mrb[117].mxu0 }
 0xb67   :  { %v8276_v48 = vadd.f32 %v8275_v39, %v8274_v10  ;;  %v8277_v23 = vpop.f32.mrb[118].mxu0 }
 0xb68   :  { %v8278_v56 = vpop.f32.mrb[119].mxu0 }
 0xb69   :  { %v5180_v2 = vadd.f32 %v8276_v48, %v13219_v34  ;;  %v8279_v17 = vadd.f32 %v8278_v56, %v8277_v23 }
 0xb6b   :  { %v13317_v13 = vadd.f32 %v13171_v3, %v5180_v2  ;;  %v5183_v63 = vadd.f32 %v8279_v17, %v13219_v34 }
 0xb6d   :  { %v5308_v55 = vadd.f32 %v5307_v33, %v13317_v13  ;;  %v5330_v53 = vmul.f32 %v13317_v13, %v13317_v13  ;;  %v13324_v61 = vadd.f32 %v13175_v19, %v5183_v63 }
 0xb6f   :  { %v5345_v22 = vadd.f32 %v5344_v54, %v5330_v53  ;;  %v5309_v58 = vadd.f32 %v5308_v55, %v13324_v61  ;;  %v5331_v20 = vmul.f32 %v13324_v61, %v13324_v61 }
 0xb71   :  { %v5346_v27 = vadd.f32 %v5345_v22, %v5331_v20 }
 0xb75   :  { %v8280_v37 = vpop.f32.mrb[120].mxu0 }
 0xb76   :  { %v8281_v3 = vpop.f32.mrb[121].mxu0 }
 0xb77   :  { %v8282_v15 = vadd.f32 %v8281_v3, %v8280_v37  ;;  %v8283_v59 = vpop.f32.mrb[122].mxu0 }
 0xb78   :  { %v8284_v57 = vpop.f32.mrb[123].mxu0 }
 0xb79   :  { %v5188_v51 = vadd.f32 %v8282_v15, %v13219_v34  ;;  %v8285_v6 = vadd.f32 %v8284_v57, %v8283_v59 }
 0xb7b   :  { %v13331_v46 = vadd.f32 %v13182_v5, %v5188_v51  ;;  %v5191_v19 = vadd.f32 %v8285_v6, %v13219_v34  ;;  %v13389_v51 = vld [vmem:[#allocation12 + $0x4] ss:$0 sm:$0xff] }
 0xb7d   :  { %v5310_v28 = vadd.f32 %v5309_v58, %v13331_v46  ;;  %v5332_v44 = vmul.f32 %v13331_v46, %v13331_v46  ;;  %v13338_v42 = vadd.f32 %v13187_v49, %v5191_v19 }
 0xb7f   :  { %v5347_v8 = vadd.f32 %v5346_v27, %v5332_v44  ;;  %v5311_v26 = vadd.f32 %v5310_v28, %v13338_v42  ;;  %v5333_v14 = vmul.f32 %v13338_v42, %v13338_v42 }
 0xb81   :  { %v5348_v12 = vadd.f32 %v5347_v8, %v5333_v14  ;;  %v13395_v8 = vld [vmem:[#allocation13 + $0x4] ss:$0 sm:$0xff] }
 0xb85   :  { %v8286_v11 = vpop.f32.mrb[124].mxu0 }
 0xb86   :  { %v8287_v5 = vpop.f32.mrb[125].mxu0 }
 0xb87   :  { %v8288_v30 = vadd.f32 %v8287_v5, %v8286_v11  ;;  %v8289_v41 = vpop.f32.mrb[126].mxu0 }
 0xb88   :  { %v8290_v4 = vpop.f32.mrb[127].mxu0 }
 0xb89   :  { %v5196_v9 = vadd.f32 %v8288_v30, %v13219_v34  ;;  %v8291_v45 = vadd.f32 %v8290_v4, %v8289_v41 }
 0xb8b   :  { %v13345_v1 = vadd.f32 %v13179_v60, %v5196_v9  ;;  %v5199_v49 = vadd.f32 %v8291_v45, %v13219_v34 }
 0xb8d   :  { %v5312_v62 = vadd.f32 %v5311_v26, %v13345_v1  ;;  %v5334_v18 = vmul.f32 %v13345_v1, %v13345_v1  ;;  %v5296_v31 = vadd.f32 %v13185_v16, %v5199_v49 }
 0xb8f   :  { %v5349_v35 = vadd.f32 %v5348_v12, %v5334_v18  ;;  %v5313_v0 = vadd.f32 %v5312_v62, %v5296_v31  ;;  %v5335_v36 = vmul.f32 %v5296_v31, %v5296_v31 }
 0xb91   :  { %v5314_v25 = vrot.slane %v5313_v0, 4  ;;  %v5350_v33 = vadd.f32 %v5349_v35, %v5335_v36 }
 0xb93   :  { %v5315_v40 = vadd.f32 %v5314_v25, %v5313_v0  ;;  %v5351_v54 = vrot.slane %v5350_v33, 4 }
 0xb95   :  { %v5316_v10 = vrot.slane %v5315_v40, 2  ;;  %v5352_v39 = vadd.f32 %v5351_v54, %v5350_v33  ;;  %v14938_v54 = vld [vmem:[#allocation48_spill] sm:$0xff] }
 0xb97   :  { %v5317_v60 = vadd.f32 %v5316_v10, %v5315_v40  ;;  %v5353_v48 = vrot.slane %v5352_v39, 2 }
 0xb99   :  { %v5318_v23 = vrot.slane %v5317_v60, 1  ;;  %v5354_v34 = vadd.f32 %v5353_v48, %v5352_v39  ;;  %v14939_v39 = vld [vmem:[#allocation42_spill] sm:$0xff]  ;;  %v14940_v48 = vld [vmem:[#allocation49_spill] sm:$0xff] }
 0xb9b   :  { %v5319_v56 = vadd.f32 %v5318_v23, %v5317_v60  ;;  %v5355_v2 = vrot.slane %v5354_v34, 1 }
 0xb9d   :  { %v5356_v17 = vadd.f32 %v5355_v2, %v5354_v34  ;;  %v13352_v63 = vmul.f32 0.0078125, %v5319_v56  ;;  %v14941_v34 = vld [vmem:[#allocation50_spill] sm:$0xff]  ;;  %v14942_v2 = vld [vmem:[#allocation43_spill] sm:$0xff] }
 0xb9f   :  { %v5358_v55 = vmul.f32 0.0078125, %v5356_v17  ;;  %v5359_v16 = vmul.f32 %v13352_v63, %v13352_v63  ;;  %v5376_v53 = vsub.f32 %v5296_v31, %v13352_v63  ;;  %v5361_v22 = vsub.f32 %v13223_v50, %v13352_v63 }
 0xba0   :  { %v5362_v58 = vsub.f32 %v13227_v52, %v13352_v63  ;;  %v5363_v20 = vsub.f32 %v13237_v29, %v13352_v63  ;;  %v5364_v27 = vsub.f32 %v13244_v43, %v13352_v63  ;;  %v5365_v37 = vsub.f32 %v13263_v21, %v13352_v63 }
 0xba1   :  { %v5360_v3 = vsub.f32 %v5358_v55, %v5359_v16  ;;  %v5366_v15 = vsub.f32 %v13270_v47, %v13352_v63  ;;  %v5367_v59 = vsub.f32 %v13289_v38, %v13352_v63  ;;  %v5368_v50 = vsub.f32 %v13296_v7, %v13352_v63  ;;  %v14943_v55 = vld [vmem:[#allocation51_spill] sm:$0xff] }
 0xba2   :  { %v5369_v52 = vsub.f32 %v13303_v24, %v13352_v63  ;;  %v5370_v29 = vsub.f32 %v13310_v32, %v13352_v63  ;;  %v5371_v43 = vsub.f32 %v13317_v13, %v13352_v63  ;;  %v5372_v21 = vsub.f32 %v13324_v61, %v13352_v63 }
 0xba3   :  { %v5377_v57 = vadd.f32 1e-05, %v5360_v3  ;;  %v5373_v47 = vsub.f32 %v13331_v46, %v13352_v63  ;;  %v5374_v38 = vsub.f32 %v13338_v42, %v13352_v63  ;;  %v5375_v7 = vsub.f32 %v13345_v1, %v13352_v63  ;;  %v5962_v63 = vld [vmem:[#allocation7 + $0xb8] sm:$0xff] }
 0xba5   :  { %8802 = vrsqrt.f32 %v5377_v57 }
 0xbaf   :  { %v13387_v24 = vpop.eup %8802 }
 0xbb0   :  { %v5394_v6 = vmul.f32 %v13387_v24, %v5376_v53  ;;  %v5379_v19 = vmul.f32 %v13387_v24, %v5361_v22  ;;  %v5380_v28 = vmul.f32 %v13387_v24, %v5362_v58  ;;  %v5381_v44 = vmul.f32 %v13387_v24, %v5363_v20  ;;  %v14944_v53 = vld [vmem:[#allocation45_spill] sm:$0xff] }
 0xbb1   :  { %v5382_v26 = vmul.f32 %v13387_v24, %v5364_v27  ;;  %v5383_v14 = vmul.f32 %v13387_v24, %v5365_v37  ;;  %v5384_v12 = vmul.f32 %v13387_v24, %v5366_v15  ;;  %v5385_v11 = vmul.f32 %v13387_v24, %v5367_v59 }
 0xbb2   :  { %v5418_v5 = vmul.f32 %v13389_v51, %v5394_v6  ;;  %v5403_v30 = vmul.f32 %v13389_v51, %v5379_v19  ;;  %v5404_v41 = vmul.f32 %v13389_v51, %v5380_v28  ;;  %v5405_v4 = vmul.f32 %v13389_v51, %v5381_v44  ;;  %v5955_v28 = vld [vmem:[#allocation7 + $0x10] sm:$0xff] }
 0xbb3   :  { %v5406_v9 = vmul.f32 %v13389_v51, %v5382_v26  ;;  %v5407_v45 = vmul.f32 %v13389_v51, %v5383_v14  ;;  %v5408_v49 = vmul.f32 %v13389_v51, %v5384_v12  ;;  %v5386_v62 = vmul.f32 %v13387_v24, %v5368_v50  ;;  %v5956_v12 = vld [vmem:[#allocation7 + $0x28] sm:$0xff] }
 0xbb4   :  { %v5442_v18 = vadd.f32 %v13395_v8, %v5418_v5  ;;  %v5427_v31 = vadd.f32 %v13395_v8, %v5403_v30  ;;  %v5428_v35 = vadd.f32 %v13395_v8, %v5404_v41  ;;  %v5429_v0 = vadd.f32 %v13395_v8, %v5405_v4  ;;  %v5957_v30 = vld [vmem:[#allocation7 + $0x40] sm:$0xff]  ;;  %v5958_v41 = vld [vmem:[#allocation7 + $0x58] sm:$0xff]  ;;  %v14946_v4 = vld [vmem:[#allocation52_spill] sm:$0xff] }
 0xbb5   :  { %v5430_v36 = vadd.f32 %v13395_v8, %v5406_v9  ;;  %v5431_v25 = vadd.f32 %v13395_v8, %v5407_v45  ;;  %v5432_v33 = vadd.f32 %v13395_v8, %v5408_v49  ;;  %v5409_v40 = vmul.f32 %v13389_v51, %v5385_v11  ;;  %v5916_v45 = vld [vmem:[#allocation7 + $0x20] sm:$0xff] }
 0xbb6   :  { %v5474_v10 = vadd.f32 %v5442_v18, %v14938_v54  ;;  %v5459_v60 = vadd.f32 %v5427_v31, %v14939_v39  ;;  %v5460_v23 = vadd.f32 %v5428_v35, %v14940_v48  ;;  %v5461_v56 = vadd.f32 %v5429_v0, %v14941_v34 }
 0xbb7   :  { %v5462_v17 = vadd.f32 %v5430_v36, %v14942_v2  ;;  %v5463_v16 = vadd.f32 %v5431_v25, %v14943_v55  ;;  %v5464_v22 = vadd.f32 %v5432_v33, %v14944_v53  ;;  %v5410_v58 = vmul.f32 %v13389_v51, %v5386_v62  ;;  %v14948_v62 = vld [vmem:[#allocation44_spill] sm:$0xff]  ;;  %v5960_v55 = vld [vmem:[#allocation7 + $0x88] sm:$0xff] }
 0xbb8   :  { %v13425_v20 = vmax.f32 %v5474_v10, 0.0  ;;  %v13427_v27 = vmax.f32 %v5459_v60, 0.0  ;;  %v13429_v37 = vmax.f32 %v5460_v23, 0.0  ;;  %v13431_v3 = vmax.f32 %v5461_v56, 0.0  ;;  %v5959_v56 = vld [vmem:[#allocation7 + $0x70] sm:$0xff]  ;;  %v14949_v53 = vld [vmem:[#allocation47_spill] sm:$0xff] }
 0xbb9   :  { %v13433_v15 = vmax.f32 %v5462_v17, 0.0  ;;  %v13435_v59 = vmax.f32 %v5463_v16, 0.0  ;;  %v13437_v50 = vmax.f32 %v5464_v22, 0.0  ;;  %v5433_v57 = vadd.f32 %v13395_v8, %v5409_v40 }
 0xbba   :  { %14945 = vst [vmem:[#allocation39_spill] sm:$0xff] %v13425_v20  ;;  %5555 = vrot.lane.b32.xlu0 %v13425_v20, %s9019_s26  ;;  %5557 = vrot.lane.b32.xlu1 %v13427_v27, %s9019_s26  ;;  %v5604_v6 = vrot.slane %v13429_v37, 1  ;;  %v5605_v19 = vrot.slane %v13431_v3, 1  ;;  %v5434_v44 = vadd.f32 %v13395_v8, %v5410_v58  ;;  %v5387_v26 = vmul.f32 %v13387_v24, %v5369_v52 }
 0xbbb   :  { %v5606_v14 = vrot.slane %v13433_v15, 1  ;;  %v5607_v11 = vrot.slane %v13435_v59, 1  ;;  %v5608_v5 = vrot.slane %v13437_v50, 1  ;;  %v5465_v9 = vadd.f32 %v5433_v57, %v14946_v4 }
 0xbbc   :  { %v13456_v49 = vsel %vm263_vm0, %v5604_v6, %v5605_v19  ;;  %v5466_v18 = vadd.f32 %v5434_v44, %v14948_v62  ;;  %v5388_v52 = vmul.f32 %v13387_v24, %v5370_v29  ;;  %v5411_v31 = vmul.f32 %v13389_v51, %v5387_v26  ;;  %v14952_v62 = vld [vmem:[#allocation46_spill] sm:$0xff] }
 0xbbd   :  { %v13466_v35 = vsel %vm263_vm0, %v5605_v19, %v5606_v14  ;;  %v5971_v0 = vmul.f32 %v5955_v28, %v13456_v49  ;;  %v13471_v36 = vsel %vm263_vm0, %v5607_v11, %v5608_v5  ;;  %v13475_v25 = vsel %vm263_vm0, %v5606_v14, %v5607_v11  ;;  %v14950_v19 = vld [vmem:[#allocation55_spill] sm:$0xff] }
 0xbbe   :  { %5867 = vrot.lane.b32.xlu0 %v13429_v37, %s9021_s23  ;;  %5869 = vrot.lane.b32.xlu1 %v13431_v3, %s9021_s23  ;;  %v5972_v32 = vmul.f32 %v5956_v12, %v13466_v35  ;;  %v5973_v29 = vmul.f32 %v5957_v30, %v13475_v25  ;;  %v5974_v33 = vmul.f32 %v5958_v41, %v13471_v36  ;;  %v13484_v40 = vmax.f32 %v5465_v9, 0.0  ;;  %v14951_v9 = vld [vmem:[#allocation56_spill] sm:$0xff] }
 0xbbf   :  { %v13486_v54 = vmax.f32 %v5466_v18, 0.0  ;;  %v5412_v10 = vmul.f32 %v13389_v51, %v5388_v52  ;;  %v5435_v39 = vadd.f32 %v13395_v8, %v5411_v31  ;;  %v5389_v60 = vmul.f32 %v13387_v24, %v5371_v43 }
 0xbc0   :  { %v5987_v48 = vpack.c.bf16 %v5972_v32, %v5971_v0  ;;  %v5988_v23 = vpack.c.bf16 %v5974_v33, %v5973_v29  ;;  %v5609_v34 = vrot.slane %v13484_v40, 1  ;;  %v5390_v2 = vmul.f32 %v13387_v24, %v5372_v21 }
 0xbc1   :  { %v5610_v17 = vrot.slane %v13486_v54, 1  ;;  %v5436_v16 = vadd.f32 %v13395_v8, %v5412_v10  ;;  %v5467_v22 = vadd.f32 %v5435_v39, %v14949_v53  ;;  %v5413_v13 = vmul.f32 %v13389_v51, %v5389_v60  ;;  %v14953_v10 = vld [vmem:[#allocation53_spill] sm:$0xff] }
 0xbc2   :  { %8586 = vmatprep.mubr.bf16.mxu0 %v5987_v48  ;;  %5559 = vrot.lane.b32.xlu0 %v13429_v37, %s9019_s26  ;;  %v13507_v43 = vsel %vm263_vm0, %v5608_v5, %v5609_v34  ;;  %v5414_v61 = vmul.f32 %v13389_v51, %v5390_v2  ;;  %v5391_v21 = vmul.f32 %v13387_v24, %v5373_v47  ;;  %v5961_v5 = vld [vmem:[#allocation7 + $0xa0] sm:$0xff]  ;;  %v5618_v53 = vrot.slane %v13425_v20, 1 }
 0xbc3   :  { %8587 = vmatmul.mubr.bf16.vlgmr.msra.gmra.mrb[128].mxu0 %v5988_v23  ;;  %5561 = vrot.lane.b32.xlu1 %v13431_v3, %s9019_s26  ;;  %v13518_v58 = vsel %vm263_vm0, %v5609_v34, %v5610_v17  ;;  %v5975_v57 = vmul.f32 %v5959_v56, %v13507_v43  ;;  %v5468_v28 = vadd.f32 %v5436_v16, %v14950_v19  ;;  %v13522_v44 = vmax.f32 %v5467_v22, 0.0  ;;  %v5963_v34 = vld [vmem:[#allocation7 + $0xd0] sm:$0xff]  ;;  %v5964_v56 = vld [vmem:[#allocation7 + $0xe8] sm:$0xff]  ;;  %v14954_v2 = vld [vmem:[#allocation54_spill] sm:$0xff] }
 0xbc4   :  { %v5976_v26 = vmul.f32 %v5960_v55, %v13518_v58  ;;  %v5437_v46 = vadd.f32 %v13395_v8, %v5413_v13  ;;  %v5438_v47 = vadd.f32 %v13395_v8, %v5414_v61  ;;  %v5392_v14 = vmul.f32 %v13387_v24, %v5374_v38  ;;  %v14956_v16 = vld [vmem:[#allocation26_spill] sm:$0xff] }
 0xbc5   :  { %v13531_v12 = vmax.f32 %v5468_v28, 0.0  ;;  %v5611_v11 = vrot.slane %v13522_v44, 1  ;;  %v5415_v30 = vmul.f32 %v13389_v51, %v5391_v21  ;;  %v5393_v41 = vmul.f32 %v13387_v24, %v5375_v7 }
 0xbc6   :  { %v5989_v4 = vpack.c.bf16 %v5976_v26, %v5975_v57  ;;  %5871 = vrot.lane.b32.xlu0 %v13433_v15, %s9021_s23  ;;  %v5469_v42 = vadd.f32 %v5437_v46, %v14951_v9  ;;  %v5470_v38 = vadd.f32 %v5438_v47, %v14952_v62  ;;  %v5416_v18 = vmul.f32 %v13389_v51, %v5392_v14  ;;  %v5965_v26 = vld [vmem:[#allocation7 + $0x100] sm:$0xff]  ;;  %v5966_v14 = vld [vmem:[#allocation7 + $0x118] sm:$0xff] }
 0xbc7   :  { %5873 = vrot.lane.b32.xlu1 %v13435_v59, %s9021_s23  ;;  %v5612_v52 = vrot.slane %v13531_v12, 1  ;;  %v13549_v1 = vsel %vm263_vm0, %v5610_v17, %v5611_v11  ;;  %v5439_v7 = vadd.f32 %v13395_v8, %v5415_v30  ;;  %v5417_v24 = vmul.f32 %v13389_v51, %v5393_v41  ;;  %v5967_v41 = vld [vmem:[#allocation7 + $0x130] sm:$0xff] }
 0xbc8   :  { %8590 = vmatprep.mubr.bf16.mxu0 %v5989_v4  ;;  %v5977_v31 = vmul.f32 %v5961_v5, %v13549_v1  ;;  %v13554_v0 = vmax.f32 %v5469_v42, 0.0  ;;  %v13556_v32 = vmax.f32 %v5470_v38, 0.0  ;;  %v5440_v29 = vadd.f32 %v13395_v8, %v5416_v18  ;;  %v5968_v4 = vld [vmem:[#allocation7 + $0x148] sm:$0xff] }
 0xbc9   :  { %v13561_v33 = vsel %vm263_vm0, %v5611_v11, %v5612_v52  ;;  %v5471_v39 = vadd.f32 %v5439_v7, %v14953_v10  ;;  %v5441_v60 = vadd.f32 %v13395_v8, %v5417_v24 }
 0xbca   :  { %5563 = vrot.lane.b32.xlu0 %v13433_v15, %s9019_s26  ;;  %v5978_v51 = vmul.f32 %v5962_v63, %v13561_v33  ;;  %v5613_v48 = vrot.slane %v13554_v0, 1  ;;  %v5614_v23 = vrot.slane %v13556_v32, 1  ;;  %v5472_v17 = vadd.f32 %v5440_v29, %v14954_v2  ;;  %v8753_v2 = vld [vmem:[%s14677_s2 + $0x3c8] sm:$0xff]  }
 0xbcb   :  { %5565 = vrot.lane.b32.xlu1 %v13435_v59, %s9019_s26  ;;  %v13573_v55 = vmax.f32 %v5471_v39, 0.0  ;;  %v5473_v8 = vadd.f32 %v5441_v60, %v14956_v16  ;;  %v5969_v39 = vld [vmem:[#allocation7 + $0x160] sm:$0xff]  ;;  %v5970_v60 = vld [vmem:[#allocation7 + $0x178] sm:$0xff]  ;;  %v8755_v16 = vld [vmem:[%s14677_s2 + $0x3d0] sm:$0xff]  }
 0xbcc   :  { %v5990_v22 = vpack.c.bf16 %v5978_v51, %v5977_v31  ;;  %v13579_v13 = vsel %vm263_vm0, %v5613_v48, %v5614_v23  ;;  %v13583_v61 = vsel %vm263_vm0, %v5612_v52, %v5613_v48  ;;  %v13585_v21 = vmax.f32 %v5472_v17, 0.0  ;;  %v8754_v17 = vld [vmem:[%s14677_s2 + $0x410] sm:$0xff]  }
 0xbcd   :  { %14955 = vst [vmem:[#allocation40_spill] sm:$0xff] %v13573_v55  ;;  %v5979_v57 = vmul.f32 %v5963_v34, %v13583_v61  ;;  %v5980_v19 = vmul.f32 %v5964_v56, %v13579_v13  ;;  %v5615_v28 = vrot.slane %v13573_v55, 1  ;;  %v13590_v46 = vmax.f32 %v5473_v8, 0.0  ;;  %v8751_v34 = vld [vmem:[%s14677_s2 + $0x3c0] sm:$0xff]   ;;  %v8752_v56 = vld [vmem:[%s14677_s2 + $0x408] sm:$0xff]   ;;  %v8756_v8 = vld [vmem:[%s14677_s2 + $0x418] sm:$0xff]  }
 0xbce   :  { %14957 = vst [vmem:[#allocation30_spill] sm:$0xff] %v13585_v21  ;;  %8591 = vmatmul.mubr.bf16.gmra.mrb[132].mxu0 %v5990_v22  ;;  %5875 = vrot.lane.b32.xlu0 %v13437_v50, %s9021_s23  ;;  %v5616_v47 = vrot.slane %v13585_v21, 1  ;;  %v5603_v52 = vrot.slane %v13427_v27, 1  ;;  %v8758_v22 = vld [vmem:[%s14677_s2 + $0x420] sm:$0xff]  }
 0xbcf   :  { %14958 = vst [vmem:[#allocation36_spill] sm:$0xff] %v13590_v46  ;;  %v5991_v11 = vpack.c.bf16 %v5980_v19, %v5979_v57  ;;  %5877 = vrot.lane.b32.xlu1 %v13484_v40, %s9021_s23  ;;  %v13599_v5 = vsel %vm263_vm0, %v5614_v23, %v5615_v28  ;;  %v5617_v30 = vrot.slane %v13590_v46, 1  ;;  %v8750_v23 = vld [vmem:[%s14677_s2 + $0x400] sm:$0xff]   ;;  %v8760_v19 = vld [vmem:[%s14677_s2 + $0x428] sm:$0xff]  }
 0xbd0   :  { %v13604_v9 = vsel %vm263_vm0, %v5615_v28, %v5616_v47  ;;  %v5981_v42 = vmul.f32 %v5965_v26, %v13599_v5  ;;  %v13627_v29 = vsel %vm263_vm0, %v5603_v52, %v5604_v6  ;;  %v13631_v10 = vsel %vm263_vm0, %v5618_v53, %v5603_v52  ;;  %8308 = vmatprep.subr.bf16.mxu1 %v8750_v23  ;;  %v8759_v57 = vld [vmem:[%s14677_s2 + $0x3e0] sm:$0xff]   ;;  %v8761_v28 = vld [vmem:[%s14677_s2 + $0x3e8] sm:$0xff]   ;;  %v8762_v26 = vld [vmem:[%s14677_s2 + $0x430] sm:$0xff]  }
 0xbd1   :  { %8594 = vmatprep.mubr.bf16.mxu0 %v5991_v11  ;;  %v5982_v62 = vmul.f32 %v5966_v14, %v13604_v9  ;;  %v13610_v38 = vsel %vm263_vm0, %v5617_v30, %v5618_v53  ;;  %v13614_v18 = vsel %vm263_vm0, %v5616_v47, %v5617_v30  ;;  %v5985_v51 = vmul.f32 %v5969_v39, %v13631_v10  ;;  %v8757_v53 = vld [vmem:[%s14677_s2 + $0x3d8] sm:$0xff]   ;;  %v8763_v11 = vld [vmem:[%s14677_s2 + $0x3f0] sm:$0xff]  }
 0xbd2   :  { %5567 = vrot.lane.b32.xlu0 %v13437_v50, %s9019_s26  ;;  %v5983_v63 = vmul.f32 %v5967_v41, %v13614_v18  ;;  %v5984_v7 = vmul.f32 %v5968_v4, %v13610_v38  ;;  %v5986_v48 = vmul.f32 %v5970_v60, %v13627_v29  ;;  %8309 = vmatpush3.bf16.msra.mxu1 %v8751_v34  ;;  %v5524_v47 = vrot.slane %v13429_v37, 7 }
 0xbd3   :  { %5569 = vrot.lane.b32.xlu1 %v13484_v40, %s9019_s26  ;;  %v5992_v24 = vpack.c.bf16 %v5982_v62, %v5981_v42  ;;  %8310 = vmatprep.subr.bf16.mxu1 %v8752_v56  ;;  %v5523_v14 = vrot.slane %v13427_v27, 7  ;;  %v5525_v30 = vrot.slane %v13431_v3, 7  ;;  %v8764_v42 = vld [vmem:[%s14677_s2 + $0x438] sm:$0xff]   ;;  %v14761_v52 = vrot.slane %v13425_v20, 7 }
 0xbd4   :  { %v5993_v31 = vpack.c.bf16 %v5984_v7, %v5983_v63  ;;  %v5994_v6 = vpack.c.bf16 %v5986_v48, %v5985_v51  ;;  %v8765_v62 = vld [vmem:[%s14677_s2 + $0x3f8] sm:$0xff]   ;;  %v5526_v7 = vrot.slane %v13433_v15, 7  ;;  %v5528_v39 = vrot.slane %v13437_v50, 7 }
 0xbd5   :  { %v13722_v41 = vsel %vm182_vm1, %v5523_v14, %v5524_v47  ;;  %v13726_v4 = vsel %vm182_vm1, %v5524_v47, %v5525_v30  ;;  %v13747_v63 = vsel %vm182_vm1, %v14761_v52, %v5523_v14  ;;  %v5529_v60 = vrot.slane %v13484_v40, 7 }
 0xbd6   :  { %8595 = vmatmul.mubr.bf16.gmra.mrb[136].mxu0 %v5992_v24  ;;  %5879 = vrot.lane.b32.xlu0 %v13486_v54, %s9021_s23  ;;  %v5527_v24 = vrot.slane %v13435_v59, 7  ;;  %v5530_v51 = vrot.slane %v13486_v54, 7  ;;  %v5531_v48 = vrot.slane %v13522_v44, 7 }
 0xbd7   :  { %8598 = vmatprep.mubr.bf16.mxu0 %v5993_v31  ;;  %5881 = vrot.lane.b32.xlu1 %v13522_v44, %s9021_s23  ;;  %v13761_v31 = vsel %vm182_vm1, %v5525_v30, %v5526_v7 }
 0xbd8   :  { %8311 = vmatpush3.bf16.msra.mxu1 %v8753_v2  ;;  %v13821_v23 = vsel %vm182_vm1, %v5530_v51, %v5531_v48 }
 0xbd9   :  { %8312 = vmatprep.subr.bf16.mxu1 %v8754_v17 }
 0xbda   :  { %5571 = vrot.lane.b32.xlu0 %v13486_v54, %s9019_s26 }
 0xbdb   :  { %5573 = vrot.lane.b32.xlu1 %v13522_v44, %s9019_s26 }
 0xbdc   :  { %8313 = vmatpush3.bf16.msra.mxu1 %v8755_v16 }
 0xbdd   :  { %8314 = vmatprep.subr.bf16.mxu1 %v8756_v8 }
 0xbde   :  { %8599 = vmatmul.mubr.bf16.gmra.mrb[140].mxu0 %v5994_v6  ;;  %5883 = vrot.lane.b32.xlu0 %v13531_v12, %s9021_s23 }
 0xbdf   :  { %5885 = vrot.lane.b32.xlu1 %v13554_v0, %s9021_s23 }
 0xbe0   :  { %8315 = vmatpush3.bf16.msra.mxu1 %v8757_v53  ;;  %v5532_v53 = vrot.slane %v13531_v12, 7 }
 0xbe1   :  { %8316 = vmatprep.subr.bf16.mxu1 %v8758_v22 }
 0xbe2   :  { %5575 = vrot.lane.b32.xlu0 %v13531_v12, %s9019_s26 }
 0xbe3   :  { %5577 = vrot.lane.b32.xlu1 %v13554_v0, %s9019_s26 }
 0xbe4   :  { %8317 = vmatpush3.bf16.msra.mxu1 %v8759_v57  ;;  %v13859_v57 = vsel %vm182_vm1, %v5531_v48, %v5532_v53 }
 0xbe5   :  { %8318 = vmatprep.subr.bf16.mxu1 %v8760_v19 }
 0xbe6   :  { %5887 = vrot.lane.b32.xlu0 %v13556_v32, %s9021_s23 }
 0xbe7   :  { %5889 = vrot.lane.b32.xlu1 %v13573_v55, %s9021_s23 }
 0xbe8   :  { %8319 = vmatpush3.bf16.msra.mxu1 %v8761_v28 }
 0xbe9   :  { %8320 = vmatprep.subr.bf16.mxu1 %v8762_v26 }
 0xbea   :  { %5579 = vrot.lane.b32.xlu0 %v13556_v32, %s9019_s26 }
 0xbeb   :  { %5581 = vrot.lane.b32.xlu1 %v13573_v55, %s9019_s26 }
 0xbec   :  { %8321 = vmatpush3.bf16.msra.mxu1 %v8763_v11 }
 0xbed   :  { %8322 = vmatprep.subr.bf16.mxu1 %v8764_v42  ;;  %v5534_v42 = vrot.slane %v13556_v32, 7 }
 0xbee   :  { %5891 = vrot.lane.b32.xlu0 %v13585_v21, %s9021_s23 }
 0xbef   :  { %5893 = vrot.lane.b32.xlu1 %v13590_v46, %s9021_s23 }
 0xbf0   :  { %8323 = vmatpush3.bf16.msra.mxu1 %v8765_v62 }
 0xbf2   :  { %5583 = vrot.lane.b32.xlu0 %v13585_v21, %s9019_s26 }
 0xbf3   :  { %5585 = vrot.lane.b32.xlu1 %v13590_v46, %s9019_s26 }
 0xbf6   :  { %5895 = vrot.lane.b32.xlu0 %v13425_v20, %s9021_s23 }
 0xbf7   :  { %5897 = vrot.lane.b32.xlu1 %v13427_v27, %s9021_s23 }
 0xbfa   :  { %5771 = vrot.lane.b32.xlu0 %v13627_v29, %s9019_s26 }
 0xbfb   :  { %5773 = vrot.lane.b32.xlu1 %v13456_v49, %s9019_s26 }
 0xbfe   :  { %5819 = vrot.lane.b32.xlu0 %v13722_v41, %s9020_s4 }
 0xbff   :  { %5821 = vrot.lane.b32.xlu1 %v13726_v4, %s9020_s4 }
 0xc02   :  { %5635 = vrot.lane.b32.xlu0 %v13631_v10, %s9020_s4 }
 0xc03   :  { %5637 = vrot.lane.b32.xlu1 %v13627_v29, %s9020_s4  ;;  %v13765_v29 = vsel %vm182_vm1, %v5526_v7, %v5527_v24 }
 0xc06   :  { %5683 = vrot.lane.b32.xlu0 %v13747_v63, %s9021_s23 }
 0xc07   :  { %5685 = vrot.lane.b32.xlu1 %v13722_v41, %s9021_s23 }
 0xc0a   :  { %5775 = vrot.lane.b32.xlu0 %v13466_v35, %s9019_s26 }
 0xc0b   :  { %5777 = vrot.lane.b32.xlu1 %v13475_v25, %s9019_s26 }
 0xc0e   :  { %5823 = vrot.lane.b32.xlu0 %v13761_v31, %s9020_s4 }
 0xc0f   :  { %5825 = vrot.lane.b32.xlu1 %v13765_v29, %s9020_s4 }
 0xc12   :  { %5639 = vrot.lane.b32.xlu0 %v13456_v49, %s9020_s4  ;;  %v13787_v49 = vsel %vm182_vm1, %v5527_v24, %v5528_v39 }
 0xc13   :  { %5641 = vrot.lane.b32.xlu1 %v13466_v35, %s9020_s4  ;;  %v13791_v35 = vsel %vm182_vm1, %v5528_v39, %v5529_v60 }
 0xc16   :  { %5687 = vrot.lane.b32.xlu0 %v13726_v4, %s9021_s23 }
 0xc17   :  { %5689 = vrot.lane.b32.xlu1 %v13761_v31, %s9021_s23 }
 0xc1a   :  { %5779 = vrot.lane.b32.xlu0 %v13471_v36, %s9019_s26 }
 0xc1b   :  { %5781 = vrot.lane.b32.xlu1 %v13507_v43, %s9019_s26 }
 0xc1e   :  { %5827 = vrot.lane.b32.xlu0 %v13787_v49, %s9020_s4 }
 0xc1f   :  { %5829 = vrot.lane.b32.xlu1 %v13791_v35, %s9020_s4 }
 0xc22   :  { %5643 = vrot.lane.b32.xlu0 %v13475_v25, %s9020_s4 }
 0xc23   :  { %5645 = vrot.lane.b32.xlu1 %v13471_v36, %s9020_s4  ;;  %v13817_v36 = vsel %vm182_vm1, %v5529_v60, %v5530_v51 }
 0xc26   :  { %5691 = vrot.lane.b32.xlu0 %v13765_v29, %s9021_s23 }
 0xc27   :  { %5693 = vrot.lane.b32.xlu1 %v13787_v49, %s9021_s23 }
 0xc2a   :  { %5783 = vrot.lane.b32.xlu0 %v13518_v58, %s9019_s26 }
 0xc2b   :  { %5785 = vrot.lane.b32.xlu1 %v13549_v1, %s9019_s26 }
 0xc2c   :  { %v13811_v25 = vpop.permute.xlu0 %5555  ;;  %v13813_v6 = vpop.permute.xlu1 %5557 }
 0xc2e   :  { %5831 = vrot.lane.b32.xlu0 %v13817_v36, %s9020_s4 }
 0xc2f   :  { %5833 = vrot.lane.b32.xlu1 %v13821_v23, %s9020_s4 }
 0xc30   :  { %v13827_v34 = vpop.permute.xlu0 %5867  ;;  %v13829_v56 = vpop.permute.xlu1 %5869 }
 0xc32   :  { %5647 = vrot.lane.b32.xlu0 %v13507_v43, %s9020_s4  ;;  %v5533_v43 = vrot.slane %v13554_v0, 7 }
 0xc33   :  { %5649 = vrot.lane.b32.xlu1 %v13518_v58, %s9020_s4 }
 0xc34   :  { %v13835_v2 = vpop.permute.xlu0 %5559  ;;  %v13863_v19 = vsel %vm182_vm1, %v5532_v53, %v5533_v43  ;;  %v13901_v7 = vsel %vm182_vm1, %v5533_v43, %v5534_v42 }
 0xc35   :  { %v13837_v17 = vpop.permute.xlu1 %5561  ;;  %14959 = vst [vmem:[#allocation32_spill] sm:$0xff] %v13901_v7 }
 0xc36   :  { %5695 = vrot.lane.b32.xlu0 %v13791_v35, %s9021_s23 }
 0xc37   :  { %5697 = vrot.lane.b32.xlu1 %v13817_v36, %s9021_s23 }
 0xc38   :  { %v13843_v16 = vpop.permute.xlu0 %5871 }
 0xc39   :  { %v13845_v8 = vpop.permute.xlu1 %5873 }
 0xc3a   :  { %5787 = vrot.lane.b32.xlu0 %v13561_v33, %s9019_s26 }
 0xc3b   :  { %5789 = vrot.lane.b32.xlu1 %v13583_v61, %s9019_s26 }
 0xc3c   :  { %v13853_v58 = vpop.permute.xlu0 %5563 }
 0xc3d   :  { %v13855_v22 = vpop.permute.xlu1 %5565 }
 0xc3e   :  { %5835 = vrot.lane.b32.xlu0 %v13859_v57, %s9020_s4 }
 0xc3f   :  { %5837 = vrot.lane.b32.xlu1 %v13863_v19, %s9020_s4 }
 0xc40   :  { %v13869_v28 = vpop.permute.xlu0 %5875 }
 0xc41   :  { %v13871_v26 = vpop.permute.xlu1 %5877 }
 0xc42   :  { %5651 = vrot.lane.b32.xlu0 %v13549_v1, %s9020_s4  ;;  %v5535_v1 = vrot.slane %v13573_v55, 7 }
 0xc43   :  { %5653 = vrot.lane.b32.xlu1 %v13561_v33, %s9020_s4 }
 0xc44   :  { %v13877_v47 = vpop.permute.xlu0 %5567  ;;  %v13905_v24 = vsel %vm182_vm1, %v5534_v42, %v5535_v1  ;;  %v5536_v42 = vrot.slane %v13585_v21, 7 }
 0xc45   :  { %v13879_v14 = vpop.permute.xlu1 %5569  ;;  %14960 = vst [vmem:[#allocation27_spill] sm:$0xff] %v13905_v24 }
 0xc46   :  { %5699 = vrot.lane.b32.xlu0 %v13821_v23, %s9021_s23 }
 0xc47   :  { %5701 = vrot.lane.b32.xlu1 %v13859_v57, %s9021_s23 }
 0xc48   :  { %v13885_v11 = vpop.permute.xlu0 %5879 }
 0xc49   :  { %v13887_v30 = vpop.permute.xlu1 %5881 }
 0xc4a   :  { %5791 = vrot.lane.b32.xlu0 %v13579_v13, %s9019_s26 }
 0xc4b   :  { %5793 = vrot.lane.b32.xlu1 %v13599_v5, %s9019_s26 }
 0xc4c   :  { %v13895_v33 = vpop.permute.xlu0 %5571 }
 0xc4d   :  { %v13897_v62 = vpop.permute.xlu1 %5573 }
 0xc4e   :  { %5839 = vrot.lane.b32.xlu0 %v13901_v7, %s9020_s4 }
 0xc4f   :  { %5841 = vrot.lane.b32.xlu1 %v13905_v24, %s9020_s4 }
 0xc50   :  { %v13911_v39 = vpop.permute.xlu0 %5883 }
 0xc51   :  { %v13913_v60 = vpop.permute.xlu1 %5885 }
 0xc52   :  { %5655 = vrot.lane.b32.xlu0 %v13583_v61, %s9020_s4  ;;  %v5537_v61 = vrot.slane %v13590_v46, 7 }
 0xc53   :  { %5657 = vrot.lane.b32.xlu1 %v13579_v13, %s9020_s4 }
 0xc54   :  { %v13919_v51 = vpop.permute.xlu0 %5575  ;;  %v13947_v55 = vsel %vm182_vm1, %v5536_v42, %v5537_v61 }
 0xc55   :  { %v13921_v48 = vpop.permute.xlu1 %5577 }
 0xc56   :  { %5703 = vrot.lane.b32.xlu0 %v13863_v19, %s9021_s23 }
 0xc57   :  { %5705 = vrot.lane.b32.xlu1 %v13901_v7, %s9021_s23  ;;  %v13943_v7 = vsel %vm182_vm1, %v5535_v1, %v5536_v42 }
 0xc58   :  { %v13927_v53 = vpop.permute.xlu0 %5887  ;;  %14963 = vst [vmem:[#allocation41_spill] sm:$0xff] %v13943_v7 }
 0xc59   :  { %v13929_v43 = vpop.permute.xlu1 %5889 }
 0xc5a   :  { %5795 = vrot.lane.b32.xlu0 %v13604_v9, %s9019_s26 }
 0xc5b   :  { %5797 = vrot.lane.b32.xlu1 %v13614_v18, %s9019_s26 }
 0xc5c   :  { %v13937_v13 = vpop.permute.xlu0 %5579 }
 0xc5d   :  { %14961 = vst [vmem:[#allocation33_spill] sm:$0xff] %v13937_v13  ;;  %v13939_v52 = vpop.permute.xlu1 %5581 }
 0xc5e   :  { %14962 = vst [vmem:[#allocation29_spill] sm:$0xff] %v13939_v52  ;;  %5843 = vrot.lane.b32.xlu0 %v13943_v7, %s9020_s4 }
 0xc5f   :  { %5845 = vrot.lane.b32.xlu1 %v13947_v55, %s9020_s4 }
 0xc60   :  { %v13953_v46 = vpop.permute.xlu0 %5891 }
 0xc61   :  { %14964 = vst [vmem:[#allocation38_spill] sm:$0xff] %v13953_v46  ;;  %v13955_v21 = vpop.permute.xlu1 %5893  ;;  %v5915_v46 = vld [vmem:[#allocation7 + $0x8] sm:$0xff] }
 0xc62   :  { %14965 = vst [vmem:[#allocation34_spill] sm:$0xff] %v13955_v21  ;;  %5659 = vrot.lane.b32.xlu0 %v13599_v5, %s9020_s4 }
 0xc63   :  { %5661 = vrot.lane.b32.xlu1 %v13604_v9, %s9020_s4  ;;  %v14970_v9 = vrot.slane %v13425_v20, 7 }
 0xc64   :  { %v13961_v1 = vpop.permute.xlu0 %5583 }
 0xc65   :  { %14966 = vst [vmem:[#allocation35_spill] sm:$0xff] %v13961_v1  ;;  %v13963_v42 = vpop.permute.xlu1 %5585 }
 0xc66   :  { %14967 = vst [vmem:[#allocation28_spill] sm:$0xff] %v13963_v42  ;;  %5707 = vrot.lane.b32.xlu0 %v13905_v24, %s9021_s23  ;;  %v5539_v42 = vsel %vm182_vm1, %v5537_v61, %v14970_v9 }
 0xc67   :  { %5709 = vrot.lane.b32.xlu1 %v13943_v7, %s9021_s23  ;;  %v5587_v9 = vadd.f32 %v13811_v25, %v5539_v42 }
 0xc68   :  { %v13969_v52 = vpop.permute.xlu0 %5895 }
 0xc69   :  { %14968 = vst [vmem:[#allocation37_spill] sm:$0xff] %v13969_v52  ;;  %v13971_v13 = vpop.permute.xlu1 %5897 }
 0xc6a   :  { %14969 = vst [vmem:[#allocation31_spill] sm:$0xff] %v13971_v13  ;;  %5799 = vrot.lane.b32.xlu0 %v13610_v38, %s9019_s26 }
 0xc6b   :  { %5801 = vrot.lane.b32.xlu1 %v13631_v10, %s9019_s26 }
 0xc6c   :  { %v5772_v5 = vpop.permute.xlu0 %5771 }
 0xc6d   :  { %v5774_v1 = vpop.permute.xlu1 %5773  ;;  %v5803_v7 = vadd.f32 %v5772_v5, %v13427_v27 }
 0xc6e   :  { %5847 = vrot.lane.b32.xlu0 %v5539_v42, %s9020_s4  ;;  %v5804_v13 = vadd.f32 %v5774_v1, %v13429_v37 }
 0xc6f   :  { %5849 = vrot.lane.b32.xlu1 %v13747_v63, %s9020_s4 }
 0xc70   :  { %v5820_v52 = vpop.permute.xlu0 %5819 }
 0xc71   :  { %v5822_v24 = vpop.permute.xlu1 %5821  ;;  %v5851_v21 = vadd.f32 %v5820_v52, %v5803_v7  ;;  %v5588_v52 = vadd.f32 %v13813_v6, %v13747_v63 }
 0xc72   :  { %v5852_v10 = vadd.f32 %v5822_v24, %v5804_v13  ;;  %5663 = vrot.lane.b32.xlu0 %v13614_v18, %s9020_s4 }
 0xc73   :  { %v5899_v61 = vadd.f32 %v13827_v34, %v5851_v21  ;;  %5665 = vrot.lane.b32.xlu1 %v13610_v38, %s9020_s4  ;;  %v5731_v34 = vld [vmem:[#allocation7] sm:$0xff] }
 0xc74   :  { %v5900_v27 = vadd.f32 %v13829_v56, %v5852_v10  ;;  %v5636_v5 = vpop.permute.xlu0 %5635  ;;  %v5732_v56 = vld [vmem:[#allocation7 + $0x18] sm:$0xff] }
 0xc75   :  { %v5931_v37 = vmul.f32 %v5915_v46, %v5899_v61  ;;  %v5638_v1 = vpop.permute.xlu1 %5637  ;;  %v5667_v18 = vadd.f32 %v5636_v5, %v5587_v9 }
 0xc76   :  { %v5932_v7 = vmul.f32 %v5916_v45, %v5900_v27  ;;  %5711 = vrot.lane.b32.xlu0 %v13947_v55, %s9021_s23  ;;  %v5668_v21 = vadd.f32 %v5638_v1, %v5588_v52  ;;  %v5918_v52 = vld [vmem:[#allocation7 + $0x50] sm:$0xff] }
 0xc77   :  { %5713 = vrot.lane.b32.xlu1 %v5539_v42, %s9021_s23 }
 0xc78   :  { %v5684_v38 = vpop.permute.xlu0 %5683  ;;  %v5947_v24 = vpack.c.bf16 %v5932_v7, %v5931_v37  ;;  %v5917_v37 = vld [vmem:[#allocation7 + $0x38] sm:$0xff] }
 0xc79   :  { %v5686_v13 = vpop.permute.xlu1 %5685  ;;  %v5715_v10 = vadd.f32 %v5684_v38, %v5667_v18 }
 0xc7a   :  { %v5716_v25 = vadd.f32 %v5686_v13, %v5668_v21  ;;  %6228 = vmatprep.mubr.bf16.mxu1 %v5947_v24  ;;  %v5733_v13 = vld [vmem:[#allocation7 + $0x30] sm:$0xff] }
 0xc7b   :  { %v5747_v46 = vmul.f32 %v5731_v34, %v5715_v10  ;;  %v5589_v34 = vadd.f32 %v13835_v2, %v13722_v41 }
 0xc7c   :  { %v5748_v61 = vmul.f32 %v5732_v56, %v5716_v25  ;;  %v5776_v20 = vpop.permute.xlu0 %5775 }
 0xc7d   :  { %v5778_v63 = vpop.permute.xlu1 %5777  ;;  %v5805_v6 = vadd.f32 %v5776_v20, %v13431_v3  ;;  %v5590_v20 = vadd.f32 %v13837_v17, %v13726_v4 }
 0xc7e   :  { %v5763_v45 = vpack.c.bf16 %v5748_v61, %v5747_v46  ;;  %v5806_v27 = vadd.f32 %v5778_v63, %v13433_v15  ;;  %v5734_v46 = vld [vmem:[#allocation7 + $0x48] sm:$0xff] }
 0xc80   :  { %6229 = vmatmul.mubr.bf16.vlgmr.msra.gmra.mrb[112].mxu1 %v5763_v45  ;;  %v5824_v42 = vpop.permute.xlu0 %5823 }
 0xc81   :  { %v5826_v5 = vpop.permute.xlu1 %5825  ;;  %v5853_v9 = vadd.f32 %v5824_v42, %v5805_v6 }
 0xc82   :  { %v5854_v1 = vadd.f32 %v5826_v5, %v5806_v27 }
 0xc83   :  { %v5901_v7 = vadd.f32 %v13843_v16, %v5853_v9 }
 0xc84   :  { %v5902_v18 = vadd.f32 %v13845_v8, %v5854_v1  ;;  %v5640_v21 = vpop.permute.xlu0 %5639  ;;  %v5919_v1 = vld [vmem:[#allocation7 + $0x68] sm:$0xff] }
 0xc85   :  { %v5933_v38 = vmul.f32 %v5917_v37, %v5901_v7  ;;  %v5642_v24 = vpop.permute.xlu1 %5641  ;;  %v5669_v15 = vadd.f32 %v5640_v21, %v5589_v34  ;;  %v5920_v37 = vld [vmem:[#allocation7 + $0x80] sm:$0xff]  ;;  %v5591_v21 = vadd.f32 %v13853_v58, %v13761_v31  ;;  %v5736_v31 = vld [vmem:[#allocation7 + $0x78] sm:$0xff] }
 0xc86   :  { %v5934_v3 = vmul.f32 %v5918_v52, %v5902_v18  ;;  %v5670_v56 = vadd.f32 %v5642_v24, %v5590_v20 }
 0xc88   :  { %v5688_v10 = vpop.permute.xlu0 %5687  ;;  %v5948_v25 = vpack.c.bf16 %v5934_v3, %v5933_v38 }
 0xc89   :  { %v5690_v61 = vpop.permute.xlu1 %5689  ;;  %v5717_v16 = vadd.f32 %v5688_v10, %v5669_v15 }
 0xc8a   :  { %v5718_v63 = vadd.f32 %v5690_v61, %v5670_v56  ;;  %6236 = vmatprep.mubr.bf16.mxu1 %v5948_v25 }
 0xc8b   :  { %v5749_v8 = vmul.f32 %v5733_v13, %v5717_v16 }
 0xc8c   :  { %v5750_v45 = vmul.f32 %v5734_v46, %v5718_v63  ;;  %v5780_v6 = vpop.permute.xlu0 %5779 }
 0xc8d   :  { %v5782_v41 = vpop.permute.xlu1 %5781  ;;  %v5807_v27 = vadd.f32 %v5780_v6, %v13435_v59  ;;  %v5592_v59 = vadd.f32 %v13855_v22, %v13765_v29 }
 0xc8e   :  { %v5764_v2 = vpack.c.bf16 %v5750_v45, %v5749_v8  ;;  %v5808_v4 = vadd.f32 %v5782_v41, %v13437_v50 }
 0xc90   :  { %6237 = vmatmul.mubr.bf16.gmra.mrb[116].mxu1 %v5764_v2  ;;  %v5828_v17 = vpop.permute.xlu0 %5827 }
 0xc91   :  { %v5830_v42 = vpop.permute.xlu1 %5829  ;;  %v5855_v5 = vadd.f32 %v5828_v17, %v5807_v27 }
 0xc92   :  { %v5856_v9 = vadd.f32 %v5830_v42, %v5808_v4  ;;  %v5921_v42 = vld [vmem:[#allocation7 + $0x98] sm:$0xff] }
 0xc93   :  { %v5903_v52 = vadd.f32 %v13869_v28, %v5855_v5  ;;  %v5735_v28 = vld [vmem:[#allocation7 + $0x60] sm:$0xff] }
 0xc94   :  { %v5904_v7 = vadd.f32 %v13871_v26, %v5856_v9  ;;  %v5644_v18 = vpop.permute.xlu0 %5643  ;;  %v5922_v9 = vld [vmem:[#allocation7 + $0xb0] sm:$0xff] }
 0xc95   :  { %v5935_v34 = vmul.f32 %v5919_v1, %v5903_v52  ;;  %v5646_v38 = vpop.permute.xlu1 %5645  ;;  %v5671_v20 = vadd.f32 %v5644_v18, %v5591_v21  ;;  %v5593_v52 = vadd.f32 %v13877_v47, %v13787_v49  ;;  %v5594_v21 = vadd.f32 %v13879_v14, %v13791_v35 }
 0xc96   :  { %v5936_v50 = vmul.f32 %v5920_v37, %v5904_v7  ;;  %v14014_v24 = vpop.f32.mrb[128].mxu0  ;;  %v5672_v15 = vadd.f32 %v5646_v38, %v5592_v59 }
 0xc97   :  { %v14016_v3 = vpop.f32.mrb[129].mxu0 }
 0xc98   :  { %v14018_v56 = vpop.f32.mrb[130].mxu0  ;;  %v5692_v26 = vpop.permute.xlu0 %5691  ;;  %v5949_v13 = vpack.c.bf16 %v5936_v50, %v5935_v34  ;;  %v5737_v50 = vld [vmem:[#allocation7 + $0x90] sm:$0xff] }
 0xc99   :  { %v14020_v10 = vpop.f32.mrb[131].mxu0  ;;  %v5694_v58 = vpop.permute.xlu1 %5693  ;;  %v5719_v25 = vadd.f32 %v5692_v26, %v5671_v20 }
 0xc9a   :  { %v5720_v46 = vadd.f32 %v5694_v58, %v5672_v15  ;;  %6244 = vmatprep.mubr.bf16.mxu1 %v5949_v13 }
 0xc9b   :  { %v5751_v29 = vmul.f32 %v5735_v28, %v5719_v25  ;;  %v5738_v28 = vld [vmem:[#allocation7 + $0xa8] sm:$0xff] }
 0xc9c   :  { %v5752_v22 = vmul.f32 %v5736_v31, %v5720_v46  ;;  %v5784_v61 = vpop.permute.xlu0 %5783 }
 0xc9d   :  { %v5786_v16 = vpop.permute.xlu1 %5785  ;;  %v5809_v8 = vadd.f32 %v5784_v61, %v13484_v40 }
 0xc9e   :  { %v5765_v63 = vpack.c.bf16 %v5752_v22, %v5751_v29  ;;  %v5810_v45 = vadd.f32 %v5786_v16, %v13486_v54 }
 0xca0   :  { %6245 = vmatmul.mubr.bf16.gmra.mrb[120].mxu1 %v5765_v63  ;;  %v5832_v6 = vpop.permute.xlu0 %5831 }
 0xca1   :  { %v14024_v41 = vpop.f32.mrb[132].mxu0  ;;  %v5834_v2 = vpop.permute.xlu1 %5833  ;;  %v5857_v27 = vadd.f32 %v5832_v6, %v5809_v8 }
 0xca2   :  { %v14026_v4 = vpop.f32.mrb[133].mxu0  ;;  %v5858_v17 = vadd.f32 %v5834_v2, %v5810_v45  ;;  %v5923_v2 = vld [vmem:[#allocation7 + $0xc8] sm:$0xff] }
 0xca3   :  { %v14028_v5 = vpop.f32.mrb[134].mxu0  ;;  %v5905_v1 = vadd.f32 %v13885_v11, %v5857_v27 }
 0xca4   :  { %v14031_v37 = vpop.f32.mrb[135].mxu0  ;;  %v5906_v40 = vadd.f32 %v13887_v30, %v5858_v17  ;;  %v5648_v54 = vpop.permute.xlu0 %5647  ;;  %v5924_v17 = vld [vmem:[#allocation7 + $0xe0] sm:$0xff] }
 0xca5   :  { %v5937_v7 = vmul.f32 %v5921_v42, %v5905_v1  ;;  %v5650_v18 = vpop.permute.xlu1 %5649  ;;  %v5673_v38 = vadd.f32 %v5648_v54, %v5593_v52  ;;  %v5595_v1 = vadd.f32 %v13895_v33, %v13817_v36  ;;  %v5596_v52 = vadd.f32 %v13897_v62, %v13821_v23 }
 0xca6   :  { %v5938_v34 = vmul.f32 %v5922_v9, %v5906_v40  ;;  %v5674_v59 = vadd.f32 %v5650_v18, %v5594_v21 }
 0xca8   :  { %v5696_v20 = vpop.permute.xlu0 %5695  ;;  %v5950_v15 = vpack.c.bf16 %v5938_v34, %v5937_v7  ;;  %v5739_v34 = vld [vmem:[#allocation7 + $0xc0] sm:$0xff] }
 0xca9   :  { %v14038_v11 = vpop.f32.mrb[136].mxu0  ;;  %v5698_v26 = vpop.permute.xlu1 %5697  ;;  %v5721_v30 = vadd.f32 %v5696_v20, %v5673_v38 }
 0xcaa   :  { %v14040_v13 = vpop.f32.mrb[137].mxu0  ;;  %v5722_v31 = vadd.f32 %v5698_v26, %v5674_v59  ;;  %6252 = vmatprep.mubr.bf16.mxu1 %v5950_v15 }
 0xcab   :  { %v14042_v49 = vpop.f32.mrb[138].mxu0  ;;  %v5753_v47 = vmul.f32 %v5737_v50, %v5721_v30 }
 0xcac   :  { %v14044_v58 = vpop.f32.mrb[139].mxu0  ;;  %v5754_v35 = vmul.f32 %v5738_v28, %v5722_v31  ;;  %v5788_v14 = vpop.permute.xlu0 %5787 }
 0xcad   :  { %v5790_v25 = vpop.permute.xlu1 %5789  ;;  %v5811_v29 = vadd.f32 %v5788_v14, %v13522_v44  ;;  %v5925_v14 = vld [vmem:[#allocation7 + $0xf8] sm:$0xff] }
 0xcae   :  { %v5766_v46 = vpack.c.bf16 %v5754_v35, %v5753_v47  ;;  %v5812_v22 = vadd.f32 %v5790_v25, %v13531_v12  ;;  %v5926_v25 = vld [vmem:[#allocation7 + $0x110] sm:$0xff] }
 0xcb0   :  { %6253 = vmatmul.mubr.bf16.gmra.mrb[124].mxu1 %v5766_v46  ;;  %v5836_v61 = vpop.permute.xlu0 %5835 }
 0xcb1   :  { %v14048_v16 = vpop.f32.mrb[140].mxu0  ;;  %v5838_v63 = vpop.permute.xlu1 %5837  ;;  %v5859_v8 = vadd.f32 %v5836_v61, %v5811_v29  ;;  %v5597_v61 = vadd.f32 %v13919_v51, %v13859_v57 }
 0xcb2   :  { %v14050_v45 = vpop.f32.mrb[141].mxu0  ;;  %v5860_v6 = vadd.f32 %v5838_v63, %v5812_v22 }
 0xcb3   :  { %v14052_v27 = vpop.f32.mrb[142].mxu0  ;;  %v5907_v42 = vadd.f32 %v13911_v39, %v5859_v8  ;;  %v5740_v39 = vld [vmem:[#allocation7 + $0xd8] sm:$0xff] }
 0xcb4   :  { %v14055_v9 = vpop.f32.mrb[143].mxu0  ;;  %v5908_v44 = vadd.f32 %v13913_v60, %v5860_v6  ;;  %v5652_v12 = vpop.permute.xlu0 %5651 }
 0xcb5   :  { %v5939_v40 = vmul.f32 %v5923_v2, %v5907_v42  ;;  %v5654_v54 = vpop.permute.xlu1 %5653  ;;  %v5675_v18 = vadd.f32 %v5652_v12, %v5595_v1  ;;  %v5742_v12 = vld [vmem:[#allocation7 + $0x108] sm:$0xff] }
 0xcb6   :  { %v5940_v7 = vmul.f32 %v5924_v17, %v5908_v44  ;;  %v5676_v21 = vadd.f32 %v5654_v54, %v5596_v52  ;;  %v5741_v17 = vld [vmem:[#allocation7 + $0xf0] sm:$0xff] }
 0xcb8   :  { %v5700_v38 = vpop.permute.xlu0 %5699  ;;  %v5951_v59 = vpack.c.bf16 %v5940_v7, %v5939_v40  ;;  %v14971_v7 = vld [vmem:[#allocation40_spill] sm:$0xff] }
 0xcb9   :  { %v5702_v50 = vpop.permute.xlu1 %5701  ;;  %v5723_v20 = vadd.f32 %v5700_v38, %v5675_v18 }
 0xcba   :  { %v5724_v15 = vadd.f32 %v5702_v50, %v5676_v21  ;;  %6260 = vmatprep.mubr.bf16.mxu1 %v5951_v59  ;;  %v14972_v21 = vld [vmem:[#allocation30_spill] sm:$0xff] }
 0xcbb   :  { %v5755_v60 = vmul.f32 %v5739_v34, %v5723_v20  ;;  %v5928_v50 = vld [vmem:[#allocation7 + $0x140] sm:$0xff] }
 0xcbc   :  { %v5756_v28 = vmul.f32 %v5740_v39, %v5724_v15  ;;  %v5792_v26 = vpop.permute.xlu0 %5791  ;;  %v5927_v39 = vld [vmem:[#allocation7 + $0x128] sm:$0xff]  ;;  %v14973_v20 = vld [vmem:[#allocation38_spill] sm:$0xff] }
 0xcbd   :  { %v5794_v36 = vpop.permute.xlu1 %5793  ;;  %v5813_v30 = vadd.f32 %v5792_v26, %v13554_v0  ;;  %v5598_v0 = vadd.f32 %v13921_v48, %v13863_v19 }
 0xcbe   :  { %v5767_v33 = vpack.c.bf16 %v5756_v28, %v5755_v60  ;;  %v5814_v23 = vadd.f32 %v5794_v36, %v13556_v32  ;;  %v14974_v60 = vld [vmem:[#allocation34_spill] sm:$0xff]  ;;  %v14975_v36 = vld [vmem:[#allocation32_spill] sm:$0xff] }
 0xcc0   :  { %6261 = vmatmul.mubr.bf16.gmra.mrb[128].mxu1 %v5767_v33  ;;  %v5840_v62 = vpop.permute.xlu0 %5839  ;;  %v14976_v33 = vld [vmem:[#allocation33_spill] sm:$0xff] }
 0xcc1   :  { %v5842_v31 = vpop.permute.xlu1 %5841  ;;  %v5861_v47 = vadd.f32 %v5840_v62, %v5813_v30  ;;  %v5599_v30 = vadd.f32 %v14976_v33, %v14975_v36  ;;  %v5745_v33 = vld [vmem:[#allocation7 + $0x150] sm:$0xff] }
 0xcc2   :  { %v5862_v35 = vadd.f32 %v5842_v31, %v5814_v23  ;;  %v14977_v31 = vld [vmem:[#allocation27_spill] sm:$0xff] }
 0xcc3   :  { %v5909_v46 = vadd.f32 %v13927_v53, %v5861_v47  ;;  %v14978_v47 = vld [vmem:[#allocation29_spill] sm:$0xff] }
 0xcc4   :  { %v5910_v29 = vadd.f32 %v13929_v43, %v5862_v35  ;;  %v5656_v22 = vpop.permute.xlu0 %5655  ;;  %v5600_v35 = vadd.f32 %v14978_v47, %v14977_v31 }
 0xcc5   :  { %v5941_v63 = vmul.f32 %v5925_v14, %v5909_v46  ;;  %v5658_v8 = vpop.permute.xlu1 %5657  ;;  %v5677_v6 = vadd.f32 %v5656_v22, %v5597_v61 }
 0xcc6   :  { %v5942_v32 = vmul.f32 %v5926_v25, %v5910_v29  ;;  %v5678_v2 = vadd.f32 %v5658_v8, %v5598_v0  ;;  %v5743_v29 = vld [vmem:[#allocation7 + $0x120] sm:$0xff] }
 0xcc8   :  { %v5704_v42 = vpop.permute.xlu0 %5703  ;;  %v5952_v44 = vpack.c.bf16 %v5942_v32, %v5941_v63  ;;  %v5744_v63 = vld [vmem:[#allocation7 + $0x138] sm:$0xff] }
 0xcc9   :  { %v5706_v1 = vpop.permute.xlu1 %5705  ;;  %v5725_v53 = vadd.f32 %v5704_v42, %v5677_v6 }
 0xcca   :  { %v5726_v40 = vadd.f32 %v5706_v1, %v5678_v2  ;;  %6268 = vmatprep.mubr.bf16.mxu1 %v5952_v44 }
 0xccb   :  { %v5757_v43 = vmul.f32 %v5741_v17, %v5725_v53  ;;  %v14980_v53 = vld [vmem:[#allocation39_spill] sm:$0xff] }
 0xccc   :  { %v5758_v54 = vmul.f32 %v5742_v12, %v5726_v40  ;;  %v5796_v52 = vpop.permute.xlu0 %5795  ;;  %v14979_v12 = vld [vmem:[#allocation36_spill] sm:$0xff] }
 0xccd   :  { %v5798_v57 = vpop.permute.xlu1 %5797  ;;  %v5815_v18 = vadd.f32 %v5796_v52, %v14971_v7  ;;  %v5930_v7 = vld [vmem:[#allocation7 + $0x170] sm:$0xff] }
 0xcce   :  { %v5768_v51 = vpack.c.bf16 %v5758_v54, %v5757_v43  ;;  %v5816_v19 = vadd.f32 %v5798_v57, %v14972_v21 }
 0xcd0   :  { %6269 = vmatmul.mubr.bf16.gmra.mrb[132].mxu1 %v5768_v51  ;;  %v5844_v48 = vpop.permute.xlu0 %5843  ;;  %v5929_v51 = vld [vmem:[#allocation7 + $0x158] sm:$0xff] }
 0xcd1   :  { %v5846_v34 = vpop.permute.xlu1 %5845  ;;  %v5863_v38 = vadd.f32 %v5844_v48, %v5815_v18  ;;  %v14981_v18 = vld [vmem:[#allocation37_spill] sm:$0xff] }
 0xcd2   :  { %v5864_v59 = vadd.f32 %v5846_v34, %v5816_v19  ;;  %v14982_v19 = vld [vmem:[#allocation31_spill] sm:$0xff] }
 0xcd3   :  { %v5911_v15 = vadd.f32 %v14973_v20, %v5863_v38  ;;  %v14983_v38 = vld [vmem:[#allocation41_spill] sm:$0xff] }
 0xcd4   :  { %v5912_v28 = vadd.f32 %v14974_v60, %v5864_v59  ;;  %v5660_v26 = vpop.permute.xlu0 %5659  ;;  %v14984_v59 = vld [vmem:[#allocation35_spill] sm:$0xff] }
 0xcd5   :  { %v5943_v23 = vmul.f32 %v5927_v39, %v5911_v15  ;;  %v5662_v62 = vpop.permute.xlu1 %5661  ;;  %v5679_v25 = vadd.f32 %v5660_v26, %v5599_v30  ;;  %v5601_v39 = vadd.f32 %v14984_v59, %v14983_v38  ;;  %v14985_v15 = vld [vmem:[#allocation28_spill] sm:$0xff] }
 0xcd6   :  { %v5944_v14 = vmul.f32 %v5928_v50, %v5912_v28  ;;  %v5680_v46 = vadd.f32 %v5662_v62, %v5600_v35  ;;  %v5602_v60 = vadd.f32 %v14985_v15, %v13947_v55  ;;  %v5746_v62 = vld [vmem:[#allocation7 + $0x168] sm:$0xff] }
 0xcd8   :  { %v5708_v22 = vpop.permute.xlu0 %5707  ;;  %v5953_v61 = vpack.c.bf16 %v5944_v14, %v5943_v23 }
 0xcd9   :  { %v5710_v8 = vpop.permute.xlu1 %5709  ;;  %v5727_v0 = vadd.f32 %v5708_v22, %v5679_v25  ;;  %v14086_v22 = vld [vmem:[#allocation10 + $0x5] ss:$0 sm:$0xff] }
 0xcda   :  { %v5728_v32 = vadd.f32 %v5710_v8, %v5680_v46  ;;  %6276 = vmatprep.mubr.bf16.mxu1 %v5953_v61 }
 0xcdb   :  { %v5759_v6 = vmul.f32 %v5743_v29, %v5727_v0  ;;  %v14986_v0 = vlaneseq }
 0xcdc   :  { %v5760_v2 = vmul.f32 %v5744_v63, %v5728_v32  ;;  %v5800_v17 = vpop.permute.xlu0 %5799 }
 0xcdd   :  { %v5802_v42 = vpop.permute.xlu1 %5801  ;;  %v5817_v1 = vadd.f32 %v5800_v17, %v14979_v12  ;;  %v14089_v32 = vand.u32 127, %v14986_v0 }
 0xcde   :  { %v5769_v44 = vpack.c.bf16 %v5760_v2, %v5759_v6  ;;  %v5818_v40 = vadd.f32 %v5802_v42, %v14980_v53 }
 0xcdf   :  { %vm6408_vm2 = vcmp.lt.s32.totalorder %v14089_v32, 4 }
 0xce0   :  { %6277 = vmatmul.mubr.bf16.gmra.mrb[136].mxu1 %v5769_v44  ;;  %v5848_v43 = vpop.permute.xlu0 %5847 }
 0xce1   :  { %v5850_v54 = vpop.permute.xlu1 %5849  ;;  %v5865_v52 = vadd.f32 %v5848_v43, %v5817_v1 }
 0xce2   :  { %v5866_v57 = vadd.f32 %v5850_v54, %v5818_v40 }
 0xce3   :  { %v5913_v21 = vadd.f32 %v14981_v18, %v5865_v52 }
 0xce4   :  { %v5914_v48 = vadd.f32 %v14982_v19, %v5866_v57  ;;  %v5664_v34 = vpop.permute.xlu0 %5663 }
 0xce5   :  { %v5945_v50 = vmul.f32 %v5929_v51, %v5913_v21  ;;  %v5666_v20 = vpop.permute.xlu1 %5665  ;;  %v5681_v26 = vadd.f32 %v5664_v34, %v5601_v39 }
 0xce6   :  { %v5946_v28 = vmul.f32 %v5930_v7, %v5914_v48  ;;  %v5682_v36 = vadd.f32 %v5666_v20, %v5602_v60 }
 0xce8   :  { %v5712_v30 = vpop.permute.xlu0 %5711  ;;  %v5954_v23 = vpack.c.bf16 %v5946_v28, %v5945_v50 }
 0xce9   :  { %v5714_v31 = vpop.permute.xlu1 %5713  ;;  %v5729_v47 = vadd.f32 %v5712_v30, %v5681_v26 }
 0xcea   :  { %v5730_v35 = vadd.f32 %v5714_v31, %v5682_v36  ;;  %6284 = vmatprep.mubr.bf16.mxu1 %v5954_v23 }
 0xceb   :  { %v5761_v14 = vmul.f32 %v5745_v33, %v5729_v47 }
 0xcec   :  { %v5762_v25 = vmul.f32 %v5746_v62, %v5730_v35 }
 0xcee   :  { %v5770_v46 = vpack.c.bf16 %v5762_v25, %v5761_v14 }
 0xcf0   :  { %6285 = vmatmul.mubr.bf16.gmra.mrb[140].mxu1 %v5770_v46 }
 0xd53   :  { %v8324_v29 = vpop.f32.mrb[112].mxu1 }
 0xd54   :  { %v8325_v61 = vpop.f32.mrb[113].mxu1 }
 0xd55   :  { %v8326_v55 = vadd.f32 %v8325_v61, %v8324_v29  ;;  %v8327_v63 = vpop.f32.mrb[114].mxu1 }
 0xd56   :  { %v8328_v8 = vpop.f32.mrb[115].mxu1 }
 0xd57   :  { %v6231_v6 = vadd.f32 %v8326_v55, %v14086_v22  ;;  %v8329_v2 = vadd.f32 %v8328_v8, %v8327_v63 }
 0xd59   :  { %v6328_v17 = vadd.f32 %v14016_v3, %v6231_v6  ;;  %v6234_v42 = vadd.f32 %v8329_v2, %v14086_v22 }
 0xd5b   :  { %v14095_v44 = vmax.f32 %v6328_v17, 0.0  ;;  %v6331_v12 = vadd.f32 %v14020_v10, %v6234_v42 }
 0xd5d   :  { %v14098_v1 = vmax.f32 %v6331_v12, 0.0  ;;  %v6485_v53 = vsel %vm6408_vm2, %v14095_v44, inf  ;;  %v6411_v40 = vsel %vm6408_vm2, %v14095_v44, -inf }
 0xd5e   :  { %6501 = vmin.xlane.f32.xlu1 %v6485_v53  ;;  %6427 = vmax.xlane.f32.xlu0 %v6411_v40 }
 0xd5f   :  { %v6412_v3 = vsel %vm6408_vm2, %v14098_v1, -inf  ;;  %v6486_v10 = vsel %vm6408_vm2, %v14098_v1, inf }
 0xd62   :  { %6429 = vmax.xlane.f32.xlu1 %v6412_v3  ;;  %6503 = vmin.xlane.f32.xlu0 %v6486_v10 }
 0xd63   :  { %v8330_v43 = vpop.f32.mrb[116].mxu1 }
 0xd64   :  { %v8331_v54 = vpop.f32.mrb[117].mxu1 }
 0xd65   :  { %v8332_v52 = vadd.f32 %v8331_v54, %v8330_v43  ;;  %v8333_v57 = vpop.f32.mrb[118].mxu1 }
 0xd66   :  { %v8334_v51 = vpop.f32.mrb[119].mxu1 }
 0xd67   :  { %v6239_v7 = vadd.f32 %v8332_v52, %v14086_v22  ;;  %v8335_v18 = vadd.f32 %v8334_v51, %v8333_v57 }
 0xd69   :  { %v6336_v21 = vadd.f32 %v14014_v24, %v6239_v7  ;;  %v6242_v19 = vadd.f32 %v8335_v18, %v14086_v22 }
 0xd6b   :  { %v14115_v48 = vmax.f32 %v6336_v21, 0.0  ;;  %v6339_v34 = vadd.f32 %v14018_v56, %v6242_v19 }
 0xd6d   :  { %v14118_v38 = vmax.f32 %v6339_v34, 0.0  ;;  %v6487_v59 = vsel %vm6408_vm2, %v14115_v48, inf  ;;  %v6413_v39 = vsel %vm6408_vm2, %v14115_v48, -inf }
 0xd6e   :  { %6505 = vmin.xlane.f32.xlu1 %v6487_v59  ;;  %6431 = vmax.xlane.f32.xlu0 %v6413_v39 }
 0xd6f   :  { %v6414_v24 = vsel %vm6408_vm2, %v14118_v38, -inf  ;;  %v6488_v60 = vsel %vm6408_vm2, %v14118_v38, inf }
 0xd72   :  { %6433 = vmax.xlane.f32.xlu0 %v6414_v24 }
 0xd73   :  { %v8336_v50 = vpop.f32.mrb[120].mxu1 }
 0xd74   :  { %v8337_v20 = vpop.f32.mrb[121].mxu1 }
 0xd75   :  { %v8338_v56 = vadd.f32 %v8337_v20, %v8336_v50  ;;  %v8339_v15 = vpop.f32.mrb[122].mxu1 }
 0xd76   :  { %v8340_v28 = vpop.f32.mrb[123].mxu1  ;;  %6507 = vmin.xlane.f32.xlu0 %v6488_v60 }
 0xd77   :  { %v6247_v26 = vadd.f32 %v8338_v56, %v14086_v22  ;;  %v8341_v36 = vadd.f32 %v8340_v28, %v8339_v15 }
 0xd79   :  { %v6344_v33 = vadd.f32 %v14026_v4, %v6247_v26  ;;  %v6250_v30 = vadd.f32 %v8341_v36, %v14086_v22 }
 0xd7b   :  { %v14135_v23 = vmax.f32 %v6344_v33, 0.0  ;;  %v6347_v62 = vadd.f32 %v14031_v37, %v6250_v30 }
 0xd7d   :  { %v14138_v31 = vmax.f32 %v6347_v62, 0.0  ;;  %v6415_v47 = vsel %vm6408_vm2, %v14135_v23, -inf  ;;  %v6489_v4 = vsel %vm6408_vm2, %v14135_v23, inf }
 0xd7e   :  { %6435 = vmax.xlane.f32.xlu1 %v6415_v47 }
 0xd7f   :  { %v6416_v35 = vsel %vm6408_vm2, %v14138_v31, -inf  ;;  %v6490_v37 = vsel %vm6408_vm2, %v14138_v31, inf }
 0xd80   :  { %6437 = vmax.xlane.f32.xlu0 %v6416_v35 }
 0xd82   :  { %6509 = vmin.xlane.f32.xlu1 %v6489_v4 }
 0xd83   :  { %v8342_v14 = vpop.f32.mrb[124].mxu1 }
 0xd84   :  { %v8343_v25 = vpop.f32.mrb[125].mxu1  ;;  %6511 = vmin.xlane.f32.xlu0 %v6490_v37 }
 0xd85   :  { %v8344_v46 = vadd.f32 %v8343_v25, %v8342_v14  ;;  %v8345_v29 = vpop.f32.mrb[126].mxu1 }
 0xd86   :  { %v8346_v61 = vpop.f32.mrb[127].mxu1 }
 0xd87   :  { %v6255_v55 = vadd.f32 %v8344_v46, %v14086_v22  ;;  %v8347_v63 = vadd.f32 %v8346_v61, %v8345_v29 }
 0xd89   :  { %v6352_v8 = vadd.f32 %v14024_v41, %v6255_v55  ;;  %v6258_v0 = vadd.f32 %v8347_v63, %v14086_v22 }
 0xd8b   :  { %v14155_v6 = vmax.f32 %v6352_v8, 0.0  ;;  %v6355_v2 = vadd.f32 %v14028_v5, %v6258_v0 }
 0xd8d   :  { %v14158_v17 = vmax.f32 %v6355_v2, 0.0  ;;  %v6417_v42 = vsel %vm6408_vm2, %v14155_v6, -inf  ;;  %v6491_v41 = vsel %vm6408_vm2, %v14155_v6, inf }
 0xd8e   :  { %6439 = vmax.xlane.f32.xlu1 %v6417_v42 }
 0xd8f   :  { %v6418_v12 = vsel %vm6408_vm2, %v14158_v17, -inf  ;;  %v6492_v5 = vsel %vm6408_vm2, %v14158_v17, inf }
 0xd90   :  { %6441 = vmax.xlane.f32.xlu0 %v6418_v12 }
 0xd92   :  { %6513 = vmin.xlane.f32.xlu1 %v6491_v41 }
 0xd93   :  { %v8348_v53 = vpop.f32.mrb[128].mxu1 }
 0xd94   :  { %v8349_v40 = vpop.f32.mrb[129].mxu1  ;;  %6515 = vmin.xlane.f32.xlu0 %v6492_v5 }
 0xd95   :  { %v8350_v3 = vadd.f32 %v8349_v40, %v8348_v53  ;;  %v8351_v10 = vpop.f32.mrb[130].mxu1 }
 0xd96   :  { %v8352_v43 = vpop.f32.mrb[131].mxu1 }
 0xd97   :  { %v6263_v54 = vadd.f32 %v8350_v3, %v14086_v22  ;;  %v8353_v52 = vadd.f32 %v8352_v43, %v8351_v10 }
 0xd99   :  { %v6360_v57 = vadd.f32 %v14040_v13, %v6263_v54  ;;  %v6266_v51 = vadd.f32 %v8353_v52, %v14086_v22 }
 0xd9b   :  { %v14175_v7 = vmax.f32 %v6360_v57, 0.0  ;;  %v6363_v18 = vadd.f32 %v14044_v58, %v6266_v51 }
 0xd9d   :  { %v14178_v21 = vmax.f32 %v6363_v18, 0.0  ;;  %v6419_v19 = vsel %vm6408_vm2, %v14175_v7, -inf  ;;  %v6493_v13 = vsel %vm6408_vm2, %v14175_v7, inf }
 0xd9e   :  { %6443 = vmax.xlane.f32.xlu1 %v6419_v19 }
 0xd9f   :  { %v6420_v34 = vsel %vm6408_vm2, %v14178_v21, -inf  ;;  %v6494_v58 = vsel %vm6408_vm2, %v14178_v21, inf }
 0xda0   :  { %6445 = vmax.xlane.f32.xlu0 %v6420_v34 }
 0xda2   :  { %6517 = vmin.xlane.f32.xlu1 %v6493_v13 }
 0xda3   :  { %v8354_v59 = vpop.f32.mrb[132].mxu1 }
 0xda4   :  { %v8355_v39 = vpop.f32.mrb[133].mxu1  ;;  %6519 = vmin.xlane.f32.xlu0 %v6494_v58 }
 0xda5   :  { %v8356_v24 = vadd.f32 %v8355_v39, %v8354_v59  ;;  %v8357_v50 = vpop.f32.mrb[134].mxu1 }
 0xda6   :  { %v8358_v20 = vpop.f32.mrb[135].mxu1 }
 0xda7   :  { %v6271_v56 = vadd.f32 %v8356_v24, %v14086_v22  ;;  %v8359_v15 = vadd.f32 %v8358_v20, %v8357_v50 }
 0xda9   :  { %v6368_v60 = vadd.f32 %v14038_v11, %v6271_v56  ;;  %v6274_v28 = vadd.f32 %v8359_v15, %v14086_v22  ;;  %v9022_v56 = vmov 0  }
 0xdaa   :  { %8620 = vset.pattern.permute.xlu1 %v9022_v56  ;;  %8621 = vset.pattern.permute.xlu0 %v9022_v56 }
 0xdab   :  { %v14195_v26 = vmax.f32 %v6368_v60, 0.0  ;;  %v6371_v36 = vadd.f32 %v14042_v49, %v6274_v28  ;;  %7267 = vmatprep.mubr.bf16.mxu0 %v9022_v56 }
 0xdad   :  { %v14198_v33 = vmax.f32 %v6371_v36, 0.0  ;;  %v6421_v30 = vsel %vm6408_vm2, %v14195_v26, -inf  ;;  %v6495_v11 = vsel %vm6408_vm2, %v14195_v26, inf }
 0xdae   :  { %6447 = vmax.xlane.f32.xlu1 %v6421_v30 }
 0xdaf   :  { %v6422_v62 = vsel %vm6408_vm2, %v14198_v33, -inf  ;;  %v6496_v49 = vsel %vm6408_vm2, %v14198_v33, inf }
 0xdb0   :  { %6449 = vmax.xlane.f32.xlu0 %v6422_v62 }
 0xdb2   :  { %6521 = vmin.xlane.f32.xlu1 %v6495_v11 }
 0xdb3   :  { %v8360_v47 = vpop.f32.mrb[136].mxu1 }
 0xdb4   :  { %v8361_v35 = vpop.f32.mrb[137].mxu1  ;;  %6523 = vmin.xlane.f32.xlu0 %v6496_v49 }
 0xdb5   :  { %v8362_v4 = vadd.f32 %v8361_v35, %v8360_v47  ;;  %v8363_v14 = vpop.f32.mrb[138].mxu1 }
 0xdb6   :  { %v8364_v37 = vpop.f32.mrb[139].mxu1 }
 0xdb7   :  { %v6279_v25 = vadd.f32 %v8362_v4, %v14086_v22  ;;  %v8365_v46 = vadd.f32 %v8364_v37, %v8363_v14 }
 0xdb9   :  { %v6376_v29 = vadd.f32 %v14050_v45, %v6279_v25  ;;  %v6282_v61 = vadd.f32 %v8365_v46, %v14086_v22 }
 0xdbb   :  { %v14215_v55 = vmax.f32 %v6376_v29, 0.0  ;;  %v6379_v63 = vadd.f32 %v14055_v9, %v6282_v61 }
 0xdbd   :  { %v14218_v8 = vmax.f32 %v6379_v63, 0.0  ;;  %v6423_v0 = vsel %vm6408_vm2, %v14215_v55, -inf  ;;  %v6497_v45 = vsel %vm6408_vm2, %v14215_v55, inf }
 0xdbe   :  { %6451 = vmax.xlane.f32.xlu1 %v6423_v0 }
 0xdbf   :  { %v6424_v2 = vsel %vm6408_vm2, %v14218_v8, -inf  ;;  %v6498_v9 = vsel %vm6408_vm2, %v14218_v8, inf }
 0xdc0   :  { %6453 = vmax.xlane.f32.xlu0 %v6424_v2 }
 0xdc2   :  { %6525 = vmin.xlane.f32.xlu1 %v6497_v45 }
 0xdc3   :  { %v8366_v42 = vpop.f32.mrb[140].mxu1 }
 0xdc4   :  { %v8367_v12 = vpop.f32.mrb[141].mxu1  ;;  %6527 = vmin.xlane.f32.xlu0 %v6498_v9 }
 0xdc5   :  { %v8368_v41 = vadd.f32 %v8367_v12, %v8366_v42  ;;  %v8369_v53 = vpop.f32.mrb[142].mxu1 }
 0xdc6   :  { %v8370_v5 = vpop.f32.mrb[143].mxu1 }
 0xdc7   :  { %v6287_v40 = vadd.f32 %v8368_v41, %v14086_v22  ;;  %v8371_v3 = vadd.f32 %v8370_v5, %v8369_v53 }
 0xdc9   :  { %v6384_v10 = vadd.f32 %v14048_v16, %v6287_v40  ;;  %v6290_v43 = vadd.f32 %v8371_v3, %v14086_v22 }
 0xdcb   :  { %v14235_v54 = vmax.f32 %v6384_v10, 0.0  ;;  %v6387_v52 = vadd.f32 %v14052_v27, %v6290_v43 }
 0xdcd   :  { %v14238_v57 = vmax.f32 %v6387_v52, 0.0  ;;  %v6425_v51 = vsel %vm6408_vm2, %v14235_v54, -inf  ;;  %v6499_v16 = vsel %vm6408_vm2, %v14235_v54, inf }
 0xdce   :  { %6455 = vmax.xlane.f32.xlu1 %v6425_v51 }
 0xdcf   :  { %v6426_v18 = vsel %vm6408_vm2, %v14238_v57, -inf  ;;  %v6500_v27 = vsel %vm6408_vm2, %v14238_v57, inf }
 0xdd0   :  { %6457 = vmax.xlane.f32.xlu0 %v6426_v18 }
 0xdd2   :  { %6529 = vmin.xlane.f32.xlu1 %v6499_v16 }
 0xdd4   :  { %6531 = vmin.xlane.f32.xlu0 %v6500_v27 }
 0xdeb   :  { %v6428_v22 = vpop.xlane.xlu0 %6427  ;;  %v6502_v34 = vpop.xlane.xlu1 %6501 }
 0xdef   :  { %v6504_v19 = vpop.xlane.xlu0 %6503  ;;  %v6430_v59 = vpop.xlane.xlu1 %6429 }
 0xdfb   :  { %v6432_v13 = vpop.xlane.xlu0 %6431  ;;  %v6506_v39 = vpop.xlane.xlu1 %6505 }
 0xdfc   :  { %v6459_v28 = vmax.f32 %v6428_v22, %v6432_v13  ;;  %v6533_v49 = vmin.f32 %v6502_v34, %v6506_v39 }
 0xdff   :  { %v6434_v58 = vpop.xlane.xlu0 %6433 }
 0xe00   :  { %v6460_v36 = vmax.f32 %v6430_v59, %v6434_v58 }
 0xe03   :  { %v6508_v24 = vpop.xlane.xlu0 %6507 }
 0xe04   :  { %v6534_v35 = vmin.f32 %v6504_v19, %v6508_v24 }
 0xe0b   :  { %v6436_v50 = vpop.xlane.xlu1 %6435 }
 0xe0c   :  { %v6461_v62 = vmax.f32 %v6459_v28, %v6436_v50  ;;  %v14261_v50 = vld [vmem:[#allocation15] ss:$0 sm:$0xff] }
 0xe0d   :  { %v6438_v20 = vpop.xlane.xlu0 %6437 }
 0xe0e   :  { %v6462_v11 = vmax.f32 %v6460_v36, %v6438_v20 }
 0xe0f   :  { %v6510_v15 = vpop.xlane.xlu1 %6509 }
 0xe10   :  { %v6535_v25 = vmin.f32 %v6533_v49, %v6510_v15 }
 0xe11   :  { %v6512_v60 = vpop.xlane.xlu0 %6511 }
 0xe12   :  { %v6536_v46 = vmin.f32 %v6534_v35, %v6512_v60 }
 0xe1b   :  { %v6440_v30 = vpop.xlane.xlu1 %6439 }
 0xe1c   :  { %v6463_v4 = vmax.f32 %v6461_v62, %v6440_v30 }
 0xe1d   :  { %v6442_v47 = vpop.xlane.xlu0 %6441 }
 0xe1e   :  { %v6464_v14 = vmax.f32 %v6462_v11, %v6442_v47 }
 0xe1f   :  { %v6514_v37 = vpop.xlane.xlu1 %6513 }
 0xe20   :  { %v6465_v29 = vmax.f32 %v6463_v4, %v6464_v14  ;;  %v6537_v0 = vmin.f32 %v6535_v25, %v6514_v37 }
 0xe21   :  { %v6516_v61 = vpop.xlane.xlu0 %6515 }
 0xe22   :  { %v6466_v63 = vrot.slane %v6465_v29, 4  ;;  %v6538_v2 = vmin.f32 %v6536_v46, %v6516_v61 }
 0xe24   :  { %v6467_v45 = vmax.f32 %v6465_v29, %v6466_v63  ;;  %v6539_v42 = vmin.f32 %v6537_v0, %v6538_v2 }
 0xe26   :  { %v6468_v9 = vrot.slane %v6467_v45, 2  ;;  %v6540_v12 = vrot.slane %v6539_v42, 4 }
 0xe28   :  { %v6469_v41 = vmax.f32 %v6467_v45, %v6468_v9  ;;  %v6541_v53 = vmin.f32 %v6539_v42, %v6540_v12 }
 0xe2a   :  { %v6542_v5 = vrot.slane %v6541_v53, 2  ;;  %v6470_v40 = vrot.slane %v6469_v41, 1 }
 0xe2b   :  { %v14252_v18 = vpop.xlane.xlu1 %6443 }
 0xe2c   :  { %v6543_v3 = vmin.f32 %v6541_v53, %v6542_v5  ;;  %v6471_v43 = vmax.f32 %v6469_v41, %v6470_v40 }
 0xe2d   :  { %v6446_v39 = vpop.xlane.xlu0 %6445 }
 0xe2e   :  { %v6544_v10 = vrot.slane %v6543_v3, 1 }
 0xe2f   :  { %v6518_v36 = vpop.xlane.xlu1 %6517 }
 0xe30   :  { %v6545_v52 = vmin.f32 %v6543_v3, %v6544_v10 }
 0xe31   :  { %v6520_v49 = vpop.xlane.xlu0 %6519 }
 0xe32   :  { %v6575_v51 = vsub.f32 %v6471_v43, %v6545_v52  ;;  %v6560_v16 = vsub.f32 %v14098_v1, %v6545_v52  ;;  %v6559_v27 = vsub.f32 %v14095_v44, %v6545_v52  ;;  %v6561_v22 = vsub.f32 %v14115_v48, %v6545_v52 }
 0xe33   :  { %v6562_v19 = vsub.f32 %v14118_v38, %v6545_v52  ;;  %v6563_v13 = vsub.f32 %v14135_v23, %v6545_v52  ;;  %v6564_v59 = vsub.f32 %v14138_v31, %v6545_v52  ;;  %v6565_v58 = vsub.f32 %v14155_v6, %v6545_v52 }
 0xe34   :  { %8804 = vrcp.f32 %v6575_v51  ;;  %v6566_v47 = vsub.f32 %v14158_v17, %v6545_v52 }
 0xe3b   :  { %v6448_v14 = vpop.xlane.xlu1 %6447 }
 0xe3c   :  { %v6472_v12 = vmax.f32 %v14252_v18, %v6448_v14 }
 0xe3d   :  { %v6450_v37 = vpop.xlane.xlu0 %6449 }
 0xe3e   :  { %v8805_v34 = vpop.eup %8804  ;;  %v6473_v41 = vmax.f32 %v6446_v39, %v6450_v37 }
 0xe3f   :  { %v6579_v24 = vmul.f32 %v8805_v34, %v6560_v16  ;;  %v6578_v20 = vmul.f32 %v8805_v34, %v6559_v27  ;;  %v6580_v56 = vmul.f32 %v8805_v34, %v6561_v22  ;;  %v6581_v1 = vmul.f32 %v8805_v34, %v6562_v19  ;;  %v6522_v46 = vpop.xlane.xlu1 %6521 }
 0xe40   :  { %v6582_v15 = vmul.f32 %v8805_v34, %v6563_v13  ;;  %v6583_v44 = vmul.f32 %v8805_v34, %v6564_v59  ;;  %v6584_v60 = vmul.f32 %v8805_v34, %v6565_v58  ;;  %v6585_v35 = vmul.f32 %v8805_v34, %v6566_v47 }
 0xe41   :  { %v6596_v48 = vsel %vm6408_vm2, %v6579_v24, 0.0  ;;  %v6595_v38 = vsel %vm6408_vm2, %v6578_v20, 0.0  ;;  %v6597_v23 = vsel %vm6408_vm2, %v6580_v56, 0.0  ;;  %v6598_v31 = vsel %vm6408_vm2, %v6581_v1, 0.0  ;;  %v6524_v61 = vpop.xlane.xlu0 %6523 }
 0xe42   :  { %v6635_v6 = vmul.f32 %v14261_v50, %v6596_v48  ;;  %6612 = vst [vmem:[%s14687_s14 + $0x8] sm:$0xff] %v6596_v48  ;;  %v6634_v28 = vmul.f32 %v14261_v50, %v6595_v38  ;;  %6611 = vst [vmem:[%s14687_s14] sm:$0xff] %v6595_v38  ;;  %v6599_v30 = vsel %vm6408_vm2, %v6582_v15, 0.0  ;;  %v6600_v62 = vsel %vm6408_vm2, %v6583_v44, 0.0 }
 0xe43   :  { %6613 = vst [vmem:[%s14687_s14 + $0x10] sm:$0xff] %v6597_v23  ;;  %6614 = vst [vmem:[%s14687_s14 + $0x18] sm:$0xff] %v6598_v31  ;;  %v6601_v11 = vsel %vm6408_vm2, %v6584_v60, 0.0  ;;  %v6636_v4 = vmul.f32 %v14261_v50, %v6597_v23  ;;  %v6602_v17 = vsel %vm6408_vm2, %v6585_v35, 0.0  ;;  %v6637_v25 = vmul.f32 %v14261_v50, %v6598_v31 }
 0xe44   :  { %6652 = vadd.xlane.f32.xlu0 %v6635_v6  ;;  %6650 = vadd.xlane.f32.xlu1 %v6634_v28  ;;  %6615 = vst [vmem:[%s14687_s14 + $0x20] sm:$0xff] %v6599_v30  ;;  %6616 = vst [vmem:[%s14687_s14 + $0x28] sm:$0xff] %v6600_v62  ;;  %v6638_v29 = vmul.f32 %v14261_v50, %v6599_v30  ;;  %v6639_v0 = vmul.f32 %v14261_v50, %v6600_v62 }
 0xe45   :  { %6617 = vst [vmem:[%s14687_s14 + $0x30] sm:$0xff] %v6601_v11  ;;  %6618 = vst [vmem:[%s14687_s14 + $0x38] sm:$0xff] %v6602_v17  ;;  %v6640_v45 = vmul.f32 %v14261_v50, %v6601_v11  ;;  %v6641_v53 = vmul.f32 %v14261_v50, %v6602_v17  ;;  %v6546_v43 = vmin.f32 %v6518_v36, %v6522_v46 }
 0xe46   :  { %v6547_v52 = vmin.f32 %v6520_v49, %v6524_v61 }
 0xe48   :  { %6654 = vadd.xlane.f32.xlu1 %v6636_v4 }
 0xe4b   :  { %v6452_v63 = vpop.xlane.xlu1 %6451 }
 0xe4c   :  { %6656 = vadd.xlane.f32.xlu1 %v6637_v25  ;;  %v6474_v40 = vmax.f32 %v6472_v12, %v6452_v63 }
 0xe4d   :  { %v6454_v2 = vpop.xlane.xlu0 %6453 }
 0xe4e   :  { %v6475_v3 = vmax.f32 %v6473_v41, %v6454_v2  ;;  %v7879_v41 = vld [vmem:[#allocation4] ss:$0 sm:$0xff] }
 0xe4f   :  { %v6526_v42 = vpop.xlane.xlu1 %6525 }
 0xe50   :  { %6658 = vadd.xlane.f32.xlu1 %v6638_v29  ;;  %v6548_v22 = vmin.f32 %v6546_v43, %v6526_v42 }
 0xe51   :  { %v6528_v9 = vpop.xlane.xlu0 %6527 }
 0xe52   :  { %v6549_v19 = vmin.f32 %v6547_v52, %v6528_v9 }
 0xe54   :  { %6660 = vadd.xlane.f32.xlu1 %v6639_v0 }
 0xe58   :  { %6662 = vadd.xlane.f32.xlu1 %v6640_v45 }
 0xe5b   :  { %v6456_v5 = vpop.xlane.xlu1 %6455 }
 0xe5c   :  { %6664 = vadd.xlane.f32.xlu1 %v6641_v53  ;;  %v6476_v51 = vmax.f32 %v6474_v40, %v6456_v5  ;;  %v7881_v5 = vld [vmem:[#allocation6] ss:$0 sm:$0xff] }
 0xe5d   :  { %v6458_v10 = vpop.xlane.xlu0 %6457 }
 0xe5e   :  { %v6477_v16 = vmax.f32 %v6475_v3, %v6458_v10 }
 0xe5f   :  { %v6530_v27 = vpop.xlane.xlu1 %6529 }
 0xe60   :  { %v6478_v34 = vmax.f32 %v6476_v51, %v6477_v16  ;;  %v6550_v58 = vmin.f32 %v6548_v22, %v6530_v27 }
 0xe61   :  { %v6532_v13 = vpop.xlane.xlu0 %6531 }
 0xe62   :  { %v6479_v59 = vrot.slane %v6478_v34, 4  ;;  %v6551_v18 = vmin.f32 %v6549_v19, %v6532_v13  ;;  %v6744_v13 = vadd.s32 4294967288, %v14089_v32 }
 0xe64   :  { %v6480_v39 = vmax.f32 %v6478_v34, %v6479_v59  ;;  %v6552_v24 = vmin.f32 %v6550_v58, %v6551_v18  ;;  %v6751_v59 = vadd.s32 4294967280, %v14089_v32  ;;  %v6758_v58 = vadd.s32 4294967272, %v14089_v32 }
 0xe65   :  { %v6765_v18 = vadd.s32 4294967264, %v14089_v32 }
 0xe66   :  { %v6481_v20 = vrot.slane %v6480_v39, 2  ;;  %v6553_v56 = vrot.slane %v6552_v24, 4 }
 0xe68   :  { %v6482_v1 = vmax.f32 %v6480_v39, %v6481_v20  ;;  %v6554_v15 = vmin.f32 %v6552_v24, %v6553_v56  ;;  %v6779_v39 = vadd.s32 4294967248, %v14089_v32  ;;  %v14987_v24 = vld [vmem:[#allocation25_spill] sm:$0xff] }
 0xe69   :  { %v14377_v20 = vsub.s32 %v14089_v32, %v14987_v24 }
 0xe6a   :  { %v6555_v44 = vrot.slane %v6554_v15, 2  ;;  %v6483_v60 = vrot.slane %v6482_v1, 1 }
 0xe6c   :  { %v6556_v48 = vmin.f32 %v6554_v15, %v6555_v44  ;;  %v6484_v23 = vmax.f32 %v6482_v1, %v6483_v60  ;;  %v14382_v1 = vsub.s32 %v6744_v13, %v14987_v24  ;;  %v14385_v15 = vsub.s32 %v6751_v59, %v14987_v24 }
 0xe6d   :  { %v14388_v60 = vsub.s32 %v6758_v58, %v14987_v24 }
 0xe6e   :  { %v6557_v38 = vrot.slane %v6556_v48, 1 }
 0xe70   :  { %v6558_v31 = vmin.f32 %v6556_v48, %v6557_v38  ;;  %v6786_v48 = vadd.s32 4294967240, %v14089_v32 }
 0xe72   :  { %v6576_v6 = vsub.f32 %v6484_v23, %v6558_v31  ;;  %v6568_v28 = vsub.f32 %v14178_v21, %v6558_v31  ;;  %v6567_v36 = vsub.f32 %v14175_v7, %v6558_v31  ;;  %v6569_v30 = vsub.f32 %v14195_v26, %v6558_v31 }
 0xe73   :  { %v6570_v62 = vsub.f32 %v14198_v33, %v6558_v31  ;;  %v6571_v47 = vsub.f32 %v14215_v55, %v6558_v31  ;;  %v6572_v49 = vsub.f32 %v14218_v8, %v6558_v31  ;;  %v6573_v35 = vsub.f32 %v14235_v54, %v6558_v31 }
 0xe74   :  { %8806 = vrcp.f32 %v6576_v6  ;;  %v6574_v4 = vsub.f32 %v14238_v57, %v6558_v31  ;;  %v14395_v6 = vsub.s32 %v6765_v18, %v14987_v24 }
 0xe7e   :  { %v8807_v11 = vpop.eup %8806 }
 0xe7f   :  { %v6588_v14 = vmul.f32 %v8807_v11, %v6568_v28  ;;  %v6587_v17 = vmul.f32 %v8807_v11, %v6567_v36  ;;  %v6589_v37 = vmul.f32 %v8807_v11, %v6569_v30  ;;  %v6590_v25 = vmul.f32 %v8807_v11, %v6570_v62 }
 0xe80   :  { %v6591_v21 = vmul.f32 %v8807_v11, %v6571_v47  ;;  %v6592_v46 = vmul.f32 %v8807_v11, %v6572_v49  ;;  %v6593_v7 = vmul.f32 %v8807_v11, %v6573_v35  ;;  %v6594_v29 = vmul.f32 %v8807_v11, %v6574_v4 }
 0xe81   :  { %v6604_v26 = vsel %vm6408_vm2, %v6588_v14, 0.0  ;;  %v6603_v33 = vsel %vm6408_vm2, %v6587_v17, 0.0  ;;  %v6605_v55 = vsel %vm6408_vm2, %v6589_v37, 0.0  ;;  %v6606_v8 = vsel %vm6408_vm2, %v6590_v25, 0.0 }
 0xe82   :  { %v6643_v54 = vmul.f32 %v14261_v50, %v6604_v26  ;;  %6620 = vst [vmem:[%s14687_s14 + $0x48] sm:$0xff] %v6604_v26  ;;  %v6642_v57 = vmul.f32 %v14261_v50, %v6603_v33  ;;  %6619 = vst [vmem:[%s14687_s14 + $0x40] sm:$0xff] %v6603_v33  ;;  %v6607_v61 = vsel %vm6408_vm2, %v6591_v21, 0.0  ;;  %v6608_v63 = vsel %vm6408_vm2, %v6592_v46, 0.0 }
 0xe83   :  { %6621 = vst [vmem:[%s14687_s14 + $0x50] sm:$0xff] %v6605_v55  ;;  %6622 = vst [vmem:[%s14687_s14 + $0x58] sm:$0xff] %v6606_v8  ;;  %v6609_v0 = vsel %vm6408_vm2, %v6593_v7, 0.0  ;;  %v6610_v2 = vsel %vm6408_vm2, %v6594_v29, 0.0  ;;  %v6644_v45 = vmul.f32 %v14261_v50, %v6605_v55  ;;  %v6645_v42 = vmul.f32 %v14261_v50, %v6606_v8 }
 0xe84   :  { %6668 = vadd.xlane.f32.xlu0 %v6643_v54  ;;  %6666 = vadd.xlane.f32.xlu1 %v6642_v57  ;;  %6623 = vst [vmem:[%s14687_s14 + $0x60] sm:$0xff] %v6607_v61  ;;  %6624 = vst [vmem:[%s14687_s14 + $0x68] sm:$0xff] %v6608_v63  ;;  %v6646_v9 = vmul.f32 %v14261_v50, %v6607_v61  ;;  %v6647_v12 = vmul.f32 %v14261_v50, %v6608_v63 }
 0xe85   :  { %6625 = vst [vmem:[%s14687_s14 + $0x70] sm:$0xff] %v6609_v0  ;;  %6626 = vst [vmem:[%s14687_s14 + $0x78] sm:$0xff] %v6610_v2  ;;  %v6648_v53 = vmul.f32 %v14261_v50, %v6609_v0  ;;  %v6649_v40 = vmul.f32 %v14261_v50, %v6610_v2  ;;  %v6772_v50 = vadd.s32 4294967256, %v14089_v32  ;;  %v14401_v36 = vsub.s32 %v6779_v39, %v14987_v24 }
 0xe86   :  { %v14413_v4 = vsub.s32 %v6786_v48, %v14987_v24 }
 0xe87   :  { %v14398_v28 = vsub.s32 %v6772_v50, %v14987_v24 }
 0xe88   :  { %6670 = vadd.xlane.f32.xlu0 %v6644_v45 }
 0xe8c   :  { %6672 = vadd.xlane.f32.xlu0 %v6645_v42 }
 0xe90   :  { %6674 = vadd.xlane.f32.xlu0 %v6646_v9 }
 0xe94   :  { %6676 = vadd.xlane.f32.xlu0 %v6647_v12 }
 0xe95   :  { %6689 = vperm.xlu1 %8620, %v7879_v41  }
 0xe98   :  { %6678 = vadd.xlane.f32.xlu0 %v6648_v53 }
 0xe99   :  { %7040 = vperm.xlu1 %8620, %v7881_v5  }
 0xe9c   :  { %6680 = vadd.xlane.f32.xlu0 %v6649_v40 }
 0xed1   :  { %v6651_v3 = vpop.xlane.xlu1 %6650  ;;  %v6653_v27 = vpop.xlane.xlu0 %6652 }
 0xed5   :  { %v6655_v10 = vpop.xlane.xlu1 %6654 }
 0xed9   :  { %v6657_v43 = vpop.xlane.xlu1 %6656 }
 0xedd   :  { %v6659_v52 = vpop.xlane.xlu1 %6658 }
 0xee1   :  { %v6661_v51 = vpop.xlane.xlu1 %6660 }
 0xee5   :  { %v6663_v16 = vpop.xlane.xlu1 %6662 }
 0xee9   :  { %v6665_v22 = vpop.xlane.xlu1 %6664 }
 0xf11   :  { %v6667_v19 = vpop.xlane.xlu1 %6666  ;;  %v6669_v34 = vpop.xlane.xlu0 %6668 }
 0xf15   :  { %v14379_v56 = vpop.permute.xlu1 %6689  ;;  %v6671_v44 = vpop.xlane.xlu0 %6670 }
 0xf16   :  { %v6700_v38 = vadd.f32 %v14379_v56, %v6667_v19  ;;  %v6701_v23 = vadd.f32 %v14379_v56, %v6669_v34  ;;  %v6702_v31 = vadd.f32 %v14379_v56, %v6671_v44  ;;  %v6692_v30 = vadd.f32 %v14379_v56, %v6651_v3 }
 0xf17   :  { %v6693_v32 = vadd.f32 %v14379_v56, %v6653_v27  ;;  %v6694_v49 = vadd.f32 %v14379_v56, %v6655_v10  ;;  %v6695_v14 = vadd.f32 %v14379_v56, %v6657_v43  ;;  %v6696_v17 = vadd.f32 %v14379_v56, %v6659_v52 }
 0xf18   :  { %v14405_v62 = vmax.f32 %v6700_v38, 0.0  ;;  %v14407_v11 = vmax.f32 %v6701_v23, 0.0  ;;  %v14409_v47 = vmax.f32 %v6702_v31, 0.0  ;;  %v6697_v37 = vadd.f32 %v14379_v56, %v6661_v51 }
 0xf19   :  { %v6673_v35 = vpop.xlane.xlu0 %6672  ;;  %v6698_v33 = vadd.f32 %v14379_v56, %v6663_v16  ;;  %v14430_v55 = vmax.f32 %v6692_v30, 0.0  ;;  %v14434_v57 = vmax.f32 %v6693_v32, 0.0  ;;  %v14436_v61 = vmax.f32 %v6694_v49, 0.0 }
 0xf1a   :  { %v6796_v25 = vrot.slane %v14405_v62, %v14377_v20  ;;  %v6800_v21 = vrot.slane %v14407_v11, %v14382_v1  ;;  %v6855_v46 = vmul.f32 %v14405_v62, %v14405_v62  ;;  %v6856_v7 = vmul.f32 %v14407_v11, %v14407_v11 }
 0xf1b   :  { %v6857_v29 = vmul.f32 %v14409_v47, %v14409_v47  ;;  %v6703_v26 = vadd.f32 %v14379_v56, %v6673_v35  ;;  %v6805_v63 = vrot.slane %v14409_v47, %v14385_v15  ;;  %v6699_v42 = vadd.f32 %v14379_v56, %v6665_v22 }
 0xf1c   :  { %v6921_v8 = vrot.slane %v6855_v46, %v14377_v20  ;;  %v6925_v54 = vrot.slane %v6856_v7, %v14382_v1  ;;  %v6801_v9 = vsel %vm6749_vm3, %v6800_v21, %v6796_v25  ;;  %v14447_v53 = vmax.f32 %v6695_v14, 0.0 }
 0xf1d   :  { %v6930_v0 = vrot.slane %v6857_v29, %v14385_v15  ;;  %v14441_v2 = vmax.f32 %v6703_v26, 0.0  ;;  %v6675_v45 = vpop.xlane.xlu0 %6674  ;;  %v14453_v3 = vmax.f32 %v6696_v17, 0.0  ;;  %v14455_v10 = vmax.f32 %v6697_v37, 0.0 }
 0xf1e   :  { %v6926_v12 = vsel %vm6749_vm3, %v6925_v54, %v6921_v8  ;;  %v6704_v41 = vadd.f32 %v14379_v56, %v6675_v45  ;;  %v6743_v52 = vrot.slane %v14430_v55, %v14377_v20  ;;  %v6748_v51 = vrot.slane %v14434_v57, %v14382_v1 }
 0xf1f   :  { %v6810_v5 = vrot.slane %v14441_v2, %v14388_v60  ;;  %v6858_v40 = vmul.f32 %v14441_v2, %v14441_v2  ;;  %v6755_v16 = vrot.slane %v14436_v61, %v14385_v15  ;;  %v6806_v27 = vsel %vm6756_vm4, %v6805_v63, %v6801_v9 }
 0xf20   :  { %v14457_v43 = vmax.f32 %v6704_v41, 0.0  ;;  %v6931_v22 = vsel %vm6756_vm4, %v6930_v0, %v6926_v12  ;;  %v14468_v13 = vmax.f32 %v6698_v33, 0.0  ;;  %v14471_v58 = vmax.f32 %v6699_v42, 0.0 }
 0xf21   :  { %v6935_v19 = vrot.slane %v6858_v40, %v14388_v60  ;;  %v6677_v34 = vpop.xlane.xlu0 %6676  ;;  %v6750_v18 = vsel %vm6749_vm3, %v6748_v51, %v6743_v52  ;;  %v6762_v50 = vrot.slane %v14447_v53, %v14388_v60  ;;  %v6769_v38 = vrot.slane %v14453_v3, %v14395_v6 }
 0xf22   :  { %v6705_v59 = vadd.f32 %v14379_v56, %v6677_v34  ;;  %v6815_v39 = vrot.slane %v14457_v43, %v14395_v6  ;;  %v6859_v44 = vmul.f32 %v14457_v43, %v14457_v43  ;;  %v6757_v48 = vsel %vm6756_vm4, %v6755_v16, %v6750_v18 }
 0xf23   :  { %v6811_v23 = vsel %vm6763_vm5, %v6810_v5, %v6806_v27  ;;  %v6764_v30 = vsel %vm6763_vm5, %v6762_v50, %v6757_v48  ;;  %v6776_v32 = vrot.slane %v14455_v10, %v14398_v28  ;;  %v6936_v49 = vsel %vm6763_vm5, %v6935_v19, %v6931_v22 }
 0xf24   :  { %v14484_v31 = vmax.f32 %v6705_v59, 0.0  ;;  %v6771_v14 = vsel %vm6770_vm6, %v6769_v38, %v6764_v30  ;;  %v6783_v17 = vrot.slane %v14468_v13, %v14401_v36  ;;  %v6847_v37 = vmul.f32 %v14430_v55, %v14430_v55 }
 0xf25   :  { %v6679_v35 = vpop.xlane.xlu0 %6678  ;;  %v6778_v46 = vsel %vm6777_vm7, %v6776_v32, %v6771_v14  ;;  %v6848_v7 = vmul.f32 %v14434_v57, %v14434_v57  ;;  %v6816_v29 = vsel %vm6770_vm6, %v6815_v39, %v6811_v23  ;;  %v6940_v26 = vrot.slane %v6859_v44, %v14395_v6 }
 0xf26   :  { %v6860_v25 = vmul.f32 %v14484_v31, %v14484_v31  ;;  %v6706_v21 = vadd.f32 %v14379_v56, %v6679_v35  ;;  %v6790_v33 = vrot.slane %v14471_v58, %v14413_v4  ;;  %v6849_v8 = vmul.f32 %v14436_v61, %v14436_v61 }
 0xf27   :  { %v6820_v54 = vrot.slane %v14484_v31, %v14398_v28  ;;  %v6785_v0 = vsel %vm6784_vm8, %v6783_v17, %v6778_v46  ;;  %v6850_v45 = vmul.f32 %v14447_v53, %v14447_v53  ;;  %v6851_v12 = vmul.f32 %v14453_v3, %v14453_v3 }
 0xf28   :  { %v14509_v63 = vmax.f32 %v6706_v21, 0.0  ;;  %v6945_v42 = vrot.slane %v6860_v25, %v14398_v28  ;;  %v6852_v41 = vmul.f32 %v14455_v10, %v14455_v10  ;;  %v6882_v5 = vrot.slane %v6847_v37, %v14377_v20 }
 0xf29   :  { %v6681_v9 = vpop.xlane.xlu0 %6680  ;;  %v6886_v16 = vrot.slane %v6848_v7, %v14382_v1  ;;  %v6792_v27 = vsel %vm6791_vm9, %v6790_v33, %v6785_v0  ;;  %v6853_v22 = vmul.f32 %v14468_v13, %v14468_v13  ;;  %v6854_v19 = vmul.f32 %v14471_v58, %v14471_v58 }
 0xf2a   :  { %v6825_v40 = vrot.slane %v14509_v63, %v14401_v36  ;;  %v6861_v52 = vmul.f32 %v14509_v63, %v14509_v63  ;;  %v6707_v51 = vadd.f32 %v14379_v56, %v6681_v9  ;;  %v6891_v34 = vrot.slane %v6849_v8, %v14385_v15 }
 0xf2b   :  { %v6821_v18 = vsel %vm6777_vm7, %v6820_v54, %v6816_v29  ;;  %v6887_v50 = vsel %vm6749_vm3, %v6886_v16, %v6882_v5  ;;  %v6896_v56 = vrot.slane %v6850_v45, %v14388_v60  ;;  %v6901_v48 = vrot.slane %v6851_v12, %v14395_v6  ;;  %v7880_v12 = vld [vmem:[#allocation5] ss:$0 sm:$0xff]  ;;  %v8771_v5 = vld [vmem:[#allocation16 + $0x14] ss:$8 sps:$4 sm:$0xff]  }
 0xf2c   :  { %v14532_v59 = vmax.f32 %v6707_v51, 0.0  ;;  %v6950_v39 = vrot.slane %v6861_v52, %v14401_v36  ;;  %v6892_v44 = vsel %vm6756_vm4, %v6891_v34, %v6887_v50  ;;  %v6906_v38 = vrot.slane %v6852_v41, %v14398_v28  ;;  %v8768_v41 = vld [vmem:[#allocation16 + $0x4] ss:$8 sps:$4 sm:$0xff]   ;;  %v8772_v51 = vld [vmem:[#allocation16 + $0x20] ss:$8 sps:$4 sm:$0xff]   ;;  %v8780_v34 = vld [vmem:[%s14685_s12 + $0x48] sm:$0xff]  }
 0xf2d   :  { %v6826_v32 = vsel %vm6784_vm8, %v6825_v40, %v6821_v18  ;;  %v6897_v35 = vsel %vm6763_vm5, %v6896_v56, %v6892_v44  ;;  %v6911_v17 = vrot.slane %v6853_v22, %v14401_v36  ;;  %v6916_v37 = vrot.slane %v6854_v19, %v14413_v4  ;;  %7235 = vmatprep.subr.bf16.mxu0 %v8768_v41  ;;  %v8769_v40 = vld [vmem:[#allocation16 + $0x10] ss:$8 sps:$4 sm:$0xff]   ;;  %v8774_v52 = vld [vmem:[#allocation16 + $0x24] ss:$8 sps:$4 sm:$0xff]   ;;  %v8777_v16 = vld [vmem:[#allocation16 + $0x34] ss:$8 sps:$4 sm:$0xff]  }
 0xf2e   :  { %v6830_v23 = vrot.slane %v14532_v59, %v14413_v4  ;;  %v6862_v30 = vmul.f32 %v14532_v59, %v14532_v59  ;;  %v6902_v14 = vsel %vm6770_vm6, %v6901_v48, %v6897_v35  ;;  %v6941_v25 = vsel %vm6770_vm6, %v6940_v26, %v6936_v49  ;;  %v8778_v22 = vld [vmem:[%s14685_s12 + $0x40] sm:$0xff]   ;;  %v8781_v18 = vld [vmem:[%s14685_s12 + $0x8] sm:$0xff]   ;;  %v8782_v50 = vld [vmem:[%s14685_s12 + $0x50] sm:$0xff]  }
 0xf2f   :  { %v6907_v7 = vsel %vm6777_vm7, %v6906_v38, %v6902_v14  ;;  %v6946_v29 = vsel %vm6777_vm7, %v6945_v42, %v6941_v25  ;;  %v8766_v42 = vld [vmem:[#allocation16] ss:$8 sps:$4 sm:$0xff]   ;;  %8388 = vmatprep.subr.bf16.mxu1 %v8778_v22 }
 0xf30   :  { %v6955_v21 = vrot.slane %v6862_v30, %v14413_v4  ;;  %v6831_v46 = vsel %vm6791_vm9, %v6830_v23, %v6826_v32  ;;  %v6912_v8 = vsel %vm6784_vm8, %v6911_v17, %v6907_v7  ;;  %v6951_v54 = vsel %vm6784_vm8, %v6950_v39, %v6946_v29  ;;  %7236 = vmatpush1.bf16.msra.mxu0 %v8766_v42  ;;  %v8779_v19 = vld [vmem:[%s14685_s12] sm:$0xff]   ;;  %v8783_v56 = vld [vmem:[%s14685_s12 + $0x10] sm:$0xff]   ;;  %v8784_v39 = vld [vmem:[%s14685_s12 + $0x58] sm:$0xff]  }
 0xf31   :  { %v6833_v33 = vsel %vm6832_vm10, %v6831_v46, %v6792_v27  ;;  %v6917_v45 = vsel %vm6791_vm9, %v6916_v37, %v6912_v8  ;;  %7237 = vmatprep.subr.bf16.mxu0 %v8771_v5  ;;  %v8775_v27 = vld [vmem:[#allocation16 + $0x30] ss:$8 sps:$4 sm:$0xff]   ;;  %8389 = vmatpush3.bf16.msra.mxu1 %v8779_v19  ;;  %v8785_v44 = vld [vmem:[%s14685_s12 + $0x18] sm:$0xff]  }
 0xf32   :  { %v6836_v0 = vsel %vm6835_vm11, %v6833_v33, 0.0  ;;  %v6956_v49 = vsel %vm6791_vm9, %v6955_v21, %v6951_v54  ;;  %8390 = vmatprep.subr.bf16.mxu1 %v8780_v34  ;;  %v8786_v48 = vld [vmem:[%s14685_s12 + $0x60] sm:$0xff]   ;;  %v8788_v23 = vld [vmem:[%s14685_s12 + $0x68] sm:$0xff]   ;;  %v8790_v32 = vld [vmem:[%s14685_s12 + $0x70] sm:$0xff]  }
 0xf33   :  { %6837 = vadd.xlane.f32.xlu0 %v6836_v0  ;;  %v6957_v26 = vsel %vm6832_vm10, %v6956_v49, %v6917_v45  ;;  %v8787_v38 = vld [vmem:[%s14685_s12 + $0x20] sm:$0xff]   ;;  %v8789_v30 = vld [vmem:[%s14685_s12 + $0x28] sm:$0xff]   ;;  %v8791_v35 = vld [vmem:[%s14685_s12 + $0x30] sm:$0xff]  }
 0xf34   :  { %v6959_v9 = vsel %vm6835_vm11, %v6957_v26, 0.0  ;;  %7238 = vmatpush1.bf16.msra.mxu0 %v8769_v40 }
 0xf35   :  { %7239 = vmatprep.subr.bf16.mxu0 %v8774_v52  ;;  %8391 = vmatpush3.bf16.msra.mxu1 %v8781_v18 }
 0xf36   :  { %8392 = vmatprep.subr.bf16.mxu1 %v8782_v50 }
 0xf37   :  { %6960 = vadd.xlane.f32.xlu0 %v6959_v9 }
 0xf38   :  { %7240 = vmatpush1.bf16.msra.mxu0 %v8772_v51 }
 0xf39   :  { %7241 = vmatprep.subr.bf16.mxu0 %v8777_v16  ;;  %8393 = vmatpush3.bf16.msra.mxu1 %v8783_v56 }
 0xf3a   :  { %8394 = vmatprep.subr.bf16.mxu1 %v8784_v39 }
 0xf3c   :  { %7242 = vmatpush1.bf16.msra.mxu0 %v8775_v27 }
 0xf3d   :  { %8395 = vmatpush3.bf16.msra.mxu1 %v8785_v44 }
 0xf3e   :  { %8396 = vmatprep.subr.bf16.mxu1 %v8786_v48 }
 0xf41   :  { %8397 = vmatpush3.bf16.msra.mxu1 %v8787_v38 }
 0xf42   :  { %8398 = vmatprep.subr.bf16.mxu1 %v8788_v23 }
 0xf45   :  { %8399 = vmatpush3.bf16.msra.mxu1 %v8789_v30 }
 0xf46   :  { %8400 = vmatprep.subr.bf16.mxu1 %v8790_v32 }
 0xf49   :  { %8401 = vmatpush3.bf16.msra.mxu1 %v8791_v35 }
 0xf4d   :  { %7014 = vperm.xlu0 %8621, %v7880_v12  }
 0xfc0   :  { %v6838_v14 = vpop.xlane.xlu0 %6837 }
 0xfc1   :  { %v6840_v17 = vsel %vm6839_vm12, %v6838_v14, 0.0 }
 0xfc2   :  { %v6841_v37 = vrot.slane %v6840_v17, 4 }
 0xfc4   :  { %v6842_v25 = vadd.f32 %v6841_v37, %v6840_v17  ;;  %v6961_v21 = vpop.xlane.xlu0 %6960 }
 0xfc5   :  { %v6962_v46 = vsel %vm6839_vm12, %v6961_v21, 0.0 }
 0xfc6   :  { %v6843_v7 = vrot.slane %v6842_v25, 2  ;;  %v6963_v29 = vrot.slane %v6962_v46, 4 }
 0xfc8   :  { %v6844_v33 = vadd.f32 %v6843_v7, %v6842_v25  ;;  %v6964_v8 = vadd.f32 %v6963_v29, %v6962_v46 }
 0xfca   :  { %v6845_v54 = vrot.slane %v6844_v33, 1  ;;  %v6965_v0 = vrot.slane %v6964_v8, 2 }
 0xfcc   :  { %v6846_v45 = vadd.f32 %v6845_v54, %v6844_v33  ;;  %v6966_v49 = vadd.f32 %v6965_v0, %v6964_v8 }
 0xfce   :  { %v6969_v26 = vmul.f32 0.0078125, %v6846_v45  ;;  %v6967_v9 = vrot.slane %v6966_v49, 1  ;;  %v7041_v45 = vpop.permute.xlu1 %7040 }
 0xfd0   :  { %v6968_v12 = vadd.f32 %v6967_v9, %v6966_v49  ;;  %v6971_v42 = vmul.f32 %v6969_v26, %v6969_v26  ;;  %v6973_v52 = vsub.f32 %v14430_v55, %v6969_v26  ;;  %v6974_v51 = vsub.f32 %v14434_v57, %v6969_v26 }
 0xfd1   :  { %v6975_v16 = vsub.f32 %v14436_v61, %v6969_v26  ;;  %v6976_v27 = vsub.f32 %v14447_v53, %v6969_v26  ;;  %v6977_v22 = vsub.f32 %v14453_v3, %v6969_v26  ;;  %v6978_v19 = vsub.f32 %v14455_v10, %v6969_v26 }
 0xfd2   :  { %v6970_v41 = vmul.f32 0.0078125, %v6968_v12  ;;  %v6979_v34 = vsub.f32 %v14468_v13, %v6969_v26  ;;  %v6980_v18 = vsub.f32 %v14471_v58, %v6969_v26  ;;  %v6981_v50 = vsub.f32 %v14405_v62, %v6969_v26  ;;  %v7015_v62 = vpop.permute.xlu0 %7014 }
 0xfd3   :  { %v6982_v56 = vsub.f32 %v14407_v11, %v6969_v26  ;;  %v6983_v55 = vsub.f32 %v14409_v47, %v6969_v26  ;;  %v6984_v57 = vsub.f32 %v14441_v2, %v6969_v26  ;;  %v6985_v61 = vsub.f32 %v14457_v43, %v6969_v26 }
 0xfd4   :  { %v6972_v5 = vsub.f32 %v6970_v41, %v6971_v42  ;;  %v6986_v53 = vsub.f32 %v14484_v31, %v6969_v26  ;;  %v6987_v3 = vsub.f32 %v14509_v63, %v6969_v26  ;;  %v6988_v10 = vsub.f32 %v14532_v59, %v6969_v26 }
 0xfd6   :  { %v6989_v40 = vadd.f32 1e-05, %v6972_v5 }
 0xfd8   :  { %8808 = vrsqrt.f32 %v6989_v40 }
 0xfe2   :  { %v8809_v39 = vpop.eup %8808 }
 0xfe3   :  { %v6991_v13 = vmul.f32 %v8809_v39, %v6973_v52  ;;  %v6992_v44 = vmul.f32 %v8809_v39, %v6974_v51  ;;  %v6993_v58 = vmul.f32 %v8809_v39, %v6975_v16  ;;  %v6994_v48 = vmul.f32 %v8809_v39, %v6976_v27 }
 0xfe4   :  { %v6995_v38 = vmul.f32 %v8809_v39, %v6977_v22  ;;  %v6996_v11 = vmul.f32 %v8809_v39, %v6978_v19  ;;  %v6997_v23 = vmul.f32 %v8809_v39, %v6979_v34  ;;  %v6998_v47 = vmul.f32 %v8809_v39, %v6980_v18 }
 0xfe5   :  { %v6999_v30 = vmul.f32 %v8809_v39, %v6981_v50  ;;  %v7000_v2 = vmul.f32 %v8809_v39, %v6982_v56  ;;  %v7001_v32 = vmul.f32 %v8809_v39, %v6983_v55  ;;  %v7002_v35 = vmul.f32 %v8809_v39, %v6984_v57 }
 0xfe6   :  { %v7003_v43 = vmul.f32 %v8809_v39, %v6985_v61  ;;  %v7004_v14 = vmul.f32 %v8809_v39, %v6986_v53  ;;  %v7005_v31 = vmul.f32 %v8809_v39, %v6987_v3  ;;  %v7006_v17 = vmul.f32 %v8809_v39, %v6988_v10 }
 0xfe7   :  { %v7017_v63 = vmul.f32 %v7015_v62, %v6991_v13  ;;  %v7018_v37 = vmul.f32 %v7015_v62, %v6992_v44  ;;  %v7019_v59 = vmul.f32 %v7015_v62, %v6993_v58  ;;  %v7020_v25 = vmul.f32 %v7015_v62, %v6994_v48 }
 0xfe8   :  { %v7021_v21 = vmul.f32 %v7015_v62, %v6995_v38  ;;  %v7022_v46 = vmul.f32 %v7015_v62, %v6996_v11  ;;  %v7023_v7 = vmul.f32 %v7015_v62, %v6997_v23  ;;  %v7024_v29 = vmul.f32 %v7015_v62, %v6998_v47 }
 0xfe9   :  { %v7025_v33 = vmul.f32 %v7015_v62, %v6999_v30  ;;  %v7026_v8 = vmul.f32 %v7015_v62, %v7000_v2  ;;  %v7027_v54 = vmul.f32 %v7015_v62, %v7001_v32  ;;  %v7028_v0 = vmul.f32 %v7015_v62, %v7002_v35 }
 0xfea   :  { %v7029_v49 = vmul.f32 %v7015_v62, %v7003_v43  ;;  %v7030_v26 = vmul.f32 %v7015_v62, %v7004_v14  ;;  %v7031_v9 = vmul.f32 %v7015_v62, %v7005_v31  ;;  %v7032_v12 = vmul.f32 %v7015_v62, %v7006_v17 }
 0xfeb   :  { %v7043_v42 = vadd.f32 %v7041_v45, %v7017_v63  ;;  %v7044_v41 = vadd.f32 %v7041_v45, %v7018_v37  ;;  %v7045_v5 = vadd.f32 %v7041_v45, %v7019_v59  ;;  %v7046_v40 = vadd.f32 %v7041_v45, %v7020_v25 }
 0xfec   :  { %v7047_v52 = vadd.f32 %v7041_v45, %v7021_v21  ;;  %v7048_v51 = vadd.f32 %v7041_v45, %v7022_v46  ;;  %v7049_v16 = vadd.f32 %v7041_v45, %v7023_v7  ;;  %v7050_v27 = vadd.f32 %v7041_v45, %v7024_v29 }
 0xfed   :  { %v7051_v22 = vadd.f32 %v7041_v45, %v7025_v33  ;;  %v7052_v19 = vadd.f32 %v7041_v45, %v7026_v8  ;;  %v7053_v34 = vadd.f32 %v7041_v45, %v7027_v54  ;;  %v7054_v18 = vadd.f32 %v7041_v45, %v7028_v0 }
 0xfee   :  { %v7055_v50 = vadd.f32 %v7041_v45, %v7029_v49  ;;  %v7056_v56 = vadd.f32 %v7041_v45, %v7030_v26  ;;  %v7057_v55 = vadd.f32 %v7041_v45, %v7031_v9  ;;  %v7058_v57 = vadd.f32 %v7041_v45, %v7032_v12 }
 0xfef   :  { %v7059_v39 = vpack.c.bf16 %v7044_v41, %v7043_v42  ;;  %v7060_v61 = vpack.c.bf16 %v7046_v40, %v7045_v5  ;;  %v7061_v53 = vpack.c.bf16 %v7048_v51, %v7047_v52  ;;  %v7062_v3 = vpack.c.bf16 %v7050_v27, %v7049_v16 }
 0xff0   :  { %v7063_v10 = vpack.c.bf16 %v7052_v19, %v7051_v22  ;;  %v7064_v13 = vpack.c.bf16 %v7054_v18, %v7053_v34  ;;  %v7065_v62 = vpack.c.bf16 %v7056_v56, %v7055_v50  ;;  %v7066_v30 = vpack.c.bf16 %v7058_v57, %v7057_v55  ;;  %v8792_v18 = vld [vmem:[%s14685_s12 + $0x78] sm:$0xff]  }
 0xff1   :  { %v7095_v44 = vunpack.c.l.b16 %v7059_v39  ;;  %v7096_v58 = vunpack.c.h.b16 %v7059_v39  ;;  %v7097_v48 = vunpack.c.l.b16 %v7060_v61  ;;  %v7098_v38 = vunpack.c.h.b16 %v7060_v61  ;;  %8402 = vmatprep.subr.bf16.mxu1 %v8792_v18  ;;  %v7075_v50 = vld [vmem:[#allocation18] sm:$0x3] }
 0xff2   :  { %v7103_v11 = vunpack.c.l.b16 %v7063_v10  ;;  %v7104_v23 = vunpack.c.h.b16 %v7063_v10  ;;  %v7105_v47 = vunpack.c.l.b16 %v7064_v13  ;;  %v7099_v2 = vunpack.c.l.b16 %v7061_v53 }
 0xff3   :  { %v7100_v32 = vunpack.c.h.b16 %v7061_v53  ;;  %v7101_v35 = vunpack.c.l.b16 %v7062_v3  ;;  %v7106_v43 = vunpack.c.h.b16 %v7064_v13  ;;  %v7114_v14 = vrot.slane %v7095_v44, %v14377_v20 }
 0xff4   :  { %v7118_v31 = vrot.slane %v7096_v58, %v14382_v1  ;;  %v7123_v17 = vrot.slane %v7097_v48, %v14385_v15  ;;  %v7102_v63 = vunpack.c.h.b16 %v7062_v3  ;;  %v7107_v37 = vunpack.c.l.b16 %v7065_v62 }
 0xff5   :  { %v7108_v59 = vunpack.c.h.b16 %v7065_v62  ;;  %v7128_v25 = vrot.slane %v7098_v38, %v14388_v60  ;;  %v7153_v46 = vrot.slane %v7103_v11, %v14377_v20  ;;  %v7157_v7 = vrot.slane %v7104_v23, %v14382_v1  ;;  %v7891_v11 = vld [vmem:[%s14686_s13] ss:$0 sm:$0xff] }
 0xff6   :  { %v7119_v21 = vsel %vm6749_vm3, %v7118_v31, %v7114_v14  ;;  %v7162_v29 = vrot.slane %v7105_v47, %v14385_v15  ;;  %v7109_v33 = vunpack.c.l.b16 %v7066_v30  ;;  %v7110_v8 = vunpack.c.h.b16 %v7066_v30 }
 0xff7   :  { %v7124_v54 = vsel %vm6756_vm4, %v7123_v17, %v7119_v21  ;;  %v7133_v0 = vrot.slane %v7099_v2, %v14395_v6  ;;  %v7138_v49 = vrot.slane %v7100_v32, %v14398_v28  ;;  %v7158_v26 = vsel %vm6749_vm3, %v7157_v7, %v7153_v46 }
 0xff8   :  { %v7129_v45 = vsel %vm6763_vm5, %v7128_v25, %v7124_v54  ;;  %v7167_v9 = vrot.slane %v7106_v43, %v14388_v60  ;;  %v7143_v1 = vrot.slane %v7101_v35, %v14401_v36  ;;  %v7163_v15 = vsel %vm6756_vm4, %v7162_v29, %v7158_v26 }
 0xff9   :  { %v7134_v20 = vsel %vm6770_vm6, %v7133_v0, %v7129_v45  ;;  %v7172_v12 = vrot.slane %v7107_v37, %v14395_v6  ;;  %v7148_v41 = vrot.slane %v7102_v63, %v14413_v4  ;;  %v7177_v40 = vrot.slane %v7108_v59, %v14398_v28 }
 0xffa   :  { %v7139_v42 = vsel %vm6777_vm7, %v7138_v49, %v7134_v20  ;;  %v7168_v5 = vsel %vm6763_vm5, %v7167_v9, %v7163_v15  ;;  %v7182_v51 = vrot.slane %v7109_v33, %v14401_v36  ;;  %v7187_v6 = vrot.slane %v7110_v8, %v14413_v4  ;;  %v8793_v36 = vld [vmem:[%s14685_s12 + $0x38] sm:$0xff]  }
 0xffb   :  { %v7144_v52 = vsel %vm6784_vm8, %v7143_v1, %v7139_v42  ;;  %v7173_v60 = vsel %vm6770_vm6, %v7172_v12, %v7168_v5  ;;  %8403 = vmatpush3.bf16.msra.mxu1 %v8793_v36  ;;  %v7079_v4 = vsub.s32 0, %v14987_v24  ;;  %v7083_v56 = vsub.s32 1, %v14987_v24 }
 0xffc   :  { %v7149_v16 = vsel %vm6791_vm9, %v7148_v41, %v7144_v52  ;;  %v7178_v27 = vsel %vm6777_vm7, %v7177_v40, %v7173_v60 }
 0xffd   :  { %v7183_v22 = vsel %vm6784_vm8, %v7182_v51, %v7178_v27  ;;  %v7080_v55 = vrot.slane %v7075_v50, %v7079_v4  ;;  %v7084_v57 = vrot.slane %v7075_v50, %v7083_v56 }
 0xffe   :  { %v7188_v19 = vsel %vm6791_vm9, %v7187_v6, %v7183_v22 }
 0xfff   :  { %v7189_v34 = vsel %vm6832_vm10, %v7188_v19, %v7149_v16 }
0x1000   :  { %v7190_v28 = vpack.c.b16 %v7189_v34, %v7189_v34 }
0x1002   :  { %7890 = vmatmul.mubr.msk.bf16.vlgmr.msra.gmra.mrb[144].mxu0 %vm7231_vm13, %v7190_v28 }
0x10d5   :  { %v7269_v39 = vpop.f32.mrb[144].mxu0 }
0x10d6   :  { %v7270_v61 = vadd.f32 %v7269_v39, %v7080_v55  ;;  %v7271_v53 = vpop.f32.mrb[145].mxu0 }
0x10d7   :  { %v7272_v3 = vadd.f32 %v7271_v53, %v7084_v57  ;;  %v7273_v10 = vpop.f32.mrb[146].mxu0 }
0x10d8   :  { %v7276_v13 = vmax.f32 %v7270_v61, 0.0  ;;  %v7274_v44 = vpop.f32.mrb[147].mxu0 }
0x10d9   :  { %v7277_v58 = vmax.f32 %v7272_v3, 0.0 }
0x10da   :  { %v7278_v62 = vpack.c.bf16 %v7276_v13, %v7276_v13 }
0x10db   :  { %v7279_v48 = vpack.c.bf16 %v7277_v58, %v7277_v58 }
0x10dd   :  { %7447 = vmatprep.mubr.bf16.mxu1 %v7279_v48 }
0x10de   :  { %7448 = vmatmul.mubr.bf16.vlgmr.msra.gmra.mrb[144].mxu1 %v7278_v62 }
0x11b1   :  { %v8404_v38 = vpop.f32.mrb[144].mxu1 }
0x11b2   :  { %v8405_v24 = vpop.f32.mrb[145].mxu1 }
0x11b3   :  { %v8406_v23 = vadd.f32 %v8405_v24, %v8404_v38  ;;  %v8407_v47 = vpop.f32.mrb[146].mxu1 }
0x11b4   :  { %v8408_v30 = vpop.f32.mrb[147].mxu1 }
0x11b5   :  { %v7450_v2 = vadd.f32 %v8406_v23, %v7891_v11 }
0x11b7   :  { %7455 = vst [vmem:[#allocation19] sm:$0x3] %v7450_v2 }
0x11b8   :  { %8985 = shalt.err (!%p8982_p4)
}
0x11b9   :  { %s8986_s13 = scalar_lea.hbm %s14688_s15, 32 }
0x11ba   :  { %p8987_p5 = scmp.ne.s32.totalorder %s14688_s15, %s8986_s13  ;;  %p8990_p6 = scmp.lt.u32.totalorder %s8986_s13, %s14688_s15 }
0x11bc   :  { %p8992_p7 = pnand %p8990_p6, %p8987_p5 }
0x11be   :  { %8995 = shalt.err (!%p8992_p7)
}
0x11bf   :  { %7467 = dma.vmem_to_hbm [thread:$0]  %s7465_s7, 32, %s14688_s15, [#allocation9]  }
0x11c0   :  { %9004 = dma.done.wait [#allocation9], 32  }
0x11c1   :  { %9005 = vsyncadd [#allocation9], 4294967264 }
0x11c2   :  { %7473 = vsyncpa [#allocation8], 1 }
0x11c3   :  { %7474 = vsyncpa [#allocation11], 1 }
0x11c4   :  { %7475 = vsyncpa [#allocation14], 1 }
0x11c5   :  { %7476 = vsyncpa [#allocation17], 1 }
0x11c6   :  { %7477 = vsyncpa [#allocation9], 1 }

</bundles_post_ra>
